<compile_context>
chip_gen: v7x
topology: tpu7x:2x2x1
jax: 0.10.0
libtpu: 0.0.40
codegen_flags: <defaults>
</compile_context>

<pallas_src>
import math

import jax
import jax.numpy as jnp
from jax.experimental import pallas as pl
from jax.experimental.pallas import tpu as pltpu

F32 = jnp.float32
BF16 = jnp.bfloat16

# ----------------------------- model config --------------------------------
HIDDEN = 64                      # stands in for 768
N_HEADS = 4
HEAD_DIM = HIDDEN // N_HEADS
FFN = 4 * HIDDEN
N_LAYERS = 2
VOCAB = 100
SEQ = 8                          # text sequence length (tile-aligned)
IMG = 16                         # image spatial size (B, 3, IMG, IMG)
PATCH = 8
N_PATCH = (IMG // PATCH) ** 2    # 4 patches
IMG_SEQ = N_PATCH + 1            # +CLS -> 5 tokens
IMG_PAD = 8                      # image sequence padded to a sublane tile
PATCH_DIM = 3 * PATCH * PATCH
FUSION_DIM = 128                 # stands in for 512
TASKS = {"sentiment": 5, "humor": 4, "sarcasm": 4, "offensive": 4, "motivational": 2}
HEADS_TOTAL = sum(TASKS.values())   # 19
HEADS_PAD = 128                     # lane-dense padded classifier output
NEG_INF = -1e9


# ----------------------------- in-kernel helpers ----------------------------

def _mm(a, b):
    """MXU matmul: activations cast to bf16, weights are pre-cast bf16, f32 acc."""
    return jnp.dot(a.astype(BF16), b, preferred_element_type=jnp.float32)


def _ln(x, g, b, eps=1e-12):
    xf = x.astype(jnp.float32)
    mu = jnp.mean(xf, axis=-1, keepdims=True)
    var = jnp.mean(jnp.square(xf - mu), axis=-1, keepdims=True)
    return (xf - mu) * jax.lax.rsqrt(var + eps) * g + b


def _gelu(x):
    # TODO(synk): HF DistilBERT/ViT use exact erf GELU; tanh approximation kept
    # here since erf lowering inside Mosaic kernels is not guaranteed.
    return jax.nn.gelu(x)


def _mha(x_flat, wqkv, bqkv, wo, bo, bias, batch, seq):
    """Fused QKV + per-head SDPA batched over the batch dim + out-projection.

    x_flat: (batch*seq, H) f32; wqkv/wo: bf16; bqkv/bo: f32 (1, ...);
    bias: additive f32 key bias, shape (batch, 1, seq) or (1, 1, seq).
    """
    qkv = _mm(x_flat, wqkv) + bqkv                          # (B*S, 3H) f32
    scale = 1.0 / math.sqrt(HEAD_DIM)
    ctx = []
    for h in range(N_HEADS):                                # static unroll over heads
        lo = h * HEAD_DIM
        qh = qkv[:, lo:lo + HEAD_DIM].reshape(batch, seq, HEAD_DIM)
        kh = qkv[:, HIDDEN + lo:HIDDEN + lo + HEAD_DIM].reshape(batch, seq, HEAD_DIM)
        vh = qkv[:, 2 * HIDDEN + lo:2 * HIDDEN + lo + HEAD_DIM].reshape(batch, seq, HEAD_DIM)
        s = jnp.einsum("bqd,bkd->bqk", qh.astype(BF16), kh.astype(BF16),
                       preferred_element_type=jnp.float32) * scale
        s = s + bias                                        # f32 additive mask
        s = s - jnp.max(s, axis=-1, keepdims=True)
        p = jnp.exp(s)
        p = p * pl.reciprocal(jnp.sum(p, axis=-1, keepdims=True), approx=True)
        o = jnp.einsum("bqk,bkd->bqd", p.astype(BF16), vh.astype(BF16),
                       preferred_element_type=jnp.float32)
        ctx.append(o.reshape(batch * seq, HEAD_DIM))
    ctx = jnp.concatenate(ctx, axis=1)                      # (B*S, H)
    return _mm(ctx, wo) + bo


# ----------------------------- the fused kernel ------------------------------

def _fused_kernel(*refs):
    (t_emb, t_bias, t_eg, t_eb,
     t_wqkv, t_bqkv, t_wo, t_bo, t_ln1g, t_ln1b,
     t_wf1, t_bf1, t_wf2, t_bf2, t_ln2g, t_ln2b,
     patches, i_wp, i_base, i_bias,
     i_wqkv, i_bqkv, i_wo, i_bo, i_ln1g, i_ln1b,
     i_wf1, i_bf1, i_wf2, i_bf2, i_ln2g, i_ln2b,
     i_fg, i_fb,
     f_w, f_b, h_w, h_b,
     out_ref) = refs

    B = out_ref.shape[0]

    # ---------------- text encoder (DistilBERT-style, post-LN) ----------------
    x = _ln(t_emb[...], t_eg[...], t_eb[...])               # (B*SEQ, H)
    tb = t_bias[...]                                        # (B, 1, SEQ) f32
    for l in range(N_LAYERS):
        a = _mha(x, t_wqkv[l], t_bqkv[l], t_wo[l], t_bo[l], tb, B, SEQ)
        x = _ln(x + a, t_ln1g[l], t_ln1b[l])
        f = _mm(_gelu(_mm(x, t_wf1[l]) + t_bf1[l]), t_wf2[l]) + t_bf2[l]
        x = _ln(x + f, t_ln2g[l], t_ln2b[l])
    text_cls = x.reshape(B, SEQ, HIDDEN)[:, 0, :]           # (B, H) CLS rows

    # ---------------- image encoder (ViT-style, pre-LN) -----------------------
    tok = _mm(patches[...], i_wp[...])                      # (B*IMG_PAD, H)
    y = (tok.reshape(B, IMG_PAD, HIDDEN) + i_base[...][None, :, :])
    y = y.reshape(B * IMG_PAD, HIDDEN)
    ib = i_bias[...]                                        # (1, 1, IMG_PAD) key-pad bias
    for l in range(N_LAYERS):
        h = _ln(y, i_ln1g[l], i_ln1b[l])
        y = y + _mha(h, i_wqkv[l], i_bqkv[l], i_wo[l], i_bo[l], ib, B, IMG_PAD)
        h = _ln(y, i_ln2g[l], i_ln2b[l])
        y = y + (_mm(_gelu(_mm(h, i_wf1[l]) + i_bf1[l]), i_wf2[l]) + i_bf2[l])
    y = _ln(y, i_fg[...], i_fb[...])
    image_cls = y.reshape(B, IMG_PAD, HIDDEN)[:, 0, :]      # (B, H) CLS rows

    # ---------------- fusion MLP + 5 classifier heads --------------------------
    fused = jnp.concatenate([text_cls, image_cls], axis=-1)  # (B, 2H)=(B,128), lane-dense
    hdn = jnp.maximum(_mm(fused, f_w[...]) + f_b[...], 0.0)  # Linear + ReLU
    # Dropout(p=0.2) is identity at inference time (deploy/eval mode).
    out_ref[...] = (_mm(hdn, h_w[...]) + h_b[...]).astype(out_ref.dtype)


# ----------------------------- BlockSpec helper ------------------------------

def _full_spec(shape):
    n = len(shape)
    return pl.BlockSpec(tuple(shape), lambda *_, _n=n: (0,) * _n)


# ----------------------------- parameters -----------------------------------

def _init_linear(key, din, dout):
    kw, kb = jax.random.split(key)
    return {"w": jax.random.normal(kw, (din, dout), F32) * 0.02,
            "b": jax.random.normal(kb, (dout,), F32) * 0.02}


def _init_layer(key):
    ks = jax.random.split(key, 6)
    return {
        "q": _init_linear(ks[0], HIDDEN, HIDDEN),
        "k": _init_linear(ks[1], HIDDEN, HIDDEN),
        "v": _init_linear(ks[2], HIDDEN, HIDDEN),
        "o": _init_linear(ks[3], HIDDEN, HIDDEN),
        "ln1_g": jnp.ones((HIDDEN,), F32), "ln1_b": jnp.zeros((HIDDEN,), F32),
        "ffn1": _init_linear(ks[4], HIDDEN, FFN),
        "ffn2": _init_linear(ks[5], FFN, HIDDEN),
        "ln2_g": jnp.ones((HIDDEN,), F32), "ln2_b": jnp.zeros((HIDDEN,), F32),
    }


def init_params(key):
    keys = jax.random.split(key, 9)
    # TODO(synk): pretrained 'distilbert-base-uncased' / ViT weights cannot be
    # loaded; synthetic deterministic init is used instead (structural parity).
    return {
        "text": {
            "tok_emb": jax.random.normal(keys[2], (VOCAB, HIDDEN), F32) * 0.02,
            "pos_emb": jax.random.normal(keys[3], (SEQ, HIDDEN), F32) * 0.02,
            "emb_ln_g": jnp.ones((HIDDEN,), F32),
            "emb_ln_b": jnp.zeros((HIDDEN,), F32),
            "layers": [_init_layer(k) for k in jax.random.split(keys[0], N_LAYERS)],
        },
        "image": {
            "patch": _init_linear(keys[4], PATCH_DIM, HIDDEN),
            "cls": jax.random.normal(keys[5], (1, HIDDEN), F32) * 0.02,
            "pos_emb": jax.random.normal(keys[6], (IMG_SEQ, HIDDEN), F32) * 0.02,
            "layers": [_init_layer(k) for k in jax.random.split(keys[1], N_LAYERS)],
            "final_ln_g": jnp.ones((HIDDEN,), F32),
            "final_ln_b": jnp.zeros((HIDDEN,), F32),
        },
        "fusion": _init_linear(keys[7], 2 * HIDDEN, FUSION_DIM),
        "heads": {t: _init_linear(k, FUSION_DIM, n)
                  for (t, n), k in zip(TASKS.items(), jax.random.split(keys[8], len(TASKS)))},
    }


# --------------------- one-time parameter packing (outside jit) ---------------

_LAYER_KEYS = ("wqkv", "bqkv", "wo", "bo", "ln1g", "ln1b",
               "wf1", "bf1", "wf2", "bf2", "ln2g", "ln2b")


def _pack_layers(layers):
    """Stack per-layer params; matmul weights -> bf16, LN/bias stay f32."""
    return {
        "wqkv": jnp.stack([jnp.concatenate([l["q"]["w"], l["k"]["w"], l["v"]["w"]], axis=1)
                           for l in layers]).astype(BF16),
        "bqkv": jnp.stack([jnp.concatenate([l["q"]["b"], l["k"]["b"], l["v"]["b"]])
                           .reshape(1, 3 * HIDDEN) for l in layers]),
        "wo": jnp.stack([l["o"]["w"] for l in layers]).astype(BF16),
        "bo": jnp.stack([l["o"]["b"].reshape(1, HIDDEN) for l in layers]),
        "ln1g": jnp.stack([l["ln1_g"].reshape(1, HIDDEN) for l in layers]),
        "ln1b": jnp.stack([l["ln1_b"].reshape(1, HIDDEN) for l in layers]),
        "wf1": jnp.stack([l["ffn1"]["w"] for l in layers]).astype(BF16),
        "bf1": jnp.stack([l["ffn1"]["b"].reshape(1, FFN) for l in layers]),
        "wf2": jnp.stack([l["ffn2"]["w"] for l in layers]).astype(BF16),
        "bf2": jnp.stack([l["ffn2"]["b"].reshape(1, HIDDEN) for l in layers]),
        "ln2g": jnp.stack([l["ln2_g"].reshape(1, HIDDEN) for l in layers]),
        "ln2b": jnp.stack([l["ln2_b"].reshape(1, HIDDEN) for l in layers]),
    }


def pack_params(params):
    tp, ip = params["text"], params["image"]

    # Image token "base": row 0 = CLS + pos[0], rows 1..N_PATCH = patch bias +
    # pos, rows >= IMG_SEQ = 0 (padded rows, masked out as attention keys).
    base = jnp.zeros((IMG_PAD, HIDDEN), F32)
    base = base.at[0].set(ip["cls"][0] + ip["pos_emb"][0])
    base = base.at[1:IMG_SEQ].set(ip["pos_emb"][1:IMG_SEQ] + ip["patch"]["b"][None, :])
    img_bias = jnp.where(jnp.arange(IMG_PAD) < IMG_SEQ, 0.0, NEG_INF)
    img_bias = img_bias.astype(F32).reshape(1, 1, IMG_PAD)

    # 5 classifier heads concatenated and padded to 128 lanes (unmasked store).
    wh = jnp.concatenate([params["heads"][t]["w"] for t in TASKS], axis=1)
    bh = jnp.concatenate([params["heads"][t]["b"] for t in TASKS], axis=0)
    wh_p = jnp.zeros((FUSION_DIM, HEADS_PAD), F32).at[:, :HEADS_TOTAL].set(wh).astype(BF16)
    bh_p = jnp.zeros((1, HEADS_PAD), F32).at[0, :HEADS_TOTAL].set(bh)

    return {
        "tok_emb": tp["tok_emb"],                       # f32, JAX-side gather
        "pos_emb": tp["pos_emb"],
        "t_eg": tp["emb_ln_g"].reshape(1, HIDDEN),
        "t_eb": tp["emb_ln_b"].reshape(1, HIDDEN),
        "t_layers": _pack_layers(tp["layers"]),
        "i_wp": ip["patch"]["w"].astype(BF16),
        "i_base": base,
        "i_bias": img_bias,
        "i_layers": _pack_layers(ip["layers"]),
        "i_fg": ip["final_ln_g"].reshape(1, HIDDEN),
        "i_fb": ip["final_ln_b"].reshape(1, HIDDEN),
        "f_w": params["fusion"]["w"].astype(BF16),
        "f_b": params["fusion"]["b"].reshape(1, FUSION_DIM),
        "h_w": wh_p,
        "h_b": bh_p,
    }


# ----------------------------- forward pass ----------------------------------

def multimodal_forward(packed, input_ids, attention_mask, pixel_values):
    B, S = input_ids.shape

    # Text embeddings (gather stays in JAX) + precomputed f32 attention bias.
    emb = jnp.take(packed["tok_emb"], input_ids, axis=0) + packed["pos_emb"][None, :, :]
    emb = emb.reshape(B * S, HIDDEN)
    t_bias = (1.0 - attention_mask.astype(F32))[:, None, :] * NEG_INF       # (B,1,S)

    # Patchify (NCHW -> (B, N_PATCH, C*P*P)), pad to IMG_PAD rows (row 0 = CLS
    # placeholder, rows >= IMG_SEQ = pad), flatten for the in-kernel matmul.
    nhw = IMG // PATCH
    patches = pixel_values.reshape(B, 3, nhw, PATCH, nhw, PATCH)
    patches = patches.transpose(0, 2, 4, 1, 3, 5).reshape(B, N_PATCH, PATCH_DIM)
    patches_pad = jnp.zeros((B, IMG_PAD, PATCH_DIM), F32).at[:, 1:IMG_SEQ].set(patches)
    patches_pad = patches_pad.reshape(B * IMG_PAD, PATCH_DIM)

    tl, il = packed["t_layers"], packed["i_layers"]
    args = [emb, t_bias, packed["t_eg"], packed["t_eb"],
            *[tl[k] for k in _LAYER_KEYS],
            patches_pad, packed["i_wp"], packed["i_base"], packed["i_bias"],
            *[il[k] for k in _LAYER_KEYS],
            packed["i_fg"], packed["i_fb"],
            packed["f_w"], packed["f_b"], packed["h_w"], packed["h_b"]]

    logits = pl.pallas_call(
        _fused_kernel,
        out_shape=jax.ShapeDtypeStruct((B, HEADS_PAD), F32),
        grid=(1,),
        in_specs=[_full_spec(a.shape) for a in args],
        out_specs=_full_spec((B, HEADS_PAD)),
        compiler_params=pltpu.CompilerParams(dimension_semantics=("arbitrary",)),
    )(*args)

    out, off = {}, 0
    for t, n in TASKS.items():
        out[t] = logits[:, off:off + n]
        off += n
    return out


if __name__ == "__main__":
    key = jax.random.PRNGKey(0)
    kp, k1, k2 = jax.random.split(key, 3)
    params = init_params(kp)
    packed = pack_params(params)          # one-time packing, outside jit

    B = 2
    input_ids = jax.random.randint(k1, (B, SEQ), 0, VOCAB)
    attention_mask = jnp.concatenate(
        [jnp.ones((B, SEQ - 2), jnp.int32), jnp.zeros((B, 2), jnp.int32)], axis=1)
    pixel_values = jax.random.normal(k2, (B, 3, IMG, IMG), F32)

    fwd = jax.jit(multimodal_forward)
    out = fwd(packed, input_ids, attention_mask, pixel_values)
    out = jax.block_until_ready(out)

    assert set(out.keys()) == set(TASKS.keys())
    for t, n in TASKS.items():
        assert out[t].shape == (B, n), (t, out[t].shape)
        assert bool(jnp.all(jnp.isfinite(out[t])))
    print("KERNEL_OK")
</pallas_src>

<mosaic_0001>
module attributes {stable_mosaic.version = 11 : i64} {
  func.func @_fused_kernel(%arg0: i32, %arg1: memref<16x64xf32, #tpu.memory_space<vmem>>, %arg2: memref<2x1x8xf32, #tpu.memory_space<vmem>>, %arg3: memref<1x64xf32, #tpu.memory_space<vmem>>, %arg4: memref<1x64xf32, #tpu.memory_space<vmem>>, %arg5: memref<2x64x192xbf16, #tpu.memory_space<vmem>>, %arg6: memref<2x1x192xf32, #tpu.memory_space<vmem>>, %arg7: memref<2x64x64xbf16, #tpu.memory_space<vmem>>, %arg8: memref<2x1x64xf32, #tpu.memory_space<vmem>>, %arg9: memref<2x1x64xf32, #tpu.memory_space<vmem>>, %arg10: memref<2x1x64xf32, #tpu.memory_space<vmem>>, %arg11: memref<2x64x256xbf16, #tpu.memory_space<vmem>>, %arg12: memref<2x1x256xf32, #tpu.memory_space<vmem>>, %arg13: memref<2x256x64xbf16, #tpu.memory_space<vmem>>, %arg14: memref<2x1x64xf32, #tpu.memory_space<vmem>>, %arg15: memref<2x1x64xf32, #tpu.memory_space<vmem>>, %arg16: memref<2x1x64xf32, #tpu.memory_space<vmem>>, %arg17: memref<16x192xf32, #tpu.memory_space<vmem>>, %arg18: memref<192x64xbf16, #tpu.memory_space<vmem>>, %arg19: memref<8x64xf32, #tpu.memory_space<vmem>>, %arg20: memref<1x1x8xf32, #tpu.memory_space<vmem>>, %arg21: memref<2x64x192xbf16, #tpu.memory_space<vmem>>, %arg22: memref<2x1x192xf32, #tpu.memory_space<vmem>>, %arg23: memref<2x64x64xbf16, #tpu.memory_space<vmem>>, %arg24: memref<2x1x64xf32, #tpu.memory_space<vmem>>, %arg25: memref<2x1x64xf32, #tpu.memory_space<vmem>>, %arg26: memref<2x1x64xf32, #tpu.memory_space<vmem>>, %arg27: memref<2x64x256xbf16, #tpu.memory_space<vmem>>, %arg28: memref<2x1x256xf32, #tpu.memory_space<vmem>>, %arg29: memref<2x256x64xbf16, #tpu.memory_space<vmem>>, %arg30: memref<2x1x64xf32, #tpu.memory_space<vmem>>, %arg31: memref<2x1x64xf32, #tpu.memory_space<vmem>>, %arg32: memref<2x1x64xf32, #tpu.memory_space<vmem>>, %arg33: memref<1x64xf32, #tpu.memory_space<vmem>>, %arg34: memref<1x64xf32, #tpu.memory_space<vmem>>, %arg35: memref<128x128xbf16, #tpu.memory_space<vmem>>, %arg36: memref<1x128xf32, #tpu.memory_space<vmem>>, %arg37: memref<128x128xbf16, #tpu.memory_space<vmem>>, %arg38: memref<1x128xf32, #tpu.memory_space<vmem>>, %arg39: memref<2x128xf32, #tpu.memory_space<vmem>>) attributes {dimension_semantics = [#tpu.dimension_semantics<arbitrary>], iteration_bounds = array<i64: 1>, scalar_prefetch = 0 : i64, scratch_operands = 0 : i64, tpu.core_type = #tpu.core_type<tc>, window_params = [{pipeline_mode = #tpu.pipeline_mode<synchronous>, transform_indices = @transform_0, window_bounds = array<i64: 16, 64>}, {pipeline_mode = #tpu.pipeline_mode<synchronous>, transform_indices = @transform_1, window_bounds = array<i64: 2, 1, 8>}, {pipeline_mode = #tpu.pipeline_mode<synchronous>, transform_indices = @transform_2, window_bounds = array<i64: 1, 64>}, {pipeline_mode = #tpu.pipeline_mode<synchronous>, transform_indices = @transform_3, window_bounds = array<i64: 1, 64>}, {pipeline_mode = #tpu.pipeline_mode<synchronous>, transform_indices = @transform_4, window_bounds = array<i64: 2, 64, 192>}, {pipeline_mode = #tpu.pipeline_mode<synchronous>, transform_indices = @transform_5, window_bounds = array<i64: 2, 1, 192>}, {pipeline_mode = #tpu.pipeline_mode<synchronous>, transform_indices = @transform_6, window_bounds = array<i64: 2, 64, 64>}, {pipeline_mode = #tpu.pipeline_mode<synchronous>, transform_indices = @transform_7, window_bounds = array<i64: 2, 1, 64>}, {pipeline_mode = #tpu.pipeline_mode<synchronous>, transform_indices = @transform_8, window_bounds = array<i64: 2, 1, 64>}, {pipeline_mode = #tpu.pipeline_mode<synchronous>, transform_indices = @transform_9, window_bounds = array<i64: 2, 1, 64>}, {pipeline_mode = #tpu.pipeline_mode<synchronous>, transform_indices = @transform_10, window_bounds = array<i64: 2, 64, 256>}, {pipeline_mode = #tpu.pipeline_mode<synchronous>, transform_indices = @transform_11, window_bounds = array<i64: 2, 1, 256>}, {pipeline_mode = #tpu.pipeline_mode<synchronous>, transform_indices = @transform_12, window_bounds = array<i64: 2, 256, 64>}, {pipeline_mode = #tpu.pipeline_mode<synchronous>, transform_indices = @transform_13, window_bounds = array<i64: 2, 1, 64>}, {pipeline_mode = #tpu.pipeline_mode<synchronous>, transform_indices = @transform_14, window_bounds = array<i64: 2, 1, 64>}, {pipeline_mode = #tpu.pipeline_mode<synchronous>, transform_indices = @transform_15, window_bounds = array<i64: 2, 1, 64>}, {pipeline_mode = #tpu.pipeline_mode<synchronous>, transform_indices = @transform_16, window_bounds = array<i64: 16, 192>}, {pipeline_mode = #tpu.pipeline_mode<synchronous>, transform_indices = @transform_17, window_bounds = array<i64: 192, 64>}, {pipeline_mode = #tpu.pipeline_mode<synchronous>, transform_indices = @transform_18, window_bounds = array<i64: 8, 64>}, {pipeline_mode = #tpu.pipeline_mode<synchronous>, transform_indices = @transform_19, window_bounds = array<i64: 1, 1, 8>}, {pipeline_mode = #tpu.pipeline_mode<synchronous>, transform_indices = @transform_20, window_bounds = array<i64: 2, 64, 192>}, {pipeline_mode = #tpu.pipeline_mode<synchronous>, transform_indices = @transform_21, window_bounds = array<i64: 2, 1, 192>}, {pipeline_mode = #tpu.pipeline_mode<synchronous>, transform_indices = @transform_22, window_bounds = array<i64: 2, 64, 64>}, {pipeline_mode = #tpu.pipeline_mode<synchronous>, transform_indices = @transform_23, window_bounds = array<i64: 2, 1, 64>}, {pipeline_mode = #tpu.pipeline_mode<synchronous>, transform_indices = @transform_24, window_bounds = array<i64: 2, 1, 64>}, {pipeline_mode = #tpu.pipeline_mode<synchronous>, transform_indices = @transform_25, window_bounds = array<i64: 2, 1, 64>}, {pipeline_mode = #tpu.pipeline_mode<synchronous>, transform_indices = @transform_26, window_bounds = array<i64: 2, 64, 256>}, {pipeline_mode = #tpu.pipeline_mode<synchronous>, transform_indices = @transform_27, window_bounds = array<i64: 2, 1, 256>}, {pipeline_mode = #tpu.pipeline_mode<synchronous>, transform_indices = @transform_28, window_bounds = array<i64: 2, 256, 64>}, {pipeline_mode = #tpu.pipeline_mode<synchronous>, transform_indices = @transform_29, window_bounds = array<i64: 2, 1, 64>}, {pipeline_mode = #tpu.pipeline_mode<synchronous>, transform_indices = @transform_30, window_bounds = array<i64: 2, 1, 64>}, {pipeline_mode = #tpu.pipeline_mode<synchronous>, transform_indices = @transform_31, window_bounds = array<i64: 2, 1, 64>}, {pipeline_mode = #tpu.pipeline_mode<synchronous>, transform_indices = @transform_32, window_bounds = array<i64: 1, 64>}, {pipeline_mode = #tpu.pipeline_mode<synchronous>, transform_indices = @transform_33, window_bounds = array<i64: 1, 64>}, {pipeline_mode = #tpu.pipeline_mode<synchronous>, transform_indices = @transform_34, window_bounds = array<i64: 128, 128>}, {pipeline_mode = #tpu.pipeline_mode<synchronous>, transform_indices = @transform_35, window_bounds = array<i64: 1, 128>}, {pipeline_mode = #tpu.pipeline_mode<synchronous>, transform_indices = @transform_36, window_bounds = array<i64: 128, 128>}, {pipeline_mode = #tpu.pipeline_mode<synchronous>, transform_indices = @transform_37, window_bounds = array<i64: 1, 128>}, {pipeline_mode = #tpu.pipeline_mode<synchronous>, transform_indices = @transform_38, window_bounds = array<i64: 2, 128>}]} {
    %c0 = arith.constant 0 : index
    %c0_0 = arith.constant 0 : index
    %0 = vector.load %arg1[%c0, %c0_0] : memref<16x64xf32, #tpu.memory_space<vmem>>, vector<16x64xf32>
    %c0_1 = arith.constant 0 : index
    %c0_2 = arith.constant 0 : index
    %1 = vector.load %arg3[%c0_1, %c0_2] : memref<1x64xf32, #tpu.memory_space<vmem>>, vector<1x64xf32>
    %c0_3 = arith.constant 0 : index
    %c0_4 = arith.constant 0 : index
    %2 = vector.load %arg4[%c0_3, %c0_4] : memref<1x64xf32, #tpu.memory_space<vmem>>, vector<1x64xf32>
    %cst = arith.constant dense<0.000000e+00> : vector<16xf32>
    %3 = vector.multi_reduction <add>, %0, %cst [1] : vector<16x64xf32> to vector<16xf32>
    %4 = vector.shape_cast %3 : vector<16xf32> to vector<16x1xf32>
    %cst_5 = arith.constant 6.400000e+01 : f32
    %5 = vector.broadcast %cst_5 : f32 to vector<16x1xf32>
    %6 = arith.divf %4, %5 : vector<16x1xf32>
    %7 = vector.broadcast %6 : vector<16x1xf32> to vector<16x64xf32>
    %8 = arith.subf %0, %7 : vector<16x64xf32>
    %9 = arith.mulf %8, %8 : vector<16x64xf32>
    %cst_6 = arith.constant dense<0.000000e+00> : vector<16xf32>
    %10 = vector.multi_reduction <add>, %9, %cst_6 [1] : vector<16x64xf32> to vector<16xf32>
    %11 = vector.shape_cast %10 : vector<16xf32> to vector<16x1xf32>
    %cst_7 = arith.constant 6.400000e+01 : f32
    %12 = vector.broadcast %cst_7 : f32 to vector<16x1xf32>
    %13 = arith.divf %11, %12 : vector<16x1xf32>
    %14 = vector.broadcast %6 : vector<16x1xf32> to vector<16x64xf32>
    %15 = arith.subf %0, %14 : vector<16x64xf32>
    %cst_8 = arith.constant 9.99999996E-13 : f32
    %16 = vector.broadcast %cst_8 : f32 to vector<16x1xf32>
    %17 = arith.addf %13, %16 : vector<16x1xf32>
    %18 = math.rsqrt %17 : vector<16x1xf32>
    %19 = vector.broadcast %18 : vector<16x1xf32> to vector<16x64xf32>
    %20 = arith.mulf %15, %19 : vector<16x64xf32>
    %21 = vector.broadcast %1 : vector<1x64xf32> to vector<16x64xf32>
    %22 = arith.mulf %20, %21 : vector<16x64xf32>
    %23 = vector.broadcast %2 : vector<1x64xf32> to vector<16x64xf32>
    %24 = arith.addf %22, %23 : vector<16x64xf32>
    %c0_9 = arith.constant 0 : index
    %c0_10 = arith.constant 0 : index
    %c0_11 = arith.constant 0 : index
    %25 = vector.load %arg2[%c0_9, %c0_10, %c0_11] : memref<2x1x8xf32, #tpu.memory_space<vmem>>, vector<2x1x8xf32>
    %c0_12 = arith.constant 0 : index
    %c0_13 = arith.constant 0 : index
    %c0_14 = arith.constant 0 : index
    %26 = vector.load %arg5[%c0_12, %c0_13, %c0_14] : memref<2x64x192xbf16, #tpu.memory_space<vmem>>, vector<1x64x192xbf16>
    %27 = vector.shape_cast %26 : vector<1x64x192xbf16> to vector<64x192xbf16>
    %c0_15 = arith.constant 0 : index
    %c0_16 = arith.constant 0 : index
    %c0_17 = arith.constant 0 : index
    %28 = vector.load %arg6[%c0_15, %c0_16, %c0_17] : memref<2x1x192xf32, #tpu.memory_space<vmem>>, vector<1x1x192xf32>
    %29 = vector.shape_cast %28 : vector<1x1x192xf32> to vector<1x192xf32>
    %c0_18 = arith.constant 0 : index
    %c0_19 = arith.constant 0 : index
    %c0_20 = arith.constant 0 : index
    %30 = vector.load %arg7[%c0_18, %c0_19, %c0_20] : memref<2x64x64xbf16, #tpu.memory_space<vmem>>, vector<1x64x64xbf16>
    %31 = vector.shape_cast %30 : vector<1x64x64xbf16> to vector<64x64xbf16>
    %c0_21 = arith.constant 0 : index
    %c0_22 = arith.constant 0 : index
    %c0_23 = arith.constant 0 : index
    %32 = vector.load %arg8[%c0_21, %c0_22, %c0_23] : memref<2x1x64xf32, #tpu.memory_space<vmem>>, vector<1x1x64xf32>
    %33 = vector.shape_cast %32 : vector<1x1x64xf32> to vector<1x64xf32>
    %34 = arith.truncf %24 : vector<16x64xf32> to vector<16x64xbf16>
    %cst_24 = arith.constant dense<0.000000e+00> : vector<16x192xf32>
    %35 = tpu.matmul %34, %27, %cst_24 {dimension_numbers = #tpu.dot_dimension_numbers<[1], [0], [0], [1], [0, 0, 1, 1], [], []>} : vector<16x64xbf16>, vector<64x192xbf16>, vector<16x192xf32> -> vector<16x192xf32>
    %36 = vector.broadcast %29 : vector<1x192xf32> to vector<16x192xf32>
    %37 = arith.addf %35, %36 : vector<16x192xf32>
    %38 = vector.extract_strided_slice %37 {offsets = [0, 0], sizes = [16, 16], strides = [1, 1]} : vector<16x192xf32> to vector<16x16xf32>
    %39 = vector.shape_cast %38 : vector<16x16xf32> to vector<2x8x16xf32>
    %40 = vector.extract_strided_slice %37 {offsets = [0, 64], sizes = [16, 16], strides = [1, 1]} : vector<16x192xf32> to vector<16x16xf32>
    %41 = vector.shape_cast %40 : vector<16x16xf32> to vector<2x8x16xf32>
    %42 = vector.extract_strided_slice %37 {offsets = [0, 128], sizes = [16, 16], strides = [1, 1]} : vector<16x192xf32> to vector<16x16xf32>
    %43 = vector.shape_cast %42 : vector<16x16xf32> to vector<2x8x16xf32>
    %44 = arith.truncf %39 : vector<2x8x16xf32> to vector<2x8x16xbf16>
    %45 = arith.truncf %41 : vector<2x8x16xf32> to vector<2x8x16xbf16>
    "tpu.trace_start"() <{level = 10 : i32, message = "bqd,bkd->bqk"}> : () -> ()
    %cst_25 = arith.constant dense<0.000000e+00> : vector<2x8x8xf32>
    %46 = tpu.matmul %44, %45, %cst_25 {dimension_numbers = #tpu.dot_dimension_numbers<[2], [2], [1], [1], [0, 0, 0, 1, 1, 1], [0], [0]>} : vector<2x8x16xbf16>, vector<2x8x16xbf16>, vector<2x8x8xf32> -> vector<2x8x8xf32>
    "tpu.trace_stop"() : () -> ()
    %cst_26 = arith.constant 2.500000e-01 : f32
    %47 = vector.broadcast %cst_26 : f32 to vector<2x8x8xf32>
    %48 = arith.mulf %46, %47 : vector<2x8x8xf32>
    %49 = vector.broadcast %25 : vector<2x1x8xf32> to vector<2x8x8xf32>
    %50 = arith.addf %48, %49 : vector<2x8x8xf32>
    %cst_27 = arith.constant dense<0xFF800000> : vector<2x8xf32>
    %51 = vector.multi_reduction <maximumf>, %50, %cst_27 [2] : vector<2x8x8xf32> to vector<2x8xf32>
    %52 = vector.shape_cast %51 : vector<2x8xf32> to vector<2x8x1xf32>
    %53 = vector.broadcast %52 : vector<2x8x1xf32> to vector<2x8x8xf32>
    %54 = arith.subf %50, %53 : vector<2x8x8xf32>
    %55 = math.exp %54 : vector<2x8x8xf32>
    %cst_28 = arith.constant dense<0.000000e+00> : vector<2x8xf32>
    %56 = vector.multi_reduction <add>, %55, %cst_28 [2] : vector<2x8x8xf32> to vector<2x8xf32>
    %57 = vector.shape_cast %56 : vector<2x8xf32> to vector<2x8x1xf32>
    %58 = tpu.reciprocal %57 {approx = true} : vector<2x8x1xf32> -> vector<2x8x1xf32>
    %59 = vector.broadcast %58 : vector<2x8x1xf32> to vector<2x8x8xf32>
    %60 = arith.mulf %55, %59 : vector<2x8x8xf32>
    %61 = arith.truncf %60 : vector<2x8x8xf32> to vector<2x8x8xbf16>
    %62 = arith.truncf %43 : vector<2x8x16xf32> to vector<2x8x16xbf16>
    "tpu.trace_start"() <{level = 10 : i32, message = "bqk,bkd->bqd"}> : () -> ()
    %cst_29 = arith.constant dense<0.000000e+00> : vector<2x8x16xf32>
    %63 = tpu.matmul %61, %62, %cst_29 {dimension_numbers = #tpu.dot_dimension_numbers<[2], [1], [1], [2], [0, 0, 0, 1, 1, 2], [0], [0]>} : vector<2x8x8xbf16>, vector<2x8x16xbf16>, vector<2x8x16xf32> -> vector<2x8x16xf32>
    "tpu.trace_stop"() : () -> ()
    %64 = vector.shape_cast %63 : vector<2x8x16xf32> to vector<16x16xf32>
    %65 = vector.extract_strided_slice %37 {offsets = [0, 16], sizes = [16, 16], strides = [1, 1]} : vector<16x192xf32> to vector<16x16xf32>
    %66 = vector.shape_cast %65 : vector<16x16xf32> to vector<2x8x16xf32>
    %67 = vector.extract_strided_slice %37 {offsets = [0, 80], sizes = [16, 16], strides = [1, 1]} : vector<16x192xf32> to vector<16x16xf32>
    %68 = vector.shape_cast %67 : vector<16x16xf32> to vector<2x8x16xf32>
    %69 = vector.extract_strided_slice %37 {offsets = [0, 144], sizes = [16, 16], strides = [1, 1]} : vector<16x192xf32> to vector<16x16xf32>
    %70 = vector.shape_cast %69 : vector<16x16xf32> to vector<2x8x16xf32>
    %71 = arith.truncf %66 : vector<2x8x16xf32> to vector<2x8x16xbf16>
    %72 = arith.truncf %68 : vector<2x8x16xf32> to vector<2x8x16xbf16>
    "tpu.trace_start"() <{level = 10 : i32, message = "bqd,bkd->bqk"}> : () -> ()
    %cst_30 = arith.constant dense<0.000000e+00> : vector<2x8x8xf32>
    %73 = tpu.matmul %71, %72, %cst_30 {dimension_numbers = #tpu.dot_dimension_numbers<[2], [2], [1], [1], [0, 0, 0, 1, 1, 1], [0], [0]>} : vector<2x8x16xbf16>, vector<2x8x16xbf16>, vector<2x8x8xf32> -> vector<2x8x8xf32>
    "tpu.trace_stop"() : () -> ()
    %cst_31 = arith.constant 2.500000e-01 : f32
    %74 = vector.broadcast %cst_31 : f32 to vector<2x8x8xf32>
    %75 = arith.mulf %73, %74 : vector<2x8x8xf32>
    %76 = vector.broadcast %25 : vector<2x1x8xf32> to vector<2x8x8xf32>
    %77 = arith.addf %75, %76 : vector<2x8x8xf32>
    %cst_32 = arith.constant dense<0xFF800000> : vector<2x8xf32>
    %78 = vector.multi_reduction <maximumf>, %77, %cst_32 [2] : vector<2x8x8xf32> to vector<2x8xf32>
    %79 = vector.shape_cast %78 : vector<2x8xf32> to vector<2x8x1xf32>
    %80 = vector.broadcast %79 : vector<2x8x1xf32> to vector<2x8x8xf32>
    %81 = arith.subf %77, %80 : vector<2x8x8xf32>
    %82 = math.exp %81 : vector<2x8x8xf32>
    %cst_33 = arith.constant dense<0.000000e+00> : vector<2x8xf32>
    %83 = vector.multi_reduction <add>, %82, %cst_33 [2] : vector<2x8x8xf32> to vector<2x8xf32>
    %84 = vector.shape_cast %83 : vector<2x8xf32> to vector<2x8x1xf32>
    %85 = tpu.reciprocal %84 {approx = true} : vector<2x8x1xf32> -> vector<2x8x1xf32>
    %86 = vector.broadcast %85 : vector<2x8x1xf32> to vector<2x8x8xf32>
    %87 = arith.mulf %82, %86 : vector<2x8x8xf32>
    %88 = arith.truncf %87 : vector<2x8x8xf32> to vector<2x8x8xbf16>
    %89 = arith.truncf %70 : vector<2x8x16xf32> to vector<2x8x16xbf16>
    "tpu.trace_start"() <{level = 10 : i32, message = "bqk,bkd->bqd"}> : () -> ()
    %cst_34 = arith.constant dense<0.000000e+00> : vector<2x8x16xf32>
    %90 = tpu.matmul %88, %89, %cst_34 {dimension_numbers = #tpu.dot_dimension_numbers<[2], [1], [1], [2], [0, 0, 0, 1, 1, 2], [0], [0]>} : vector<2x8x8xbf16>, vector<2x8x16xbf16>, vector<2x8x16xf32> -> vector<2x8x16xf32>
    "tpu.trace_stop"() : () -> ()
    %91 = vector.shape_cast %90 : vector<2x8x16xf32> to vector<16x16xf32>
    %92 = vector.extract_strided_slice %37 {offsets = [0, 32], sizes = [16, 16], strides = [1, 1]} : vector<16x192xf32> to vector<16x16xf32>
    %93 = vector.shape_cast %92 : vector<16x16xf32> to vector<2x8x16xf32>
    %94 = vector.extract_strided_slice %37 {offsets = [0, 96], sizes = [16, 16], strides = [1, 1]} : vector<16x192xf32> to vector<16x16xf32>
    %95 = vector.shape_cast %94 : vector<16x16xf32> to vector<2x8x16xf32>
    %96 = vector.extract_strided_slice %37 {offsets = [0, 160], sizes = [16, 16], strides = [1, 1]} : vector<16x192xf32> to vector<16x16xf32>
    %97 = vector.shape_cast %96 : vector<16x16xf32> to vector<2x8x16xf32>
    %98 = arith.truncf %93 : vector<2x8x16xf32> to vector<2x8x16xbf16>
    %99 = arith.truncf %95 : vector<2x8x16xf32> to vector<2x8x16xbf16>
    "tpu.trace_start"() <{level = 10 : i32, message = "bqd,bkd->bqk"}> : () -> ()
    %cst_35 = arith.constant dense<0.000000e+00> : vector<2x8x8xf32>
    %100 = tpu.matmul %98, %99, %cst_35 {dimension_numbers = #tpu.dot_dimension_numbers<[2], [2], [1], [1], [0, 0, 0, 1, 1, 1], [0], [0]>} : vector<2x8x16xbf16>, vector<2x8x16xbf16>, vector<2x8x8xf32> -> vector<2x8x8xf32>
    "tpu.trace_stop"() : () -> ()
    %cst_36 = arith.constant 2.500000e-01 : f32
    %101 = vector.broadcast %cst_36 : f32 to vector<2x8x8xf32>
    %102 = arith.mulf %100, %101 : vector<2x8x8xf32>
    %103 = vector.broadcast %25 : vector<2x1x8xf32> to vector<2x8x8xf32>
    %104 = arith.addf %102, %103 : vector<2x8x8xf32>
    %cst_37 = arith.constant dense<0xFF800000> : vector<2x8xf32>
    %105 = vector.multi_reduction <maximumf>, %104, %cst_37 [2] : vector<2x8x8xf32> to vector<2x8xf32>
    %106 = vector.shape_cast %105 : vector<2x8xf32> to vector<2x8x1xf32>
    %107 = vector.broadcast %106 : vector<2x8x1xf32> to vector<2x8x8xf32>
    %108 = arith.subf %104, %107 : vector<2x8x8xf32>
    %109 = math.exp %108 : vector<2x8x8xf32>
    %cst_38 = arith.constant dense<0.000000e+00> : vector<2x8xf32>
    %110 = vector.multi_reduction <add>, %109, %cst_38 [2] : vector<2x8x8xf32> to vector<2x8xf32>
    %111 = vector.shape_cast %110 : vector<2x8xf32> to vector<2x8x1xf32>
    %112 = tpu.reciprocal %111 {approx = true} : vector<2x8x1xf32> -> vector<2x8x1xf32>
    %113 = vector.broadcast %112 : vector<2x8x1xf32> to vector<2x8x8xf32>
    %114 = arith.mulf %109, %113 : vector<2x8x8xf32>
    %115 = arith.truncf %114 : vector<2x8x8xf32> to vector<2x8x8xbf16>
    %116 = arith.truncf %97 : vector<2x8x16xf32> to vector<2x8x16xbf16>
    "tpu.trace_start"() <{level = 10 : i32, message = "bqk,bkd->bqd"}> : () -> ()
    %cst_39 = arith.constant dense<0.000000e+00> : vector<2x8x16xf32>
    %117 = tpu.matmul %115, %116, %cst_39 {dimension_numbers = #tpu.dot_dimension_numbers<[2], [1], [1], [2], [0, 0, 0, 1, 1, 2], [0], [0]>} : vector<2x8x8xbf16>, vector<2x8x16xbf16>, vector<2x8x16xf32> -> vector<2x8x16xf32>
    "tpu.trace_stop"() : () -> ()
    %118 = vector.shape_cast %117 : vector<2x8x16xf32> to vector<16x16xf32>
    %119 = vector.extract_strided_slice %37 {offsets = [0, 48], sizes = [16, 16], strides = [1, 1]} : vector<16x192xf32> to vector<16x16xf32>
    %120 = vector.shape_cast %119 : vector<16x16xf32> to vector<2x8x16xf32>
    %121 = vector.extract_strided_slice %37 {offsets = [0, 112], sizes = [16, 16], strides = [1, 1]} : vector<16x192xf32> to vector<16x16xf32>
    %122 = vector.shape_cast %121 : vector<16x16xf32> to vector<2x8x16xf32>
    %123 = vector.extract_strided_slice %37 {offsets = [0, 176], sizes = [16, 16], strides = [1, 1]} : vector<16x192xf32> to vector<16x16xf32>
    %124 = vector.shape_cast %123 : vector<16x16xf32> to vector<2x8x16xf32>
    %125 = arith.truncf %120 : vector<2x8x16xf32> to vector<2x8x16xbf16>
    %126 = arith.truncf %122 : vector<2x8x16xf32> to vector<2x8x16xbf16>
    "tpu.trace_start"() <{level = 10 : i32, message = "bqd,bkd->bqk"}> : () -> ()
    %cst_40 = arith.constant dense<0.000000e+00> : vector<2x8x8xf32>
    %127 = tpu.matmul %125, %126, %cst_40 {dimension_numbers = #tpu.dot_dimension_numbers<[2], [2], [1], [1], [0, 0, 0, 1, 1, 1], [0], [0]>} : vector<2x8x16xbf16>, vector<2x8x16xbf16>, vector<2x8x8xf32> -> vector<2x8x8xf32>
    "tpu.trace_stop"() : () -> ()
    %cst_41 = arith.constant 2.500000e-01 : f32
    %128 = vector.broadcast %cst_41 : f32 to vector<2x8x8xf32>
    %129 = arith.mulf %127, %128 : vector<2x8x8xf32>
    %130 = vector.broadcast %25 : vector<2x1x8xf32> to vector<2x8x8xf32>
    %131 = arith.addf %129, %130 : vector<2x8x8xf32>
    %cst_42 = arith.constant dense<0xFF800000> : vector<2x8xf32>
    %132 = vector.multi_reduction <maximumf>, %131, %cst_42 [2] : vector<2x8x8xf32> to vector<2x8xf32>
    %133 = vector.shape_cast %132 : vector<2x8xf32> to vector<2x8x1xf32>
    %134 = vector.broadcast %133 : vector<2x8x1xf32> to vector<2x8x8xf32>
    %135 = arith.subf %131, %134 : vector<2x8x8xf32>
    %136 = math.exp %135 : vector<2x8x8xf32>
    %cst_43 = arith.constant dense<0.000000e+00> : vector<2x8xf32>
    %137 = vector.multi_reduction <add>, %136, %cst_43 [2] : vector<2x8x8xf32> to vector<2x8xf32>
    %138 = vector.shape_cast %137 : vector<2x8xf32> to vector<2x8x1xf32>
    %139 = tpu.reciprocal %138 {approx = true} : vector<2x8x1xf32> -> vector<2x8x1xf32>
    %140 = vector.broadcast %139 : vector<2x8x1xf32> to vector<2x8x8xf32>
    %141 = arith.mulf %136, %140 : vector<2x8x8xf32>
    %142 = arith.truncf %141 : vector<2x8x8xf32> to vector<2x8x8xbf16>
    %143 = arith.truncf %124 : vector<2x8x16xf32> to vector<2x8x16xbf16>
    "tpu.trace_start"() <{level = 10 : i32, message = "bqk,bkd->bqd"}> : () -> ()
    %cst_44 = arith.constant dense<0.000000e+00> : vector<2x8x16xf32>
    %144 = tpu.matmul %142, %143, %cst_44 {dimension_numbers = #tpu.dot_dimension_numbers<[2], [1], [1], [2], [0, 0, 0, 1, 1, 2], [0], [0]>} : vector<2x8x8xbf16>, vector<2x8x16xbf16>, vector<2x8x16xf32> -> vector<2x8x16xf32>
    "tpu.trace_stop"() : () -> ()
    %145 = vector.shape_cast %144 : vector<2x8x16xf32> to vector<16x16xf32>
    %146 = tpu.concatenate %64, %91, %118, %145 in 1 : vector<16x16xf32>, vector<16x16xf32>, vector<16x16xf32>, vector<16x16xf32> -> vector<16x64xf32>
    %147 = arith.truncf %146 : vector<16x64xf32> to vector<16x64xbf16>
    %cst_45 = arith.constant dense<0.000000e+00> : vector<16x64xf32>
    %148 = tpu.matmul %147, %31, %cst_45 {dimension_numbers = #tpu.dot_dimension_numbers<[1], [0], [0], [1], [0, 0, 1, 1], [], []>} : vector<16x64xbf16>, vector<64x64xbf16>, vector<16x64xf32> -> vector<16x64xf32>
    %149 = vector.broadcast %33 : vector<1x64xf32> to vector<16x64xf32>
    %150 = arith.addf %148, %149 : vector<16x64xf32>
    %151 = arith.addf %24, %150 : vector<16x64xf32>
    %c0_46 = arith.constant 0 : index
    %c0_47 = arith.constant 0 : index
    %c0_48 = arith.constant 0 : index
    %152 = vector.load %arg9[%c0_46, %c0_47, %c0_48] : memref<2x1x64xf32, #tpu.memory_space<vmem>>, vector<1x1x64xf32>
    %153 = vector.shape_cast %152 : vector<1x1x64xf32> to vector<1x64xf32>
    %c0_49 = arith.constant 0 : index
    %c0_50 = arith.constant 0 : index
    %c0_51 = arith.constant 0 : index
    %154 = vector.load %arg10[%c0_49, %c0_50, %c0_51] : memref<2x1x64xf32, #tpu.memory_space<vmem>>, vector<1x1x64xf32>
    %155 = vector.shape_cast %154 : vector<1x1x64xf32> to vector<1x64xf32>
    %cst_52 = arith.constant dense<0.000000e+00> : vector<16xf32>
    %156 = vector.multi_reduction <add>, %151, %cst_52 [1] : vector<16x64xf32> to vector<16xf32>
    %157 = vector.shape_cast %156 : vector<16xf32> to vector<16x1xf32>
    %cst_53 = arith.constant 6.400000e+01 : f32
    %158 = vector.broadcast %cst_53 : f32 to vector<16x1xf32>
    %159 = arith.divf %157, %158 : vector<16x1xf32>
    %160 = vector.broadcast %159 : vector<16x1xf32> to vector<16x64xf32>
    %161 = arith.subf %151, %160 : vector<16x64xf32>
    %162 = arith.mulf %161, %161 : vector<16x64xf32>
    %cst_54 = arith.constant dense<0.000000e+00> : vector<16xf32>
    %163 = vector.multi_reduction <add>, %162, %cst_54 [1] : vector<16x64xf32> to vector<16xf32>
    %164 = vector.shape_cast %163 : vector<16xf32> to vector<16x1xf32>
    %cst_55 = arith.constant 6.400000e+01 : f32
    %165 = vector.broadcast %cst_55 : f32 to vector<16x1xf32>
    %166 = arith.divf %164, %165 : vector<16x1xf32>
    %167 = vector.broadcast %159 : vector<16x1xf32> to vector<16x64xf32>
    %168 = arith.subf %151, %167 : vector<16x64xf32>
    %cst_56 = arith.constant 9.99999996E-13 : f32
    %169 = vector.broadcast %cst_56 : f32 to vector<16x1xf32>
    %170 = arith.addf %166, %169 : vector<16x1xf32>
    %171 = math.rsqrt %170 : vector<16x1xf32>
    %172 = vector.broadcast %171 : vector<16x1xf32> to vector<16x64xf32>
    %173 = arith.mulf %168, %172 : vector<16x64xf32>
    %174 = vector.broadcast %153 : vector<1x64xf32> to vector<16x64xf32>
    %175 = arith.mulf %173, %174 : vector<16x64xf32>
    %176 = vector.broadcast %155 : vector<1x64xf32> to vector<16x64xf32>
    %177 = arith.addf %175, %176 : vector<16x64xf32>
    %c0_57 = arith.constant 0 : index
    %c0_58 = arith.constant 0 : index
    %c0_59 = arith.constant 0 : index
    %178 = vector.load %arg11[%c0_57, %c0_58, %c0_59] : memref<2x64x256xbf16, #tpu.memory_space<vmem>>, vector<1x64x256xbf16>
    %179 = vector.shape_cast %178 : vector<1x64x256xbf16> to vector<64x256xbf16>
    %180 = arith.truncf %177 : vector<16x64xf32> to vector<16x64xbf16>
    %cst_60 = arith.constant dense<0.000000e+00> : vector<16x256xf32>
    %181 = tpu.matmul %180, %179, %cst_60 {dimension_numbers = #tpu.dot_dimension_numbers<[1], [0], [0], [1], [0, 0, 1, 1], [], []>} : vector<16x64xbf16>, vector<64x256xbf16>, vector<16x256xf32> -> vector<16x256xf32>
    %c0_61 = arith.constant 0 : index
    %c0_62 = arith.constant 0 : index
    %c0_63 = arith.constant 0 : index
    %182 = vector.load %arg12[%c0_61, %c0_62, %c0_63] : memref<2x1x256xf32, #tpu.memory_space<vmem>>, vector<1x1x256xf32>
    %183 = vector.shape_cast %182 : vector<1x1x256xf32> to vector<1x256xf32>
    %184 = vector.broadcast %183 : vector<1x256xf32> to vector<16x256xf32>
    %185 = arith.addf %181, %184 : vector<16x256xf32>
    %186 = arith.mulf %185, %185 : vector<16x256xf32>
    %187 = arith.mulf %185, %186 : vector<16x256xf32>
    %cst_64 = arith.constant 4.471500e-02 : f32
    %188 = vector.broadcast %cst_64 : f32 to vector<16x256xf32>
    %189 = arith.mulf %188, %187 : vector<16x256xf32>
    %190 = arith.addf %185, %189 : vector<16x256xf32>
    %cst_65 = arith.constant 0.797884583 : f32
    %191 = vector.broadcast %cst_65 : f32 to vector<16x256xf32>
    %192 = arith.mulf %191, %190 : vector<16x256xf32>
    %193 = math.tanh %192 : vector<16x256xf32>
    %cst_66 = arith.constant 1.000000e+00 : f32
    %194 = vector.broadcast %cst_66 : f32 to vector<16x256xf32>
    %195 = arith.addf %194, %193 : vector<16x256xf32>
    %cst_67 = arith.constant 5.000000e-01 : f32
    %196 = vector.broadcast %cst_67 : f32 to vector<16x256xf32>
    %197 = arith.mulf %196, %195 : vector<16x256xf32>
    %198 = arith.mulf %185, %197 : vector<16x256xf32>
    %c0_68 = arith.constant 0 : index
    %c0_69 = arith.constant 0 : index
    %c0_70 = arith.constant 0 : index
    %199 = vector.load %arg13[%c0_68, %c0_69, %c0_70] : memref<2x256x64xbf16, #tpu.memory_space<vmem>>, vector<1x256x64xbf16>
    %200 = vector.shape_cast %199 : vector<1x256x64xbf16> to vector<256x64xbf16>
    %201 = arith.truncf %198 : vector<16x256xf32> to vector<16x256xbf16>
    %cst_71 = arith.constant dense<0.000000e+00> : vector<16x64xf32>
    %202 = tpu.matmul %201, %200, %cst_71 {dimension_numbers = #tpu.dot_dimension_numbers<[1], [0], [0], [1], [0, 0, 1, 1], [], []>} : vector<16x256xbf16>, vector<256x64xbf16>, vector<16x64xf32> -> vector<16x64xf32>
    %c0_72 = arith.constant 0 : index
    %c0_73 = arith.constant 0 : index
    %c0_74 = arith.constant 0 : index
    %203 = vector.load %arg14[%c0_72, %c0_73, %c0_74] : memref<2x1x64xf32, #tpu.memory_space<vmem>>, vector<1x1x64xf32>
    %204 = vector.shape_cast %203 : vector<1x1x64xf32> to vector<1x64xf32>
    %205 = vector.broadcast %204 : vector<1x64xf32> to vector<16x64xf32>
    %206 = arith.addf %202, %205 : vector<16x64xf32>
    %207 = arith.addf %177, %206 : vector<16x64xf32>
    %c0_75 = arith.constant 0 : index
    %c0_76 = arith.constant 0 : index
    %c0_77 = arith.constant 0 : index
    %208 = vector.load %arg15[%c0_75, %c0_76, %c0_77] : memref<2x1x64xf32, #tpu.memory_space<vmem>>, vector<1x1x64xf32>
    %209 = vector.shape_cast %208 : vector<1x1x64xf32> to vector<1x64xf32>
    %c0_78 = arith.constant 0 : index
    %c0_79 = arith.constant 0 : index
    %c0_80 = arith.constant 0 : index
    %210 = vector.load %arg16[%c0_78, %c0_79, %c0_80] : memref<2x1x64xf32, #tpu.memory_space<vmem>>, vector<1x1x64xf32>
    %211 = vector.shape_cast %210 : vector<1x1x64xf32> to vector<1x64xf32>
    %cst_81 = arith.constant dense<0.000000e+00> : vector<16xf32>
    %212 = vector.multi_reduction <add>, %207, %cst_81 [1] : vector<16x64xf32> to vector<16xf32>
    %213 = vector.shape_cast %212 : vector<16xf32> to vector<16x1xf32>
    %cst_82 = arith.constant 6.400000e+01 : f32
    %214 = vector.broadcast %cst_82 : f32 to vector<16x1xf32>
    %215 = arith.divf %213, %214 : vector<16x1xf32>
    %216 = vector.broadcast %215 : vector<16x1xf32> to vector<16x64xf32>
    %217 = arith.subf %207, %216 : vector<16x64xf32>
    %218 = arith.mulf %217, %217 : vector<16x64xf32>
    %cst_83 = arith.constant dense<0.000000e+00> : vector<16xf32>
    %219 = vector.multi_reduction <add>, %218, %cst_83 [1] : vector<16x64xf32> to vector<16xf32>
    %220 = vector.shape_cast %219 : vector<16xf32> to vector<16x1xf32>
    %cst_84 = arith.constant 6.400000e+01 : f32
    %221 = vector.broadcast %cst_84 : f32 to vector<16x1xf32>
    %222 = arith.divf %220, %221 : vector<16x1xf32>
    %223 = vector.broadcast %215 : vector<16x1xf32> to vector<16x64xf32>
    %224 = arith.subf %207, %223 : vector<16x64xf32>
    %cst_85 = arith.constant 9.99999996E-13 : f32
    %225 = vector.broadcast %cst_85 : f32 to vector<16x1xf32>
    %226 = arith.addf %222, %225 : vector<16x1xf32>
    %227 = math.rsqrt %226 : vector<16x1xf32>
    %228 = vector.broadcast %227 : vector<16x1xf32> to vector<16x64xf32>
    %229 = arith.mulf %224, %228 : vector<16x64xf32>
    %230 = vector.broadcast %209 : vector<1x64xf32> to vector<16x64xf32>
    %231 = arith.mulf %229, %230 : vector<16x64xf32>
    %232 = vector.broadcast %211 : vector<1x64xf32> to vector<16x64xf32>
    %233 = arith.addf %231, %232 : vector<16x64xf32>
    %c1 = arith.constant 1 : index
    %c0_86 = arith.constant 0 : index
    %c0_87 = arith.constant 0 : index
    %234 = vector.load %arg5[%c1, %c0_86, %c0_87] : memref<2x64x192xbf16, #tpu.memory_space<vmem>>, vector<1x64x192xbf16>
    %235 = vector.shape_cast %234 : vector<1x64x192xbf16> to vector<64x192xbf16>
    %c1_88 = arith.constant 1 : index
    %c0_89 = arith.constant 0 : index
    %c0_90 = arith.constant 0 : index
    %236 = vector.load %arg6[%c1_88, %c0_89, %c0_90] : memref<2x1x192xf32, #tpu.memory_space<vmem>>, vector<1x1x192xf32>
    %237 = vector.shape_cast %236 : vector<1x1x192xf32> to vector<1x192xf32>
    %c1_91 = arith.constant 1 : index
    %c0_92 = arith.constant 0 : index
    %c0_93 = arith.constant 0 : index
    %238 = vector.load %arg7[%c1_91, %c0_92, %c0_93] : memref<2x64x64xbf16, #tpu.memory_space<vmem>>, vector<1x64x64xbf16>
    %239 = vector.shape_cast %238 : vector<1x64x64xbf16> to vector<64x64xbf16>
    %c1_94 = arith.constant 1 : index
    %c0_95 = arith.constant 0 : index
    %c0_96 = arith.constant 0 : index
    %240 = vector.load %arg8[%c1_94, %c0_95, %c0_96] : memref<2x1x64xf32, #tpu.memory_space<vmem>>, vector<1x1x64xf32>
    %241 = vector.shape_cast %240 : vector<1x1x64xf32> to vector<1x64xf32>
    %242 = arith.truncf %233 : vector<16x64xf32> to vector<16x64xbf16>
    %cst_97 = arith.constant dense<0.000000e+00> : vector<16x192xf32>
    %243 = tpu.matmul %242, %235, %cst_97 {dimension_numbers = #tpu.dot_dimension_numbers<[1], [0], [0], [1], [0, 0, 1, 1], [], []>} : vector<16x64xbf16>, vector<64x192xbf16>, vector<16x192xf32> -> vector<16x192xf32>
    %244 = vector.broadcast %237 : vector<1x192xf32> to vector<16x192xf32>
    %245 = arith.addf %243, %244 : vector<16x192xf32>
    %246 = vector.extract_strided_slice %245 {offsets = [0, 0], sizes = [16, 16], strides = [1, 1]} : vector<16x192xf32> to vector<16x16xf32>
    %247 = vector.shape_cast %246 : vector<16x16xf32> to vector<2x8x16xf32>
    %248 = vector.extract_strided_slice %245 {offsets = [0, 64], sizes = [16, 16], strides = [1, 1]} : vector<16x192xf32> to vector<16x16xf32>
    %249 = vector.shape_cast %248 : vector<16x16xf32> to vector<2x8x16xf32>
    %250 = vector.extract_strided_slice %245 {offsets = [0, 128], sizes = [16, 16], strides = [1, 1]} : vector<16x192xf32> to vector<16x16xf32>
    %251 = vector.shape_cast %250 : vector<16x16xf32> to vector<2x8x16xf32>
    %252 = arith.truncf %247 : vector<2x8x16xf32> to vector<2x8x16xbf16>
    %253 = arith.truncf %249 : vector<2x8x16xf32> to vector<2x8x16xbf16>
    "tpu.trace_start"() <{level = 10 : i32, message = "bqd,bkd->bqk"}> : () -> ()
    %cst_98 = arith.constant dense<0.000000e+00> : vector<2x8x8xf32>
    %254 = tpu.matmul %252, %253, %cst_98 {dimension_numbers = #tpu.dot_dimension_numbers<[2], [2], [1], [1], [0, 0, 0, 1, 1, 1], [0], [0]>} : vector<2x8x16xbf16>, vector<2x8x16xbf16>, vector<2x8x8xf32> -> vector<2x8x8xf32>
    "tpu.trace_stop"() : () -> ()
    %cst_99 = arith.constant 2.500000e-01 : f32
    %255 = vector.broadcast %cst_99 : f32 to vector<2x8x8xf32>
    %256 = arith.mulf %254, %255 : vector<2x8x8xf32>
    %257 = vector.broadcast %25 : vector<2x1x8xf32> to vector<2x8x8xf32>
    %258 = arith.addf %256, %257 : vector<2x8x8xf32>
    %cst_100 = arith.constant dense<0xFF800000> : vector<2x8xf32>
    %259 = vector.multi_reduction <maximumf>, %258, %cst_100 [2] : vector<2x8x8xf32> to vector<2x8xf32>
    %260 = vector.shape_cast %259 : vector<2x8xf32> to vector<2x8x1xf32>
    %261 = vector.broadcast %260 : vector<2x8x1xf32> to vector<2x8x8xf32>
    %262 = arith.subf %258, %261 : vector<2x8x8xf32>
    %263 = math.exp %262 : vector<2x8x8xf32>
    %cst_101 = arith.constant dense<0.000000e+00> : vector<2x8xf32>
    %264 = vector.multi_reduction <add>, %263, %cst_101 [2] : vector<2x8x8xf32> to vector<2x8xf32>
    %265 = vector.shape_cast %264 : vector<2x8xf32> to vector<2x8x1xf32>
    %266 = tpu.reciprocal %265 {approx = true} : vector<2x8x1xf32> -> vector<2x8x1xf32>
    %267 = vector.broadcast %266 : vector<2x8x1xf32> to vector<2x8x8xf32>
    %268 = arith.mulf %263, %267 : vector<2x8x8xf32>
    %269 = arith.truncf %268 : vector<2x8x8xf32> to vector<2x8x8xbf16>
    %270 = arith.truncf %251 : vector<2x8x16xf32> to vector<2x8x16xbf16>
    "tpu.trace_start"() <{level = 10 : i32, message = "bqk,bkd->bqd"}> : () -> ()
    %cst_102 = arith.constant dense<0.000000e+00> : vector<2x8x16xf32>
    %271 = tpu.matmul %269, %270, %cst_102 {dimension_numbers = #tpu.dot_dimension_numbers<[2], [1], [1], [2], [0, 0, 0, 1, 1, 2], [0], [0]>} : vector<2x8x8xbf16>, vector<2x8x16xbf16>, vector<2x8x16xf32> -> vector<2x8x16xf32>
    "tpu.trace_stop"() : () -> ()
    %272 = vector.shape_cast %271 : vector<2x8x16xf32> to vector<16x16xf32>
    %273 = vector.extract_strided_slice %245 {offsets = [0, 16], sizes = [16, 16], strides = [1, 1]} : vector<16x192xf32> to vector<16x16xf32>
    %274 = vector.shape_cast %273 : vector<16x16xf32> to vector<2x8x16xf32>
    %275 = vector.extract_strided_slice %245 {offsets = [0, 80], sizes = [16, 16], strides = [1, 1]} : vector<16x192xf32> to vector<16x16xf32>
    %276 = vector.shape_cast %275 : vector<16x16xf32> to vector<2x8x16xf32>
    %277 = vector.extract_strided_slice %245 {offsets = [0, 144], sizes = [16, 16], strides = [1, 1]} : vector<16x192xf32> to vector<16x16xf32>
    %278 = vector.shape_cast %277 : vector<16x16xf32> to vector<2x8x16xf32>
    %279 = arith.truncf %274 : vector<2x8x16xf32> to vector<2x8x16xbf16>
    %280 = arith.truncf %276 : vector<2x8x16xf32> to vector<2x8x16xbf16>
    "tpu.trace_start"() <{level = 10 : i32, message = "bqd,bkd->bqk"}> : () -> ()
    %cst_103 = arith.constant dense<0.000000e+00> : vector<2x8x8xf32>
    %281 = tpu.matmul %279, %280, %cst_103 {dimension_numbers = #tpu.dot_dimension_numbers<[2], [2], [1], [1], [0, 0, 0, 1, 1, 1], [0], [0]>} : vector<2x8x16xbf16>, vector<2x8x16xbf16>, vector<2x8x8xf32> -> vector<2x8x8xf32>
    "tpu.trace_stop"() : () -> ()
    %cst_104 = arith.constant 2.500000e-01 : f32
    %282 = vector.broadcast %cst_104 : f32 to vector<2x8x8xf32>
    %283 = arith.mulf %281, %282 : vector<2x8x8xf32>
    %284 = vector.broadcast %25 : vector<2x1x8xf32> to vector<2x8x8xf32>
    %285 = arith.addf %283, %284 : vector<2x8x8xf32>
    %cst_105 = arith.constant dense<0xFF800000> : vector<2x8xf32>
    %286 = vector.multi_reduction <maximumf>, %285, %cst_105 [2] : vector<2x8x8xf32> to vector<2x8xf32>
    %287 = vector.shape_cast %286 : vector<2x8xf32> to vector<2x8x1xf32>
    %288 = vector.broadcast %287 : vector<2x8x1xf32> to vector<2x8x8xf32>
    %289 = arith.subf %285, %288 : vector<2x8x8xf32>
    %290 = math.exp %289 : vector<2x8x8xf32>
    %cst_106 = arith.constant dense<0.000000e+00> : vector<2x8xf32>
    %291 = vector.multi_reduction <add>, %290, %cst_106 [2] : vector<2x8x8xf32> to vector<2x8xf32>
    %292 = vector.shape_cast %291 : vector<2x8xf32> to vector<2x8x1xf32>
    %293 = tpu.reciprocal %292 {approx = true} : vector<2x8x1xf32> -> vector<2x8x1xf32>
    %294 = vector.broadcast %293 : vector<2x8x1xf32> to vector<2x8x8xf32>
    %295 = arith.mulf %290, %294 : vector<2x8x8xf32>
    %296 = arith.truncf %295 : vector<2x8x8xf32> to vector<2x8x8xbf16>
    %297 = arith.truncf %278 : vector<2x8x16xf32> to vector<2x8x16xbf16>
    "tpu.trace_start"() <{level = 10 : i32, message = "bqk,bkd->bqd"}> : () -> ()
    %cst_107 = arith.constant dense<0.000000e+00> : vector<2x8x16xf32>
    %298 = tpu.matmul %296, %297, %cst_107 {dimension_numbers = #tpu.dot_dimension_numbers<[2], [1], [1], [2], [0, 0, 0, 1, 1, 2], [0], [0]>} : vector<2x8x8xbf16>, vector<2x8x16xbf16>, vector<2x8x16xf32> -> vector<2x8x16xf32>
    "tpu.trace_stop"() : () -> ()
    %299 = vector.shape_cast %298 : vector<2x8x16xf32> to vector<16x16xf32>
    %300 = vector.extract_strided_slice %245 {offsets = [0, 32], sizes = [16, 16], strides = [1, 1]} : vector<16x192xf32> to vector<16x16xf32>
    %301 = vector.shape_cast %300 : vector<16x16xf32> to vector<2x8x16xf32>
    %302 = vector.extract_strided_slice %245 {offsets = [0, 96], sizes = [16, 16], strides = [1, 1]} : vector<16x192xf32> to vector<16x16xf32>
    %303 = vector.shape_cast %302 : vector<16x16xf32> to vector<2x8x16xf32>
    %304 = vector.extract_strided_slice %245 {offsets = [0, 160], sizes = [16, 16], strides = [1, 1]} : vector<16x192xf32> to vector<16x16xf32>
    %305 = vector.shape_cast %304 : vector<16x16xf32> to vector<2x8x16xf32>
    %306 = arith.truncf %301 : vector<2x8x16xf32> to vector<2x8x16xbf16>
    %307 = arith.truncf %303 : vector<2x8x16xf32> to vector<2x8x16xbf16>
    "tpu.trace_start"() <{level = 10 : i32, message = "bqd,bkd->bqk"}> : () -> ()
    %cst_108 = arith.constant dense<0.000000e+00> : vector<2x8x8xf32>
    %308 = tpu.matmul %306, %307, %cst_108 {dimension_numbers = #tpu.dot_dimension_numbers<[2], [2], [1], [1], [0, 0, 0, 1, 1, 1], [0], [0]>} : vector<2x8x16xbf16>, vector<2x8x16xbf16>, vector<2x8x8xf32> -> vector<2x8x8xf32>
    "tpu.trace_stop"() : () -> ()
    %cst_109 = arith.constant 2.500000e-01 : f32
    %309 = vector.broadcast %cst_109 : f32 to vector<2x8x8xf32>
    %310 = arith.mulf %308, %309 : vector<2x8x8xf32>
    %311 = vector.broadcast %25 : vector<2x1x8xf32> to vector<2x8x8xf32>
    %312 = arith.addf %310, %311 : vector<2x8x8xf32>
    %cst_110 = arith.constant dense<0xFF800000> : vector<2x8xf32>
    %313 = vector.multi_reduction <maximumf>, %312, %cst_110 [2] : vector<2x8x8xf32> to vector<2x8xf32>
    %314 = vector.shape_cast %313 : vector<2x8xf32> to vector<2x8x1xf32>
    %315 = vector.broadcast %314 : vector<2x8x1xf32> to vector<2x8x8xf32>
    %316 = arith.subf %312, %315 : vector<2x8x8xf32>
    %317 = math.exp %316 : vector<2x8x8xf32>
    %cst_111 = arith.constant dense<0.000000e+00> : vector<2x8xf32>
    %318 = vector.multi_reduction <add>, %317, %cst_111 [2] : vector<2x8x8xf32> to vector<2x8xf32>
    %319 = vector.shape_cast %318 : vector<2x8xf32> to vector<2x8x1xf32>
    %320 = tpu.reciprocal %319 {approx = true} : vector<2x8x1xf32> -> vector<2x8x1xf32>
    %321 = vector.broadcast %320 : vector<2x8x1xf32> to vector<2x8x8xf32>
    %322 = arith.mulf %317, %321 : vector<2x8x8xf32>
    %323 = arith.truncf %322 : vector<2x8x8xf32> to vector<2x8x8xbf16>
    %324 = arith.truncf %305 : vector<2x8x16xf32> to vector<2x8x16xbf16>
    "tpu.trace_start"() <{level = 10 : i32, message = "bqk,bkd->bqd"}> : () -> ()
    %cst_112 = arith.constant dense<0.000000e+00> : vector<2x8x16xf32>
    %325 = tpu.matmul %323, %324, %cst_112 {dimension_numbers = #tpu.dot_dimension_numbers<[2], [1], [1], [2], [0, 0, 0, 1, 1, 2], [0], [0]>} : vector<2x8x8xbf16>, vector<2x8x16xbf16>, vector<2x8x16xf32> -> vector<2x8x16xf32>
    "tpu.trace_stop"() : () -> ()
    %326 = vector.shape_cast %325 : vector<2x8x16xf32> to vector<16x16xf32>
    %327 = vector.extract_strided_slice %245 {offsets = [0, 48], sizes = [16, 16], strides = [1, 1]} : vector<16x192xf32> to vector<16x16xf32>
    %328 = vector.shape_cast %327 : vector<16x16xf32> to vector<2x8x16xf32>
    %329 = vector.extract_strided_slice %245 {offsets = [0, 112], sizes = [16, 16], strides = [1, 1]} : vector<16x192xf32> to vector<16x16xf32>
    %330 = vector.shape_cast %329 : vector<16x16xf32> to vector<2x8x16xf32>
    %331 = vector.extract_strided_slice %245 {offsets = [0, 176], sizes = [16, 16], strides = [1, 1]} : vector<16x192xf32> to vector<16x16xf32>
    %332 = vector.shape_cast %331 : vector<16x16xf32> to vector<2x8x16xf32>
    %333 = arith.truncf %328 : vector<2x8x16xf32> to vector<2x8x16xbf16>
    %334 = arith.truncf %330 : vector<2x8x16xf32> to vector<2x8x16xbf16>
    "tpu.trace_start"() <{level = 10 : i32, message = "bqd,bkd->bqk"}> : () -> ()
    %cst_113 = arith.constant dense<0.000000e+00> : vector<2x8x8xf32>
    %335 = tpu.matmul %333, %334, %cst_113 {dimension_numbers = #tpu.dot_dimension_numbers<[2], [2], [1], [1], [0, 0, 0, 1, 1, 1], [0], [0]>} : vector<2x8x16xbf16>, vector<2x8x16xbf16>, vector<2x8x8xf32> -> vector<2x8x8xf32>
    "tpu.trace_stop"() : () -> ()
    %cst_114 = arith.constant 2.500000e-01 : f32
    %336 = vector.broadcast %cst_114 : f32 to vector<2x8x8xf32>
    %337 = arith.mulf %335, %336 : vector<2x8x8xf32>
    %338 = vector.broadcast %25 : vector<2x1x8xf32> to vector<2x8x8xf32>
    %339 = arith.addf %337, %338 : vector<2x8x8xf32>
    %cst_115 = arith.constant dense<0xFF800000> : vector<2x8xf32>
    %340 = vector.multi_reduction <maximumf>, %339, %cst_115 [2] : vector<2x8x8xf32> to vector<2x8xf32>
    %341 = vector.shape_cast %340 : vector<2x8xf32> to vector<2x8x1xf32>
    %342 = vector.broadcast %341 : vector<2x8x1xf32> to vector<2x8x8xf32>
    %343 = arith.subf %339, %342 : vector<2x8x8xf32>
    %344 = math.exp %343 : vector<2x8x8xf32>
    %cst_116 = arith.constant dense<0.000000e+00> : vector<2x8xf32>
    %345 = vector.multi_reduction <add>, %344, %cst_116 [2] : vector<2x8x8xf32> to vector<2x8xf32>
    %346 = vector.shape_cast %345 : vector<2x8xf32> to vector<2x8x1xf32>
    %347 = tpu.reciprocal %346 {approx = true} : vector<2x8x1xf32> -> vector<2x8x1xf32>
    %348 = vector.broadcast %347 : vector<2x8x1xf32> to vector<2x8x8xf32>
    %349 = arith.mulf %344, %348 : vector<2x8x8xf32>
    %350 = arith.truncf %349 : vector<2x8x8xf32> to vector<2x8x8xbf16>
    %351 = arith.truncf %332 : vector<2x8x16xf32> to vector<2x8x16xbf16>
    "tpu.trace_start"() <{level = 10 : i32, message = "bqk,bkd->bqd"}> : () -> ()
    %cst_117 = arith.constant dense<0.000000e+00> : vector<2x8x16xf32>
    %352 = tpu.matmul %350, %351, %cst_117 {dimension_numbers = #tpu.dot_dimension_numbers<[2], [1], [1], [2], [0, 0, 0, 1, 1, 2], [0], [0]>} : vector<2x8x8xbf16>, vector<2x8x16xbf16>, vector<2x8x16xf32> -> vector<2x8x16xf32>
    "tpu.trace_stop"() : () -> ()
    %353 = vector.shape_cast %352 : vector<2x8x16xf32> to vector<16x16xf32>
    %354 = tpu.concatenate %272, %299, %326, %353 in 1 : vector<16x16xf32>, vector<16x16xf32>, vector<16x16xf32>, vector<16x16xf32> -> vector<16x64xf32>
    %355 = arith.truncf %354 : vector<16x64xf32> to vector<16x64xbf16>
    %cst_118 = arith.constant dense<0.000000e+00> : vector<16x64xf32>
    %356 = tpu.matmul %355, %239, %cst_118 {dimension_numbers = #tpu.dot_dimension_numbers<[1], [0], [0], [1], [0, 0, 1, 1], [], []>} : vector<16x64xbf16>, vector<64x64xbf16>, vector<16x64xf32> -> vector<16x64xf32>
    %357 = vector.broadcast %241 : vector<1x64xf32> to vector<16x64xf32>
    %358 = arith.addf %356, %357 : vector<16x64xf32>
    %359 = arith.addf %233, %358 : vector<16x64xf32>
    %c1_119 = arith.constant 1 : index
    %c0_120 = arith.constant 0 : index
    %c0_121 = arith.constant 0 : index
    %360 = vector.load %arg9[%c1_119, %c0_120, %c0_121] : memref<2x1x64xf32, #tpu.memory_space<vmem>>, vector<1x1x64xf32>
    %361 = vector.shape_cast %360 : vector<1x1x64xf32> to vector<1x64xf32>
    %c1_122 = arith.constant 1 : index
    %c0_123 = arith.constant 0 : index
    %c0_124 = arith.constant 0 : index
    %362 = vector.load %arg10[%c1_122, %c0_123, %c0_124] : memref<2x1x64xf32, #tpu.memory_space<vmem>>, vector<1x1x64xf32>
    %363 = vector.shape_cast %362 : vector<1x1x64xf32> to vector<1x64xf32>
    %cst_125 = arith.constant dense<0.000000e+00> : vector<16xf32>
    %364 = vector.multi_reduction <add>, %359, %cst_125 [1] : vector<16x64xf32> to vector<16xf32>
    %365 = vector.shape_cast %364 : vector<16xf32> to vector<16x1xf32>
    %cst_126 = arith.constant 6.400000e+01 : f32
    %366 = vector.broadcast %cst_126 : f32 to vector<16x1xf32>
    %367 = arith.divf %365, %366 : vector<16x1xf32>
    %368 = vector.broadcast %367 : vector<16x1xf32> to vector<16x64xf32>
    %369 = arith.subf %359, %368 : vector<16x64xf32>
    %370 = arith.mulf %369, %369 : vector<16x64xf32>
    %cst_127 = arith.constant dense<0.000000e+00> : vector<16xf32>
    %371 = vector.multi_reduction <add>, %370, %cst_127 [1] : vector<16x64xf32> to vector<16xf32>
    %372 = vector.shape_cast %371 : vector<16xf32> to vector<16x1xf32>
    %cst_128 = arith.constant 6.400000e+01 : f32
    %373 = vector.broadcast %cst_128 : f32 to vector<16x1xf32>
    %374 = arith.divf %372, %373 : vector<16x1xf32>
    %375 = vector.broadcast %367 : vector<16x1xf32> to vector<16x64xf32>
    %376 = arith.subf %359, %375 : vector<16x64xf32>
    %cst_129 = arith.constant 9.99999996E-13 : f32
    %377 = vector.broadcast %cst_129 : f32 to vector<16x1xf32>
    %378 = arith.addf %374, %377 : vector<16x1xf32>
    %379 = math.rsqrt %378 : vector<16x1xf32>
    %380 = vector.broadcast %379 : vector<16x1xf32> to vector<16x64xf32>
    %381 = arith.mulf %376, %380 : vector<16x64xf32>
    %382 = vector.broadcast %361 : vector<1x64xf32> to vector<16x64xf32>
    %383 = arith.mulf %381, %382 : vector<16x64xf32>
    %384 = vector.broadcast %363 : vector<1x64xf32> to vector<16x64xf32>
    %385 = arith.addf %383, %384 : vector<16x64xf32>
    %c1_130 = arith.constant 1 : index
    %c0_131 = arith.constant 0 : index
    %c0_132 = arith.constant 0 : index
    %386 = vector.load %arg11[%c1_130, %c0_131, %c0_132] : memref<2x64x256xbf16, #tpu.memory_space<vmem>>, vector<1x64x256xbf16>
    %387 = vector.shape_cast %386 : vector<1x64x256xbf16> to vector<64x256xbf16>
    %388 = arith.truncf %385 : vector<16x64xf32> to vector<16x64xbf16>
    %cst_133 = arith.constant dense<0.000000e+00> : vector<16x256xf32>
    %389 = tpu.matmul %388, %387, %cst_133 {dimension_numbers = #tpu.dot_dimension_numbers<[1], [0], [0], [1], [0, 0, 1, 1], [], []>} : vector<16x64xbf16>, vector<64x256xbf16>, vector<16x256xf32> -> vector<16x256xf32>
    %c1_134 = arith.constant 1 : index
    %c0_135 = arith.constant 0 : index
    %c0_136 = arith.constant 0 : index
    %390 = vector.load %arg12[%c1_134, %c0_135, %c0_136] : memref<2x1x256xf32, #tpu.memory_space<vmem>>, vector<1x1x256xf32>
    %391 = vector.shape_cast %390 : vector<1x1x256xf32> to vector<1x256xf32>
    %392 = vector.broadcast %391 : vector<1x256xf32> to vector<16x256xf32>
    %393 = arith.addf %389, %392 : vector<16x256xf32>
    %394 = arith.mulf %393, %393 : vector<16x256xf32>
    %395 = arith.mulf %393, %394 : vector<16x256xf32>
    %cst_137 = arith.constant 4.471500e-02 : f32
    %396 = vector.broadcast %cst_137 : f32 to vector<16x256xf32>
    %397 = arith.mulf %396, %395 : vector<16x256xf32>
    %398 = arith.addf %393, %397 : vector<16x256xf32>
    %cst_138 = arith.constant 0.797884583 : f32
    %399 = vector.broadcast %cst_138 : f32 to vector<16x256xf32>
    %400 = arith.mulf %399, %398 : vector<16x256xf32>
    %401 = math.tanh %400 : vector<16x256xf32>
    %cst_139 = arith.constant 1.000000e+00 : f32
    %402 = vector.broadcast %cst_139 : f32 to vector<16x256xf32>
    %403 = arith.addf %402, %401 : vector<16x256xf32>
    %cst_140 = arith.constant 5.000000e-01 : f32
    %404 = vector.broadcast %cst_140 : f32 to vector<16x256xf32>
    %405 = arith.mulf %404, %403 : vector<16x256xf32>
    %406 = arith.mulf %393, %405 : vector<16x256xf32>
    %c1_141 = arith.constant 1 : index
    %c0_142 = arith.constant 0 : index
    %c0_143 = arith.constant 0 : index
    %407 = vector.load %arg13[%c1_141, %c0_142, %c0_143] : memref<2x256x64xbf16, #tpu.memory_space<vmem>>, vector<1x256x64xbf16>
    %408 = vector.shape_cast %407 : vector<1x256x64xbf16> to vector<256x64xbf16>
    %409 = arith.truncf %406 : vector<16x256xf32> to vector<16x256xbf16>
    %cst_144 = arith.constant dense<0.000000e+00> : vector<16x64xf32>
    %410 = tpu.matmul %409, %408, %cst_144 {dimension_numbers = #tpu.dot_dimension_numbers<[1], [0], [0], [1], [0, 0, 1, 1], [], []>} : vector<16x256xbf16>, vector<256x64xbf16>, vector<16x64xf32> -> vector<16x64xf32>
    %c1_145 = arith.constant 1 : index
    %c0_146 = arith.constant 0 : index
    %c0_147 = arith.constant 0 : index
    %411 = vector.load %arg14[%c1_145, %c0_146, %c0_147] : memref<2x1x64xf32, #tpu.memory_space<vmem>>, vector<1x1x64xf32>
    %412 = vector.shape_cast %411 : vector<1x1x64xf32> to vector<1x64xf32>
    %413 = vector.broadcast %412 : vector<1x64xf32> to vector<16x64xf32>
    %414 = arith.addf %410, %413 : vector<16x64xf32>
    %415 = arith.addf %385, %414 : vector<16x64xf32>
    %c1_148 = arith.constant 1 : index
    %c0_149 = arith.constant 0 : index
    %c0_150 = arith.constant 0 : index
    %416 = vector.load %arg15[%c1_148, %c0_149, %c0_150] : memref<2x1x64xf32, #tpu.memory_space<vmem>>, vector<1x1x64xf32>
    %417 = vector.shape_cast %416 : vector<1x1x64xf32> to vector<1x64xf32>
    %c1_151 = arith.constant 1 : index
    %c0_152 = arith.constant 0 : index
    %c0_153 = arith.constant 0 : index
    %418 = vector.load %arg16[%c1_151, %c0_152, %c0_153] : memref<2x1x64xf32, #tpu.memory_space<vmem>>, vector<1x1x64xf32>
    %419 = vector.shape_cast %418 : vector<1x1x64xf32> to vector<1x64xf32>
    %cst_154 = arith.constant dense<0.000000e+00> : vector<16xf32>
    %420 = vector.multi_reduction <add>, %415, %cst_154 [1] : vector<16x64xf32> to vector<16xf32>
    %421 = vector.shape_cast %420 : vector<16xf32> to vector<16x1xf32>
    %cst_155 = arith.constant 6.400000e+01 : f32
    %422 = vector.broadcast %cst_155 : f32 to vector<16x1xf32>
    %423 = arith.divf %421, %422 : vector<16x1xf32>
    %424 = vector.broadcast %423 : vector<16x1xf32> to vector<16x64xf32>
    %425 = arith.subf %415, %424 : vector<16x64xf32>
    %426 = arith.mulf %425, %425 : vector<16x64xf32>
    %cst_156 = arith.constant dense<0.000000e+00> : vector<16xf32>
    %427 = vector.multi_reduction <add>, %426, %cst_156 [1] : vector<16x64xf32> to vector<16xf32>
    %428 = vector.shape_cast %427 : vector<16xf32> to vector<16x1xf32>
    %cst_157 = arith.constant 6.400000e+01 : f32
    %429 = vector.broadcast %cst_157 : f32 to vector<16x1xf32>
    %430 = arith.divf %428, %429 : vector<16x1xf32>
    %431 = vector.broadcast %423 : vector<16x1xf32> to vector<16x64xf32>
    %432 = arith.subf %415, %431 : vector<16x64xf32>
    %cst_158 = arith.constant 9.99999996E-13 : f32
    %433 = vector.broadcast %cst_158 : f32 to vector<16x1xf32>
    %434 = arith.addf %430, %433 : vector<16x1xf32>
    %435 = math.rsqrt %434 : vector<16x1xf32>
    %436 = vector.broadcast %435 : vector<16x1xf32> to vector<16x64xf32>
    %437 = arith.mulf %432, %436 : vector<16x64xf32>
    %438 = vector.broadcast %417 : vector<1x64xf32> to vector<16x64xf32>
    %439 = arith.mulf %437, %438 : vector<16x64xf32>
    %440 = vector.broadcast %419 : vector<1x64xf32> to vector<16x64xf32>
    %441 = arith.addf %439, %440 : vector<16x64xf32>
    %442 = vector.shape_cast %441 : vector<16x64xf32> to vector<2x8x64xf32>
    %443 = vector.extract_strided_slice %442 {offsets = [0, 0, 0], sizes = [2, 1, 64], strides = [1, 1, 1]} : vector<2x8x64xf32> to vector<2x1x64xf32>
    %444 = vector.shape_cast %443 : vector<2x1x64xf32> to vector<2x64xf32>
    %c0_159 = arith.constant 0 : index
    %c0_160 = arith.constant 0 : index
    %445 = vector.load %arg17[%c0_159, %c0_160] : memref<16x192xf32, #tpu.memory_space<vmem>>, vector<16x192xf32>
    %c0_161 = arith.constant 0 : index
    %c0_162 = arith.constant 0 : index
    %446 = vector.load %arg18[%c0_161, %c0_162] : memref<192x64xbf16, #tpu.memory_space<vmem>>, vector<192x64xbf16>
    %447 = arith.truncf %445 : vector<16x192xf32> to vector<16x192xbf16>
    %cst_163 = arith.constant dense<0.000000e+00> : vector<16x64xf32>
    %448 = tpu.matmul %447, %446, %cst_163 {dimension_numbers = #tpu.dot_dimension_numbers<[1], [0], [0], [1], [0, 0, 1, 1], [], []>} : vector<16x192xbf16>, vector<192x64xbf16>, vector<16x64xf32> -> vector<16x64xf32>
    %449 = vector.shape_cast %448 : vector<16x64xf32> to vector<2x8x64xf32>
    %c0_164 = arith.constant 0 : index
    %c0_165 = arith.constant 0 : index
    %450 = vector.load %arg19[%c0_164, %c0_165] : memref<8x64xf32, #tpu.memory_space<vmem>>, vector<8x64xf32>
    %451 = vector.shape_cast %450 : vector<8x64xf32> to vector<1x8x64xf32>
    %452 = vector.broadcast %451 : vector<1x8x64xf32> to vector<2x8x64xf32>
    %453 = arith.addf %449, %452 : vector<2x8x64xf32>
    %454 = vector.shape_cast %453 : vector<2x8x64xf32> to vector<16x64xf32>
    %c0_166 = arith.constant 0 : index
    %c0_167 = arith.constant 0 : index
    %c0_168 = arith.constant 0 : index
    %455 = vector.load %arg20[%c0_166, %c0_167, %c0_168] : memref<1x1x8xf32, #tpu.memory_space<vmem>>, vector<1x1x8xf32>
    %c0_169 = arith.constant 0 : index
    %c0_170 = arith.constant 0 : index
    %c0_171 = arith.constant 0 : index
    %456 = vector.load %arg25[%c0_169, %c0_170, %c0_171] : memref<2x1x64xf32, #tpu.memory_space<vmem>>, vector<1x1x64xf32>
    %457 = vector.shape_cast %456 : vector<1x1x64xf32> to vector<1x64xf32>
    %c0_172 = arith.constant 0 : index
    %c0_173 = arith.constant 0 : index
    %c0_174 = arith.constant 0 : index
    %458 = vector.load %arg26[%c0_172, %c0_173, %c0_174] : memref<2x1x64xf32, #tpu.memory_space<vmem>>, vector<1x1x64xf32>
    %459 = vector.shape_cast %458 : vector<1x1x64xf32> to vector<1x64xf32>
    %cst_175 = arith.constant dense<0.000000e+00> : vector<16xf32>
    %460 = vector.multi_reduction <add>, %454, %cst_175 [1] : vector<16x64xf32> to vector<16xf32>
    %461 = vector.shape_cast %460 : vector<16xf32> to vector<16x1xf32>
    %cst_176 = arith.constant 6.400000e+01 : f32
    %462 = vector.broadcast %cst_176 : f32 to vector<16x1xf32>
    %463 = arith.divf %461, %462 : vector<16x1xf32>
    %464 = vector.broadcast %463 : vector<16x1xf32> to vector<16x64xf32>
    %465 = arith.subf %454, %464 : vector<16x64xf32>
    %466 = arith.mulf %465, %465 : vector<16x64xf32>
    %cst_177 = arith.constant dense<0.000000e+00> : vector<16xf32>
    %467 = vector.multi_reduction <add>, %466, %cst_177 [1] : vector<16x64xf32> to vector<16xf32>
    %468 = vector.shape_cast %467 : vector<16xf32> to vector<16x1xf32>
    %cst_178 = arith.constant 6.400000e+01 : f32
    %469 = vector.broadcast %cst_178 : f32 to vector<16x1xf32>
    %470 = arith.divf %468, %469 : vector<16x1xf32>
    %471 = vector.broadcast %463 : vector<16x1xf32> to vector<16x64xf32>
    %472 = arith.subf %454, %471 : vector<16x64xf32>
    %cst_179 = arith.constant 9.99999996E-13 : f32
    %473 = vector.broadcast %cst_179 : f32 to vector<16x1xf32>
    %474 = arith.addf %470, %473 : vector<16x1xf32>
    %475 = math.rsqrt %474 : vector<16x1xf32>
    %476 = vector.broadcast %475 : vector<16x1xf32> to vector<16x64xf32>
    %477 = arith.mulf %472, %476 : vector<16x64xf32>
    %478 = vector.broadcast %457 : vector<1x64xf32> to vector<16x64xf32>
    %479 = arith.mulf %477, %478 : vector<16x64xf32>
    %480 = vector.broadcast %459 : vector<1x64xf32> to vector<16x64xf32>
    %481 = arith.addf %479, %480 : vector<16x64xf32>
    %c0_180 = arith.constant 0 : index
    %c0_181 = arith.constant 0 : index
    %c0_182 = arith.constant 0 : index
    %482 = vector.load %arg21[%c0_180, %c0_181, %c0_182] : memref<2x64x192xbf16, #tpu.memory_space<vmem>>, vector<1x64x192xbf16>
    %483 = vector.shape_cast %482 : vector<1x64x192xbf16> to vector<64x192xbf16>
    %c0_183 = arith.constant 0 : index
    %c0_184 = arith.constant 0 : index
    %c0_185 = arith.constant 0 : index
    %484 = vector.load %arg22[%c0_183, %c0_184, %c0_185] : memref<2x1x192xf32, #tpu.memory_space<vmem>>, vector<1x1x192xf32>
    %485 = vector.shape_cast %484 : vector<1x1x192xf32> to vector<1x192xf32>
    %c0_186 = arith.constant 0 : index
    %c0_187 = arith.constant 0 : index
    %c0_188 = arith.constant 0 : index
    %486 = vector.load %arg23[%c0_186, %c0_187, %c0_188] : memref<2x64x64xbf16, #tpu.memory_space<vmem>>, vector<1x64x64xbf16>
    %487 = vector.shape_cast %486 : vector<1x64x64xbf16> to vector<64x64xbf16>
    %c0_189 = arith.constant 0 : index
    %c0_190 = arith.constant 0 : index
    %c0_191 = arith.constant 0 : index
    %488 = vector.load %arg24[%c0_189, %c0_190, %c0_191] : memref<2x1x64xf32, #tpu.memory_space<vmem>>, vector<1x1x64xf32>
    %489 = vector.shape_cast %488 : vector<1x1x64xf32> to vector<1x64xf32>
    %490 = arith.truncf %481 : vector<16x64xf32> to vector<16x64xbf16>
    %cst_192 = arith.constant dense<0.000000e+00> : vector<16x192xf32>
    %491 = tpu.matmul %490, %483, %cst_192 {dimension_numbers = #tpu.dot_dimension_numbers<[1], [0], [0], [1], [0, 0, 1, 1], [], []>} : vector<16x64xbf16>, vector<64x192xbf16>, vector<16x192xf32> -> vector<16x192xf32>
    %492 = vector.broadcast %485 : vector<1x192xf32> to vector<16x192xf32>
    %493 = arith.addf %491, %492 : vector<16x192xf32>
    %494 = vector.extract_strided_slice %493 {offsets = [0, 0], sizes = [16, 16], strides = [1, 1]} : vector<16x192xf32> to vector<16x16xf32>
    %495 = vector.shape_cast %494 : vector<16x16xf32> to vector<2x8x16xf32>
    %496 = vector.extract_strided_slice %493 {offsets = [0, 64], sizes = [16, 16], strides = [1, 1]} : vector<16x192xf32> to vector<16x16xf32>
    %497 = vector.shape_cast %496 : vector<16x16xf32> to vector<2x8x16xf32>
    %498 = vector.extract_strided_slice %493 {offsets = [0, 128], sizes = [16, 16], strides = [1, 1]} : vector<16x192xf32> to vector<16x16xf32>
    %499 = vector.shape_cast %498 : vector<16x16xf32> to vector<2x8x16xf32>
    %500 = arith.truncf %495 : vector<2x8x16xf32> to vector<2x8x16xbf16>
    %501 = arith.truncf %497 : vector<2x8x16xf32> to vector<2x8x16xbf16>
    "tpu.trace_start"() <{level = 10 : i32, message = "bqd,bkd->bqk"}> : () -> ()
    %cst_193 = arith.constant dense<0.000000e+00> : vector<2x8x8xf32>
    %502 = tpu.matmul %500, %501, %cst_193 {dimension_numbers = #tpu.dot_dimension_numbers<[2], [2], [1], [1], [0, 0, 0, 1, 1, 1], [0], [0]>} : vector<2x8x16xbf16>, vector<2x8x16xbf16>, vector<2x8x8xf32> -> vector<2x8x8xf32>
    "tpu.trace_stop"() : () -> ()
    %cst_194 = arith.constant 2.500000e-01 : f32
    %503 = vector.broadcast %cst_194 : f32 to vector<2x8x8xf32>
    %504 = arith.mulf %502, %503 : vector<2x8x8xf32>
    %505 = vector.broadcast %455 : vector<1x1x8xf32> to vector<2x8x8xf32>
    %506 = arith.addf %504, %505 : vector<2x8x8xf32>
    %cst_195 = arith.constant dense<0xFF800000> : vector<2x8xf32>
    %507 = vector.multi_reduction <maximumf>, %506, %cst_195 [2] : vector<2x8x8xf32> to vector<2x8xf32>
    %508 = vector.shape_cast %507 : vector<2x8xf32> to vector<2x8x1xf32>
    %509 = vector.broadcast %508 : vector<2x8x1xf32> to vector<2x8x8xf32>
    %510 = arith.subf %506, %509 : vector<2x8x8xf32>
    %511 = math.exp %510 : vector<2x8x8xf32>
    %cst_196 = arith.constant dense<0.000000e+00> : vector<2x8xf32>
    %512 = vector.multi_reduction <add>, %511, %cst_196 [2] : vector<2x8x8xf32> to vector<2x8xf32>
    %513 = vector.shape_cast %512 : vector<2x8xf32> to vector<2x8x1xf32>
    %514 = tpu.reciprocal %513 {approx = true} : vector<2x8x1xf32> -> vector<2x8x1xf32>
    %515 = vector.broadcast %514 : vector<2x8x1xf32> to vector<2x8x8xf32>
    %516 = arith.mulf %511, %515 : vector<2x8x8xf32>
    %517 = arith.truncf %516 : vector<2x8x8xf32> to vector<2x8x8xbf16>
    %518 = arith.truncf %499 : vector<2x8x16xf32> to vector<2x8x16xbf16>
    "tpu.trace_start"() <{level = 10 : i32, message = "bqk,bkd->bqd"}> : () -> ()
    %cst_197 = arith.constant dense<0.000000e+00> : vector<2x8x16xf32>
    %519 = tpu.matmul %517, %518, %cst_197 {dimension_numbers = #tpu.dot_dimension_numbers<[2], [1], [1], [2], [0, 0, 0, 1, 1, 2], [0], [0]>} : vector<2x8x8xbf16>, vector<2x8x16xbf16>, vector<2x8x16xf32> -> vector<2x8x16xf32>
    "tpu.trace_stop"() : () -> ()
    %520 = vector.shape_cast %519 : vector<2x8x16xf32> to vector<16x16xf32>
    %521 = vector.extract_strided_slice %493 {offsets = [0, 16], sizes = [16, 16], strides = [1, 1]} : vector<16x192xf32> to vector<16x16xf32>
    %522 = vector.shape_cast %521 : vector<16x16xf32> to vector<2x8x16xf32>
    %523 = vector.extract_strided_slice %493 {offsets = [0, 80], sizes = [16, 16], strides = [1, 1]} : vector<16x192xf32> to vector<16x16xf32>
    %524 = vector.shape_cast %523 : vector<16x16xf32> to vector<2x8x16xf32>
    %525 = vector.extract_strided_slice %493 {offsets = [0, 144], sizes = [16, 16], strides = [1, 1]} : vector<16x192xf32> to vector<16x16xf32>
    %526 = vector.shape_cast %525 : vector<16x16xf32> to vector<2x8x16xf32>
    %527 = arith.truncf %522 : vector<2x8x16xf32> to vector<2x8x16xbf16>
    %528 = arith.truncf %524 : vector<2x8x16xf32> to vector<2x8x16xbf16>
    "tpu.trace_start"() <{level = 10 : i32, message = "bqd,bkd->bqk"}> : () -> ()
    %cst_198 = arith.constant dense<0.000000e+00> : vector<2x8x8xf32>
    %529 = tpu.matmul %527, %528, %cst_198 {dimension_numbers = #tpu.dot_dimension_numbers<[2], [2], [1], [1], [0, 0, 0, 1, 1, 1], [0], [0]>} : vector<2x8x16xbf16>, vector<2x8x16xbf16>, vector<2x8x8xf32> -> vector<2x8x8xf32>
    "tpu.trace_stop"() : () -> ()
    %cst_199 = arith.constant 2.500000e-01 : f32
    %530 = vector.broadcast %cst_199 : f32 to vector<2x8x8xf32>
    %531 = arith.mulf %529, %530 : vector<2x8x8xf32>
    %532 = vector.broadcast %455 : vector<1x1x8xf32> to vector<2x8x8xf32>
    %533 = arith.addf %531, %532 : vector<2x8x8xf32>
    %cst_200 = arith.constant dense<0xFF800000> : vector<2x8xf32>
    %534 = vector.multi_reduction <maximumf>, %533, %cst_200 [2] : vector<2x8x8xf32> to vector<2x8xf32>
    %535 = vector.shape_cast %534 : vector<2x8xf32> to vector<2x8x1xf32>
    %536 = vector.broadcast %535 : vector<2x8x1xf32> to vector<2x8x8xf32>
    %537 = arith.subf %533, %536 : vector<2x8x8xf32>
    %538 = math.exp %537 : vector<2x8x8xf32>
    %cst_201 = arith.constant dense<0.000000e+00> : vector<2x8xf32>
    %539 = vector.multi_reduction <add>, %538, %cst_201 [2] : vector<2x8x8xf32> to vector<2x8xf32>
    %540 = vector.shape_cast %539 : vector<2x8xf32> to vector<2x8x1xf32>
    %541 = tpu.reciprocal %540 {approx = true} : vector<2x8x1xf32> -> vector<2x8x1xf32>
    %542 = vector.broadcast %541 : vector<2x8x1xf32> to vector<2x8x8xf32>
    %543 = arith.mulf %538, %542 : vector<2x8x8xf32>
    %544 = arith.truncf %543 : vector<2x8x8xf32> to vector<2x8x8xbf16>
    %545 = arith.truncf %526 : vector<2x8x16xf32> to vector<2x8x16xbf16>
    "tpu.trace_start"() <{level = 10 : i32, message = "bqk,bkd->bqd"}> : () -> ()
    %cst_202 = arith.constant dense<0.000000e+00> : vector<2x8x16xf32>
    %546 = tpu.matmul %544, %545, %cst_202 {dimension_numbers = #tpu.dot_dimension_numbers<[2], [1], [1], [2], [0, 0, 0, 1, 1, 2], [0], [0]>} : vector<2x8x8xbf16>, vector<2x8x16xbf16>, vector<2x8x16xf32> -> vector<2x8x16xf32>
    "tpu.trace_stop"() : () -> ()
    %547 = vector.shape_cast %546 : vector<2x8x16xf32> to vector<16x16xf32>
    %548 = vector.extract_strided_slice %493 {offsets = [0, 32], sizes = [16, 16], strides = [1, 1]} : vector<16x192xf32> to vector<16x16xf32>
    %549 = vector.shape_cast %548 : vector<16x16xf32> to vector<2x8x16xf32>
    %550 = vector.extract_strided_slice %493 {offsets = [0, 96], sizes = [16, 16], strides = [1, 1]} : vector<16x192xf32> to vector<16x16xf32>
    %551 = vector.shape_cast %550 : vector<16x16xf32> to vector<2x8x16xf32>
    %552 = vector.extract_strided_slice %493 {offsets = [0, 160], sizes = [16, 16], strides = [1, 1]} : vector<16x192xf32> to vector<16x16xf32>
    %553 = vector.shape_cast %552 : vector<16x16xf32> to vector<2x8x16xf32>
    %554 = arith.truncf %549 : vector<2x8x16xf32> to vector<2x8x16xbf16>
    %555 = arith.truncf %551 : vector<2x8x16xf32> to vector<2x8x16xbf16>
    "tpu.trace_start"() <{level = 10 : i32, message = "bqd,bkd->bqk"}> : () -> ()
    %cst_203 = arith.constant dense<0.000000e+00> : vector<2x8x8xf32>
    %556 = tpu.matmul %554, %555, %cst_203 {dimension_numbers = #tpu.dot_dimension_numbers<[2], [2], [1], [1], [0, 0, 0, 1, 1, 1], [0], [0]>} : vector<2x8x16xbf16>, vector<2x8x16xbf16>, vector<2x8x8xf32> -> vector<2x8x8xf32>
    "tpu.trace_stop"() : () -> ()
    %cst_204 = arith.constant 2.500000e-01 : f32
    %557 = vector.broadcast %cst_204 : f32 to vector<2x8x8xf32>
    %558 = arith.mulf %556, %557 : vector<2x8x8xf32>
    %559 = vector.broadcast %455 : vector<1x1x8xf32> to vector<2x8x8xf32>
    %560 = arith.addf %558, %559 : vector<2x8x8xf32>
    %cst_205 = arith.constant dense<0xFF800000> : vector<2x8xf32>
    %561 = vector.multi_reduction <maximumf>, %560, %cst_205 [2] : vector<2x8x8xf32> to vector<2x8xf32>
    %562 = vector.shape_cast %561 : vector<2x8xf32> to vector<2x8x1xf32>
    %563 = vector.broadcast %562 : vector<2x8x1xf32> to vector<2x8x8xf32>
    %564 = arith.subf %560, %563 : vector<2x8x8xf32>
    %565 = math.exp %564 : vector<2x8x8xf32>
    %cst_206 = arith.constant dense<0.000000e+00> : vector<2x8xf32>
    %566 = vector.multi_reduction <add>, %565, %cst_206 [2] : vector<2x8x8xf32> to vector<2x8xf32>
    %567 = vector.shape_cast %566 : vector<2x8xf32> to vector<2x8x1xf32>
    %568 = tpu.reciprocal %567 {approx = true} : vector<2x8x1xf32> -> vector<2x8x1xf32>
    %569 = vector.broadcast %568 : vector<2x8x1xf32> to vector<2x8x8xf32>
    %570 = arith.mulf %565, %569 : vector<2x8x8xf32>
    %571 = arith.truncf %570 : vector<2x8x8xf32> to vector<2x8x8xbf16>
    %572 = arith.truncf %553 : vector<2x8x16xf32> to vector<2x8x16xbf16>
    "tpu.trace_start"() <{level = 10 : i32, message = "bqk,bkd->bqd"}> : () -> ()
    %cst_207 = arith.constant dense<0.000000e+00> : vector<2x8x16xf32>
    %573 = tpu.matmul %571, %572, %cst_207 {dimension_numbers = #tpu.dot_dimension_numbers<[2], [1], [1], [2], [0, 0, 0, 1, 1, 2], [0], [0]>} : vector<2x8x8xbf16>, vector<2x8x16xbf16>, vector<2x8x16xf32> -> vector<2x8x16xf32>
    "tpu.trace_stop"() : () -> ()
    %574 = vector.shape_cast %573 : vector<2x8x16xf32> to vector<16x16xf32>
    %575 = vector.extract_strided_slice %493 {offsets = [0, 48], sizes = [16, 16], strides = [1, 1]} : vector<16x192xf32> to vector<16x16xf32>
    %576 = vector.shape_cast %575 : vector<16x16xf32> to vector<2x8x16xf32>
    %577 = vector.extract_strided_slice %493 {offsets = [0, 112], sizes = [16, 16], strides = [1, 1]} : vector<16x192xf32> to vector<16x16xf32>
    %578 = vector.shape_cast %577 : vector<16x16xf32> to vector<2x8x16xf32>
    %579 = vector.extract_strided_slice %493 {offsets = [0, 176], sizes = [16, 16], strides = [1, 1]} : vector<16x192xf32> to vector<16x16xf32>
    %580 = vector.shape_cast %579 : vector<16x16xf32> to vector<2x8x16xf32>
    %581 = arith.truncf %576 : vector<2x8x16xf32> to vector<2x8x16xbf16>
    %582 = arith.truncf %578 : vector<2x8x16xf32> to vector<2x8x16xbf16>
    "tpu.trace_start"() <{level = 10 : i32, message = "bqd,bkd->bqk"}> : () -> ()
    %cst_208 = arith.constant dense<0.000000e+00> : vector<2x8x8xf32>
    %583 = tpu.matmul %581, %582, %cst_208 {dimension_numbers = #tpu.dot_dimension_numbers<[2], [2], [1], [1], [0, 0, 0, 1, 1, 1], [0], [0]>} : vector<2x8x16xbf16>, vector<2x8x16xbf16>, vector<2x8x8xf32> -> vector<2x8x8xf32>
    "tpu.trace_stop"() : () -> ()
    %cst_209 = arith.constant 2.500000e-01 : f32
    %584 = vector.broadcast %cst_209 : f32 to vector<2x8x8xf32>
    %585 = arith.mulf %583, %584 : vector<2x8x8xf32>
    %586 = vector.broadcast %455 : vector<1x1x8xf32> to vector<2x8x8xf32>
    %587 = arith.addf %585, %586 : vector<2x8x8xf32>
    %cst_210 = arith.constant dense<0xFF800000> : vector<2x8xf32>
    %588 = vector.multi_reduction <maximumf>, %587, %cst_210 [2] : vector<2x8x8xf32> to vector<2x8xf32>
    %589 = vector.shape_cast %588 : vector<2x8xf32> to vector<2x8x1xf32>
    %590 = vector.broadcast %589 : vector<2x8x1xf32> to vector<2x8x8xf32>
    %591 = arith.subf %587, %590 : vector<2x8x8xf32>
    %592 = math.exp %591 : vector<2x8x8xf32>
    %cst_211 = arith.constant dense<0.000000e+00> : vector<2x8xf32>
    %593 = vector.multi_reduction <add>, %592, %cst_211 [2] : vector<2x8x8xf32> to vector<2x8xf32>
    %594 = vector.shape_cast %593 : vector<2x8xf32> to vector<2x8x1xf32>
    %595 = tpu.reciprocal %594 {approx = true} : vector<2x8x1xf32> -> vector<2x8x1xf32>
    %596 = vector.broadcast %595 : vector<2x8x1xf32> to vector<2x8x8xf32>
    %597 = arith.mulf %592, %596 : vector<2x8x8xf32>
    %598 = arith.truncf %597 : vector<2x8x8xf32> to vector<2x8x8xbf16>
    %599 = arith.truncf %580 : vector<2x8x16xf32> to vector<2x8x16xbf16>
    "tpu.trace_start"() <{level = 10 : i32, message = "bqk,bkd->bqd"}> : () -> ()
    %cst_212 = arith.constant dense<0.000000e+00> : vector<2x8x16xf32>
    %600 = tpu.matmul %598, %599, %cst_212 {dimension_numbers = #tpu.dot_dimension_numbers<[2], [1], [1], [2], [0, 0, 0, 1, 1, 2], [0], [0]>} : vector<2x8x8xbf16>, vector<2x8x16xbf16>, vector<2x8x16xf32> -> vector<2x8x16xf32>
    "tpu.trace_stop"() : () -> ()
    %601 = vector.shape_cast %600 : vector<2x8x16xf32> to vector<16x16xf32>
    %602 = tpu.concatenate %520, %547, %574, %601 in 1 : vector<16x16xf32>, vector<16x16xf32>, vector<16x16xf32>, vector<16x16xf32> -> vector<16x64xf32>
    %603 = arith.truncf %602 : vector<16x64xf32> to vector<16x64xbf16>
    %cst_213 = arith.constant dense<0.000000e+00> : vector<16x64xf32>
    %604 = tpu.matmul %603, %487, %cst_213 {dimension_numbers = #tpu.dot_dimension_numbers<[1], [0], [0], [1], [0, 0, 1, 1], [], []>} : vector<16x64xbf16>, vector<64x64xbf16>, vector<16x64xf32> -> vector<16x64xf32>
    %605 = vector.broadcast %489 : vector<1x64xf32> to vector<16x64xf32>
    %606 = arith.addf %604, %605 : vector<16x64xf32>
    %607 = arith.addf %454, %606 : vector<16x64xf32>
    %c0_214 = arith.constant 0 : index
    %c0_215 = arith.constant 0 : index
    %c0_216 = arith.constant 0 : index
    %608 = vector.load %arg31[%c0_214, %c0_215, %c0_216] : memref<2x1x64xf32, #tpu.memory_space<vmem>>, vector<1x1x64xf32>
    %609 = vector.shape_cast %608 : vector<1x1x64xf32> to vector<1x64xf32>
    %c0_217 = arith.constant 0 : index
    %c0_218 = arith.constant 0 : index
    %c0_219 = arith.constant 0 : index
    %610 = vector.load %arg32[%c0_217, %c0_218, %c0_219] : memref<2x1x64xf32, #tpu.memory_space<vmem>>, vector<1x1x64xf32>
    %611 = vector.shape_cast %610 : vector<1x1x64xf32> to vector<1x64xf32>
    %cst_220 = arith.constant dense<0.000000e+00> : vector<16xf32>
    %612 = vector.multi_reduction <add>, %607, %cst_220 [1] : vector<16x64xf32> to vector<16xf32>
    %613 = vector.shape_cast %612 : vector<16xf32> to vector<16x1xf32>
    %cst_221 = arith.constant 6.400000e+01 : f32
    %614 = vector.broadcast %cst_221 : f32 to vector<16x1xf32>
    %615 = arith.divf %613, %614 : vector<16x1xf32>
    %616 = vector.broadcast %615 : vector<16x1xf32> to vector<16x64xf32>
    %617 = arith.subf %607, %616 : vector<16x64xf32>
    %618 = arith.mulf %617, %617 : vector<16x64xf32>
    %cst_222 = arith.constant dense<0.000000e+00> : vector<16xf32>
    %619 = vector.multi_reduction <add>, %618, %cst_222 [1] : vector<16x64xf32> to vector<16xf32>
    %620 = vector.shape_cast %619 : vector<16xf32> to vector<16x1xf32>
    %cst_223 = arith.constant 6.400000e+01 : f32
    %621 = vector.broadcast %cst_223 : f32 to vector<16x1xf32>
    %622 = arith.divf %620, %621 : vector<16x1xf32>
    %623 = vector.broadcast %615 : vector<16x1xf32> to vector<16x64xf32>
    %624 = arith.subf %607, %623 : vector<16x64xf32>
    %cst_224 = arith.constant 9.99999996E-13 : f32
    %625 = vector.broadcast %cst_224 : f32 to vector<16x1xf32>
    %626 = arith.addf %622, %625 : vector<16x1xf32>
    %627 = math.rsqrt %626 : vector<16x1xf32>
    %628 = vector.broadcast %627 : vector<16x1xf32> to vector<16x64xf32>
    %629 = arith.mulf %624, %628 : vector<16x64xf32>
    %630 = vector.broadcast %609 : vector<1x64xf32> to vector<16x64xf32>
    %631 = arith.mulf %629, %630 : vector<16x64xf32>
    %632 = vector.broadcast %611 : vector<1x64xf32> to vector<16x64xf32>
    %633 = arith.addf %631, %632 : vector<16x64xf32>
    %c0_225 = arith.constant 0 : index
    %c0_226 = arith.constant 0 : index
    %c0_227 = arith.constant 0 : index
    %634 = vector.load %arg27[%c0_225, %c0_226, %c0_227] : memref<2x64x256xbf16, #tpu.memory_space<vmem>>, vector<1x64x256xbf16>
    %635 = vector.shape_cast %634 : vector<1x64x256xbf16> to vector<64x256xbf16>
    %636 = arith.truncf %633 : vector<16x64xf32> to vector<16x64xbf16>
    %cst_228 = arith.constant dense<0.000000e+00> : vector<16x256xf32>
    %637 = tpu.matmul %636, %635, %cst_228 {dimension_numbers = #tpu.dot_dimension_numbers<[1], [0], [0], [1], [0, 0, 1, 1], [], []>} : vector<16x64xbf16>, vector<64x256xbf16>, vector<16x256xf32> -> vector<16x256xf32>
    %c0_229 = arith.constant 0 : index
    %c0_230 = arith.constant 0 : index
    %c0_231 = arith.constant 0 : index
    %638 = vector.load %arg28[%c0_229, %c0_230, %c0_231] : memref<2x1x256xf32, #tpu.memory_space<vmem>>, vector<1x1x256xf32>
    %639 = vector.shape_cast %638 : vector<1x1x256xf32> to vector<1x256xf32>
    %640 = vector.broadcast %639 : vector<1x256xf32> to vector<16x256xf32>
    %641 = arith.addf %637, %640 : vector<16x256xf32>
    %642 = arith.mulf %641, %641 : vector<16x256xf32>
    %643 = arith.mulf %641, %642 : vector<16x256xf32>
    %cst_232 = arith.constant 4.471500e-02 : f32
    %644 = vector.broadcast %cst_232 : f32 to vector<16x256xf32>
    %645 = arith.mulf %644, %643 : vector<16x256xf32>
    %646 = arith.addf %641, %645 : vector<16x256xf32>
    %cst_233 = arith.constant 0.797884583 : f32
    %647 = vector.broadcast %cst_233 : f32 to vector<16x256xf32>
    %648 = arith.mulf %647, %646 : vector<16x256xf32>
    %649 = math.tanh %648 : vector<16x256xf32>
    %cst_234 = arith.constant 1.000000e+00 : f32
    %650 = vector.broadcast %cst_234 : f32 to vector<16x256xf32>
    %651 = arith.addf %650, %649 : vector<16x256xf32>
    %cst_235 = arith.constant 5.000000e-01 : f32
    %652 = vector.broadcast %cst_235 : f32 to vector<16x256xf32>
    %653 = arith.mulf %652, %651 : vector<16x256xf32>
    %654 = arith.mulf %641, %653 : vector<16x256xf32>
    %c0_236 = arith.constant 0 : index
    %c0_237 = arith.constant 0 : index
    %c0_238 = arith.constant 0 : index
    %655 = vector.load %arg29[%c0_236, %c0_237, %c0_238] : memref<2x256x64xbf16, #tpu.memory_space<vmem>>, vector<1x256x64xbf16>
    %656 = vector.shape_cast %655 : vector<1x256x64xbf16> to vector<256x64xbf16>
    %657 = arith.truncf %654 : vector<16x256xf32> to vector<16x256xbf16>
    %cst_239 = arith.constant dense<0.000000e+00> : vector<16x64xf32>
    %658 = tpu.matmul %657, %656, %cst_239 {dimension_numbers = #tpu.dot_dimension_numbers<[1], [0], [0], [1], [0, 0, 1, 1], [], []>} : vector<16x256xbf16>, vector<256x64xbf16>, vector<16x64xf32> -> vector<16x64xf32>
    %c0_240 = arith.constant 0 : index
    %c0_241 = arith.constant 0 : index
    %c0_242 = arith.constant 0 : index
    %659 = vector.load %arg30[%c0_240, %c0_241, %c0_242] : memref<2x1x64xf32, #tpu.memory_space<vmem>>, vector<1x1x64xf32>
    %660 = vector.shape_cast %659 : vector<1x1x64xf32> to vector<1x64xf32>
    %661 = vector.broadcast %660 : vector<1x64xf32> to vector<16x64xf32>
    %662 = arith.addf %658, %661 : vector<16x64xf32>
    %663 = arith.addf %607, %662 : vector<16x64xf32>
    %c1_243 = arith.constant 1 : index
    %c0_244 = arith.constant 0 : index
    %c0_245 = arith.constant 0 : index
    %664 = vector.load %arg25[%c1_243, %c0_244, %c0_245] : memref<2x1x64xf32, #tpu.memory_space<vmem>>, vector<1x1x64xf32>
    %665 = vector.shape_cast %664 : vector<1x1x64xf32> to vector<1x64xf32>
    %c1_246 = arith.constant 1 : index
    %c0_247 = arith.constant 0 : index
    %c0_248 = arith.constant 0 : index
    %666 = vector.load %arg26[%c1_246, %c0_247, %c0_248] : memref<2x1x64xf32, #tpu.memory_space<vmem>>, vector<1x1x64xf32>
    %667 = vector.shape_cast %666 : vector<1x1x64xf32> to vector<1x64xf32>
    %cst_249 = arith.constant dense<0.000000e+00> : vector<16xf32>
    %668 = vector.multi_reduction <add>, %663, %cst_249 [1] : vector<16x64xf32> to vector<16xf32>
    %669 = vector.shape_cast %668 : vector<16xf32> to vector<16x1xf32>
    %cst_250 = arith.constant 6.400000e+01 : f32
    %670 = vector.broadcast %cst_250 : f32 to vector<16x1xf32>
    %671 = arith.divf %669, %670 : vector<16x1xf32>
    %672 = vector.broadcast %671 : vector<16x1xf32> to vector<16x64xf32>
    %673 = arith.subf %663, %672 : vector<16x64xf32>
    %674 = arith.mulf %673, %673 : vector<16x64xf32>
    %cst_251 = arith.constant dense<0.000000e+00> : vector<16xf32>
    %675 = vector.multi_reduction <add>, %674, %cst_251 [1] : vector<16x64xf32> to vector<16xf32>
    %676 = vector.shape_cast %675 : vector<16xf32> to vector<16x1xf32>
    %cst_252 = arith.constant 6.400000e+01 : f32
    %677 = vector.broadcast %cst_252 : f32 to vector<16x1xf32>
    %678 = arith.divf %676, %677 : vector<16x1xf32>
    %679 = vector.broadcast %671 : vector<16x1xf32> to vector<16x64xf32>
    %680 = arith.subf %663, %679 : vector<16x64xf32>
    %cst_253 = arith.constant 9.99999996E-13 : f32
    %681 = vector.broadcast %cst_253 : f32 to vector<16x1xf32>
    %682 = arith.addf %678, %681 : vector<16x1xf32>
    %683 = math.rsqrt %682 : vector<16x1xf32>
    %684 = vector.broadcast %683 : vector<16x1xf32> to vector<16x64xf32>
    %685 = arith.mulf %680, %684 : vector<16x64xf32>
    %686 = vector.broadcast %665 : vector<1x64xf32> to vector<16x64xf32>
    %687 = arith.mulf %685, %686 : vector<16x64xf32>
    %688 = vector.broadcast %667 : vector<1x64xf32> to vector<16x64xf32>
    %689 = arith.addf %687, %688 : vector<16x64xf32>
    %c1_254 = arith.constant 1 : index
    %c0_255 = arith.constant 0 : index
    %c0_256 = arith.constant 0 : index
    %690 = vector.load %arg21[%c1_254, %c0_255, %c0_256] : memref<2x64x192xbf16, #tpu.memory_space<vmem>>, vector<1x64x192xbf16>
    %691 = vector.shape_cast %690 : vector<1x64x192xbf16> to vector<64x192xbf16>
    %c1_257 = arith.constant 1 : index
    %c0_258 = arith.constant 0 : index
    %c0_259 = arith.constant 0 : index
    %692 = vector.load %arg22[%c1_257, %c0_258, %c0_259] : memref<2x1x192xf32, #tpu.memory_space<vmem>>, vector<1x1x192xf32>
    %693 = vector.shape_cast %692 : vector<1x1x192xf32> to vector<1x192xf32>
    %c1_260 = arith.constant 1 : index
    %c0_261 = arith.constant 0 : index
    %c0_262 = arith.constant 0 : index
    %694 = vector.load %arg23[%c1_260, %c0_261, %c0_262] : memref<2x64x64xbf16, #tpu.memory_space<vmem>>, vector<1x64x64xbf16>
    %695 = vector.shape_cast %694 : vector<1x64x64xbf16> to vector<64x64xbf16>
    %c1_263 = arith.constant 1 : index
    %c0_264 = arith.constant 0 : index
    %c0_265 = arith.constant 0 : index
    %696 = vector.load %arg24[%c1_263, %c0_264, %c0_265] : memref<2x1x64xf32, #tpu.memory_space<vmem>>, vector<1x1x64xf32>
    %697 = vector.shape_cast %696 : vector<1x1x64xf32> to vector<1x64xf32>
    %698 = arith.truncf %689 : vector<16x64xf32> to vector<16x64xbf16>
    %cst_266 = arith.constant dense<0.000000e+00> : vector<16x192xf32>
    %699 = tpu.matmul %698, %691, %cst_266 {dimension_numbers = #tpu.dot_dimension_numbers<[1], [0], [0], [1], [0, 0, 1, 1], [], []>} : vector<16x64xbf16>, vector<64x192xbf16>, vector<16x192xf32> -> vector<16x192xf32>
    %700 = vector.broadcast %693 : vector<1x192xf32> to vector<16x192xf32>
    %701 = arith.addf %699, %700 : vector<16x192xf32>
    %702 = vector.extract_strided_slice %701 {offsets = [0, 0], sizes = [16, 16], strides = [1, 1]} : vector<16x192xf32> to vector<16x16xf32>
    %703 = vector.shape_cast %702 : vector<16x16xf32> to vector<2x8x16xf32>
    %704 = vector.extract_strided_slice %701 {offsets = [0, 64], sizes = [16, 16], strides = [1, 1]} : vector<16x192xf32> to vector<16x16xf32>
    %705 = vector.shape_cast %704 : vector<16x16xf32> to vector<2x8x16xf32>
    %706 = vector.extract_strided_slice %701 {offsets = [0, 128], sizes = [16, 16], strides = [1, 1]} : vector<16x192xf32> to vector<16x16xf32>
    %707 = vector.shape_cast %706 : vector<16x16xf32> to vector<2x8x16xf32>
    %708 = arith.truncf %703 : vector<2x8x16xf32> to vector<2x8x16xbf16>
    %709 = arith.truncf %705 : vector<2x8x16xf32> to vector<2x8x16xbf16>
    "tpu.trace_start"() <{level = 10 : i32, message = "bqd,bkd->bqk"}> : () -> ()
    %cst_267 = arith.constant dense<0.000000e+00> : vector<2x8x8xf32>
    %710 = tpu.matmul %708, %709, %cst_267 {dimension_numbers = #tpu.dot_dimension_numbers<[2], [2], [1], [1], [0, 0, 0, 1, 1, 1], [0], [0]>} : vector<2x8x16xbf16>, vector<2x8x16xbf16>, vector<2x8x8xf32> -> vector<2x8x8xf32>
    "tpu.trace_stop"() : () -> ()
    %cst_268 = arith.constant 2.500000e-01 : f32
    %711 = vector.broadcast %cst_268 : f32 to vector<2x8x8xf32>
    %712 = arith.mulf %710, %711 : vector<2x8x8xf32>
    %713 = vector.broadcast %455 : vector<1x1x8xf32> to vector<2x8x8xf32>
    %714 = arith.addf %712, %713 : vector<2x8x8xf32>
    %cst_269 = arith.constant dense<0xFF800000> : vector<2x8xf32>
    %715 = vector.multi_reduction <maximumf>, %714, %cst_269 [2] : vector<2x8x8xf32> to vector<2x8xf32>
    %716 = vector.shape_cast %715 : vector<2x8xf32> to vector<2x8x1xf32>
    %717 = vector.broadcast %716 : vector<2x8x1xf32> to vector<2x8x8xf32>
    %718 = arith.subf %714, %717 : vector<2x8x8xf32>
    %719 = math.exp %718 : vector<2x8x8xf32>
    %cst_270 = arith.constant dense<0.000000e+00> : vector<2x8xf32>
    %720 = vector.multi_reduction <add>, %719, %cst_270 [2] : vector<2x8x8xf32> to vector<2x8xf32>
    %721 = vector.shape_cast %720 : vector<2x8xf32> to vector<2x8x1xf32>
    %722 = tpu.reciprocal %721 {approx = true} : vector<2x8x1xf32> -> vector<2x8x1xf32>
    %723 = vector.broadcast %722 : vector<2x8x1xf32> to vector<2x8x8xf32>
    %724 = arith.mulf %719, %723 : vector<2x8x8xf32>
    %725 = arith.truncf %724 : vector<2x8x8xf32> to vector<2x8x8xbf16>
    %726 = arith.truncf %707 : vector<2x8x16xf32> to vector<2x8x16xbf16>
    "tpu.trace_start"() <{level = 10 : i32, message = "bqk,bkd->bqd"}> : () -> ()
    %cst_271 = arith.constant dense<0.000000e+00> : vector<2x8x16xf32>
    %727 = tpu.matmul %725, %726, %cst_271 {dimension_numbers = #tpu.dot_dimension_numbers<[2], [1], [1], [2], [0, 0, 0, 1, 1, 2], [0], [0]>} : vector<2x8x8xbf16>, vector<2x8x16xbf16>, vector<2x8x16xf32> -> vector<2x8x16xf32>
    "tpu.trace_stop"() : () -> ()
    %728 = vector.shape_cast %727 : vector<2x8x16xf32> to vector<16x16xf32>
    %729 = vector.extract_strided_slice %701 {offsets = [0, 16], sizes = [16, 16], strides = [1, 1]} : vector<16x192xf32> to vector<16x16xf32>
    %730 = vector.shape_cast %729 : vector<16x16xf32> to vector<2x8x16xf32>
    %731 = vector.extract_strided_slice %701 {offsets = [0, 80], sizes = [16, 16], strides = [1, 1]} : vector<16x192xf32> to vector<16x16xf32>
    %732 = vector.shape_cast %731 : vector<16x16xf32> to vector<2x8x16xf32>
    %733 = vector.extract_strided_slice %701 {offsets = [0, 144], sizes = [16, 16], strides = [1, 1]} : vector<16x192xf32> to vector<16x16xf32>
    %734 = vector.shape_cast %733 : vector<16x16xf32> to vector<2x8x16xf32>
    %735 = arith.truncf %730 : vector<2x8x16xf32> to vector<2x8x16xbf16>
    %736 = arith.truncf %732 : vector<2x8x16xf32> to vector<2x8x16xbf16>
    "tpu.trace_start"() <{level = 10 : i32, message = "bqd,bkd->bqk"}> : () -> ()
    %cst_272 = arith.constant dense<0.000000e+00> : vector<2x8x8xf32>
    %737 = tpu.matmul %735, %736, %cst_272 {dimension_numbers = #tpu.dot_dimension_numbers<[2], [2], [1], [1], [0, 0, 0, 1, 1, 1], [0], [0]>} : vector<2x8x16xbf16>, vector<2x8x16xbf16>, vector<2x8x8xf32> -> vector<2x8x8xf32>
    "tpu.trace_stop"() : () -> ()
    %cst_273 = arith.constant 2.500000e-01 : f32
    %738 = vector.broadcast %cst_273 : f32 to vector<2x8x8xf32>
    %739 = arith.mulf %737, %738 : vector<2x8x8xf32>
    %740 = vector.broadcast %455 : vector<1x1x8xf32> to vector<2x8x8xf32>
    %741 = arith.addf %739, %740 : vector<2x8x8xf32>
    %cst_274 = arith.constant dense<0xFF800000> : vector<2x8xf32>
    %742 = vector.multi_reduction <maximumf>, %741, %cst_274 [2] : vector<2x8x8xf32> to vector<2x8xf32>
    %743 = vector.shape_cast %742 : vector<2x8xf32> to vector<2x8x1xf32>
    %744 = vector.broadcast %743 : vector<2x8x1xf32> to vector<2x8x8xf32>
    %745 = arith.subf %741, %744 : vector<2x8x8xf32>
    %746 = math.exp %745 : vector<2x8x8xf32>
    %cst_275 = arith.constant dense<0.000000e+00> : vector<2x8xf32>
    %747 = vector.multi_reduction <add>, %746, %cst_275 [2] : vector<2x8x8xf32> to vector<2x8xf32>
    %748 = vector.shape_cast %747 : vector<2x8xf32> to vector<2x8x1xf32>
    %749 = tpu.reciprocal %748 {approx = true} : vector<2x8x1xf32> -> vector<2x8x1xf32>
    %750 = vector.broadcast %749 : vector<2x8x1xf32> to vector<2x8x8xf32>
    %751 = arith.mulf %746, %750 : vector<2x8x8xf32>
    %752 = arith.truncf %751 : vector<2x8x8xf32> to vector<2x8x8xbf16>
    %753 = arith.truncf %734 : vector<2x8x16xf32> to vector<2x8x16xbf16>
    "tpu.trace_start"() <{level = 10 : i32, message = "bqk,bkd->bqd"}> : () -> ()
    %cst_276 = arith.constant dense<0.000000e+00> : vector<2x8x16xf32>
    %754 = tpu.matmul %752, %753, %cst_276 {dimension_numbers = #tpu.dot_dimension_numbers<[2], [1], [1], [2], [0, 0, 0, 1, 1, 2], [0], [0]>} : vector<2x8x8xbf16>, vector<2x8x16xbf16>, vector<2x8x16xf32> -> vector<2x8x16xf32>
    "tpu.trace_stop"() : () -> ()
    %755 = vector.shape_cast %754 : vector<2x8x16xf32> to vector<16x16xf32>
    %756 = vector.extract_strided_slice %701 {offsets = [0, 32], sizes = [16, 16], strides = [1, 1]} : vector<16x192xf32> to vector<16x16xf32>
    %757 = vector.shape_cast %756 : vector<16x16xf32> to vector<2x8x16xf32>
    %758 = vector.extract_strided_slice %701 {offsets = [0, 96], sizes = [16, 16], strides = [1, 1]} : vector<16x192xf32> to vector<16x16xf32>
    %759 = vector.shape_cast %758 : vector<16x16xf32> to vector<2x8x16xf32>
    %760 = vector.extract_strided_slice %701 {offsets = [0, 160], sizes = [16, 16], strides = [1, 1]} : vector<16x192xf32> to vector<16x16xf32>
    %761 = vector.shape_cast %760 : vector<16x16xf32> to vector<2x8x16xf32>
    %762 = arith.truncf %757 : vector<2x8x16xf32> to vector<2x8x16xbf16>
    %763 = arith.truncf %759 : vector<2x8x16xf32> to vector<2x8x16xbf16>
    "tpu.trace_start"() <{level = 10 : i32, message = "bqd,bkd->bqk"}> : () -> ()
    %cst_277 = arith.constant dense<0.000000e+00> : vector<2x8x8xf32>
    %764 = tpu.matmul %762, %763, %cst_277 {dimension_numbers = #tpu.dot_dimension_numbers<[2], [2], [1], [1], [0, 0, 0, 1, 1, 1], [0], [0]>} : vector<2x8x16xbf16>, vector<2x8x16xbf16>, vector<2x8x8xf32> -> vector<2x8x8xf32>
    "tpu.trace_stop"() : () -> ()
    %cst_278 = arith.constant 2.500000e-01 : f32
    %765 = vector.broadcast %cst_278 : f32 to vector<2x8x8xf32>
    %766 = arith.mulf %764, %765 : vector<2x8x8xf32>
    %767 = vector.broadcast %455 : vector<1x1x8xf32> to vector<2x8x8xf32>
    %768 = arith.addf %766, %767 : vector<2x8x8xf32>
    %cst_279 = arith.constant dense<0xFF800000> : vector<2x8xf32>
    %769 = vector.multi_reduction <maximumf>, %768, %cst_279 [2] : vector<2x8x8xf32> to vector<2x8xf32>
    %770 = vector.shape_cast %769 : vector<2x8xf32> to vector<2x8x1xf32>
    %771 = vector.broadcast %770 : vector<2x8x1xf32> to vector<2x8x8xf32>
    %772 = arith.subf %768, %771 : vector<2x8x8xf32>
    %773 = math.exp %772 : vector<2x8x8xf32>
    %cst_280 = arith.constant dense<0.000000e+00> : vector<2x8xf32>
    %774 = vector.multi_reduction <add>, %773, %cst_280 [2] : vector<2x8x8xf32> to vector<2x8xf32>
    %775 = vector.shape_cast %774 : vector<2x8xf32> to vector<2x8x1xf32>
    %776 = tpu.reciprocal %775 {approx = true} : vector<2x8x1xf32> -> vector<2x8x1xf32>
    %777 = vector.broadcast %776 : vector<2x8x1xf32> to vector<2x8x8xf32>
    %778 = arith.mulf %773, %777 : vector<2x8x8xf32>
    %779 = arith.truncf %778 : vector<2x8x8xf32> to vector<2x8x8xbf16>
    %780 = arith.truncf %761 : vector<2x8x16xf32> to vector<2x8x16xbf16>
    "tpu.trace_start"() <{level = 10 : i32, message = "bqk,bkd->bqd"}> : () -> ()
    %cst_281 = arith.constant dense<0.000000e+00> : vector<2x8x16xf32>
    %781 = tpu.matmul %779, %780, %cst_281 {dimension_numbers = #tpu.dot_dimension_numbers<[2], [1], [1], [2], [0, 0, 0, 1, 1, 2], [0], [0]>} : vector<2x8x8xbf16>, vector<2x8x16xbf16>, vector<2x8x16xf32> -> vector<2x8x16xf32>
    "tpu.trace_stop"() : () -> ()
    %782 = vector.shape_cast %781 : vector<2x8x16xf32> to vector<16x16xf32>
    %783 = vector.extract_strided_slice %701 {offsets = [0, 48], sizes = [16, 16], strides = [1, 1]} : vector<16x192xf32> to vector<16x16xf32>
    %784 = vector.shape_cast %783 : vector<16x16xf32> to vector<2x8x16xf32>
    %785 = vector.extract_strided_slice %701 {offsets = [0, 112], sizes = [16, 16], strides = [1, 1]} : vector<16x192xf32> to vector<16x16xf32>
    %786 = vector.shape_cast %785 : vector<16x16xf32> to vector<2x8x16xf32>
    %787 = vector.extract_strided_slice %701 {offsets = [0, 176], sizes = [16, 16], strides = [1, 1]} : vector<16x192xf32> to vector<16x16xf32>
    %788 = vector.shape_cast %787 : vector<16x16xf32> to vector<2x8x16xf32>
    %789 = arith.truncf %784 : vector<2x8x16xf32> to vector<2x8x16xbf16>
    %790 = arith.truncf %786 : vector<2x8x16xf32> to vector<2x8x16xbf16>
    "tpu.trace_start"() <{level = 10 : i32, message = "bqd,bkd->bqk"}> : () -> ()
    %cst_282 = arith.constant dense<0.000000e+00> : vector<2x8x8xf32>
    %791 = tpu.matmul %789, %790, %cst_282 {dimension_numbers = #tpu.dot_dimension_numbers<[2], [2], [1], [1], [0, 0, 0, 1, 1, 1], [0], [0]>} : vector<2x8x16xbf16>, vector<2x8x16xbf16>, vector<2x8x8xf32> -> vector<2x8x8xf32>
    "tpu.trace_stop"() : () -> ()
    %cst_283 = arith.constant 2.500000e-01 : f32
    %792 = vector.broadcast %cst_283 : f32 to vector<2x8x8xf32>
    %793 = arith.mulf %791, %792 : vector<2x8x8xf32>
    %794 = vector.broadcast %455 : vector<1x1x8xf32> to vector<2x8x8xf32>
    %795 = arith.addf %793, %794 : vector<2x8x8xf32>
    %cst_284 = arith.constant dense<0xFF800000> : vector<2x8xf32>
    %796 = vector.multi_reduction <maximumf>, %795, %cst_284 [2] : vector<2x8x8xf32> to vector<2x8xf32>
    %797 = vector.shape_cast %796 : vector<2x8xf32> to vector<2x8x1xf32>
    %798 = vector.broadcast %797 : vector<2x8x1xf32> to vector<2x8x8xf32>
    %799 = arith.subf %795, %798 : vector<2x8x8xf32>
    %800 = math.exp %799 : vector<2x8x8xf32>
    %cst_285 = arith.constant dense<0.000000e+00> : vector<2x8xf32>
    %801 = vector.multi_reduction <add>, %800, %cst_285 [2] : vector<2x8x8xf32> to vector<2x8xf32>
    %802 = vector.shape_cast %801 : vector<2x8xf32> to vector<2x8x1xf32>
    %803 = tpu.reciprocal %802 {approx = true} : vector<2x8x1xf32> -> vector<2x8x1xf32>
    %804 = vector.broadcast %803 : vector<2x8x1xf32> to vector<2x8x8xf32>
    %805 = arith.mulf %800, %804 : vector<2x8x8xf32>
    %806 = arith.truncf %805 : vector<2x8x8xf32> to vector<2x8x8xbf16>
    %807 = arith.truncf %788 : vector<2x8x16xf32> to vector<2x8x16xbf16>
    "tpu.trace_start"() <{level = 10 : i32, message = "bqk,bkd->bqd"}> : () -> ()
    %cst_286 = arith.constant dense<0.000000e+00> : vector<2x8x16xf32>
    %808 = tpu.matmul %806, %807, %cst_286 {dimension_numbers = #tpu.dot_dimension_numbers<[2], [1], [1], [2], [0, 0, 0, 1, 1, 2], [0], [0]>} : vector<2x8x8xbf16>, vector<2x8x16xbf16>, vector<2x8x16xf32> -> vector<2x8x16xf32>
    "tpu.trace_stop"() : () -> ()
    %809 = vector.shape_cast %808 : vector<2x8x16xf32> to vector<16x16xf32>
    %810 = tpu.concatenate %728, %755, %782, %809 in 1 : vector<16x16xf32>, vector<16x16xf32>, vector<16x16xf32>, vector<16x16xf32> -> vector<16x64xf32>
    %811 = arith.truncf %810 : vector<16x64xf32> to vector<16x64xbf16>
    %cst_287 = arith.constant dense<0.000000e+00> : vector<16x64xf32>
    %812 = tpu.matmul %811, %695, %cst_287 {dimension_numbers = #tpu.dot_dimension_numbers<[1], [0], [0], [1], [0, 0, 1, 1], [], []>} : vector<16x64xbf16>, vector<64x64xbf16>, vector<16x64xf32> -> vector<16x64xf32>
    %813 = vector.broadcast %697 : vector<1x64xf32> to vector<16x64xf32>
    %814 = arith.addf %812, %813 : vector<16x64xf32>
    %815 = arith.addf %663, %814 : vector<16x64xf32>
    %c1_288 = arith.constant 1 : index
    %c0_289 = arith.constant 0 : index
    %c0_290 = arith.constant 0 : index
    %816 = vector.load %arg31[%c1_288, %c0_289, %c0_290] : memref<2x1x64xf32, #tpu.memory_space<vmem>>, vector<1x1x64xf32>
    %817 = vector.shape_cast %816 : vector<1x1x64xf32> to vector<1x64xf32>
    %c1_291 = arith.constant 1 : index
    %c0_292 = arith.constant 0 : index
    %c0_293 = arith.constant 0 : index
    %818 = vector.load %arg32[%c1_291, %c0_292, %c0_293] : memref<2x1x64xf32, #tpu.memory_space<vmem>>, vector<1x1x64xf32>
    %819 = vector.shape_cast %818 : vector<1x1x64xf32> to vector<1x64xf32>
    %cst_294 = arith.constant dense<0.000000e+00> : vector<16xf32>
    %820 = vector.multi_reduction <add>, %815, %cst_294 [1] : vector<16x64xf32> to vector<16xf32>
    %821 = vector.shape_cast %820 : vector<16xf32> to vector<16x1xf32>
    %cst_295 = arith.constant 6.400000e+01 : f32
    %822 = vector.broadcast %cst_295 : f32 to vector<16x1xf32>
    %823 = arith.divf %821, %822 : vector<16x1xf32>
    %824 = vector.broadcast %823 : vector<16x1xf32> to vector<16x64xf32>
    %825 = arith.subf %815, %824 : vector<16x64xf32>
    %826 = arith.mulf %825, %825 : vector<16x64xf32>
    %cst_296 = arith.constant dense<0.000000e+00> : vector<16xf32>
    %827 = vector.multi_reduction <add>, %826, %cst_296 [1] : vector<16x64xf32> to vector<16xf32>
    %828 = vector.shape_cast %827 : vector<16xf32> to vector<16x1xf32>
    %cst_297 = arith.constant 6.400000e+01 : f32
    %829 = vector.broadcast %cst_297 : f32 to vector<16x1xf32>
    %830 = arith.divf %828, %829 : vector<16x1xf32>
    %831 = vector.broadcast %823 : vector<16x1xf32> to vector<16x64xf32>
    %832 = arith.subf %815, %831 : vector<16x64xf32>
    %cst_298 = arith.constant 9.99999996E-13 : f32
    %833 = vector.broadcast %cst_298 : f32 to vector<16x1xf32>
    %834 = arith.addf %830, %833 : vector<16x1xf32>
    %835 = math.rsqrt %834 : vector<16x1xf32>
    %836 = vector.broadcast %835 : vector<16x1xf32> to vector<16x64xf32>
    %837 = arith.mulf %832, %836 : vector<16x64xf32>
    %838 = vector.broadcast %817 : vector<1x64xf32> to vector<16x64xf32>
    %839 = arith.mulf %837, %838 : vector<16x64xf32>
    %840 = vector.broadcast %819 : vector<1x64xf32> to vector<16x64xf32>
    %841 = arith.addf %839, %840 : vector<16x64xf32>
    %c1_299 = arith.constant 1 : index
    %c0_300 = arith.constant 0 : index
    %c0_301 = arith.constant 0 : index
    %842 = vector.load %arg27[%c1_299, %c0_300, %c0_301] : memref<2x64x256xbf16, #tpu.memory_space<vmem>>, vector<1x64x256xbf16>
    %843 = vector.shape_cast %842 : vector<1x64x256xbf16> to vector<64x256xbf16>
    %844 = arith.truncf %841 : vector<16x64xf32> to vector<16x64xbf16>
    %cst_302 = arith.constant dense<0.000000e+00> : vector<16x256xf32>
    %845 = tpu.matmul %844, %843, %cst_302 {dimension_numbers = #tpu.dot_dimension_numbers<[1], [0], [0], [1], [0, 0, 1, 1], [], []>} : vector<16x64xbf16>, vector<64x256xbf16>, vector<16x256xf32> -> vector<16x256xf32>
    %c1_303 = arith.constant 1 : index
    %c0_304 = arith.constant 0 : index
    %c0_305 = arith.constant 0 : index
    %846 = vector.load %arg28[%c1_303, %c0_304, %c0_305] : memref<2x1x256xf32, #tpu.memory_space<vmem>>, vector<1x1x256xf32>
    %847 = vector.shape_cast %846 : vector<1x1x256xf32> to vector<1x256xf32>
    %848 = vector.broadcast %847 : vector<1x256xf32> to vector<16x256xf32>
    %849 = arith.addf %845, %848 : vector<16x256xf32>
    %850 = arith.mulf %849, %849 : vector<16x256xf32>
    %851 = arith.mulf %849, %850 : vector<16x256xf32>
    %cst_306 = arith.constant 4.471500e-02 : f32
    %852 = vector.broadcast %cst_306 : f32 to vector<16x256xf32>
    %853 = arith.mulf %852, %851 : vector<16x256xf32>
    %854 = arith.addf %849, %853 : vector<16x256xf32>
    %cst_307 = arith.constant 0.797884583 : f32
    %855 = vector.broadcast %cst_307 : f32 to vector<16x256xf32>
    %856 = arith.mulf %855, %854 : vector<16x256xf32>
    %857 = math.tanh %856 : vector<16x256xf32>
    %cst_308 = arith.constant 1.000000e+00 : f32
    %858 = vector.broadcast %cst_308 : f32 to vector<16x256xf32>
    %859 = arith.addf %858, %857 : vector<16x256xf32>
    %cst_309 = arith.constant 5.000000e-01 : f32
    %860 = vector.broadcast %cst_309 : f32 to vector<16x256xf32>
    %861 = arith.mulf %860, %859 : vector<16x256xf32>
    %862 = arith.mulf %849, %861 : vector<16x256xf32>
    %c1_310 = arith.constant 1 : index
    %c0_311 = arith.constant 0 : index
    %c0_312 = arith.constant 0 : index
    %863 = vector.load %arg29[%c1_310, %c0_311, %c0_312] : memref<2x256x64xbf16, #tpu.memory_space<vmem>>, vector<1x256x64xbf16>
    %864 = vector.shape_cast %863 : vector<1x256x64xbf16> to vector<256x64xbf16>
    %865 = arith.truncf %862 : vector<16x256xf32> to vector<16x256xbf16>
    %cst_313 = arith.constant dense<0.000000e+00> : vector<16x64xf32>
    %866 = tpu.matmul %865, %864, %cst_313 {dimension_numbers = #tpu.dot_dimension_numbers<[1], [0], [0], [1], [0, 0, 1, 1], [], []>} : vector<16x256xbf16>, vector<256x64xbf16>, vector<16x64xf32> -> vector<16x64xf32>
    %c1_314 = arith.constant 1 : index
    %c0_315 = arith.constant 0 : index
    %c0_316 = arith.constant 0 : index
    %867 = vector.load %arg30[%c1_314, %c0_315, %c0_316] : memref<2x1x64xf32, #tpu.memory_space<vmem>>, vector<1x1x64xf32>
    %868 = vector.shape_cast %867 : vector<1x1x64xf32> to vector<1x64xf32>
    %869 = vector.broadcast %868 : vector<1x64xf32> to vector<16x64xf32>
    %870 = arith.addf %866, %869 : vector<16x64xf32>
    %871 = arith.addf %815, %870 : vector<16x64xf32>
    %c0_317 = arith.constant 0 : index
    %c0_318 = arith.constant 0 : index
    %872 = vector.load %arg33[%c0_317, %c0_318] : memref<1x64xf32, #tpu.memory_space<vmem>>, vector<1x64xf32>
    %c0_319 = arith.constant 0 : index
    %c0_320 = arith.constant 0 : index
    %873 = vector.load %arg34[%c0_319, %c0_320] : memref<1x64xf32, #tpu.memory_space<vmem>>, vector<1x64xf32>
    %cst_321 = arith.constant dense<0.000000e+00> : vector<16xf32>
    %874 = vector.multi_reduction <add>, %871, %cst_321 [1] : vector<16x64xf32> to vector<16xf32>
    %875 = vector.shape_cast %874 : vector<16xf32> to vector<16x1xf32>
    %cst_322 = arith.constant 6.400000e+01 : f32
    %876 = vector.broadcast %cst_322 : f32 to vector<16x1xf32>
    %877 = arith.divf %875, %876 : vector<16x1xf32>
    %878 = vector.broadcast %877 : vector<16x1xf32> to vector<16x64xf32>
    %879 = arith.subf %871, %878 : vector<16x64xf32>
    %880 = arith.mulf %879, %879 : vector<16x64xf32>
    %cst_323 = arith.constant dense<0.000000e+00> : vector<16xf32>
    %881 = vector.multi_reduction <add>, %880, %cst_323 [1] : vector<16x64xf32> to vector<16xf32>
    %882 = vector.shape_cast %881 : vector<16xf32> to vector<16x1xf32>
    %cst_324 = arith.constant 6.400000e+01 : f32
    %883 = vector.broadcast %cst_324 : f32 to vector<16x1xf32>
    %884 = arith.divf %882, %883 : vector<16x1xf32>
    %885 = vector.broadcast %877 : vector<16x1xf32> to vector<16x64xf32>
    %886 = arith.subf %871, %885 : vector<16x64xf32>
    %cst_325 = arith.constant 9.99999996E-13 : f32
    %887 = vector.broadcast %cst_325 : f32 to vector<16x1xf32>
    %888 = arith.addf %884, %887 : vector<16x1xf32>
    %889 = math.rsqrt %888 : vector<16x1xf32>
    %890 = vector.broadcast %889 : vector<16x1xf32> to vector<16x64xf32>
    %891 = arith.mulf %886, %890 : vector<16x64xf32>
    %892 = vector.broadcast %872 : vector<1x64xf32> to vector<16x64xf32>
    %893 = arith.mulf %891, %892 : vector<16x64xf32>
    %894 = vector.broadcast %873 : vector<1x64xf32> to vector<16x64xf32>
    %895 = arith.addf %893, %894 : vector<16x64xf32>
    %896 = vector.shape_cast %895 : vector<16x64xf32> to vector<2x8x64xf32>
    %897 = vector.extract_strided_slice %896 {offsets = [0, 0, 0], sizes = [2, 1, 64], strides = [1, 1, 1]} : vector<2x8x64xf32> to vector<2x1x64xf32>
    %898 = vector.shape_cast %897 : vector<2x1x64xf32> to vector<2x64xf32>
    %899 = tpu.concatenate %444, %898 in 1 : vector<2x64xf32>, vector<2x64xf32> -> vector<2x128xf32>
    %c0_326 = arith.constant 0 : index
    %c0_327 = arith.constant 0 : index
    %900 = vector.load %arg35[%c0_326, %c0_327] : memref<128x128xbf16, #tpu.memory_space<vmem>>, vector<128x128xbf16>
    %901 = arith.truncf %899 : vector<2x128xf32> to vector<2x128xbf16>
    %cst_328 = arith.constant dense<0.000000e+00> : vector<2x128xf32>
    %902 = tpu.matmul %901, %900, %cst_328 {dimension_numbers = #tpu.dot_dimension_numbers<[1], [0], [0], [1], [0, 0, 1, 1], [], []>} : vector<2x128xbf16>, vector<128x128xbf16>, vector<2x128xf32> -> vector<2x128xf32>
    %c0_329 = arith.constant 0 : index
    %c0_330 = arith.constant 0 : index
    %903 = vector.load %arg36[%c0_329, %c0_330] : memref<1x128xf32, #tpu.memory_space<vmem>>, vector<1x128xf32>
    %904 = vector.broadcast %903 : vector<1x128xf32> to vector<2x128xf32>
    %905 = arith.addf %902, %904 : vector<2x128xf32>
    %cst_331 = arith.constant 0.000000e+00 : f32
    %906 = vector.broadcast %cst_331 : f32 to vector<2x128xf32>
    %907 = arith.maximumf %905, %906 : vector<2x128xf32>
    %c0_332 = arith.constant 0 : index
    %c0_333 = arith.constant 0 : index
    %908 = vector.load %arg37[%c0_332, %c0_333] : memref<128x128xbf16, #tpu.memory_space<vmem>>, vector<128x128xbf16>
    %909 = arith.truncf %907 : vector<2x128xf32> to vector<2x128xbf16>
    %cst_334 = arith.constant dense<0.000000e+00> : vector<2x128xf32>
    %910 = tpu.matmul %909, %908, %cst_334 {dimension_numbers = #tpu.dot_dimension_numbers<[1], [0], [0], [1], [0, 0, 1, 1], [], []>} : vector<2x128xbf16>, vector<128x128xbf16>, vector<2x128xf32> -> vector<2x128xf32>
    %c0_335 = arith.constant 0 : index
    %c0_336 = arith.constant 0 : index
    %911 = vector.load %arg38[%c0_335, %c0_336] : memref<1x128xf32, #tpu.memory_space<vmem>>, vector<1x128xf32>
    %912 = vector.broadcast %911 : vector<1x128xf32> to vector<2x128xf32>
    %913 = arith.addf %910, %912 : vector<2x128xf32>
    %c0_337 = arith.constant 0 : index
    %c0_338 = arith.constant 0 : index
    %914 = vector.load %arg39[%c0_337, %c0_338] : memref<2x128xf32, #tpu.memory_space<vmem>>, vector<2x128xf32>
    tpu.vector_store %arg39[%c0_337, %c0_338], %913 {strides = array<i32>} : memref<2x128xf32, #tpu.memory_space<vmem>>, vector<2x128xf32>,
    return
  }
  func.func @transform_0(%arg0: i32) -> (i32, i32) {
    %c0_i32 = arith.constant 0 : i32
    %c0_i32_0 = arith.constant 0 : i32
    %c0_i32_1 = arith.constant 0 : i32
    return %c0_i32, %c0_i32_0 : i32, i32
  }
  func.func @transform_1(%arg0: i32) -> (i32, i32, i32) {
    %c0_i32 = arith.constant 0 : i32
    %c0_i32_0 = arith.constant 0 : i32
    %c0_i32_1 = arith.constant 0 : i32
    %c0_i32_2 = arith.constant 0 : i32
    return %c0_i32, %c0_i32_0, %c0_i32_1 : i32, i32, i32
  }
  func.func @transform_2(%arg0: i32) -> (i32, i32) {
    %c0_i32 = arith.constant 0 : i32
    %c0_i32_0 = arith.constant 0 : i32
    %c0_i32_1 = arith.constant 0 : i32
    return %c0_i32, %c0_i32_0 : i32, i32
  }
  func.func @transform_3(%arg0: i32) -> (i32, i32) {
    %c0_i32 = arith.constant 0 : i32
    %c0_i32_0 = arith.constant 0 : i32
    %c0_i32_1 = arith.constant 0 : i32
    return %c0_i32, %c0_i32_0 : i32, i32
  }
  func.func @transform_4(%arg0: i32) -> (i32, i32, i32) {
    %c0_i32 = arith.constant 0 : i32
    %c0_i32_0 = arith.constant 0 : i32
    %c0_i32_1 = arith.constant 0 : i32
    %c0_i32_2 = arith.constant 0 : i32
    return %c0_i32, %c0_i32_0, %c0_i32_1 : i32, i32, i32
  }
  func.func @transform_5(%arg0: i32) -> (i32, i32, i32) {
    %c0_i32 = arith.constant 0 : i32
    %c0_i32_0 = arith.constant 0 : i32
    %c0_i32_1 = arith.constant 0 : i32
    %c0_i32_2 = arith.constant 0 : i32
    return %c0_i32, %c0_i32_0, %c0_i32_1 : i32, i32, i32
  }
  func.func @transform_6(%arg0: i32) -> (i32, i32, i32) {
    %c0_i32 = arith.constant 0 : i32
    %c0_i32_0 = arith.constant 0 : i32
    %c0_i32_1 = arith.constant 0 : i32
    %c0_i32_2 = arith.constant 0 : i32
    return %c0_i32, %c0_i32_0, %c0_i32_1 : i32, i32, i32
  }
  func.func @transform_7(%arg0: i32) -> (i32, i32, i32) {
    %c0_i32 = arith.constant 0 : i32
    %c0_i32_0 = arith.constant 0 : i32
    %c0_i32_1 = arith.constant 0 : i32
    %c0_i32_2 = arith.constant 0 : i32
    return %c0_i32, %c0_i32_0, %c0_i32_1 : i32, i32, i32
  }
  func.func @transform_8(%arg0: i32) -> (i32, i32, i32) {
    %c0_i32 = arith.constant 0 : i32
    %c0_i32_0 = arith.constant 0 : i32
    %c0_i32_1 = arith.constant 0 : i32
    %c0_i32_2 = arith.constant 0 : i32
    return %c0_i32, %c0_i32_0, %c0_i32_1 : i32, i32, i32
  }
  func.func @transform_9(%arg0: i32) -> (i32, i32, i32) {
    %c0_i32 = arith.constant 0 : i32
    %c0_i32_0 = arith.constant 0 : i32
    %c0_i32_1 = arith.constant 0 : i32
    %c0_i32_2 = arith.constant 0 : i32
    return %c0_i32, %c0_i32_0, %c0_i32_1 : i32, i32, i32
  }
  func.func @transform_10(%arg0: i32) -> (i32, i32, i32) {
    %c0_i32 = arith.constant 0 : i32
    %c0_i32_0 = arith.constant 0 : i32
    %c0_i32_1 = arith.constant 0 : i32
    %c0_i32_2 = arith.constant 0 : i32
    return %c0_i32, %c0_i32_0, %c0_i32_1 : i32, i32, i32
  }
  func.func @transform_11(%arg0: i32) -> (i32, i32, i32) {
    %c0_i32 = arith.constant 0 : i32
    %c0_i32_0 = arith.constant 0 : i32
    %c0_i32_1 = arith.constant 0 : i32
    %c0_i32_2 = arith.constant 0 : i32
    return %c0_i32, %c0_i32_0, %c0_i32_1 : i32, i32, i32
  }
  func.func @transform_12(%arg0: i32) -> (i32, i32, i32) {
    %c0_i32 = arith.constant 0 : i32
    %c0_i32_0 = arith.constant 0 : i32
    %c0_i32_1 = arith.constant 0 : i32
    %c0_i32_2 = arith.constant 0 : i32
    return %c0_i32, %c0_i32_0, %c0_i32_1 : i32, i32, i32
  }
  func.func @transform_13(%arg0: i32) -> (i32, i32, i32) {
    %c0_i32 = arith.constant 0 : i32
    %c0_i32_0 = arith.constant 0 : i32
    %c0_i32_1 = arith.constant 0 : i32
    %c0_i32_2 = arith.constant 0 : i32
    return %c0_i32, %c0_i32_0, %c0_i32_1 : i32, i32, i32
  }
  func.func @transform_14(%arg0: i32) -> (i32, i32, i32) {
    %c0_i32 = arith.constant 0 : i32
    %c0_i32_0 = arith.constant 0 : i32
    %c0_i32_1 = arith.constant 0 : i32
    %c0_i32_2 = arith.constant 0 : i32
    return %c0_i32, %c0_i32_0, %c0_i32_1 : i32, i32, i32
  }
  func.func @transform_15(%arg0: i32) -> (i32, i32, i32) {
    %c0_i32 = arith.constant 0 : i32
    %c0_i32_0 = arith.constant 0 : i32
    %c0_i32_1 = arith.constant 0 : i32
    %c0_i32_2 = arith.constant 0 : i32
    return %c0_i32, %c0_i32_0, %c0_i32_1 : i32, i32, i32
  }
  func.func @transform_16(%arg0: i32) -> (i32, i32) {
    %c0_i32 = arith.constant 0 : i32
    %c0_i32_0 = arith.constant 0 : i32
    %c0_i32_1 = arith.constant 0 : i32
    return %c0_i32, %c0_i32_0 : i32, i32
  }
  func.func @transform_17(%arg0: i32) -> (i32, i32) {
    %c0_i32 = arith.constant 0 : i32
    %c0_i32_0 = arith.constant 0 : i32
    %c0_i32_1 = arith.constant 0 : i32
    return %c0_i32, %c0_i32_0 : i32, i32
  }
  func.func @transform_18(%arg0: i32) -> (i32, i32) {
    %c0_i32 = arith.constant 0 : i32
    %c0_i32_0 = arith.constant 0 : i32
    %c0_i32_1 = arith.constant 0 : i32
    return %c0_i32, %c0_i32_0 : i32, i32
  }
  func.func @transform_19(%arg0: i32) -> (i32, i32, i32) {
    %c0_i32 = arith.constant 0 : i32
    %c0_i32_0 = arith.constant 0 : i32
    %c0_i32_1 = arith.constant 0 : i32
    %c0_i32_2 = arith.constant 0 : i32
    return %c0_i32, %c0_i32_0, %c0_i32_1 : i32, i32, i32
  }
  func.func @transform_20(%arg0: i32) -> (i32, i32, i32) {
    %c0_i32 = arith.constant 0 : i32
    %c0_i32_0 = arith.constant 0 : i32
    %c0_i32_1 = arith.constant 0 : i32
    %c0_i32_2 = arith.constant 0 : i32
    return %c0_i32, %c0_i32_0, %c0_i32_1 : i32, i32, i32
  }
  func.func @transform_21(%arg0: i32) -> (i32, i32, i32) {
    %c0_i32 = arith.constant 0 : i32
    %c0_i32_0 = arith.constant 0 : i32
    %c0_i32_1 = arith.constant 0 : i32
    %c0_i32_2 = arith.constant 0 : i32
    return %c0_i32, %c0_i32_0, %c0_i32_1 : i32, i32, i32
  }
  func.func @transform_22(%arg0: i32) -> (i32, i32, i32) {
    %c0_i32 = arith.constant 0 : i32
    %c0_i32_0 = arith.constant 0 : i32
    %c0_i32_1 = arith.constant 0 : i32
    %c0_i32_2 = arith.constant 0 : i32
    return %c0_i32, %c0_i32_0, %c0_i32_1 : i32, i32, i32
  }
  func.func @transform_23(%arg0: i32) -> (i32, i32, i32) {
    %c0_i32 = arith.constant 0 : i32
    %c0_i32_0 = arith.constant 0 : i32
    %c0_i32_1 = arith.constant 0 : i32
    %c0_i32_2 = arith.constant 0 : i32
    return %c0_i32, %c0_i32_0, %c0_i32_1 : i32, i32, i32
  }
  func.func @transform_24(%arg0: i32) -> (i32, i32, i32) {
    %c0_i32 = arith.constant 0 : i32
    %c0_i32_0 = arith.constant 0 : i32
    %c0_i32_1 = arith.constant 0 : i32
    %c0_i32_2 = arith.constant 0 : i32
    return %c0_i32, %c0_i32_0, %c0_i32_1 : i32, i32, i32
  }
  func.func @transform_25(%arg0: i32) -> (i32, i32, i32) {
    %c0_i32 = arith.constant 0 : i32
    %c0_i32_0 = arith.constant 0 : i32
    %c0_i32_1 = arith.constant 0 : i32
    %c0_i32_2 = arith.constant 0 : i32
    return %c0_i32, %c0_i32_0, %c0_i32_1 : i32, i32, i32
  }
  func.func @transform_26(%arg0: i32) -> (i32, i32, i32) {
    %c0_i32 = arith.constant 0 : i32
    %c0_i32_0 = arith.constant 0 : i32
    %c0_i32_1 = arith.constant 0 : i32
    %c0_i32_2 = arith.constant 0 : i32
    return %c0_i32, %c0_i32_0, %c0_i32_1 : i32, i32, i32
  }
  func.func @transform_27(%arg0: i32) -> (i32, i32, i32) {
    %c0_i32 = arith.constant 0 : i32
    %c0_i32_0 = arith.constant 0 : i32
    %c0_i32_1 = arith.constant 0 : i32
    %c0_i32_2 = arith.constant 0 : i32
    return %c0_i32, %c0_i32_0, %c0_i32_1 : i32, i32, i32
  }
  func.func @transform_28(%arg0: i32) -> (i32, i32, i32) {
    %c0_i32 = arith.constant 0 : i32
    %c0_i32_0 = arith.constant 0 : i32
    %c0_i32_1 = arith.constant 0 : i32
    %c0_i32_2 = arith.constant 0 : i32
    return %c0_i32, %c0_i32_0, %c0_i32_1 : i32, i32, i32
  }
  func.func @transform_29(%arg0: i32) -> (i32, i32, i32) {
    %c0_i32 = arith.constant 0 : i32
    %c0_i32_0 = arith.constant 0 : i32
    %c0_i32_1 = arith.constant 0 : i32
    %c0_i32_2 = arith.constant 0 : i32
    return %c0_i32, %c0_i32_0, %c0_i32_1 : i32, i32, i32
  }
  func.func @transform_30(%arg0: i32) -> (i32, i32, i32) {
    %c0_i32 = arith.constant 0 : i32
    %c0_i32_0 = arith.constant 0 : i32
    %c0_i32_1 = arith.constant 0 : i32
    %c0_i32_2 = arith.constant 0 : i32
    return %c0_i32, %c0_i32_0, %c0_i32_1 : i32, i32, i32
  }
  func.func @transform_31(%arg0: i32) -> (i32, i32, i32) {
    %c0_i32 = arith.constant 0 : i32
    %c0_i32_0 = arith.constant 0 : i32
    %c0_i32_1 = arith.constant 0 : i32
    %c0_i32_2 = arith.constant 0 : i32
    return %c0_i32, %c0_i32_0, %c0_i32_1 : i32, i32, i32
  }
  func.func @transform_32(%arg0: i32) -> (i32, i32) {
    %c0_i32 = arith.constant 0 : i32
    %c0_i32_0 = arith.constant 0 : i32
    %c0_i32_1 = arith.constant 0 : i32
    return %c0_i32, %c0_i32_0 : i32, i32
  }
  func.func @transform_33(%arg0: i32) -> (i32, i32) {
    %c0_i32 = arith.constant 0 : i32
    %c0_i32_0 = arith.constant 0 : i32
    %c0_i32_1 = arith.constant 0 : i32
    return %c0_i32, %c0_i32_0 : i32, i32
  }
  func.func @transform_34(%arg0: i32) -> (i32, i32) {
    %c0_i32 = arith.constant 0 : i32
    %c0_i32_0 = arith.constant 0 : i32
    %c0_i32_1 = arith.constant 0 : i32
    return %c0_i32, %c0_i32_0 : i32, i32
  }
  func.func @transform_35(%arg0: i32) -> (i32, i32) {
    %c0_i32 = arith.constant 0 : i32
    %c0_i32_0 = arith.constant 0 : i32
    %c0_i32_1 = arith.constant 0 : i32
    return %c0_i32, %c0_i32_0 : i32, i32
  }
  func.func @transform_36(%arg0: i32) -> (i32, i32) {
    %c0_i32 = arith.constant 0 : i32
    %c0_i32_0 = arith.constant 0 : i32
    %c0_i32_1 = arith.constant 0 : i32
    return %c0_i32, %c0_i32_0 : i32, i32
  }
  func.func @transform_37(%arg0: i32) -> (i32, i32) {
    %c0_i32 = arith.constant 0 : i32
    %c0_i32_0 = arith.constant 0 : i32
    %c0_i32_1 = arith.constant 0 : i32
    return %c0_i32, %c0_i32_0 : i32, i32
  }
  func.func @transform_38(%arg0: i32) -> (i32, i32) {
    %c0_i32 = arith.constant 0 : i32
    %c0_i32_0 = arith.constant 0 : i32
    %c0_i32_1 = arith.constant 0 : i32
    return %c0_i32, %c0_i32_0 : i32, i32
  }
}

</mosaic_0001>

<bundles_post_ra>
// kernel: multimodal_forward.1
= control target key start
LH: loop header
LB: loop body
LE: loop exit
PB: predicated region body
PF: predicated region fallthrough
CT: control target
= control target key end

     0   :  { %vm163_vm0 = vcmask 523264   ;;  %s8501_s6 = smov 4   ;;  %v8502_v15 = vmov 0   ;;  %s8503_s10 = smov 2   ;;  %v8505_v40 = vmov 0.0   ;;  %v229_v41 = vlaneseq  ;;  %s9906_s0 = inlined_call_operand.smem [shape: u32[39], index: -1, kind: input, shape index: {}] }
   0x1   :  { %s1_s5 = sld [smem:[%s9906_s0]]   ;;  %314 = vmatprep.mubr.bf16.mxu1 %v8502_v15  ;;  %s8504_s14 = smov 3   ;;  %7528 = vmatprep.subr.bf16.mxu0 %v8505_v40  ;;  %vm8507_vm1 = vmmov 0   ;;  %vm472_vm2 = vcmask 1043456   ;;  %vm330_vm3 = vcmask 130048   ;;  %vm442_vm4 = vcmask 64512  }
   0x2   :  { %s8562_s9 = sld [smem:[%s9906_s0 + %s8501_s6]]   ;;  %s8506_s18 = smov 5   ;;  %v230_v42 = vshrl.u32 %v229_v41, 7  ;;  %7530 = vmatprep.mubr.msk.bf16.mxu0 %vm8507_vm1, %v8505_v40  ;;  %vm1262_vm5 = vcmask 261120   ;;  %vm1265_vm6 = vcmask 392192   ;;  %vm6573_vm7 = vcmask 1041409  }
   0x3   :  { %s6815_s13 = sld [smem:[%s9906_s0 + %s8503_s10]]   ;;  %s8508_s22 = smov 64  }
   0x4   :  { %s6816_s17 = sld [smem:[%s9906_s0 + %s8504_s14]]   ;;  %v8593_v43 = vsub.s32 0, %v230_v42  ;;  %v8596_v45 = vsub.s32 1, %v230_v42  ;;  %s8509_s23 = smov 1  }
   0x5   :  { %s8591_s21 = sld [smem:[%s9906_s0 + %s8506_s18]]   ;;  %s8510_s27 = smov 48  }
   0x6   :  { %s8637_s26 = sld [smem:[%s9906_s0 + %s8509_s23]]   ;;  %s8511_s28 = smov 112  }
   0x7   :  { %v159_v0 = vld [vmem:[%s1_s5] sm:$0xff]  ;;  %v160_v1 = vld [vmem:[%s1_s5 + $0x8] sm:$0xff]  ;;  %s8512_s29 = smov 32   ;;  %s8513_s30 = smov 96  }
   0x8   :  { %v164_v2 = vsel %vm163_vm0, %v159_v0, 0.0  ;;  %v167_v3 = vsel %vm163_vm0, %v160_v1, 0.0  ;;  %v8094_v14 = vld [vmem:[%s8562_s9 + $0x4] ss:$8 sps:$4 sm:$0xff]   ;;  %v8096_v16 = vld [vmem:[%s8562_s9] ss:$8 sps:$4 sm:$0xff]  }
   0x9   :  { %165 = vadd.xlane.f32.xlu0 %v164_v2  ;;  %282 = vmatprep.subr.bf16.mxu1 %v8094_v14  ;;  %v8097_v17 = vld [vmem:[%s8562_s9 + $0x14] ss:$8 sps:$4 sm:$0xff]   ;;  %v8099_v18 = vld [vmem:[%s8562_s9 + $0x10] ss:$8 sps:$4 sm:$0xff]   ;;  %v8100_v19 = vld [vmem:[%s8562_s9 + $0x24] ss:$8 sps:$4 sm:$0xff]  }
   0xa   :  { %283 = vmatpush1.bf16.msra.mxu1 %v8096_v16  ;;  %v8102_v20 = vld [vmem:[%s8562_s9 + $0x20] ss:$8 sps:$4 sm:$0xff]   ;;  %v8103_v21 = vld [vmem:[%s8562_s9 + $0x34] ss:$8 sps:$4 sm:$0xff]   ;;  %v8105_v22 = vld [vmem:[%s8562_s9 + $0x30] ss:$8 sps:$4 sm:$0xff]  }
   0xb   :  { %284 = vmatprep.subr.bf16.mxu1 %v8097_v17  ;;  %v6852_v31 = vld [vmem:[%s6815_s13] ss:$0 sm:$0xff]  ;;  %s8514_s1 = smov 16   ;;  %s8515_s2 = smov 80  }
   0xc   :  { %v6853_v35 = vld [vmem:[%s6816_s17] ss:$0 sm:$0xff]  ;;  %s8516_s3 = smov 6   ;;  %s8517_s7 = smov 7  }
   0xd   :  { %168 = vadd.xlane.f32.xlu0 %v167_v3  ;;  %v217_v44 = vld [vmem:[%s8591_s21] sm:$0x3]  ;;  %s8787_s6 = sld [smem:[%s9906_s0 + %s8516_s3]]   ;;  %s8518_s12 = smov 10  }
   0xe   :  { %285 = vmatpush1.bf16.msra.mxu1 %v8099_v18  ;;  %v232_v46 = vrot.slane %v217_v44, %v8593_v43  ;;  %v236_v47 = vrot.slane %v217_v44, %v8596_v45  ;;  %v8640_v3 = vld [vmem:[%s8637_s26] ss:$0 sm:$0xff]  ;;  %s8809_s11 = sld [smem:[%s9906_s0 + %s8517_s7]]   ;;  %s8519_s16 = smov 8  }
   0xf   :  { %286 = vmatprep.subr.bf16.mxu1 %v8100_v19  ;;  %s8821_s15 = sld [smem:[%s9906_s0 + %s8518_s12]]   ;;  %s8520_s20 = smov 9  }
  0x10   :  { %s8834_s19 = sld [smem:[%s9906_s0 + %s8519_s16]]   ;;  %s8521_s3 = smov 12  }
  0x11   :  { %s8839_s25 = sld [smem:[%s9906_s0 + %s8520_s20]]   ;;  %s8522_s8 = smov 11  }
  0x12   :  { %287 = vmatpush1.bf16.msra.mxu1 %v8102_v20  ;;  %s8854_s7 = sld [smem:[%s9906_s0 + %s8521_s3]]   ;;  %s8523_s14 = smov 13  }
  0x13   :  { %288 = vmatprep.subr.bf16.mxu1 %v8103_v21  ;;  %s8876_s13 = sld [smem:[%s9906_s0 + %s8522_s8]]   ;;  %s8524_s20 = smov 14  }
  0x14   :  { %s8886_s18 = sld [smem:[%s9906_s0 + %s8523_s14]]   ;;  %s8529_s23 = smov 24  }
  0x15   :  { %s8907_s3 = sld [smem:[%s9906_s0 + %s8524_s20]]   ;;  %s8530_s5 = smov 25  }
  0x16   :  { %289 = vmatpush1.bf16.msra.mxu1 %v8105_v22  ;;  %s9145_s14 = sld [smem:[%s9906_s0 + %s8514_s1]]   ;;  %s8534_s24 = smov 23  }
  0x17   :  { %7516 = vmatprep.subr.bf16.mxu1 %v8505_v40  ;;  %s9243_s4 = sld [smem:[%s9906_s0 + %s8529_s23]]   ;;  %s8537_s16 = smov 31  }
  0x18   :  { %s8540_s17 = smov 29  }
  0x96   :  { %v166_v4 = vpop.xlane.xlu0 %165 }
  0x97   :  { %v171_v5 = vmul.f32 0.015625, %v166_v4 }
  0x99   :  { %v173_v6 = vsub.f32 %v159_v0, %v171_v5 }
  0x9a   :  { %v169_v7 = vpop.xlane.xlu0 %168 }
  0x9b   :  { %v172_v8 = vmul.f32 0.015625, %v169_v7  ;;  %v175_v9 = vmul.f32 %v173_v6, %v173_v6 }
  0x9d   :  { %v174_v10 = vsub.f32 %v160_v1, %v172_v8  ;;  %v177_v11 = vsel %vm163_vm0, %v175_v9, 0.0 }
  0x9e   :  { %178 = vadd.xlane.f32.xlu1 %v177_v11  ;;  %v8645_v11 = vld [vmem:[%s8637_s26 + $0x1] ss:$0 sm:$0xff] }
  0x9f   :  { %v176_v12 = vmul.f32 %v174_v10, %v174_v10 }
  0xa1   :  { %v180_v13 = vsel %vm163_vm0, %v176_v12, 0.0 }
  0xa2   :  { %181 = vadd.xlane.f32.xlu1 %v180_v13 }
 0x12b   :  { %v179_v23 = vpop.xlane.xlu1 %178 }
 0x12c   :  { %v183_v24 = vmul.f32 0.015625, %v179_v23 }
 0x12e   :  { %v185_v25 = vadd.f32 1e-12, %v183_v24 }
 0x12f   :  { %v182_v26 = vpop.xlane.xlu1 %181 }
 0x130   :  { %8298 = vrsqrt.f32 %v185_v25  ;;  %v184_v27 = vmul.f32 0.015625, %v182_v26 }
 0x132   :  { %v186_v28 = vadd.f32 1e-12, %v184_v27 }
 0x134   :  { %8300 = vrsqrt.f32 %v186_v28 }
 0x13a   :  { %v8299_v29 = vpop.eup %8298 }
 0x13b   :  { %v189_v30 = vmul.f32 %v8299_v29, %v173_v6 }
 0x13d   :  { %v197_v34 = vmul.f32 %v6852_v31, %v189_v30 }
 0x13e   :  { %v8301_v32 = vpop.eup %8300 }
 0x13f   :  { %v190_v33 = vmul.f32 %v8301_v32, %v174_v10  ;;  %v8579_v37 = vadd.f32 %v6853_v35, %v197_v34 }
 0x141   :  { %v198_v36 = vmul.f32 %v6852_v31, %v190_v33 }
 0x143   :  { %v8581_v38 = vadd.f32 %v6853_v35, %v198_v36 }
 0x145   :  { %v227_v39 = vpack.c.bf16 %v8581_v38, %v8579_v37 }
 0x147   :  { %6862 = vmatmul.mubr.msk.bf16.vlgmr.msra.gmra.mrb[0].mxu1 %vm163_vm0, %v227_v39 }
 0x148   :  { %7518 = vmatprep.mubr.msk.bf16.mxu1 %vm8507_vm1, %v8505_v40 }
 0x21a   :  { %v316_v48 = vpop.f32.mrb[0].mxu1 }
 0x21b   :  { %v317_v49 = vadd.f32 %v316_v48, %v232_v46  ;;  %v318_v50 = vpop.f32.mrb[1].mxu1 }
 0x21c   :  { %v319_v51 = vadd.f32 %v318_v50, %v236_v47  ;;  %v320_v52 = vpop.f32.mrb[2].mxu1 }
 0x21d   :  { %v8604_v53 = vpack.c.bf16 %v317_v49, %v317_v49  ;;  %v321_v54 = vadd.f32 %v320_v52, %v232_v46  ;;  %v322_v55 = vpop.f32.mrb[3].mxu1 }
 0x21e   :  { %v8606_v56 = vpack.c.bf16 %v319_v51, %v319_v51  ;;  %v323_v57 = vadd.f32 %v322_v55, %v236_v47 }
 0x21f   :  { %v8608_v58 = vpack.c.bf16 %v321_v54, %v321_v54  ;;  %328 = vrot.lane.b32.xlu0 %v8604_v53, %s8508_s22 }
 0x220   :  { %v474_v59 = vsel %vm472_vm2, %v8606_v56, 0  ;;  %v8625_v0 = vpack.c.bf16 %v323_v57, %v323_v57 }
 0x221   :  { %378 = vrot.lane.b32.xlu1 %v8608_v58, %s8508_s22  ;;  %7529 = vmatpush3.bf16.msra.mxu0 %v474_v59 }
 0x222   :  { %7540 = vmatprep.subr.bf16.mxu0 %v8505_v40  ;;  %v520_v1 = vsel %vm472_vm2, %v8625_v0, 0 }
 0x291   :  { %v329_v60 = vpop.permute.xlu0 %328 }
 0x292   :  { %v335_v61 = vsel %vm330_vm3, %v329_v60, 0 }
 0x293   :  { %7517 = vmatpush3.bf16.xpose.msra.mxu1 %v335_v61  ;;  %v379_v62 = vpop.permute.xlu1 %378 }
 0x294   :  { %7522 = vmatprep.subr.bf16.mxu1 %v8505_v40  ;;  %v384_v63 = vsel %vm330_vm3, %v379_v62, 0 }
 0x29a   :  { %7519 = vmatmul.mubr.msk.bf16.vlgmr.msra.gmra.mrb[4].mxu1 %vm330_vm3, %v8604_v53 }
 0x29b   :  { %7523 = vmatpush3.bf16.xpose.msra.mxu1 %v384_v63  ;;  %7524 = vmatprep.mubr.msk.bf16.mxu1 %vm8507_vm1, %v8505_v40 }
 0x29c   :  { %7534 = vmatprep.subr.bf16.mxu1 %v8505_v40 }
 0x2a2   :  { %7525 = vmatmul.mubr.msk.bf16.vlgmr.msra.gmra.mrb[8].mxu1 %vm330_vm3, %v8608_v58 }
 0x2a3   :  { %7535 = vmatpush3.bf16.msra.mxu1 %v520_v1  ;;  %7536 = vmatprep.mubr.msk.bf16.mxu1 %vm8507_vm1, %v8505_v40 }
 0x2a4   :  { %7546 = vmatprep.subr.bf16.mxu1 %v8505_v40 }
 0x36d   :  { %v371_v2 = vpop.f32.mrb[4].mxu1 }
 0x36e   :  { %v426_v4 = vmul.f32 0.25, %v371_v2  ;;  %v7520_v5 = vpop.f32.mrb[5].mxu1 }
 0x36f   :  { %v374_v6 = vpop.f32.mrb[6].mxu1 }
 0x370   :  { %v7521_v7 = vpop.f32.mrb[7].mxu1  ;;  %v440_v8 = vadd.f32 %v8640_v3, %v426_v4 }
 0x372   :  { %v443_v9 = vsel %vm442_vm4, %v440_v8, -inf }
 0x373   :  { %444 = vmax.xlane.f32.xlu1 %v443_v9 }
 0x375   :  { %v420_v10 = vpop.f32.mrb[8].mxu1 }
 0x376   :  { %v427_v12 = vmul.f32 0.25, %v420_v10  ;;  %v7526_v13 = vpop.f32.mrb[9].mxu1 }
 0x377   :  { %v423_v14 = vpop.f32.mrb[10].mxu1 }
 0x378   :  { %v7527_v16 = vpop.f32.mrb[11].mxu1  ;;  %v441_v17 = vadd.f32 %v8645_v11, %v427_v12 }
 0x37a   :  { %v446_v18 = vsel %vm442_vm4, %v441_v17, -inf }
 0x37b   :  { %447 = vmax.xlane.f32.xlu0 %v446_v18 }
 0x384   :  { %614 = vrot.lane.b32.xlu1 %v8608_v58, %s8510_s27 }
 0x400   :  { %v445_v19 = vpop.xlane.xlu1 %444 }
 0x401   :  { %v449_v20 = vsub.f32 %v440_v8, %v445_v19 }
 0x403   :  { %v451_v21 = vmul.f32 1.442695, %v449_v20 }
 0x404   :  { %v615_v30 = vpop.permute.xlu1 %614 }
 0x405   :  { %8302 = vpow2.f32 %v451_v21  ;;  %v620_v46 = vsel %vm330_vm3, %v615_v30, 0 }
 0x408   :  { %v448_v22 = vpop.xlane.xlu0 %447 }
 0x409   :  { %v450_v23 = vsub.f32 %v441_v17, %v448_v22 }
 0x40b   :  { %v453_v24 = vmul.f32 1.442695, %v450_v23 }
 0x40d   :  { %8304 = vpow2.f32 %v453_v24 }
 0x40f   :  { %v8303_v25 = vpop.eup %8302 }
 0x410   :  { %v455_v26 = vsel %vm442_vm4, %v8303_v25, 0.0 }
 0x411   :  { %456 = vadd.xlane.f32.xlu0 %v455_v26 }
 0x417   :  { %v8305_v27 = vpop.eup %8304 }
 0x418   :  { %v458_v28 = vsel %vm442_vm4, %v8305_v27, 0.0 }
 0x419   :  { %459 = vadd.xlane.f32.xlu1 %v458_v28 }
 0x427   :  { %564 = vrot.lane.b32.xlu0 %v8604_v53, %s8510_s27 }
 0x42a   :  { %562 = vrot.lane.b32.xlu1 %v8604_v53, %s8511_s28 }
 0x42e   :  { %612 = vrot.lane.b32.xlu1 %v8608_v58, %s8511_s28 }
 0x49e   :  { %v457_v29 = vpop.xlane.xlu0 %456 }
 0x49f   :  { %8306 = vrcp.f32 %v457_v29 }
 0x4a2   :  { %v565_v34 = vpop.permute.xlu0 %564 }
 0x4a3   :  { %v570_v36 = vsel %vm330_vm3, %v565_v34, 0 }
 0x4a6   :  { %v460_v31 = vpop.xlane.xlu1 %459 }
 0x4a7   :  { %8308 = vrcp.f32 %v460_v31 }
 0x4a9   :  { %v8307_v32 = vpop.eup %8306 }
 0x4aa   :  { %v463_v33 = vmul.f32 %v8307_v32, %v8303_v25  ;;  %v563_v44 = vpop.permute.xlu1 %562 }
 0x4ac   :  { %v465_v35 = vpack.c.bf16 %v463_v33, %v463_v33 }
 0x4ae   :  { %7531 = vmatmul.mubr.msk.bf16.vlgmr.msra.gmra.mrb[0].mxu0 %vm442_vm4, %v465_v35  ;;  %v613_v47 = vpop.permute.xlu1 %612 }
 0x4af   :  { %7541 = vmatpush3.bf16.xpose.msra.mxu0 %v570_v36  ;;  %7542 = vmatprep.mubr.msk.bf16.mxu0 %vm8507_vm1, %v8505_v40 }
 0x4b0   :  { %7552 = vmatprep.subr.bf16.mxu0 %v8505_v40 }
 0x4b1   :  { %v8309_v39 = vpop.eup %8308 }
 0x4b2   :  { %v464_v41 = vmul.f32 %v8309_v39, %v8305_v27 }
 0x4b4   :  { %v466_v42 = vpack.c.bf16 %v464_v41, %v464_v41 }
 0x4b6   :  { %7537 = vmatmul.mubr.msk.bf16.vlgmr.msra.gmra.mrb[12].mxu1 %vm442_vm4, %v466_v42  ;;  %7543 = vmatmul.mubr.msk.bf16.vlgmr.msra.gmra.mrb[4].mxu0 %vm330_vm3, %v563_v44 }
 0x4b7   :  { %7547 = vmatpush3.bf16.xpose.msra.mxu1 %v620_v46  ;;  %7548 = vmatprep.mubr.msk.bf16.mxu1 %vm8507_vm1, %v8505_v40 }
 0x4b8   :  { %7558 = vmatprep.subr.bf16.mxu1 %v8505_v40  ;;  %7554 = vmatprep.mubr.msk.bf16.mxu0 %vm8507_vm1, %v8505_v40 }
 0x4be   :  { %7549 = vmatmul.mubr.msk.bf16.vlgmr.msra.gmra.mrb[16].mxu1 %vm330_vm3, %v613_v47 }
 0x4bf   :  { %7560 = vmatprep.mubr.msk.bf16.mxu1 %vm8507_vm1, %v8505_v40 }
 0x581   :  { %v8675_v48 = vpop.f32.mrb[0].mxu0 }
 0x582   :  { %v7532_v49 = vpop.f32.mrb[1].mxu0 }
 0x583   :  { %v513_v50 = vpop.f32.mrb[2].mxu0 }
 0x584   :  { %v7533_v51 = vpop.f32.mrb[3].mxu0 }
 0x589   :  { %v8677_v52 = vpop.f32.mrb[12].mxu1  ;;  %v606_v54 = vpop.f32.mrb[4].mxu0 }
 0x58a   :  { %v662_v55 = vmul.f32 0.25, %v606_v54  ;;  %v7538_v57 = vpop.f32.mrb[13].mxu1  ;;  %v7544_v59 = vpop.f32.mrb[5].mxu0 }
 0x58b   :  { %v559_v60 = vpop.f32.mrb[14].mxu1  ;;  %v609_v61 = vpop.f32.mrb[6].mxu0 }
 0x58c   :  { %v7539_v62 = vpop.f32.mrb[15].mxu1  ;;  %v7545_v63 = vpop.f32.mrb[7].mxu0  ;;  %v664_v1 = vadd.f32 %v8640_v3, %v662_v55 }
 0x58e   :  { %v666_v2 = vsel %vm442_vm4, %v664_v1, -inf }
 0x58f   :  { %667 = vmax.xlane.f32.xlu0 %v666_v2 }
 0x591   :  { %v656_v4 = vpop.f32.mrb[16].mxu1 }
 0x592   :  { %v663_v5 = vmul.f32 0.25, %v656_v4  ;;  %v7550_v6 = vpop.f32.mrb[17].mxu1 }
 0x593   :  { %v659_v7 = vpop.f32.mrb[18].mxu1 }
 0x594   :  { %v7551_v8 = vpop.f32.mrb[19].mxu1  ;;  %v665_v9 = vadd.f32 %v8645_v11, %v663_v5 }
 0x596   :  { %v669_v10 = vsel %vm442_vm4, %v665_v9, -inf }
 0x597   :  { %670 = vmax.xlane.f32.xlu1 %v669_v10 }
 0x5a8   :  { %740 = vrot.lane.b32.xlu1 %v8625_v0, %s8511_s28 }
 0x5ac   :  { %790 = vrot.lane.b32.xlu1 %v8604_v53, %s8512_s29 }
 0x5b0   :  { %840 = vrot.lane.b32.xlu1 %v8608_v58, %s8512_s29 }
 0x5b4   :  { %838 = vrot.lane.b32.xlu1 %v8608_v58, %s8513_s30 }
 0x61c   :  { %v668_v12 = vpop.xlane.xlu0 %667 }
 0x61d   :  { %v672_v13 = vsub.f32 %v664_v1, %v668_v12 }
 0x61f   :  { %v674_v14 = vmul.f32 1.442695, %v672_v13 }
 0x621   :  { %8310 = vpow2.f32 %v674_v14 }
 0x624   :  { %v671_v16 = vpop.xlane.xlu1 %670 }
 0x625   :  { %v673_v17 = vsub.f32 %v665_v9, %v671_v16 }
 0x627   :  { %v676_v18 = vmul.f32 1.442695, %v673_v17 }
 0x628   :  { %v741_v19 = vpop.permute.xlu1 %740 }
 0x629   :  { %8312 = vpow2.f32 %v676_v18  ;;  %v746_v20 = vsel %vm472_vm2, %v741_v19, 0 }
 0x62a   :  { %7559 = vmatpush3.bf16.msra.mxu1 %v746_v20 }
 0x62b   :  { %v8311_v21 = vpop.eup %8310  ;;  %7570 = vmatprep.subr.bf16.mxu1 %v8505_v40 }
 0x62c   :  { %v678_v22 = vsel %vm442_vm4, %v8311_v21, 0.0  ;;  %v791_v32 = vpop.permute.xlu1 %790 }
 0x62d   :  { %679 = vadd.xlane.f32.xlu0 %v678_v22  ;;  %v796_v36 = vsel %vm330_vm3, %v791_v32, 0 }
 0x630   :  { %v841_v35 = vpop.permute.xlu1 %840 }
 0x631   :  { %v846_v41 = vsel %vm330_vm3, %v841_v35, 0 }
 0x633   :  { %v8313_v23 = vpop.eup %8312 }
 0x634   :  { %v681_v24 = vsel %vm442_vm4, %v8313_v23, 0.0  ;;  %v839_v44 = vpop.permute.xlu1 %838 }
 0x635   :  { %682 = vadd.xlane.f32.xlu0 %v681_v24 }
 0x64b   :  { %691 = vrot.lane.b32.xlu0 %v8606_v56, %s8511_s28 }
 0x64f   :  { %788 = vrot.lane.b32.xlu0 %v8604_v53, %s8513_s30 }
 0x6ba   :  { %v680_v25 = vpop.xlane.xlu0 %679 }
 0x6bb   :  { %8314 = vrcp.f32 %v680_v25 }
 0x6c2   :  { %v683_v26 = vpop.xlane.xlu0 %682 }
 0x6c3   :  { %8316 = vrcp.f32 %v683_v26 }
 0x6c5   :  { %v8315_v27 = vpop.eup %8314 }
 0x6c6   :  { %v692_v28 = vpop.permute.xlu0 %691  ;;  %v686_v29 = vmul.f32 %v8315_v27, %v8311_v21 }
 0x6c7   :  { %v697_v30 = vsel %vm472_vm2, %v692_v28, 0 }
 0x6c8   :  { %7553 = vmatpush3.bf16.msra.mxu0 %v697_v30  ;;  %v688_v31 = vpack.c.bf16 %v686_v29, %v686_v29 }
 0x6c9   :  { %7564 = vmatprep.subr.bf16.mxu0 %v8505_v40 }
 0x6ca   :  { %v789_v42 = vpop.permute.xlu0 %788 }
 0x6cb   :  { %7555 = vmatmul.mubr.msk.bf16.vlgmr.msra.gmra.mrb[8].mxu0 %vm442_vm4, %v688_v31 }
 0x6cc   :  { %7566 = vmatprep.mubr.msk.bf16.mxu0 %vm8507_vm1, %v8505_v40 }
 0x6cd   :  { %v8317_v33 = vpop.eup %8316 }
 0x6ce   :  { %v687_v34 = vmul.f32 %v8317_v33, %v8313_v23 }
 0x6d0   :  { %v689_v39 = vpack.c.bf16 %v687_v34, %v687_v34 }
 0x6d1   :  { %7565 = vmatpush3.bf16.xpose.msra.mxu0 %v796_v36 }
 0x6d2   :  { %7561 = vmatmul.mubr.msk.bf16.vlgmr.msra.gmra.mrb[20].mxu1 %vm442_vm4, %v689_v39  ;;  %7576 = vmatprep.subr.bf16.mxu0 %v8505_v40 }
 0x6d3   :  { %7571 = vmatpush3.bf16.xpose.msra.mxu1 %v846_v41  ;;  %7572 = vmatprep.mubr.msk.bf16.mxu1 %vm8507_vm1, %v8505_v40 }
 0x6d4   :  { %7582 = vmatprep.subr.bf16.mxu1 %v8505_v40 }
 0x6d8   :  { %7567 = vmatmul.mubr.msk.bf16.vlgmr.msra.gmra.mrb[12].mxu0 %vm330_vm3, %v789_v42 }
 0x6d9   :  { %7578 = vmatprep.mubr.msk.bf16.mxu0 %vm8507_vm1, %v8505_v40 }
 0x6da   :  { %7573 = vmatmul.mubr.msk.bf16.vlgmr.msra.gmra.mrb[24].mxu1 %vm330_vm3, %v839_v44 }
 0x6db   :  { %7584 = vmatprep.mubr.msk.bf16.mxu1 %vm8507_vm1, %v8505_v40 }
 0x79e   :  { %v8717_v46 = vpop.f32.mrb[8].mxu0 }
 0x79f   :  { %v7556_v47 = vpop.f32.mrb[9].mxu0 }
 0x7a0   :  { %v736_v49 = vpop.f32.mrb[10].mxu0 }
 0x7a1   :  { %v7557_v50 = vpop.f32.mrb[11].mxu0 }
 0x7a5   :  { %v8719_v51 = vpop.f32.mrb[20].mxu1 }
 0x7a6   :  { %v8034_v54 = vpack.i.bf16 %v8719_v51, %v8717_v46  ;;  %v7562_v55 = vpop.f32.mrb[21].mxu1 }
 0x7a7   :  { %v785_v57 = vpop.f32.mrb[22].mxu1 }
 0x7a8   :  { %v7563_v59 = vpop.f32.mrb[23].mxu1 }
 0x7ab   :  { %v832_v60 = vpop.f32.mrb[12].mxu0 }
 0x7ac   :  { %v888_v61 = vmul.f32 0.25, %v832_v60  ;;  %v7568_v62 = vpop.f32.mrb[13].mxu0 }
 0x7ad   :  { %v835_v63 = vpop.f32.mrb[14].mxu0  ;;  %v882_v1 = vpop.f32.mrb[24].mxu1 }
 0x7ae   :  { %v889_v2 = vmul.f32 0.25, %v882_v1  ;;  %v7569_v4 = vpop.f32.mrb[15].mxu0  ;;  %v7574_v5 = vpop.f32.mrb[25].mxu1  ;;  %v890_v6 = vadd.f32 %v8640_v3, %v888_v61 }
 0x7af   :  { %v885_v7 = vpop.f32.mrb[26].mxu1 }
 0x7b0   :  { %v7575_v8 = vpop.f32.mrb[27].mxu1  ;;  %v892_v9 = vsel %vm442_vm4, %v890_v6, -inf  ;;  %v891_v10 = vadd.f32 %v8645_v11, %v889_v2 }
 0x7b1   :  { %893 = vmax.xlane.f32.xlu0 %v892_v9 }
 0x7b2   :  { %v895_v12 = vsel %vm442_vm4, %v891_v10, -inf }
 0x7b3   :  { %896 = vmax.xlane.f32.xlu1 %v895_v12 }
 0x7c4   :  { %964 = vrot.lane.b32.xlu1 %v8625_v0, %s8513_s30 }
 0x7c8   :  { %1014 = vrot.lane.b32.xlu1 %v8604_v53, %s8514_s1 }
 0x7cc   :  { %1064 = vrot.lane.b32.xlu1 %v8608_v58, %s8514_s1 }
 0x7d0   :  { %1062 = vrot.lane.b32.xlu1 %v8608_v58, %s8515_s2 }
 0x83e   :  { %v894_v13 = vpop.xlane.xlu0 %893 }
 0x83f   :  { %v898_v14 = vsub.f32 %v890_v6, %v894_v13 }
 0x840   :  { %v897_v16 = vpop.xlane.xlu1 %896 }
 0x841   :  { %v900_v17 = vmul.f32 1.442695, %v898_v14  ;;  %v899_v18 = vsub.f32 %v891_v10, %v897_v16 }
 0x843   :  { %8318 = vpow2.f32 %v900_v17  ;;  %v902_v19 = vmul.f32 1.442695, %v899_v18 }
 0x844   :  { %v965_v20 = vpop.permute.xlu1 %964 }
 0x845   :  { %8320 = vpow2.f32 %v902_v19  ;;  %v970_v21 = vsel %vm472_vm2, %v965_v20, 0 }
 0x846   :  { %7583 = vmatpush3.bf16.msra.mxu1 %v970_v21 }
 0x847   :  { %7594 = vmatprep.subr.bf16.mxu1 %v8505_v40 }
 0x848   :  { %v1015_v30 = vpop.permute.xlu1 %1014 }
 0x84c   :  { %v1065_v35 = vpop.permute.xlu1 %1064 }
 0x84d   :  { %v8319_v22 = vpop.eup %8318  ;;  %v1070_v39 = vsel %vm330_vm3, %v1065_v35, 0 }
 0x84e   :  { %v904_v23 = vsel %vm442_vm4, %v8319_v22, 0.0 }
 0x84f   :  { %v8321_v24 = vpop.eup %8320  ;;  %905 = vadd.xlane.f32.xlu0 %v904_v23 }
 0x850   :  { %v907_v58 = vsel %vm442_vm4, %v8321_v24, 0.0  ;;  %v1063_v42 = vpop.permute.xlu1 %1062 }
 0x853   :  { %908 = vadd.xlane.f32.xlu0 %v907_v58 }
 0x869   :  { %916 = vrot.lane.b32.xlu0 %v8606_v56, %s8513_s30 }
 0x86d   :  { %1012 = vrot.lane.b32.xlu0 %v8604_v53, %s8515_s2  ;;  %v1020_v53 = vsel %vm330_vm3, %v1015_v30, 0  ;;  %v8106_v30 = vld [vmem:[%s8787_s6] sm:$0xff]  }
 0x8dc   :  { %v906_v25 = vpop.xlane.xlu0 %905 }
 0x8dd   :  { %8322 = vrcp.f32 %v906_v25 }
 0x8e0   :  { %v909_v26 = vpop.xlane.xlu0 %908 }
 0x8e1   :  { %8324 = vrcp.f32 %v909_v26 }
 0x8e4   :  { %v917_v27 = vpop.permute.xlu0 %916 }
 0x8e5   :  { %v922_v28 = vsel %vm472_vm2, %v917_v27, 0 }
 0x8e6   :  { %7577 = vmatpush3.bf16.msra.mxu0 %v922_v28 }
 0x8e7   :  { %v8323_v29 = vpop.eup %8322  ;;  %7588 = vmatprep.subr.bf16.mxu0 %v8505_v40 }
 0x8e8   :  { %v912_v31 = vmul.f32 %v8323_v29, %v8319_v22  ;;  %v1013_v41 = vpop.permute.xlu0 %1012 }
 0x8ea   :  { %v914_v32 = vpack.c.bf16 %v912_v31, %v912_v31  ;;  %v8107_v31 = vld [vmem:[%s8787_s6 + $0x8] sm:$0xff]  }
 0x8eb   :  { %v8325_v33 = vpop.eup %8324 }
 0x8ec   :  { %7579 = vmatmul.mubr.msk.bf16.vlgmr.msra.gmra.mrb[16].mxu0 %vm442_vm4, %v914_v32  ;;  %v913_v34 = vmul.f32 %v8325_v33, %v8321_v24  ;;  %v8108_v32 = vld [vmem:[%s8787_s6 + $0x10] sm:$0xff]   ;;  %v8109_v33 = vld [vmem:[%s8787_s6 + $0x18] sm:$0xff]  }
 0x8ed   :  { %7590 = vmatprep.mubr.msk.bf16.mxu0 %vm8507_vm1, %v8505_v40 }
 0x8ee   :  { %v915_v36 = vpack.c.bf16 %v913_v34, %v913_v34 }
 0x8ef   :  { %7589 = vmatpush3.bf16.xpose.msra.mxu0 %v1020_v53 }
 0x8f0   :  { %7585 = vmatmul.mubr.msk.bf16.vlgmr.msra.gmra.mrb[28].mxu1 %vm442_vm4, %v915_v36  ;;  %7600 = vmatprep.subr.bf16.mxu0 %v8505_v40 }
 0x8f1   :  { %7595 = vmatpush3.bf16.xpose.msra.mxu1 %v1070_v39  ;;  %7596 = vmatprep.mubr.msk.bf16.mxu1 %vm8507_vm1, %v8505_v40 }
 0x8f2   :  { %7606 = vmatprep.subr.bf16.mxu1 %v8505_v40 }
 0x8f6   :  { %7591 = vmatmul.mubr.msk.bf16.vlgmr.msra.gmra.mrb[20].mxu0 %vm330_vm3, %v1013_v41 }
 0x8f7   :  { %7602 = vmatprep.mubr.msk.bf16.mxu0 %vm8507_vm1, %v8505_v40 }
 0x8f8   :  { %7597 = vmatmul.mubr.msk.bf16.vlgmr.msra.gmra.mrb[32].mxu1 %vm330_vm3, %v1063_v42 }
 0x8f9   :  { %7608 = vmatprep.mubr.msk.bf16.mxu1 %vm8507_vm1, %v8505_v40 }
 0x9bf   :  { %v958_v44 = vpop.f32.mrb[16].mxu0 }
 0x9c0   :  { %v7580_v47 = vpop.f32.mrb[17].mxu0 }
 0x9c1   :  { %v961_v49 = vpop.f32.mrb[18].mxu0 }
 0x9c2   :  { %v7581_v50 = vpop.f32.mrb[19].mxu0 }
 0x9c3   :  { %v1006_v55 = vpop.f32.mrb[28].mxu1 }
 0x9c4   :  { %v8039_v57 = vpack.i.bf16 %v1006_v55, %v958_v44  ;;  %v7586_v59 = vpop.f32.mrb[29].mxu1 }
 0x9c5   :  { %v1009_v60 = vpop.f32.mrb[30].mxu1 }
 0x9c6   :  { %v7587_v61 = vpop.f32.mrb[31].mxu1 }
 0x9c9   :  { %v1056_v62 = vpop.f32.mrb[20].mxu0 }
 0x9ca   :  { %v1112_v63 = vmul.f32 0.25, %v1056_v62  ;;  %v7592_v1 = vpop.f32.mrb[21].mxu0 }
 0x9cb   :  { %v1059_v2 = vpop.f32.mrb[22].mxu0  ;;  %v1106_v4 = vpop.f32.mrb[32].mxu1 }
 0x9cc   :  { %v1113_v5 = vmul.f32 0.25, %v1106_v4  ;;  %v7593_v6 = vpop.f32.mrb[23].mxu0  ;;  %v7598_v7 = vpop.f32.mrb[33].mxu1  ;;  %v1114_v8 = vadd.f32 %v8640_v3, %v1112_v63 }
 0x9cd   :  { %v1109_v9 = vpop.f32.mrb[34].mxu1 }
 0x9ce   :  { %v7599_v10 = vpop.f32.mrb[35].mxu1  ;;  %v1116_v12 = vsel %vm442_vm4, %v1114_v8, -inf  ;;  %v1115_v13 = vadd.f32 %v8645_v11, %v1113_v5 }
 0x9cf   :  { %1117 = vmax.xlane.f32.xlu0 %v1116_v12 }
 0x9d0   :  { %v1119_v14 = vsel %vm442_vm4, %v1115_v13, -inf }
 0x9d1   :  { %1120 = vmax.xlane.f32.xlu1 %v1119_v14 }
 0x9e2   :  { %1188 = vrot.lane.b32.xlu1 %v8625_v0, %s8515_s2 }
 0x9e6   :  { %8035 = vrot.lane.b32.xlu1 %v8034_v54, %s8514_s1 }
 0x9ea   :  { %8040 = vrot.lane.b32.xlu1 %v8039_v57, %s8512_s29 }
 0xa5c   :  { %v1118_v3 = vpop.xlane.xlu0 %1117 }
 0xa5d   :  { %v1122_v16 = vsub.f32 %v1114_v8, %v1118_v3 }
 0xa5e   :  { %v1121_v17 = vpop.xlane.xlu1 %1120 }
 0xa5f   :  { %v1124_v18 = vmul.f32 1.442695, %v1122_v16  ;;  %v1123_v19 = vsub.f32 %v1115_v13, %v1121_v17 }
 0xa61   :  { %8326 = vpow2.f32 %v1124_v18  ;;  %v1126_v11 = vmul.f32 1.442695, %v1123_v19 }
 0xa62   :  { %v1189_v20 = vpop.permute.xlu1 %1188 }
 0xa63   :  { %8328 = vpow2.f32 %v1126_v11  ;;  %v1194_v21 = vsel %vm472_vm2, %v1189_v20, 0 }
 0xa64   :  { %7607 = vmatpush3.bf16.msra.mxu1 %v1194_v21 }
 0xa66   :  { %v8036_v49 = vpop.permute.xlu1 %8035 }
 0xa67   :  { %v8038_v55 = vunpack.i.h.bf16 %v8036_v49  ;;  %v8037_v57 = vunpack.i.l.bf16 %v8036_v49 }
 0xa69   :  { %v1261_v62 = vsel %vm330_vm3, %v8677_v52, %v8038_v55  ;;  %v1260_v63 = vsel %vm330_vm3, %v8675_v48, %v8037_v57  ;;  %v6881_v48 = vld [vmem:[%s8809_s11] ss:$0 sm:$0xff] }
 0xa6a   :  { %v8041_v50 = vpop.permute.xlu1 %8040  ;;  %v8122_v55 = vld [vmem:[%s8854_s7 + $0x40] sm:$0xff]  }
 0xa6b   :  { %v8327_v0 = vpop.eup %8326  ;;  %v8043_v59 = vunpack.i.h.bf16 %v8041_v50  ;;  %v8042_v60 = vunpack.i.l.bf16 %v8041_v50  ;;  %v8123_v57 = vld [vmem:[%s8854_s7] sm:$0xff]  }
 0xa6c   :  { %v1128_v22 = vsel %vm442_vm4, %v8327_v0, 0.0 }
 0xa6d   :  { %v8329_v23 = vpop.eup %8328  ;;  %1129 = vadd.xlane.f32.xlu0 %v1128_v22  ;;  %v1263_v4 = vsel %vm1262_vm5, %v1260_v63, %v8042_v60  ;;  %v1264_v5 = vsel %vm1262_vm5, %v1261_v62, %v8043_v59  ;;  %v8124_v59 = vld [vmem:[%s8854_s7 + $0x48] sm:$0xff]   ;;  %v8127_v62 = vld [vmem:[%s8854_s7 + $0x10] sm:$0xff]   ;;  %v8128_v63 = vld [vmem:[%s8854_s7 + $0x58] sm:$0xff]  }
 0xa6e   :  { %v1131_v46 = vsel %vm442_vm4, %v8329_v23, 0.0  ;;  %v8125_v60 = vld [vmem:[%s8854_s7 + $0x8] sm:$0xff]  }
 0xa71   :  { %1132 = vadd.xlane.f32.xlu0 %v1131_v46 }
 0xa87   :  { %1140 = vrot.lane.b32.xlu0 %v8606_v56, %s8515_s2 }
 0xafa   :  { %v1130_v51 = vpop.xlane.xlu0 %1129 }
 0xafb   :  { %8330 = vrcp.f32 %v1130_v51 }
 0xafe   :  { %v1133_v54 = vpop.xlane.xlu0 %1132 }
 0xaff   :  { %8332 = vrcp.f32 %v1133_v54  ;;  %v8110_v54 = vld [vmem:[%s8821_s15] ss:$8 sps:$4 sm:$0xff]  }
 0xb02   :  { %v1141_v24 = vpop.permute.xlu0 %1140 }
 0xb03   :  { %v1146_v58 = vsel %vm472_vm2, %v1141_v24, 0  ;;  %v8115_v24 = vld [vmem:[%s8821_s15 + $0x14] ss:$8 sps:$4 sm:$0xff]  }
 0xb04   :  { %7601 = vmatpush3.bf16.msra.mxu0 %v1146_v58  ;;  %v8113_v58 = vld [vmem:[%s8821_s15 + $0x10] ss:$8 sps:$4 sm:$0xff]  }
 0xb05   :  { %v8331_v25 = vpop.eup %8330  ;;  %7612 = vmatprep.subr.bf16.mxu0 %v8505_v40 }
 0xb06   :  { %v1136_v26 = vmul.f32 %v8331_v25, %v8327_v0  ;;  %v8118_v25 = vld [vmem:[%s8821_s15 + $0x24] ss:$8 sps:$4 sm:$0xff]  }
 0xb08   :  { %v1138_v27 = vpack.c.bf16 %v1136_v26, %v1136_v26  ;;  %v8116_v26 = vld [vmem:[%s8821_s15 + $0x20] ss:$8 sps:$4 sm:$0xff]  }
 0xb09   :  { %v8333_v28 = vpop.eup %8332 }
 0xb0a   :  { %7603 = vmatmul.mubr.msk.bf16.vlgmr.msra.gmra.mrb[24].mxu0 %vm442_vm4, %v1138_v27  ;;  %v1137_v29 = vmul.f32 %v8333_v28, %v8329_v23  ;;  %v8119_v27 = vld [vmem:[%s8821_s15 + $0x30] ss:$8 sps:$4 sm:$0xff]   ;;  %v8121_v28 = vld [vmem:[%s8821_s15 + $0x34] ss:$8 sps:$4 sm:$0xff]  }
 0xb0b   :  { %7620 = vmatprep.mubr.msk.bf16.mxu0 %vm8507_vm1, %v8505_v40  ;;  %7613 = vmatpush3.bf16.msra.mxu0 %v8106_v30 }
 0xb0c   :  { %v1139_v56 = vpack.c.bf16 %v1137_v29, %v1137_v29  ;;  %7614 = vmatprep.subr.bf16.mxu0 %v8505_v40 }
 0xb0e   :  { %7609 = vmatmul.mubr.msk.bf16.vlgmr.msra.gmra.mrb[36].mxu1 %vm442_vm4, %v1139_v56 }
 0xb0f   :  { %1485 = vmatprep.mubr.bf16.mxu1 %v8502_v15  ;;  %7615 = vmatpush3.bf16.msra.mxu0 %v8107_v31 }
 0xb10   :  { %7616 = vmatprep.subr.bf16.mxu0 %v8505_v40 }
 0xb13   :  { %7617 = vmatpush3.bf16.msra.mxu0 %v8108_v32 }
 0xb14   :  { %7618 = vmatprep.subr.bf16.mxu0 %v8505_v40 }
 0xb17   :  { %7619 = vmatpush3.bf16.msra.mxu0 %v8109_v33 }
 0xb18   :  { %7299 = vmatprep.subr.bf16.mxu0 %v8122_v55 }
 0xbdd   :  { %v1182_v34 = vpop.f32.mrb[24].mxu0 }
 0xbde   :  { %v7604_v35 = vpop.f32.mrb[25].mxu0 }
 0xbdf   :  { %v1185_v53 = vpop.f32.mrb[26].mxu0 }
 0xbe0   :  { %v7605_v36 = vpop.f32.mrb[27].mxu0  ;;  %v6887_v53 = vld [vmem:[%s8834_s19] ss:$0 sm:$0xff] }
 0xbe1   :  { %v1230_v39 = vpop.f32.mrb[36].mxu1 }
 0xbe2   :  { %v8044_v41 = vpack.i.bf16 %v1230_v39, %v1182_v34  ;;  %v7610_v42 = vpop.f32.mrb[37].mxu1 }
 0xbe3   :  { %v1233_v44 = vpop.f32.mrb[38].mxu1  ;;  %v6888_v42 = vld [vmem:[%s8839_s25] ss:$0 sm:$0xff] }
 0xbe4   :  { %8045 = vrot.lane.b32.xlu0 %v8044_v41, %s8510_s27  ;;  %v7611_v47 = vpop.f32.mrb[39].mxu1 }
 0xc56   :  { %v8046_v61 = vpop.permute.xlu0 %8045 }
 0xc57   :  { %v8048_v1 = vunpack.i.h.bf16 %v8046_v61  ;;  %v8047_v2 = vunpack.i.l.bf16 %v8046_v61  ;;  %v8126_v61 = vld [vmem:[%s8854_s7 + $0x50] sm:$0xff]  }
 0xc59   :  { %v1267_v6 = vsel %vm1265_vm6, %v1264_v5, %v8048_v1  ;;  %v1266_v7 = vsel %vm1265_vm6, %v1263_v4, %v8047_v2  ;;  %v8129_v1 = vld [vmem:[%s8854_s7 + $0x18] sm:$0xff]   ;;  %v8130_v2 = vld [vmem:[%s8854_s7 + $0x60] sm:$0xff]   ;;  %v8132_v5 = vld [vmem:[%s8854_s7 + $0x68] sm:$0xff]  }
 0xc5a   :  { %v1268_v8 = vpack.c.bf16 %v1267_v6, %v1266_v7  ;;  %v8131_v4 = vld [vmem:[%s8854_s7 + $0x20] sm:$0xff]   ;;  %v8133_v6 = vld [vmem:[%s8854_s7 + $0x28] sm:$0xff]   ;;  %v8134_v7 = vld [vmem:[%s8854_s7 + $0x70] sm:$0xff]  }
 0xc5c   :  { %7621 = vmatmul.mubr.msk.bf16.vlgmr.msra.gmra.mrb[28].mxu0 %vm163_vm0, %v1268_v8  ;;  %v8135_v8 = vld [vmem:[%s8854_s7 + $0x30] sm:$0xff]  }
 0xc5d   :  { %7300 = vmatpush3.bf16.msra.mxu0 %v8123_v57 }
 0xc5e   :  { %7301 = vmatprep.subr.bf16.mxu0 %v8124_v59 }
 0xc61   :  { %7302 = vmatpush3.bf16.msra.mxu0 %v8125_v60 }
 0xc62   :  { %7303 = vmatprep.subr.bf16.mxu0 %v8126_v61 }
 0xc65   :  { %7304 = vmatpush3.bf16.msra.mxu0 %v8127_v62 }
 0xc66   :  { %7305 = vmatprep.subr.bf16.mxu0 %v8128_v63 }
 0xc69   :  { %7306 = vmatpush3.bf16.msra.mxu0 %v8129_v1 }
 0xc6a   :  { %7307 = vmatprep.subr.bf16.mxu0 %v8130_v2  ;;  %v6898_v2 = vld [vmem:[%s8886_s18] ss:$0 sm:$0xff] }
 0xc6d   :  { %7308 = vmatpush3.bf16.msra.mxu0 %v8131_v4 }
 0xc6e   :  { %7309 = vmatprep.subr.bf16.mxu0 %v8132_v5 }
 0xc71   :  { %7310 = vmatpush3.bf16.msra.mxu0 %v8133_v6 }
 0xc72   :  { %7311 = vmatprep.subr.bf16.mxu0 %v8134_v7 }
 0xc75   :  { %7312 = vmatpush3.bf16.msra.mxu0 %v8135_v8 }
 0xd2f   :  { %v1336_v52 = vpop.f32.mrb[28].mxu0 }
 0xd30   :  { %v1337_v9 = vadd.f32 %v6881_v48, %v1336_v52  ;;  %v7622_v10 = vpop.f32.mrb[29].mxu0  ;;  %v8137_v52 = vld [vmem:[%s8854_s7 + $0x38] sm:$0xff]  }
 0xd31   :  { %v1339_v12 = vpop.f32.mrb[30].mxu0 }
 0xd32   :  { %v1340_v13 = vadd.f32 %v6881_v48, %v1339_v12  ;;  %v7623_v14 = vpop.f32.mrb[31].mxu0  ;;  %v1343_v3 = vadd.f32 %v1337_v9, %v8579_v37  ;;  %v8136_v48 = vld [vmem:[%s8854_s7 + $0x78] sm:$0xff]   ;;  %v1398_v9 = vld [vmem:[%s8876_s13] sm:$0x3] }
 0xd33   :  { %7313 = vmatprep.subr.bf16.mxu0 %v8136_v48  ;;  %v1403_v10 = vrot.slane %v1398_v9, %v8593_v43  ;;  %v1407_v12 = vrot.slane %v1398_v9, %v8596_v45 }
 0xd34   :  { %v1347_v16 = vsel %vm163_vm0, %v1343_v3, 0.0  ;;  %v1344_v17 = vadd.f32 %v1340_v13, %v8581_v38  ;;  %v8112_v38 = vld [vmem:[%s8821_s15 + $0x4] ss:$8 sps:$4 sm:$0xff]   ;;  %7314 = vmatpush3.bf16.msra.mxu0 %v8137_v52 }
 0xd35   :  { %1348 = vadd.xlane.f32.xlu1 %v1347_v16  ;;  %1453 = vmatprep.subr.bf16.mxu1 %v8112_v38 }
 0xd36   :  { %v1350_v18 = vsel %vm163_vm0, %v1344_v17, 0.0  ;;  %1454 = vmatpush1.bf16.msra.mxu1 %v8110_v54  ;;  %7636 = vmatprep.subr.bf16.mxu0 %v8505_v40 }
 0xd37   :  { %1351 = vadd.xlane.f32.xlu0 %v1350_v18  ;;  %1455 = vmatprep.subr.bf16.mxu1 %v8115_v24 }
 0xd3a   :  { %1456 = vmatpush1.bf16.msra.mxu1 %v8113_v58 }
 0xd3b   :  { %1457 = vmatprep.subr.bf16.mxu1 %v8118_v25 }
 0xd3e   :  { %1458 = vmatpush1.bf16.msra.mxu1 %v8116_v26 }
 0xd3f   :  { %1459 = vmatprep.subr.bf16.mxu1 %v8121_v28 }
 0xd42   :  { %1460 = vmatpush1.bf16.msra.mxu1 %v8119_v27 }
 0xdc2   :  { %v1349_v19 = vpop.xlane.xlu1 %1348 }
 0xdc3   :  { %v1353_v11 = vmul.f32 0.015625, %v1349_v19 }
 0xdc4   :  { %v1352_v20 = vpop.xlane.xlu0 %1351 }
 0xdc5   :  { %v1355_v21 = vsub.f32 %v1343_v3, %v1353_v11  ;;  %v1354_v0 = vmul.f32 0.015625, %v1352_v20 }
 0xdc7   :  { %v1356_v22 = vsub.f32 %v1344_v17, %v1354_v0  ;;  %v1357_v23 = vmul.f32 %v1355_v21, %v1355_v21 }
 0xdc9   :  { %v1359_v46 = vsel %vm163_vm0, %v1357_v23, 0.0  ;;  %v1358_v51 = vmul.f32 %v1356_v22, %v1356_v22 }
 0xdca   :  { %1360 = vadd.xlane.f32.xlu0 %v1359_v46 }
 0xdcb   :  { %v1362_v37 = vsel %vm163_vm0, %v1358_v51, 0.0 }
 0xdce   :  { %1363 = vadd.xlane.f32.xlu0 %v1362_v37 }
 0xe57   :  { %v1361_v29 = vpop.xlane.xlu0 %1360 }
 0xe58   :  { %v1365_v56 = vmul.f32 0.015625, %v1361_v29 }
 0xe5a   :  { %v1367_v30 = vadd.f32 1e-12, %v1365_v56 }
 0xe5b   :  { %v1364_v31 = vpop.xlane.xlu0 %1363 }
 0xe5c   :  { %8334 = vrsqrt.f32 %v1367_v30  ;;  %v1366_v32 = vmul.f32 0.015625, %v1364_v31 }
 0xe5e   :  { %v1368_v33 = vadd.f32 1e-12, %v1366_v32 }
 0xe60   :  { %8336 = vrsqrt.f32 %v1368_v33 }
 0xe66   :  { %v8335_v34 = vpop.eup %8334 }
 0xe67   :  { %v1371_v35 = vmul.f32 %v8335_v34, %v1355_v21 }
 0xe69   :  { %v1379_v39 = vmul.f32 %v6887_v53, %v1371_v35 }
 0xe6a   :  { %v8337_v36 = vpop.eup %8336 }
 0xe6b   :  { %v1372_v41 = vmul.f32 %v8337_v36, %v1356_v22  ;;  %v8843_v47 = vadd.f32 %v6888_v42, %v1379_v39 }
 0xe6d   :  { %v1380_v44 = vmul.f32 %v6887_v53, %v1372_v41 }
 0xe6f   :  { %v8845_v49 = vadd.f32 %v6888_v42, %v1380_v44 }
 0xe71   :  { %v1397_v50 = vpack.c.bf16 %v8845_v49, %v8843_v47 }
 0xe73   :  { %6897 = vmatmul.mubr.msk.bf16.vlgmr.msra.gmra.mrb[40].mxu1 %vm163_vm0, %v1397_v50 }
 0xe74   :  { %1865 = vmatprep.mubr.bf16.mxu1 %v8502_v15 }
 0xf46   :  { %v1487_v13 = vpop.f32.mrb[40].mxu1 }
 0xf47   :  { %v1488_v14 = vadd.f32 %v1487_v13, %v1403_v10  ;;  %v1489_v3 = vpop.f32.mrb[41].mxu1 }
 0xf48   :  { %v1490_v16 = vadd.f32 %v1489_v3, %v1407_v12  ;;  %v1491_v17 = vpop.f32.mrb[42].mxu1 }
 0xf49   :  { %v1496_v18 = vmul.f32 %v1488_v14, %v1488_v14  ;;  %v1492_v19 = vadd.f32 %v1491_v17, %v1403_v10  ;;  %v1493_v11 = vpop.f32.mrb[43].mxu1 }
 0xf4a   :  { %v1497_v20 = vmul.f32 %v1490_v16, %v1490_v16  ;;  %v1494_v21 = vadd.f32 %v1493_v11, %v1407_v12 }
 0xf4b   :  { %v1500_v0 = vmul.f32 %v1496_v18, %v1488_v14  ;;  %v1498_v22 = vmul.f32 %v1492_v19, %v1492_v19 }
 0xf4c   :  { %v1501_v23 = vmul.f32 %v1497_v20, %v1490_v16  ;;  %v1499_v46 = vmul.f32 %v1494_v21, %v1494_v21 }
 0xf4d   :  { %v1504_v51 = vmul.f32 0.044715, %v1500_v0  ;;  %v1502_v37 = vmul.f32 %v1498_v22, %v1492_v19  ;;  %v8138_v0 = vld [vmem:[%s8562_s9 + $0x40] ss:$8 sps:$4 sm:$0xff]   ;;  %v8143_v22 = vld [vmem:[%s8562_s9 + $0x54] ss:$8 sps:$4 sm:$0xff]  }
 0xf4e   :  { %v1505_v38 = vmul.f32 0.044715, %v1501_v23  ;;  %v1503_v54 = vmul.f32 %v1499_v46, %v1494_v21  ;;  %v8141_v23 = vld [vmem:[%s8562_s9 + $0x50] ss:$8 sps:$4 sm:$0xff]   ;;  %v8146_v46 = vld [vmem:[%s8562_s9 + $0x64] ss:$8 sps:$4 sm:$0xff]  }
 0xf4f   :  { %v1508_v24 = vadd.f32 %v1504_v51, %v1488_v14  ;;  %v1506_v58 = vmul.f32 0.044715, %v1502_v37  ;;  %v8144_v51 = vld [vmem:[%s8562_s9 + $0x60] ss:$8 sps:$4 sm:$0xff]   ;;  %v8147_v37 = vld [vmem:[%s8562_s9 + $0x70] ss:$8 sps:$4 sm:$0xff]  }
 0xf50   :  { %v1509_v25 = vadd.f32 %v1505_v38, %v1490_v16  ;;  %v1507_v26 = vmul.f32 0.044715, %v1503_v54  ;;  %v8149_v38 = vld [vmem:[%s8562_s9 + $0x74] ss:$8 sps:$4 sm:$0xff]  }
 0xf51   :  { %v1512_v27 = vmul.f32 0.7978846, %v1508_v24  ;;  %v1510_v28 = vadd.f32 %v1506_v58, %v1492_v19 }
 0xf52   :  { %v1513_v29 = vmul.f32 0.7978846, %v1509_v25  ;;  %v1511_v56 = vadd.f32 %v1507_v26, %v1494_v21 }
 0xf53   :  { %8338 = vtanh.f32 %v1512_v27  ;;  %v1514_v30 = vmul.f32 0.7978846, %v1510_v28 }
 0xf54   :  { %8340 = vtanh.f32 %v1513_v29  ;;  %v1515_v31 = vmul.f32 0.7978846, %v1511_v56  ;;  %v6915_v29 = vld [vmem:[%s8907_s3] ss:$0 sm:$0xff] }
 0xf55   :  { %8342 = vtanh.f32 %v1514_v30 }
 0xf56   :  { %8344 = vtanh.f32 %v1515_v31 }
 0xf5d   :  { %v8339_v32 = vpop.eup %8338 }
 0xf5e   :  { %v8341_v33 = vpop.eup %8340  ;;  %v1520_v34 = vadd.f32 1.0, %v8339_v32 }
 0xf5f   :  { %v8343_v35 = vpop.eup %8342  ;;  %v1521_v53 = vadd.f32 1.0, %v8341_v33 }
 0xf60   :  { %v8345_v36 = vpop.eup %8344  ;;  %v1524_v39 = vmul.f32 0.5, %v1520_v34  ;;  %v1522_v41 = vadd.f32 1.0, %v8343_v35 }
 0xf61   :  { %v1523_v42 = vadd.f32 1.0, %v8345_v36  ;;  %v1525_v44 = vmul.f32 0.5, %v1521_v53 }
 0xf62   :  { %v1526_v50 = vmul.f32 0.5, %v1522_v41  ;;  %v1528_v57 = vmul.f32 %v1524_v39, %v1488_v14  ;;  %v6925_v39 = vld [vmem:[%s8591_s21 + $0x2] sm:$0x3]  ;;  %s8526_s21 = smov 17  }
 0xf63   :  { %v1527_v55 = vmul.f32 0.5, %v1523_v42  ;;  %v1529_v60 = vmul.f32 %v1525_v44, %v1490_v16  ;;  %v1783_v41 = vrot.slane %v6925_v39, %v8593_v43  ;;  %v1787_v42 = vrot.slane %v6925_v39, %v8596_v45 }
 0xf64   :  { %v1530_v59 = vmul.f32 %v1526_v50, %v1492_v19 }
 0xf65   :  { %v1531_v61 = vmul.f32 %v1527_v55, %v1494_v21  ;;  %v8140_v21 = vld [vmem:[%s8562_s9 + $0x44] ss:$8 sps:$4 sm:$0xff]   ;;  %s8525_s9 = smov 15  }
 0xf66   :  { %v1564_v62 = vpack.c.bf16 %v1530_v59, %v1528_v57  ;;  %1833 = vmatprep.subr.bf16.mxu1 %v8140_v21  ;;  %s8912_s8 = sld [smem:[%s9906_s0 + %s8525_s9]]  }
 0xf67   :  { %v1565_v63 = vpack.c.bf16 %v1531_v61, %v1529_v60  ;;  %1834 = vmatpush1.bf16.msra.mxu1 %v8138_v0  ;;  %s9503_s9 = sld [smem:[%s9906_s0 + %s8537_s16]]  }
 0xf68   :  { %1835 = vmatprep.subr.bf16.mxu1 %v8143_v22 }
 0xf69   :  { %1701 = vmatprep.mubr.bf16.mxu0 %v1565_v63 }
 0xf6a   :  { %1702 = vmatmul.mubr.bf16.vlgmr.msra.gmra.mrb[32].mxu0 %v1564_v62 }
 0xf6b   :  { %7638 = vmatprep.mubr.msk.bf16.mxu0 %vm8507_vm1, %v8505_v40  ;;  %1836 = vmatpush1.bf16.msra.mxu1 %v8141_v23 }
 0xf6c   :  { %1837 = vmatprep.subr.bf16.mxu1 %v8146_v46  ;;  %v6916_v33 = vld [vmem:[%s8912_s8] ss:$0 sm:$0xff] }
 0xf6f   :  { %1838 = vmatpush1.bf16.msra.mxu1 %v8144_v51 }
 0xf70   :  { %1839 = vmatprep.subr.bf16.mxu1 %v8149_v38 }
 0xf73   :  { %1840 = vmatpush1.bf16.msra.mxu1 %v8147_v37 }
 0xf74   :  { %7624 = vmatprep.subr.bf16.mxu1 %v8505_v40 }
0x103d   :  { %v7315_v1 = vpop.f32.mrb[32].mxu0 }
0x103e   :  { %v7316_v4 = vpop.f32.mrb[33].mxu0 }
0x103f   :  { %v7317_v5 = vadd.f32 %v7316_v4, %v7315_v1  ;;  %v7318_v6 = vpop.f32.mrb[34].mxu0 }
0x1040   :  { %v7319_v7 = vpop.f32.mrb[35].mxu0 }
0x1041   :  { %v1704_v8 = vadd.f32 %v7317_v5, %v6898_v2  ;;  %v7320_v48 = vadd.f32 %v7319_v7, %v7318_v6 }
0x1043   :  { %v1707_v52 = vadd.f32 %v7320_v48, %v6898_v2  ;;  %v1710_v9 = vadd.f32 %v1704_v8, %v8843_v47 }
0x1045   :  { %v1714_v10 = vsel %vm163_vm0, %v1710_v9, 0.0  ;;  %v1711_v12 = vadd.f32 %v1707_v52, %v8845_v49 }
0x1046   :  { %1715 = vadd.xlane.f32.xlu1 %v1714_v10 }
0x1047   :  { %v1717_v13 = vsel %vm163_vm0, %v1711_v12, 0.0 }
0x1048   :  { %1718 = vadd.xlane.f32.xlu0 %v1717_v13 }
0x10d3   :  { %v1716_v14 = vpop.xlane.xlu1 %1715 }
0x10d4   :  { %v1720_v3 = vmul.f32 0.015625, %v1716_v14 }
0x10d5   :  { %v1719_v16 = vpop.xlane.xlu0 %1718 }
0x10d6   :  { %v1722_v17 = vsub.f32 %v1710_v9, %v1720_v3  ;;  %v1721_v18 = vmul.f32 0.015625, %v1719_v16  ;;  %v8959_v3 = vld [vmem:[%s8637_s26] ss:$0 sm:$0xff] }
0x10d8   :  { %v1723_v19 = vsub.f32 %v1711_v12, %v1721_v18  ;;  %v1724_v47 = vmul.f32 %v1722_v17, %v1722_v17 }
0x10da   :  { %v1726_v11 = vsel %vm163_vm0, %v1724_v47, 0.0  ;;  %v1725_v49 = vmul.f32 %v1723_v19, %v1723_v19 }
0x10db   :  { %1727 = vadd.xlane.f32.xlu1 %v1726_v11 }
0x10dc   :  { %v1729_v20 = vsel %vm163_vm0, %v1725_v49, 0.0 }
0x10dd   :  { %1730 = vadd.xlane.f32.xlu0 %v1729_v20  ;;  %v8964_v20 = vld [vmem:[%s8637_s26 + $0x1] ss:$0 sm:$0xff]  ;;  %s8535_s26 = smov 26  }
0x10de   :  { %s9485_s12 = sld [smem:[%s9906_s0 + %s8535_s26]]  }
0x10df   :  { %s9544_s26 = sld [smem:[%s9906_s0 + %s8540_s17]]  }
0x1168   :  { %v1728_v54 = vpop.xlane.xlu1 %1727 }
0x1169   :  { %v1732_v24 = vmul.f32 0.015625, %v1728_v54 }
0x116a   :  { %v1731_v58 = vpop.xlane.xlu0 %1730 }
0x116b   :  { %v1734_v25 = vadd.f32 1e-12, %v1732_v24  ;;  %v1733_v26 = vmul.f32 0.015625, %v1731_v58 }
0x116d   :  { %8346 = vrsqrt.f32 %v1734_v25  ;;  %v1735_v27 = vadd.f32 1e-12, %v1733_v26 }
0x116f   :  { %8348 = vrsqrt.f32 %v1735_v27 }
0x1177   :  { %v8347_v28 = vpop.eup %8346 }
0x1178   :  { %v1738_v56 = vmul.f32 %v8347_v28, %v1722_v17 }
0x1179   :  { %v8349_v30 = vpop.eup %8348 }
0x117a   :  { %v1746_v31 = vmul.f32 %v6915_v29, %v1738_v56  ;;  %v1739_v32 = vmul.f32 %v8349_v30, %v1723_v19 }
0x117c   :  { %v1747_v34 = vmul.f32 %v6915_v29, %v1739_v32  ;;  %v8916_v35 = vadd.f32 %v6916_v33, %v1746_v31 }
0x117e   :  { %v8918_v53 = vadd.f32 %v6916_v33, %v1747_v34 }
0x1180   :  { %v1778_v36 = vpack.c.bf16 %v8918_v53, %v8916_v35 }
0x1182   :  { %6943 = vmatmul.mubr.msk.bf16.vlgmr.msra.gmra.mrb[44].mxu1 %vm163_vm0, %v1778_v36 }
0x1183   :  { %7626 = vmatprep.mubr.msk.bf16.mxu1 %vm8507_vm1, %v8505_v40 }
0x1255   :  { %v1867_v44 = vpop.f32.mrb[44].mxu1 }
0x1256   :  { %v1868_v50 = vadd.f32 %v1867_v44, %v1783_v41  ;;  %v1869_v55 = vpop.f32.mrb[45].mxu1 }
0x1257   :  { %v1870_v57 = vadd.f32 %v1869_v55, %v1787_v42  ;;  %v1871_v59 = vpop.f32.mrb[46].mxu1 }
0x1258   :  { %v8928_v60 = vpack.c.bf16 %v1868_v50, %v1868_v50  ;;  %v1872_v61 = vadd.f32 %v1871_v59, %v1783_v41  ;;  %v1873_v62 = vpop.f32.mrb[47].mxu1 }
0x1259   :  { %v8930_v63 = vpack.c.bf16 %v1870_v57, %v1870_v57  ;;  %v1874_v1 = vadd.f32 %v1873_v62, %v1787_v42 }
0x125a   :  { %v8932_v2 = vpack.c.bf16 %v1872_v61, %v1872_v61  ;;  %1879 = vrot.lane.b32.xlu1 %v8928_v60, %s8508_s22 }
0x125b   :  { %v2010_v4 = vsel %vm472_vm2, %v8930_v63, 0  ;;  %v8949_v48 = vpack.c.bf16 %v1874_v1, %v1874_v1 }
0x125c   :  { %1928 = vrot.lane.b32.xlu0 %v8932_v2, %s8508_s22  ;;  %7637 = vmatpush3.bf16.msra.mxu0 %v2010_v4 }
0x125d   :  { %7648 = vmatprep.subr.bf16.mxu0 %v8505_v40  ;;  %v2056_v52 = vsel %vm472_vm2, %v8949_v48, 0 }
0x12cc   :  { %v1880_v5 = vpop.permute.xlu1 %1879 }
0x12cd   :  { %v1885_v6 = vsel %vm330_vm3, %v1880_v5, 0 }
0x12ce   :  { %7625 = vmatpush3.bf16.xpose.msra.mxu1 %v1885_v6  ;;  %v1929_v7 = vpop.permute.xlu0 %1928 }
0x12cf   :  { %7630 = vmatprep.subr.bf16.mxu1 %v8505_v40  ;;  %v1934_v8 = vsel %vm330_vm3, %v1929_v7, 0 }
0x12d5   :  { %7627 = vmatmul.mubr.msk.bf16.vlgmr.msra.gmra.mrb[48].mxu1 %vm330_vm3, %v8928_v60 }
0x12d6   :  { %7631 = vmatpush3.bf16.xpose.msra.mxu1 %v1934_v8  ;;  %7632 = vmatprep.mubr.msk.bf16.mxu1 %vm8507_vm1, %v8505_v40 }
0x12d7   :  { %7642 = vmatprep.subr.bf16.mxu1 %v8505_v40 }
0x12dd   :  { %7633 = vmatmul.mubr.msk.bf16.vlgmr.msra.gmra.mrb[52].mxu1 %vm330_vm3, %v8932_v2 }
0x12de   :  { %7643 = vmatpush3.bf16.msra.mxu1 %v2056_v52  ;;  %7644 = vmatprep.mubr.msk.bf16.mxu1 %vm8507_vm1, %v8505_v40 }
0x12df   :  { %7654 = vmatprep.subr.bf16.mxu1 %v8505_v40 }
0x13a8   :  { %v1921_v9 = vpop.f32.mrb[48].mxu1 }
0x13a9   :  { %v1976_v10 = vmul.f32 0.25, %v1921_v9  ;;  %v7628_v12 = vpop.f32.mrb[49].mxu1 }
0x13aa   :  { %v1924_v13 = vpop.f32.mrb[50].mxu1 }
0x13ab   :  { %v7629_v14 = vpop.f32.mrb[51].mxu1  ;;  %v1978_v16 = vadd.f32 %v8959_v3, %v1976_v10 }
0x13ad   :  { %v1980_v17 = vsel %vm442_vm4, %v1978_v16, -inf }
0x13ae   :  { %1981 = vmax.xlane.f32.xlu1 %v1980_v17 }
0x13b0   :  { %v1970_v18 = vpop.f32.mrb[52].mxu1 }
0x13b1   :  { %v1977_v19 = vmul.f32 0.25, %v1970_v18  ;;  %v7634_v47 = vpop.f32.mrb[53].mxu1 }
0x13b2   :  { %v1973_v11 = vpop.f32.mrb[54].mxu1 }
0x13b3   :  { %v7635_v49 = vpop.f32.mrb[55].mxu1  ;;  %v1979_v21 = vadd.f32 %v8964_v20, %v1977_v19 }
0x13b5   :  { %v1983_v0 = vsel %vm442_vm4, %v1979_v21, -inf }
0x13b6   :  { %1984 = vmax.xlane.f32.xlu0 %v1983_v0 }
0x13bf   :  { %2100 = vrot.lane.b32.xlu1 %v8928_v60, %s8510_s27 }
0x143b   :  { %v1982_v22 = vpop.xlane.xlu1 %1981 }
0x143c   :  { %v1986_v23 = vsub.f32 %v1978_v16, %v1982_v22 }
0x143e   :  { %v1988_v46 = vmul.f32 1.442695, %v1986_v23 }
0x143f   :  { %v2101_v26 = vpop.permute.xlu1 %2100 }
0x1440   :  { %8350 = vpow2.f32 %v1988_v46  ;;  %v2106_v31 = vsel %vm330_vm3, %v2101_v26, 0 }
0x1443   :  { %v1985_v51 = vpop.xlane.xlu0 %1984 }
0x1444   :  { %v1987_v37 = vsub.f32 %v1979_v21, %v1985_v51 }
0x1446   :  { %v1990_v38 = vmul.f32 1.442695, %v1987_v37 }
0x1448   :  { %8352 = vpow2.f32 %v1990_v38 }
0x144a   :  { %v8351_v54 = vpop.eup %8350 }
0x144b   :  { %v1992_v24 = vsel %vm442_vm4, %v8351_v54, 0.0 }
0x144c   :  { %1993 = vadd.xlane.f32.xlu1 %v1992_v24 }
0x1452   :  { %v8353_v58 = vpop.eup %8352 }
0x1453   :  { %v1995_v25 = vsel %vm442_vm4, %v8353_v58, 0.0 }
0x1454   :  { %1996 = vadd.xlane.f32.xlu0 %v1995_v25 }
0x145d   :  { %2098 = vrot.lane.b32.xlu1 %v8928_v60, %s8511_s28 }
0x1461   :  { %2148 = vrot.lane.b32.xlu1 %v8932_v2, %s8511_s28 }
0x146a   :  { %2150 = vrot.lane.b32.xlu0 %v8932_v2, %s8510_s27 }
0x14d9   :  { %v1994_v27 = vpop.xlane.xlu1 %1993 }
0x14da   :  { %8354 = vrcp.f32 %v1994_v27 }
0x14dd   :  { %v2099_v39 = vpop.permute.xlu1 %2098 }
0x14e1   :  { %v1997_v28 = vpop.xlane.xlu0 %1996  ;;  %v2149_v42 = vpop.permute.xlu1 %2148 }
0x14e2   :  { %8356 = vrcp.f32 %v1997_v28 }
0x14e4   :  { %v8355_v29 = vpop.eup %8354 }
0x14e5   :  { %v2000_v56 = vmul.f32 %v8355_v29, %v8351_v54  ;;  %v2151_v34 = vpop.permute.xlu0 %2150 }
0x14e6   :  { %v2156_v41 = vsel %vm330_vm3, %v2151_v34, 0 }
0x14e7   :  { %v2002_v30 = vpack.c.bf16 %v2000_v56, %v2000_v56 }
0x14e9   :  { %7639 = vmatmul.mubr.msk.bf16.vlgmr.msra.gmra.mrb[36].mxu0 %vm442_vm4, %v2002_v30 }
0x14ea   :  { %7649 = vmatpush3.bf16.xpose.msra.mxu0 %v2106_v31  ;;  %7650 = vmatprep.mubr.msk.bf16.mxu0 %vm8507_vm1, %v8505_v40 }
0x14eb   :  { %7660 = vmatprep.subr.bf16.mxu0 %v8505_v40 }
0x14ec   :  { %v8357_v32 = vpop.eup %8356 }
0x14ed   :  { %v2001_v33 = vmul.f32 %v8357_v32, %v8353_v58 }
0x14ef   :  { %v2003_v36 = vpack.c.bf16 %v2001_v33, %v2001_v33 }
0x14f1   :  { %7645 = vmatmul.mubr.msk.bf16.vlgmr.msra.gmra.mrb[56].mxu1 %vm442_vm4, %v2003_v36  ;;  %7651 = vmatmul.mubr.msk.bf16.vlgmr.msra.gmra.mrb[40].mxu0 %vm330_vm3, %v2099_v39 }
0x14f2   :  { %7655 = vmatpush3.bf16.xpose.msra.mxu1 %v2156_v41  ;;  %7656 = vmatprep.mubr.msk.bf16.mxu1 %vm8507_vm1, %v8505_v40 }
0x14f3   :  { %7666 = vmatprep.subr.bf16.mxu1 %v8505_v40  ;;  %7662 = vmatprep.mubr.msk.bf16.mxu0 %vm8507_vm1, %v8505_v40 }
0x14f9   :  { %7657 = vmatmul.mubr.msk.bf16.vlgmr.msra.gmra.mrb[60].mxu1 %vm330_vm3, %v2149_v42 }
0x14fa   :  { %7668 = vmatprep.mubr.msk.bf16.mxu1 %vm8507_vm1, %v8505_v40 }
0x15bc   :  { %v8994_v44 = vpop.f32.mrb[36].mxu0 }
0x15bd   :  { %v7640_v50 = vpop.f32.mrb[37].mxu0 }
0x15be   :  { %v2049_v55 = vpop.f32.mrb[38].mxu0 }
0x15bf   :  { %v7641_v57 = vpop.f32.mrb[39].mxu0 }
0x15c4   :  { %v8996_v59 = vpop.f32.mrb[56].mxu1  ;;  %v2142_v61 = vpop.f32.mrb[40].mxu0 }
0x15c5   :  { %v2198_v62 = vmul.f32 0.25, %v2142_v61  ;;  %v7646_v1 = vpop.f32.mrb[57].mxu1  ;;  %v7652_v4 = vpop.f32.mrb[41].mxu0 }
0x15c6   :  { %v2095_v5 = vpop.f32.mrb[58].mxu1  ;;  %v2145_v6 = vpop.f32.mrb[42].mxu0 }
0x15c7   :  { %v7647_v7 = vpop.f32.mrb[59].mxu1  ;;  %v7653_v8 = vpop.f32.mrb[43].mxu0  ;;  %v2200_v52 = vadd.f32 %v8959_v3, %v2198_v62 }
0x15c9   :  { %v2202_v9 = vsel %vm442_vm4, %v2200_v52, -inf }
0x15ca   :  { %2203 = vmax.xlane.f32.xlu1 %v2202_v9 }
0x15cc   :  { %v2192_v10 = vpop.f32.mrb[60].mxu1 }
0x15cd   :  { %v2199_v12 = vmul.f32 0.25, %v2192_v10  ;;  %v7658_v13 = vpop.f32.mrb[61].mxu1 }
0x15ce   :  { %v2195_v14 = vpop.f32.mrb[62].mxu1 }
0x15cf   :  { %v7659_v16 = vpop.f32.mrb[63].mxu1  ;;  %v2201_v17 = vadd.f32 %v8964_v20, %v2199_v12 }
0x15d1   :  { %v2205_v18 = vsel %vm442_vm4, %v2201_v17, -inf }
0x15d2   :  { %2206 = vmax.xlane.f32.xlu0 %v2205_v18 }
0x15db   :  { %2227 = vrot.lane.b32.xlu1 %v8930_v63, %s8511_s28 }
0x15df   :  { %2326 = vrot.lane.b32.xlu1 %v8928_v60, %s8512_s29 }
0x15e3   :  { %2376 = vrot.lane.b32.xlu1 %v8932_v2, %s8512_s29 }
0x15e7   :  { %2324 = vrot.lane.b32.xlu1 %v8928_v60, %s8513_s30 }
0x1657   :  { %v2204_v19 = vpop.xlane.xlu1 %2203 }
0x1658   :  { %v2208_v47 = vsub.f32 %v2200_v52, %v2204_v19 }
0x165a   :  { %v2210_v11 = vmul.f32 1.442695, %v2208_v47 }
0x165b   :  { %v2228_v49 = vpop.permute.xlu1 %2227 }
0x165c   :  { %8358 = vpow2.f32 %v2210_v11  ;;  %v2233_v21 = vsel %vm472_vm2, %v2228_v49, 0 }
0x165d   :  { %7661 = vmatpush3.bf16.msra.mxu0 %v2233_v21 }
0x165e   :  { %7672 = vmatprep.subr.bf16.mxu0 %v8505_v40 }
0x165f   :  { %v2207_v0 = vpop.xlane.xlu0 %2206  ;;  %v2327_v25 = vpop.permute.xlu1 %2326 }
0x1660   :  { %v2209_v22 = vsub.f32 %v2201_v17, %v2207_v0  ;;  %v2332_v56 = vsel %vm330_vm3, %v2327_v25, 0 }
0x1662   :  { %v2212_v23 = vmul.f32 1.442695, %v2209_v22 }
0x1663   :  { %v2377_v30 = vpop.permute.xlu1 %2376 }
0x1664   :  { %8360 = vpow2.f32 %v2212_v23  ;;  %v2382_v36 = vsel %vm330_vm3, %v2377_v30, 0 }
0x1666   :  { %v8359_v46 = vpop.eup %8358 }
0x1667   :  { %v2214_v51 = vsel %vm442_vm4, %v8359_v46, 0.0  ;;  %v2325_v34 = vpop.permute.xlu1 %2324 }
0x1668   :  { %2215 = vadd.xlane.f32.xlu0 %v2214_v51 }
0x166e   :  { %v8361_v37 = vpop.eup %8360 }
0x166f   :  { %v2217_v38 = vsel %vm442_vm4, %v8361_v37, 0.0 }
0x1670   :  { %2218 = vadd.xlane.f32.xlu0 %v2217_v38 }
0x1686   :  { %2276 = vrot.lane.b32.xlu0 %v8949_v48, %s8511_s28 }
0x168a   :  { %2374 = vrot.lane.b32.xlu0 %v8932_v2, %s8513_s30 }
0x16f5   :  { %v2216_v54 = vpop.xlane.xlu0 %2215 }
0x16f6   :  { %8362 = vrcp.f32 %v2216_v54 }
0x16fd   :  { %v2219_v24 = vpop.xlane.xlu0 %2218 }
0x16fe   :  { %8364 = vrcp.f32 %v2219_v24 }
0x1700   :  { %v8363_v58 = vpop.eup %8362 }
0x1701   :  { %v2277_v26 = vpop.permute.xlu0 %2276  ;;  %v2222_v27 = vmul.f32 %v8363_v58, %v8359_v46 }
0x1702   :  { %v2282_v28 = vsel %vm472_vm2, %v2277_v26, 0 }
0x1703   :  { %7667 = vmatpush3.bf16.msra.mxu1 %v2282_v28  ;;  %v2224_v29 = vpack.c.bf16 %v2222_v27, %v2222_v27 }
0x1704   :  { %7678 = vmatprep.subr.bf16.mxu1 %v8505_v40 }
0x1705   :  { %7663 = vmatmul.mubr.msk.bf16.vlgmr.msra.gmra.mrb[44].mxu0 %vm442_vm4, %v2224_v29  ;;  %v2375_v39 = vpop.permute.xlu0 %2374 }
0x1706   :  { %7673 = vmatpush3.bf16.xpose.msra.mxu0 %v2332_v56  ;;  %7674 = vmatprep.mubr.msk.bf16.mxu0 %vm8507_vm1, %v8505_v40 }
0x1707   :  { %7684 = vmatprep.subr.bf16.mxu0 %v8505_v40 }
0x1708   :  { %v8365_v31 = vpop.eup %8364 }
0x1709   :  { %v2223_v32 = vmul.f32 %v8365_v31, %v8361_v37 }
0x170b   :  { %v2225_v33 = vpack.c.bf16 %v2223_v32, %v2223_v32 }
0x170d   :  { %7669 = vmatmul.mubr.msk.bf16.vlgmr.msra.gmra.mrb[64].mxu1 %vm442_vm4, %v2225_v33  ;;  %7675 = vmatmul.mubr.msk.bf16.vlgmr.msra.gmra.mrb[48].mxu0 %vm330_vm3, %v2325_v34 }
0x170e   :  { %7679 = vmatpush3.bf16.xpose.msra.mxu1 %v2382_v36  ;;  %7680 = vmatprep.mubr.msk.bf16.mxu1 %vm8507_vm1, %v8505_v40 }
0x170f   :  { %7690 = vmatprep.subr.bf16.mxu1 %v8505_v40  ;;  %7686 = vmatprep.mubr.msk.bf16.mxu0 %vm8507_vm1, %v8505_v40 }
0x1715   :  { %7681 = vmatmul.mubr.msk.bf16.vlgmr.msra.gmra.mrb[68].mxu1 %vm330_vm3, %v2375_v39 }
0x1716   :  { %7692 = vmatprep.mubr.msk.bf16.mxu1 %vm8507_vm1, %v8505_v40 }
0x17d8   :  { %v9036_v41 = vpop.f32.mrb[44].mxu0 }
0x17d9   :  { %v7664_v42 = vpop.f32.mrb[45].mxu0 }
0x17da   :  { %v2272_v50 = vpop.f32.mrb[46].mxu0 }
0x17db   :  { %v7665_v55 = vpop.f32.mrb[47].mxu0 }
0x17e0   :  { %v9038_v57 = vpop.f32.mrb[64].mxu1  ;;  %v2368_v61 = vpop.f32.mrb[48].mxu0 }
0x17e1   :  { %v8049_v62 = vpack.i.bf16 %v9038_v57, %v9036_v41  ;;  %v2424_v1 = vmul.f32 0.25, %v2368_v61  ;;  %v7670_v4 = vpop.f32.mrb[65].mxu1  ;;  %v7676_v5 = vpop.f32.mrb[49].mxu0 }
0x17e2   :  { %v2321_v6 = vpop.f32.mrb[66].mxu1  ;;  %v2371_v7 = vpop.f32.mrb[50].mxu0 }
0x17e3   :  { %v7671_v8 = vpop.f32.mrb[67].mxu1  ;;  %v7677_v52 = vpop.f32.mrb[51].mxu0  ;;  %v2426_v9 = vadd.f32 %v8959_v3, %v2424_v1 }
0x17e5   :  { %v2428_v10 = vsel %vm442_vm4, %v2426_v9, -inf }
0x17e6   :  { %2429 = vmax.xlane.f32.xlu1 %v2428_v10 }
0x17e8   :  { %v2418_v12 = vpop.f32.mrb[68].mxu1 }
0x17e9   :  { %v2425_v13 = vmul.f32 0.25, %v2418_v12  ;;  %v7682_v14 = vpop.f32.mrb[69].mxu1 }
0x17ea   :  { %v2421_v16 = vpop.f32.mrb[70].mxu1 }
0x17eb   :  { %v7683_v17 = vpop.f32.mrb[71].mxu1  ;;  %v2427_v18 = vadd.f32 %v8964_v20, %v2425_v13 }
0x17ed   :  { %v2431_v19 = vsel %vm442_vm4, %v2427_v18, -inf }
0x17ee   :  { %2432 = vmax.xlane.f32.xlu0 %v2431_v19 }
0x17f7   :  { %2452 = vrot.lane.b32.xlu1 %v8930_v63, %s8513_s30 }
0x17fb   :  { %2550 = vrot.lane.b32.xlu1 %v8928_v60, %s8514_s1 }
0x17ff   :  { %2600 = vrot.lane.b32.xlu1 %v8932_v2, %s8514_s1 }
0x1803   :  { %2548 = vrot.lane.b32.xlu1 %v8928_v60, %s8515_s2 }
0x1873   :  { %v2430_v47 = vpop.xlane.xlu1 %2429 }
0x1874   :  { %v2434_v11 = vsub.f32 %v2426_v9, %v2430_v47 }
0x1876   :  { %v2436_v49 = vmul.f32 1.442695, %v2434_v11 }
0x1877   :  { %v2453_v21 = vpop.permute.xlu1 %2452 }
0x1878   :  { %8366 = vpow2.f32 %v2436_v49  ;;  %v2458_v0 = vsel %vm472_vm2, %v2453_v21, 0 }
0x1879   :  { %7685 = vmatpush3.bf16.msra.mxu0 %v2458_v0 }
0x187a   :  { %7696 = vmatprep.subr.bf16.mxu0 %v8505_v40 }
0x187b   :  { %v2433_v22 = vpop.xlane.xlu0 %2432  ;;  %v2551_v25 = vpop.permute.xlu1 %2550 }
0x187c   :  { %v2435_v23 = vsub.f32 %v2427_v18, %v2433_v22  ;;  %v2556_v56 = vsel %vm330_vm3, %v2551_v25, 0 }
0x187e   :  { %v2438_v46 = vmul.f32 1.442695, %v2435_v23 }
0x187f   :  { %v2601_v30 = vpop.permute.xlu1 %2600 }
0x1880   :  { %8368 = vpow2.f32 %v2438_v46  ;;  %v2606_v34 = vsel %vm330_vm3, %v2601_v30, 0 }
0x1882   :  { %v8367_v51 = vpop.eup %8366 }
0x1883   :  { %v2440_v37 = vsel %vm442_vm4, %v8367_v51, 0.0  ;;  %v2549_v33 = vpop.permute.xlu1 %2548 }
0x1884   :  { %2441 = vadd.xlane.f32.xlu0 %v2440_v37 }
0x188a   :  { %v8369_v38 = vpop.eup %8368 }
0x188b   :  { %v2443_v60 = vsel %vm442_vm4, %v8369_v38, 0.0 }
0x188c   :  { %2444 = vadd.xlane.f32.xlu0 %v2443_v60 }
0x18a2   :  { %2500 = vrot.lane.b32.xlu0 %v8949_v48, %s8513_s30 }
0x18a6   :  { %2598 = vrot.lane.b32.xlu0 %v8932_v2, %s8515_s2 }
0x1911   :  { %v2442_v54 = vpop.xlane.xlu0 %2441 }
0x1912   :  { %8370 = vrcp.f32 %v2442_v54 }
0x1919   :  { %v2445_v24 = vpop.xlane.xlu0 %2444 }
0x191a   :  { %8372 = vrcp.f32 %v2445_v24 }
0x191c   :  { %v8371_v58 = vpop.eup %8370 }
0x191d   :  { %v2501_v26 = vpop.permute.xlu0 %2500  ;;  %v2448_v27 = vmul.f32 %v8371_v58, %v8367_v51 }
0x191e   :  { %v2506_v28 = vsel %vm472_vm2, %v2501_v26, 0 }
0x191f   :  { %7691 = vmatpush3.bf16.msra.mxu1 %v2506_v28  ;;  %v2450_v29 = vpack.c.bf16 %v2448_v27, %v2448_v27  ;;  %v8150_v27 = vld [vmem:[%s8787_s6 + $0x20] sm:$0xff]   ;;  %v8151_v28 = vld [vmem:[%s8787_s6 + $0x28] sm:$0xff]  }
0x1920   :  { %7702 = vmatprep.subr.bf16.mxu1 %v8505_v40 }
0x1921   :  { %7687 = vmatmul.mubr.msk.bf16.vlgmr.msra.gmra.mrb[52].mxu0 %vm442_vm4, %v2450_v29  ;;  %v2599_v36 = vpop.permute.xlu0 %2598  ;;  %v8152_v29 = vld [vmem:[%s8787_s6 + $0x30] sm:$0xff]  }
0x1922   :  { %7697 = vmatpush3.bf16.xpose.msra.mxu0 %v2556_v56  ;;  %7698 = vmatprep.mubr.msk.bf16.mxu0 %vm8507_vm1, %v8505_v40  ;;  %v8153_v56 = vld [vmem:[%s8787_s6 + $0x38] sm:$0xff]   ;;  %s9248_s6 = sld [smem:[%s9906_s0 + %s8530_s5]]   ;;  %s8538_s5 = smov 28  }
0x1923   :  { %7708 = vmatprep.subr.bf16.mxu0 %v8505_v40  ;;  %s9512_s10 = sld [smem:[%s9906_s0 + %s8538_s5]]  }
0x1924   :  { %v8373_v2 = vpop.eup %8372 }
0x1925   :  { %v2449_v31 = vmul.f32 %v8373_v2, %v8369_v38 }
0x1927   :  { %v2451_v32 = vpack.c.bf16 %v2449_v31, %v2449_v31 }
0x1929   :  { %7693 = vmatmul.mubr.msk.bf16.vlgmr.msra.gmra.mrb[72].mxu1 %vm442_vm4, %v2451_v32  ;;  %7699 = vmatmul.mubr.msk.bf16.vlgmr.msra.gmra.mrb[56].mxu0 %vm330_vm3, %v2549_v33 }
0x192a   :  { %7703 = vmatpush3.bf16.xpose.msra.mxu1 %v2606_v34  ;;  %7704 = vmatprep.mubr.msk.bf16.mxu1 %vm8507_vm1, %v8505_v40 }
0x192b   :  { %7714 = vmatprep.subr.bf16.mxu1 %v8505_v40  ;;  %7710 = vmatprep.mubr.msk.bf16.mxu0 %vm8507_vm1, %v8505_v40 }
0x1931   :  { %7705 = vmatmul.mubr.msk.bf16.vlgmr.msra.gmra.mrb[76].mxu1 %vm330_vm3, %v2599_v36 }
0x1932   :  { %7716 = vmatprep.mubr.msk.bf16.mxu1 %vm8507_vm1, %v8505_v40 }
0x19f4   :  { %v2494_v39 = vpop.f32.mrb[52].mxu0 }
0x19f5   :  { %v7688_v42 = vpop.f32.mrb[53].mxu0 }
0x19f6   :  { %v2497_v50 = vpop.f32.mrb[54].mxu0 }
0x19f7   :  { %v7689_v55 = vpop.f32.mrb[55].mxu0 }
0x19fc   :  { %v2542_v61 = vpop.f32.mrb[72].mxu1  ;;  %v2592_v1 = vpop.f32.mrb[56].mxu0 }
0x19fd   :  { %v8054_v4 = vpack.i.bf16 %v2542_v61, %v2494_v39  ;;  %v2648_v5 = vmul.f32 0.25, %v2592_v1  ;;  %v7694_v6 = vpop.f32.mrb[73].mxu1  ;;  %v7700_v7 = vpop.f32.mrb[57].mxu0 }
0x19fe   :  { %v2545_v8 = vpop.f32.mrb[74].mxu1  ;;  %v2595_v52 = vpop.f32.mrb[58].mxu0 }
0x19ff   :  { %v7695_v9 = vpop.f32.mrb[75].mxu1  ;;  %v7701_v10 = vpop.f32.mrb[59].mxu0  ;;  %v2650_v12 = vadd.f32 %v8959_v3, %v2648_v5 }
0x1a01   :  { %v2652_v13 = vsel %vm442_vm4, %v2650_v12, -inf }
0x1a02   :  { %2653 = vmax.xlane.f32.xlu1 %v2652_v13 }
0x1a04   :  { %v2642_v14 = vpop.f32.mrb[76].mxu1 }
0x1a05   :  { %v2649_v16 = vmul.f32 0.25, %v2642_v14  ;;  %v7706_v17 = vpop.f32.mrb[77].mxu1 }
0x1a06   :  { %v2645_v18 = vpop.f32.mrb[78].mxu1  ;;  %v6960_v17 = vld [vmem:[%s8809_s11 + $0x1] ss:$0 sm:$0xff]  ;;  %s9136_s11 = sld [smem:[%s9906_s0 + %s8526_s21]]  }
0x1a07   :  { %v7707_v19 = vpop.f32.mrb[79].mxu1  ;;  %v2651_v47 = vadd.f32 %v8964_v20, %v2649_v16  ;;  %s9465_s21 = sld [smem:[%s9906_s0 + %s8534_s24]]  }
0x1a09   :  { %v2655_v11 = vsel %vm442_vm4, %v2651_v47, -inf }
0x1a0a   :  { %2656 = vmax.xlane.f32.xlu0 %v2655_v11 }
0x1a13   :  { %2676 = vrot.lane.b32.xlu1 %v8930_v63, %s8515_s2 }
0x1a17   :  { %8050 = vrot.lane.b32.xlu1 %v8049_v62, %s8514_s1 }
0x1a1b   :  { %8055 = vrot.lane.b32.xlu1 %v8054_v4, %s8512_s29 }
0x1a8f   :  { %v2654_v3 = vpop.xlane.xlu1 %2653 }
0x1a90   :  { %v2658_v49 = vsub.f32 %v2650_v12, %v2654_v3 }
0x1a92   :  { %v2660_v21 = vmul.f32 1.442695, %v2658_v49 }
0x1a93   :  { %v2677_v0 = vpop.permute.xlu1 %2676 }
0x1a94   :  { %8374 = vpow2.f32 %v2660_v21  ;;  %v2682_v20 = vsel %vm472_vm2, %v2677_v0, 0 }
0x1a95   :  { %7709 = vmatpush3.bf16.msra.mxu0 %v2682_v20 }
0x1a96   :  { %7720 = vmatprep.subr.bf16.mxu0 %v8505_v40 }
0x1a97   :  { %v2657_v22 = vpop.xlane.xlu0 %2656  ;;  %v8051_v50 = vpop.permute.xlu1 %8050 }
0x1a98   :  { %v2659_v23 = vsub.f32 %v2651_v47, %v2657_v22  ;;  %v8053_v61 = vunpack.i.h.bf16 %v8051_v50  ;;  %v8052_v1 = vunpack.i.l.bf16 %v8051_v50  ;;  %v3301_v50 = vld [vmem:[%s9145_s14 + $0x18] sm:$0xff] }
0x1a9a   :  { %v2662_v63 = vmul.f32 1.442695, %v2659_v23  ;;  %v2797_v7 = vsel %vm330_vm3, %v8996_v59, %v8053_v61  ;;  %v2796_v8 = vsel %vm330_vm3, %v8994_v44, %v8052_v1  ;;  %v8166_v1 = vld [vmem:[%s9136_s11] sm:$0xff]  }
0x1a9b   :  { %v8056_v55 = vpop.permute.xlu1 %8055 }
0x1a9c   :  { %8376 = vpow2.f32 %v2662_v63  ;;  %v8058_v4 = vunpack.i.h.bf16 %v8056_v55  ;;  %v8057_v5 = vunpack.i.l.bf16 %v8056_v55 }
0x1a9e   :  { %v8375_v46 = vpop.eup %8374  ;;  %v2799_v10 = vsel %vm1262_vm5, %v2797_v7, %v8058_v4  ;;  %v2798_v12 = vsel %vm1262_vm5, %v2796_v8, %v8057_v5  ;;  %v8168_v7 = vld [vmem:[%s9136_s11 + $0x10] sm:$0xff]   ;;  %v8169_v8 = vld [vmem:[%s9136_s11 + $0x18] sm:$0xff]  }
0x1a9f   :  { %v2664_v41 = vsel %vm442_vm4, %v8375_v46, 0.0 }
0x1aa0   :  { %2665 = vadd.xlane.f32.xlu0 %v2664_v41 }
0x1aa6   :  { %v8377_v57 = vpop.eup %8376 }
0x1aa7   :  { %v2667_v62 = vsel %vm442_vm4, %v8377_v57, 0.0 }
0x1aa8   :  { %2668 = vadd.xlane.f32.xlu0 %v2667_v62 }
0x1abe   :  { %2724 = vrot.lane.b32.xlu0 %v8949_v48, %s8515_s2 }
0x1b2d   :  { %v2666_v51 = vpop.xlane.xlu0 %2665 }
0x1b2e   :  { %8378 = vrcp.f32 %v2666_v51  ;;  %v8156_v51 = vld [vmem:[%s8821_s15 + $0x44] ss:$8 sps:$4 sm:$0xff]  }
0x1b35   :  { %v2669_v37 = vpop.xlane.xlu0 %2668 }
0x1b36   :  { %8380 = vrcp.f32 %v2669_v37  ;;  %v8154_v37 = vld [vmem:[%s8821_s15 + $0x40] ss:$8 sps:$4 sm:$0xff]  }
0x1b38   :  { %v8379_v38 = vpop.eup %8378 }
0x1b39   :  { %v2725_v60 = vpop.permute.xlu0 %2724  ;;  %v2672_v54 = vmul.f32 %v8379_v38, %v8375_v46  ;;  %v8159_v38 = vld [vmem:[%s8821_s15 + $0x54] ss:$8 sps:$4 sm:$0xff]  }
0x1b3a   :  { %v2730_v24 = vsel %vm472_vm2, %v2725_v60, 0  ;;  %v8157_v60 = vld [vmem:[%s8821_s15 + $0x50] ss:$8 sps:$4 sm:$0xff]  }
0x1b3b   :  { %7715 = vmatpush3.bf16.msra.mxu1 %v2730_v24  ;;  %v2674_v58 = vpack.c.bf16 %v2672_v54, %v2672_v54  ;;  %v8162_v54 = vld [vmem:[%s8821_s15 + $0x64] ss:$8 sps:$4 sm:$0xff]   ;;  %v8160_v24 = vld [vmem:[%s8821_s15 + $0x60] ss:$8 sps:$4 sm:$0xff]  }
0x1b3c   :  { %2991 = vmatprep.subr.bf16.mxu1 %v8156_v51 }
0x1b3d   :  { %7711 = vmatmul.mubr.msk.bf16.vlgmr.msra.gmra.mrb[60].mxu0 %vm442_vm4, %v2674_v58  ;;  %v8163_v58 = vld [vmem:[%s8821_s15 + $0x70] ss:$8 sps:$4 sm:$0xff]  }
0x1b3e   :  { %7728 = vmatprep.mubr.msk.bf16.mxu0 %vm8507_vm1, %v8505_v40  ;;  %7721 = vmatpush3.bf16.msra.mxu0 %v8150_v27 }
0x1b3f   :  { %7722 = vmatprep.subr.bf16.mxu0 %v8505_v40 }
0x1b40   :  { %v8381_v48 = vpop.eup %8380 }
0x1b41   :  { %v2673_v25 = vmul.f32 %v8381_v48, %v8377_v57  ;;  %v8165_v48 = vld [vmem:[%s8821_s15 + $0x74] ss:$8 sps:$4 sm:$0xff]   ;;  %s8527_s15 = smov 18  }
0x1b42   :  { %7723 = vmatpush3.bf16.msra.mxu0 %v8151_v28 }
0x1b43   :  { %v2675_v26 = vpack.c.bf16 %v2673_v25, %v2673_v25  ;;  %7724 = vmatprep.subr.bf16.mxu0 %v8505_v40 }
0x1b45   :  { %7717 = vmatmul.mubr.msk.bf16.vlgmr.msra.gmra.mrb[80].mxu1 %vm442_vm4, %v2675_v26 }
0x1b46   :  { %3023 = vmatprep.mubr.bf16.mxu1 %v8502_v15  ;;  %7725 = vmatpush3.bf16.msra.mxu0 %v8152_v29 }
0x1b47   :  { %7726 = vmatprep.subr.bf16.mxu0 %v8505_v40  ;;  %2992 = vmatpush1.bf16.msra.mxu1 %v8154_v37 }
0x1b48   :  { %2993 = vmatprep.subr.bf16.mxu1 %v8159_v38 }
0x1b4a   :  { %7727 = vmatpush3.bf16.msra.mxu0 %v8153_v56 }
0x1b4b   :  { %2994 = vmatpush1.bf16.msra.mxu1 %v8157_v60 }
0x1b4c   :  { %2995 = vmatprep.subr.bf16.mxu1 %v8162_v54 }
0x1b4f   :  { %2996 = vmatpush1.bf16.msra.mxu1 %v8160_v24 }
0x1b50   :  { %2997 = vmatprep.subr.bf16.mxu1 %v8165_v48 }
0x1b53   :  { %2998 = vmatpush1.bf16.msra.mxu1 %v8163_v58 }
0x1b54   :  { %3403 = vmatprep.subr.bf16.mxu1 %v8502_v15 }
0x1c10   :  { %v2718_v30 = vpop.f32.mrb[60].mxu0 }
0x1c11   :  { %v7712_v2 = vpop.f32.mrb[61].mxu0 }
0x1c12   :  { %v2721_v31 = vpop.f32.mrb[62].mxu0 }
0x1c13   :  { %v7713_v32 = vpop.f32.mrb[63].mxu0  ;;  %v6968_v31 = vld [vmem:[%s8834_s19 + $0x1] ss:$0 sm:$0xff]  ;;  %s8546_s19 = smov 38  }
0x1c14   :  { %s6851_s17 = sld [smem:[%s9906_s0 + %s8546_s19]]  }
0x1c18   :  { %v2766_v33 = vpop.f32.mrb[80].mxu1 }
0x1c19   :  { %v8059_v34 = vpack.i.bf16 %v2766_v33, %v2718_v30  ;;  %v7718_v36 = vpop.f32.mrb[81].mxu1 }
0x1c1a   :  { %v2769_v39 = vpop.f32.mrb[82].mxu1  ;;  %v6969_v36 = vld [vmem:[%s8839_s25 + $0x1] ss:$0 sm:$0xff] }
0x1c1b   :  { %8060 = vrot.lane.b32.xlu1 %v8059_v34, %s8510_s27  ;;  %v7719_v42 = vpop.f32.mrb[83].mxu1 }
0x1c1c   :  { %v3299_v42 = vld [vmem:[%s9145_s14 + $0x8] sm:$0xff] }
0x1c1d   :  { %v3327_v4 = vpack.c.bf16 %v3301_v50, %v3299_v42 }
0x1c8d   :  { %v8061_v6 = vpop.permute.xlu1 %8060 }
0x1c8e   :  { %v8063_v52 = vunpack.i.h.bf16 %v8061_v6  ;;  %v8062_v9 = vunpack.i.l.bf16 %v8061_v6  ;;  %v8167_v6 = vld [vmem:[%s9136_s11 + $0x8] sm:$0xff]  }
0x1c90   :  { %v2801_v13 = vsel %vm1265_vm6, %v2799_v10, %v8063_v52  ;;  %v2800_v14 = vsel %vm1265_vm6, %v2798_v12, %v8062_v9  ;;  %v8170_v52 = vld [vmem:[%s9136_s11 + $0x20] sm:$0xff]   ;;  %v8171_v9 = vld [vmem:[%s9136_s11 + $0x28] sm:$0xff]   ;;  %v8172_v10 = vld [vmem:[%s9136_s11 + $0x30] sm:$0xff]  }
0x1c91   :  { %v2802_v16 = vpack.c.bf16 %v2801_v13, %v2800_v14  ;;  %v8173_v12 = vld [vmem:[%s9136_s11 + $0x38] sm:$0xff]   ;;  %v8174_v13 = vld [vmem:[%s9136_s11 + $0x40] sm:$0xff]   ;;  %v8175_v14 = vld [vmem:[%s9136_s11 + $0x48] sm:$0xff]  }
0x1c93   :  { %7729 = vmatmul.mubr.msk.bf16.vlgmr.msra.gmra.mrb[64].mxu0 %vm163_vm0, %v2802_v16  ;;  %v8176_v16 = vld [vmem:[%s9136_s11 + $0x50] sm:$0xff]  }
0x1d66   :  { %v2870_v18 = vpop.f32.mrb[64].mxu0 }
0x1d67   :  { %v2871_v19 = vadd.f32 %v6960_v17, %v2870_v18  ;;  %v7730_v59 = vpop.f32.mrb[65].mxu0  ;;  %v3298_v18 = vld [vmem:[%s9145_s14] sm:$0xff] }
0x1d68   :  { %v2873_v47 = vpop.f32.mrb[66].mxu0 }
0x1d69   :  { %v2874_v11 = vadd.f32 %v6960_v17, %v2873_v47  ;;  %v7731_v44 = vpop.f32.mrb[67].mxu0  ;;  %v2877_v3 = vadd.f32 %v2871_v19, %v8916_v35  ;;  %v8177_v17 = vld [vmem:[%s9136_s11 + $0x58] sm:$0xff]   ;;  %v3300_v19 = vld [vmem:[%s9145_s14 + $0x10] sm:$0xff]  ;;  %v8178_v47 = vld [vmem:[%s8854_s7 + $0xc0] sm:$0xff]   ;;  %s8531_s11 = smov 21  }
0x1d6a   :  { %v3326_v59 = vpack.c.bf16 %v3300_v19, %v3298_v18  ;;  %7358 = vmatprep.subr.bf16.mxu0 %v8178_v47  ;;  %v8180_v44 = vld [vmem:[%s8854_s7 + $0xc8] sm:$0xff]   ;;  %s9258_s14 = sld [smem:[%s9906_s0 + %s8531_s11]]  }
0x1d6b   :  { %v2883_v49 = vsel %vm163_vm0, %v2877_v3, 0.0  ;;  %v2878_v21 = vadd.f32 %v2874_v11, %v8918_v53  ;;  %v8179_v11 = vld [vmem:[%s8854_s7 + $0x80] sm:$0xff]  }
0x1d6c   :  { %2884 = vadd.xlane.f32.xlu0 %v2883_v49  ;;  %7359 = vmatpush3.bf16.msra.mxu0 %v8179_v11  ;;  %v8182_v49 = vld [vmem:[%s8854_s7 + $0xd0] sm:$0xff]  }
0x1d6d   :  { %v2886_v0 = vsel %vm163_vm0, %v2878_v21, 0.0  ;;  %7360 = vmatprep.subr.bf16.mxu0 %v8180_v44 }
0x1d6e   :  { %2887 = vadd.xlane.f32.xlu1 %v2886_v0  ;;  %v8184_v0 = vld [vmem:[%s8854_s7 + $0xd8] sm:$0xff]  }
0x1df9   :  { %v2885_v20 = vpop.xlane.xlu0 %2884 }
0x1dfa   :  { %v2889_v22 = vmul.f32 0.015625, %v2885_v20  ;;  %v8185_v20 = vld [vmem:[%s8854_s7 + $0x98] sm:$0xff]  }
0x1dfb   :  { %v2888_v23 = vpop.xlane.xlu1 %2887 }
0x1dfc   :  { %v2891_v63 = vsub.f32 %v2877_v3, %v2889_v22  ;;  %v2890_v46 = vmul.f32 0.015625, %v2888_v23  ;;  %v8181_v3 = vld [vmem:[%s8854_s7 + $0x88] sm:$0xff]   ;;  %v8186_v22 = vld [vmem:[%s8854_s7 + $0xe0] sm:$0xff]  }
0x1dfd   :  { %7361 = vmatpush3.bf16.msra.mxu0 %v8181_v3  ;;  %v8187_v23 = vld [vmem:[%s8854_s7 + $0xa0] sm:$0xff]  }
0x1dfe   :  { %v2892_v41 = vsub.f32 %v2878_v21, %v2890_v46  ;;  %v2893_v35 = vmul.f32 %v2891_v63, %v2891_v63  ;;  %v8183_v21 = vld [vmem:[%s8854_s7 + $0x90] sm:$0xff]   ;;  %7362 = vmatprep.subr.bf16.mxu0 %v8182_v49  ;;  %v8189_v46 = vld [vmem:[%s8854_s7 + $0xa8] sm:$0xff]  }
0x1e00   :  { %v2895_v57 = vsel %vm163_vm0, %v2893_v35, 0.0  ;;  %v2894_v53 = vmul.f32 %v2892_v41, %v2892_v41  ;;  %v8191_v35 = vld [vmem:[%s8854_s7 + $0xb0] sm:$0xff]  }
0x1e01   :  { %2896 = vadd.xlane.f32.xlu0 %v2895_v57  ;;  %7363 = vmatpush3.bf16.msra.mxu0 %v8183_v21  ;;  %v8192_v57 = vld [vmem:[%s8854_s7 + $0xf8] sm:$0xff]  }
0x1e02   :  { %v2898_v62 = vsel %vm163_vm0, %v2894_v53, 0.0  ;;  %7364 = vmatprep.subr.bf16.mxu0 %v8184_v0  ;;  %v8193_v53 = vld [vmem:[%s8854_s7 + $0xb8] sm:$0xff]  }
0x1e05   :  { %2899 = vadd.xlane.f32.xlu0 %v2898_v62  ;;  %7365 = vmatpush3.bf16.msra.mxu0 %v8185_v20  ;;  %v6978_v62 = vld [vmem:[%s8876_s13 + $0x2] sm:$0x3]  ;;  %s8528_s13 = smov 20  }
0x1e06   :  { %7366 = vmatprep.subr.bf16.mxu0 %v8186_v22  ;;  %v2941_v51 = vrot.slane %v6978_v62, %v8593_v43  ;;  %v2945_v37 = vrot.slane %v6978_v62, %v8596_v45  ;;  %s9225_s20 = sld [smem:[%s9906_s0 + %s8528_s13]]   ;;  %s8533_s13 = smov 22  }
0x1e07   :  { %s9443_s23 = sld [smem:[%s9906_s0 + %s8533_s13]]  }
0x1e09   :  { %7367 = vmatpush3.bf16.msra.mxu0 %v8187_v23 }
0x1e8e   :  { %v2897_v25 = vpop.xlane.xlu0 %2896 }
0x1e8f   :  { %v2901_v26 = vmul.f32 0.015625, %v2897_v25 }
0x1e91   :  { %v2903_v27 = vadd.f32 1e-12, %v2901_v26 }
0x1e92   :  { %v2900_v28 = vpop.xlane.xlu0 %2899 }
0x1e93   :  { %8382 = vrsqrt.f32 %v2903_v27  ;;  %v2902_v29 = vmul.f32 0.015625, %v2900_v28 }
0x1e95   :  { %v2904_v56 = vadd.f32 1e-12, %v2902_v29 }
0x1e97   :  { %8384 = vrsqrt.f32 %v2904_v56 }
0x1e9d   :  { %v8383_v30 = vpop.eup %8382 }
0x1e9e   :  { %v2907_v2 = vmul.f32 %v8383_v30, %v2891_v63  ;;  %v8188_v63 = vld [vmem:[%s8854_s7 + $0xe8] sm:$0xff]  }
0x1e9f   :  { %7368 = vmatprep.subr.bf16.mxu0 %v8188_v63 }
0x1ea0   :  { %v2915_v33 = vmul.f32 %v6968_v31, %v2907_v2  ;;  %7369 = vmatpush3.bf16.msra.mxu0 %v8189_v46 }
0x1ea1   :  { %v8385_v32 = vpop.eup %8384 }
0x1ea2   :  { %v2908_v34 = vmul.f32 %v8385_v32, %v2892_v41  ;;  %v9151_v55 = vadd.f32 %v6969_v36, %v2915_v33  ;;  %v8190_v41 = vld [vmem:[%s8854_s7 + $0xf0] sm:$0xff]   ;;  %s6831_s7 = sld [smem:[%s9906_s0 + %s8527_s15]]   ;;  %s8532_s15 = smov 19  }
0x1ea3   :  { %7370 = vmatprep.subr.bf16.mxu0 %v8190_v41 }
0x1ea4   :  { %v2916_v39 = vmul.f32 %v6968_v31, %v2908_v34  ;;  %7371 = vmatpush3.bf16.msra.mxu0 %v8191_v35 }
0x1ea5   :  { %7372 = vmatprep.subr.bf16.mxu0 %v8192_v57 }
0x1ea6   :  { %v9153_v61 = vadd.f32 %v6969_v36, %v2916_v39 }
0x1ea8   :  { %v2934_v5 = vpack.c.bf16 %v9153_v61, %v9151_v55  ;;  %7373 = vmatpush3.bf16.msra.mxu0 %v8193_v53  ;;  %v3444_v20 = vld [vmem:[%s6831_s7] sm:$0xff]  ;;  %s9296_s7 = sld [smem:[%s9906_s0 + %s8532_s15]]   ;;  %s8536_s15 = smov 30  }
0x1ea9   :  { %s9498_s13 = sld [smem:[%s9906_s0 + %s8536_s15]]   ;;  %s8539_s15 = smov 27  }
0x1eaa   :  { %6987 = vmatmul.mubr.msk.bf16.vlgmr.msra.gmra.mrb[84].mxu1 %vm163_vm0, %v2934_v5  ;;  %s9534_s16 = sld [smem:[%s9906_s0 + %s8539_s15]]  }
0x1eab   :  { %3404 = vmatpush1.bf16.msra.mxu1 %v8166_v1  ;;  %7054 = vmatprep.mubr.msk.bf16.mxu1 %vm163_vm0, %v3327_v4 }
0x1eac   :  { %3405 = vmatprep.subr.bf16.mxu1 %v8502_v15 }
0x1eaf   :  { %3406 = vmatpush1.bf16.msra.mxu1 %v8167_v6 }
0x1eb0   :  { %3407 = vmatprep.subr.bf16.mxu1 %v8502_v15 }
0x1eb3   :  { %3408 = vmatpush1.bf16.msra.mxu1 %v8168_v7 }
0x1eb4   :  { %3409 = vmatprep.subr.bf16.mxu1 %v8502_v15 }
0x1eb7   :  { %3410 = vmatpush1.bf16.msra.mxu1 %v8169_v8 }
0x1eb8   :  { %3411 = vmatprep.subr.bf16.mxu1 %v8502_v15 }
0x1ebb   :  { %3412 = vmatpush1.bf16.msra.mxu1 %v8170_v52 }
0x1ebc   :  { %3413 = vmatprep.subr.bf16.mxu1 %v8502_v15 }
0x1ebf   :  { %3414 = vmatpush1.bf16.msra.mxu1 %v8171_v9 }
0x1ec0   :  { %3415 = vmatprep.subr.bf16.mxu1 %v8502_v15 }
0x1ec3   :  { %3416 = vmatpush1.bf16.msra.mxu1 %v8172_v10 }
0x1ec4   :  { %3417 = vmatprep.subr.bf16.mxu1 %v8502_v15 }
0x1ec7   :  { %3418 = vmatpush1.bf16.msra.mxu1 %v8173_v12 }
0x1ec8   :  { %3419 = vmatprep.subr.bf16.mxu1 %v8502_v15 }
0x1ecb   :  { %3420 = vmatpush1.bf16.msra.mxu1 %v8174_v13 }
0x1ecc   :  { %3421 = vmatprep.subr.bf16.mxu1 %v8502_v15 }
0x1ecf   :  { %3422 = vmatpush1.bf16.msra.mxu1 %v8175_v14 }
0x1ed0   :  { %3423 = vmatprep.subr.bf16.mxu1 %v8502_v15 }
0x1ed3   :  { %3424 = vmatpush1.bf16.msra.mxu1 %v8176_v16 }
0x1ed4   :  { %3425 = vmatprep.subr.bf16.mxu1 %v8502_v15 }
0x1ed7   :  { %3426 = vmatpush1.bf16.msra.mxu1 %v8177_v17 }
0x1ed8   :  { %7738 = vmatprep.subr.bf16.mxu1 %v8505_v40 }
0x1eda   :  { %3436 = vmatmul.mubr.bf16.vlgmr.msra.gmra.mrb[88].mxu1 %v3326_v59 }
0x1edb   :  { %7740 = vmatprep.mubr.msk.bf16.mxu1 %vm8507_vm1, %v8505_v40 }
0x1f7d   :  { %v3025_v38 = vpop.f32.mrb[84].mxu1 }
0x1f7e   :  { %v3026_v60 = vadd.f32 %v3025_v38, %v2941_v51  ;;  %v3027_v54 = vpop.f32.mrb[85].mxu1 }
0x1f7f   :  { %v3028_v24 = vadd.f32 %v3027_v54, %v2945_v37  ;;  %v3029_v58 = vpop.f32.mrb[86].mxu1 }
0x1f80   :  { %v3034_v48 = vmul.f32 %v3026_v60, %v3026_v60  ;;  %v3030_v25 = vadd.f32 %v3029_v58, %v2941_v51  ;;  %v3031_v26 = vpop.f32.mrb[87].mxu1 }
0x1f81   :  { %v3035_v27 = vmul.f32 %v3028_v24, %v3028_v24  ;;  %v3032_v28 = vadd.f32 %v3031_v26, %v2945_v37  ;;  %v8196_v26 = vld [vmem:[%s9225_s20 + $0x4] ss:$8 sps:$4 sm:$0xff]  }
0x1f82   :  { %v3038_v29 = vmul.f32 %v3034_v48, %v3026_v60  ;;  %v3036_v56 = vmul.f32 %v3030_v25, %v3030_v25  ;;  %3565 = vmatprep.subr.bf16.mxu0 %v8196_v26 }
0x1f83   :  { %v3039_v30 = vmul.f32 %v3035_v27, %v3028_v24  ;;  %v3037_v2 = vmul.f32 %v3032_v28, %v3032_v28  ;;  %v8194_v27 = vld [vmem:[%s9225_s20] ss:$8 sps:$4 sm:$0xff]  }
0x1f84   :  { %v3042_v31 = vmul.f32 0.044715, %v3038_v29  ;;  %v3040_v32 = vmul.f32 %v3036_v56, %v3030_v25  ;;  %v8197_v29 = vld [vmem:[%s9225_s20 + $0x10] ss:$8 sps:$4 sm:$0xff]   ;;  %v8202_v56 = vld [vmem:[%s9225_s20 + $0x24] ss:$8 sps:$4 sm:$0xff]  }
0x1f85   :  { %v3043_v33 = vmul.f32 0.044715, %v3039_v30  ;;  %v3041_v34 = vmul.f32 %v3037_v2, %v3032_v28  ;;  %v8200_v30 = vld [vmem:[%s9225_s20 + $0x20] ss:$8 sps:$4 sm:$0xff]   ;;  %v8203_v2 = vld [vmem:[%s9225_s20 + $0x30] ss:$8 sps:$4 sm:$0xff]  }
0x1f86   :  { %v3046_v36 = vadd.f32 %v3042_v31, %v3026_v60  ;;  %v3044_v39 = vmul.f32 0.044715, %v3040_v32  ;;  %v8205_v31 = vld [vmem:[%s9225_s20 + $0x34] ss:$8 sps:$4 sm:$0xff]  }
0x1f87   :  { %v3047_v42 = vadd.f32 %v3043_v33, %v3028_v24  ;;  %v3045_v50 = vmul.f32 0.044715, %v3041_v34 }
0x1f88   :  { %v3050_v1 = vmul.f32 0.7978846, %v3046_v36  ;;  %v3048_v4 = vadd.f32 %v3044_v39, %v3030_v25 }
0x1f89   :  { %v3051_v5 = vmul.f32 0.7978846, %v3047_v42  ;;  %v3049_v6 = vadd.f32 %v3045_v50, %v3032_v28 }
0x1f8a   :  { %8386 = vtanh.f32 %v3050_v1  ;;  %v3052_v7 = vmul.f32 0.7978846, %v3048_v4 }
0x1f8b   :  { %8388 = vtanh.f32 %v3051_v5  ;;  %v3053_v8 = vmul.f32 0.7978846, %v3049_v6 }
0x1f8c   :  { %8390 = vtanh.f32 %v3052_v7 }
0x1f8d   :  { %8392 = vtanh.f32 %v3053_v8 }
0x1f94   :  { %v8387_v52 = vpop.eup %8386 }
0x1f95   :  { %v8389_v9 = vpop.eup %8388  ;;  %v3058_v10 = vadd.f32 1.0, %v8387_v52  ;;  %v7055_v52 = vld [vmem:[%s9243_s4] ss:$0 sm:$0xff] }
0x1f96   :  { %v8391_v12 = vpop.eup %8390  ;;  %v3059_v13 = vadd.f32 1.0, %v8389_v9 }
0x1f97   :  { %v8393_v14 = vpop.eup %8392  ;;  %v3062_v16 = vmul.f32 0.5, %v3058_v10  ;;  %v3060_v17 = vadd.f32 1.0, %v8391_v12 }
0x1f98   :  { %v3061_v18 = vadd.f32 1.0, %v8393_v14  ;;  %v3063_v19 = vmul.f32 0.5, %v3059_v13  ;;  %v7056_v14 = vld [vmem:[%s9248_s6] ss:$0 sm:$0xff] }
0x1f99   :  { %v3064_v59 = vmul.f32 0.5, %v3060_v17  ;;  %v3066_v11 = vmul.f32 %v3062_v16, %v3026_v60 }
0x1f9a   :  { %v3065_v47 = vmul.f32 0.5, %v3061_v18  ;;  %v3067_v3 = vmul.f32 %v3063_v19, %v3028_v24 }
0x1f9b   :  { %v3068_v44 = vmul.f32 %v3064_v59, %v3030_v25  ;;  %v3500_v59 = vld [vmem:[%s9258_s14] sm:$0x3] }
0x1f9c   :  { %v3069_v49 = vmul.f32 %v3065_v47, %v3032_v28  ;;  %v8199_v28 = vld [vmem:[%s9225_s20 + $0x14] ss:$8 sps:$4 sm:$0xff]   ;;  %v3515_v47 = vrot.slane %v3500_v59, %v8593_v43 }
0x1f9d   :  { %v3103_v21 = vpack.c.bf16 %v3068_v44, %v3066_v11 }
0x1f9e   :  { %v3104_v0 = vpack.c.bf16 %v3069_v49, %v3067_v3 }
0x1fa0   :  { %3241 = vmatprep.mubr.bf16.mxu0 %v3104_v0 }
0x1fa1   :  { %3242 = vmatmul.mubr.bf16.vlgmr.msra.gmra.mrb[68].mxu0 %v3103_v21 }
0x1fa2   :  { %3597 = vmatprep.mubr.bf16.mxu0 %v8502_v15  ;;  %3566 = vmatpush1.bf16.msra.mxu0 %v8194_v27 }
0x1fa3   :  { %3567 = vmatprep.subr.bf16.mxu0 %v8199_v28 }
0x1fa6   :  { %3568 = vmatpush1.bf16.msra.mxu0 %v8197_v29 }
0x1fa7   :  { %3569 = vmatprep.subr.bf16.mxu0 %v8202_v56 }
0x1faa   :  { %3570 = vmatpush1.bf16.msra.mxu0 %v8200_v30 }
0x1fab   :  { %3571 = vmatprep.subr.bf16.mxu0 %v8205_v31 }
0x1fad   :  { %v3437_v22 = vpop.f32.mrb[88].mxu1 }
0x1fae   :  { %v9210_v23 = vadd.f32 %v3444_v20, %v3437_v22  ;;  %v3439_v63 = vpop.f32.mrb[89].mxu1  ;;  %3572 = vmatpush1.bf16.msra.mxu0 %v8203_v2 }
0x1faf   :  { %v3440_v46 = vpop.f32.mrb[90].mxu1  ;;  %7732 = vmatprep.subr.bf16.mxu0 %v8505_v40  ;;  %v3519_v63 = vrot.slane %v3500_v59, %v8596_v45 }
0x1fb0   :  { %v9212_v41 = vadd.f32 %v3444_v20, %v3440_v46  ;;  %v3442_v35 = vpop.f32.mrb[91].mxu1  ;;  %v3450_v57 = vsel %vm163_vm0, %v9210_v23, 0.0 }
0x1fb1   :  { %3451 = vadd.xlane.f32.xlu0 %v3450_v57 }
0x1fb2   :  { %v3453_v53 = vsel %vm163_vm0, %v9212_v41, 0.0 }
0x1fb3   :  { %3454 = vadd.xlane.f32.xlu1 %v3453_v53 }
0x203e   :  { %v3452_v62 = vpop.xlane.xlu0 %3451 }
0x203f   :  { %v3456_v51 = vmul.f32 0.015625, %v3452_v62 }
0x2040   :  { %v3455_v37 = vpop.xlane.xlu1 %3454 }
0x2041   :  { %v3458_v38 = vsub.f32 %v9210_v23, %v3456_v51  ;;  %v3457_v60 = vmul.f32 0.015625, %v3455_v37 }
0x2043   :  { %v3459_v54 = vsub.f32 %v9212_v41, %v3457_v60  ;;  %v3460_v24 = vmul.f32 %v3458_v38, %v3458_v38 }
0x2045   :  { %v3462_v58 = vsel %vm163_vm0, %v3460_v24, 0.0  ;;  %v3461_v48 = vmul.f32 %v3459_v54, %v3459_v54  ;;  %v9299_v24 = vld [vmem:[%s9296_s7] ss:$0 sm:$0xff] }
0x2046   :  { %3463 = vadd.xlane.f32.xlu0 %v3462_v58 }
0x2047   :  { %v3465_v25 = vsel %vm163_vm0, %v3461_v48, 0.0 }
0x2048   :  { %3466 = vadd.xlane.f32.xlu1 %v3465_v25 }
0x2074   :  { %v7374_v32 = vpop.f32.mrb[68].mxu0 }
0x2075   :  { %v7375_v33 = vpop.f32.mrb[69].mxu0 }
0x2076   :  { %v9236_v34 = vadd.f32 %v7375_v33, %v7374_v32  ;;  %v7377_v36 = vpop.f32.mrb[70].mxu0 }
0x2077   :  { %v7378_v39 = vpop.f32.mrb[71].mxu0 }
0x2078   :  { %v9238_v42 = vadd.f32 %v7378_v39, %v7377_v36 }
0x20d3   :  { %v3464_v50 = vpop.xlane.xlu0 %3463 }
0x20d4   :  { %v3468_v1 = vmul.f32 0.015625, %v3464_v50 }
0x20d5   :  { %v3467_v4 = vpop.xlane.xlu1 %3466 }
0x20d6   :  { %v3470_v5 = vadd.f32 1e-12, %v3468_v1  ;;  %v3469_v6 = vmul.f32 0.015625, %v3467_v4 }
0x20d8   :  { %8394 = vrsqrt.f32 %v3470_v5  ;;  %v3471_v7 = vadd.f32 1e-12, %v3469_v6 }
0x20da   :  { %8396 = vrsqrt.f32 %v3471_v7 }
0x20e2   :  { %v8395_v8 = vpop.eup %8394 }
0x20e3   :  { %v3474_v9 = vmul.f32 %v8395_v8, %v3458_v38 }
0x20e4   :  { %v8397_v10 = vpop.eup %8396 }
0x20e5   :  { %v3482_v12 = vmul.f32 %v7055_v52, %v3474_v9  ;;  %v3475_v13 = vmul.f32 %v8397_v10, %v3459_v54 }
0x20e7   :  { %v3483_v16 = vmul.f32 %v7055_v52, %v3475_v13  ;;  %v3490_v17 = vadd.f32 %v7056_v14, %v3482_v12 }
0x20e9   :  { %v3491_v18 = vadd.f32 %v7056_v14, %v3483_v16 }
0x20eb   :  { %v3510_v19 = vpack.c.bf16 %v3491_v18, %v3490_v17 }
0x20ed   :  { %7065 = vmatmul.mubr.msk.bf16.vlgmr.msra.gmra.mrb[72].mxu0 %vm163_vm0, %v3510_v19 }
0x20ee   :  { %7734 = vmatprep.mubr.msk.bf16.mxu0 %vm8507_vm1, %v8505_v40 }
0x21c0   :  { %v3599_v11 = vpop.f32.mrb[72].mxu0 }
0x21c1   :  { %v3600_v44 = vadd.f32 %v3599_v11, %v3515_v47  ;;  %v3601_v3 = vpop.f32.mrb[73].mxu0 }
0x21c2   :  { %v3603_v49 = vpop.f32.mrb[74].mxu0  ;;  %v3602_v35 = vadd.f32 %v3601_v3, %v3519_v63 }
0x21c3   :  { %v9262_v21 = vpack.c.bf16 %v3600_v44, %v3600_v44  ;;  %v3604_v0 = vadd.f32 %v3603_v49, %v3515_v47  ;;  %v3605_v20 = vpop.f32.mrb[75].mxu0 }
0x21c4   :  { %v3606_v62 = vadd.f32 %v3605_v20, %v3519_v63  ;;  %v9274_v37 = vpack.c.bf16 %v3602_v35, %v3602_v35 }
0x21c5   :  { %v9264_v22 = vpack.c.bf16 %v3604_v0, %v3604_v0  ;;  %3611 = vrot.lane.b32.xlu0 %v9262_v21, %s8508_s22 }
0x21c6   :  { %v9277_v38 = vpack.c.bf16 %v3606_v62, %v3606_v62  ;;  %v3748_v60 = vsel %vm472_vm2, %v9274_v37, 0 }
0x21c7   :  { %3660 = vrot.lane.b32.xlu1 %v9264_v22, %s8508_s22 }
0x21c8   :  { %v3794_v54 = vsel %vm472_vm2, %v9277_v38, 0 }
0x2237   :  { %v3612_v46 = vpop.permute.xlu0 %3611 }
0x2238   :  { %v3617_v57 = vsel %vm330_vm3, %v3612_v46, 0 }
0x2239   :  { %v3661_v53 = vpop.permute.xlu1 %3660  ;;  %7733 = vmatpush3.bf16.xpose.msra.mxu0 %v3617_v57 }
0x223a   :  { %v3666_v51 = vsel %vm330_vm3, %v3661_v53, 0  ;;  %7744 = vmatprep.subr.bf16.mxu0 %v8505_v40 }
0x223b   :  { %7739 = vmatpush3.bf16.xpose.msra.mxu1 %v3666_v51 }
0x223c   :  { %7750 = vmatprep.subr.bf16.mxu1 %v8505_v40 }
0x2240   :  { %7735 = vmatmul.mubr.msk.bf16.vlgmr.msra.gmra.mrb[76].mxu0 %vm330_vm3, %v9262_v21 }
0x2241   :  { %7745 = vmatpush3.bf16.msra.mxu0 %v3748_v60  ;;  %7746 = vmatprep.mubr.msk.bf16.mxu0 %vm8507_vm1, %v8505_v40 }
0x2242   :  { %7741 = vmatmul.mubr.msk.bf16.vlgmr.msra.gmra.mrb[92].mxu1 %vm330_vm3, %v9264_v22  ;;  %7756 = vmatprep.subr.bf16.mxu0 %v8505_v40 }
0x2243   :  { %7751 = vmatpush3.bf16.msra.mxu1 %v3794_v54  ;;  %7752 = vmatprep.mubr.msk.bf16.mxu1 %vm8507_vm1, %v8505_v40 }
0x2244   :  { %7762 = vmatprep.subr.bf16.mxu1 %v8505_v40 }
0x2313   :  { %v3653_v58 = vpop.f32.mrb[76].mxu0 }
0x2314   :  { %v3708_v48 = vmul.f32 0.25, %v3653_v58  ;;  %v7736_v25 = vpop.f32.mrb[77].mxu0 }
0x2315   :  { %v3656_v26 = vpop.f32.mrb[78].mxu0  ;;  %v3702_v27 = vpop.f32.mrb[92].mxu1 }
0x2316   :  { %v3716_v28 = vadd.f32 %v9299_v24, %v3708_v48  ;;  %v3709_v29 = vmul.f32 0.25, %v3702_v27  ;;  %v7737_v56 = vpop.f32.mrb[79].mxu0  ;;  %v7742_v30 = vpop.f32.mrb[93].mxu1 }
0x2317   :  { %v3705_v2 = vpop.f32.mrb[94].mxu1 }
0x2318   :  { %v3717_v31 = vadd.f32 %v9299_v24, %v3709_v29  ;;  %v7743_v32 = vpop.f32.mrb[95].mxu1  ;;  %v3718_v33 = vsel %vm442_vm4, %v3716_v28, -inf }
0x2319   :  { %3719 = vmax.xlane.f32.xlu1 %v3718_v33 }
0x231a   :  { %v3721_v36 = vsel %vm442_vm4, %v3717_v31, -inf }
0x231b   :  { %3722 = vmax.xlane.f32.xlu0 %v3721_v36 }
0x232a   :  { %3888 = vrot.lane.b32.xlu1 %v9264_v22, %s8510_s27 }
0x23a6   :  { %v3720_v39 = vpop.xlane.xlu1 %3719 }
0x23a7   :  { %v3724_v50 = vsub.f32 %v3716_v28, %v3720_v39 }
0x23a8   :  { %v3723_v1 = vpop.xlane.xlu0 %3722 }
0x23a9   :  { %v3726_v4 = vmul.f32 1.442695, %v3724_v50  ;;  %v3725_v5 = vsub.f32 %v3717_v31, %v3723_v1 }
0x23aa   :  { %v3889_v10 = vpop.permute.xlu1 %3888 }
0x23ab   :  { %8398 = vpow2.f32 %v3726_v4  ;;  %v3728_v6 = vmul.f32 1.442695, %v3725_v5  ;;  %v3894_v44 = vsel %vm330_vm3, %v3889_v10, 0 }
0x23ad   :  { %8400 = vpow2.f32 %v3728_v6 }
0x23b5   :  { %v8399_v7 = vpop.eup %8398 }
0x23b6   :  { %v3730_v8 = vsel %vm442_vm4, %v8399_v7, 0.0 }
0x23b7   :  { %v8401_v52 = vpop.eup %8400  ;;  %3731 = vadd.xlane.f32.xlu0 %v3730_v8 }
0x23b8   :  { %v3733_v9 = vsel %vm442_vm4, %v8401_v52, 0.0 }
0x23b9   :  { %3734 = vadd.xlane.f32.xlu1 %v3733_v9 }
0x23ca   :  { %3836 = vrot.lane.b32.xlu1 %v9262_v21, %s8511_s28 }
0x23cd   :  { %3838 = vrot.lane.b32.xlu0 %v9262_v21, %s8510_s27 }
0x23ce   :  { %3886 = vrot.lane.b32.xlu1 %v9264_v22, %s8511_s28 }
0x2444   :  { %v3732_v12 = vpop.xlane.xlu0 %3731 }
0x2445   :  { %8402 = vrcp.f32 %v3732_v12 }
0x2446   :  { %v3735_v13 = vpop.xlane.xlu1 %3734 }
0x2447   :  { %8404 = vrcp.f32 %v3735_v13 }
0x2448   :  { %v3839_v18 = vpop.permute.xlu0 %3838 }
0x2449   :  { %v3844_v47 = vsel %vm330_vm3, %v3839_v18, 0 }
0x244a   :  { %v3837_v3 = vpop.permute.xlu1 %3836 }
0x244e   :  { %v3887_v49 = vpop.permute.xlu1 %3886 }
0x244f   :  { %v8403_v14 = vpop.eup %8402 }
0x2450   :  { %v3738_v16 = vmul.f32 %v8403_v14, %v8399_v7 }
0x2451   :  { %v8405_v17 = vpop.eup %8404 }
0x2452   :  { %v3739_v19 = vmul.f32 %v8405_v17, %v8401_v52  ;;  %v3740_v59 = vpack.c.bf16 %v3738_v16, %v3738_v16 }
0x2454   :  { %7747 = vmatmul.mubr.msk.bf16.vlgmr.msra.gmra.mrb[80].mxu0 %vm442_vm4, %v3740_v59  ;;  %v3741_v11 = vpack.c.bf16 %v3739_v19, %v3739_v19 }
0x2455   :  { %7757 = vmatpush3.bf16.xpose.msra.mxu0 %v3844_v47  ;;  %7758 = vmatprep.mubr.msk.bf16.mxu0 %vm8507_vm1, %v8505_v40 }
0x2456   :  { %7753 = vmatmul.mubr.msk.bf16.vlgmr.msra.gmra.mrb[96].mxu1 %vm442_vm4, %v3741_v11  ;;  %7768 = vmatprep.subr.bf16.mxu0 %v8505_v40 }
0x2457   :  { %7763 = vmatpush3.bf16.xpose.msra.mxu1 %v3894_v44  ;;  %7764 = vmatprep.mubr.msk.bf16.mxu1 %vm8507_vm1, %v8505_v40 }
0x2458   :  { %7774 = vmatprep.subr.bf16.mxu1 %v8505_v40 }
0x245c   :  { %7759 = vmatmul.mubr.msk.bf16.vlgmr.msra.gmra.mrb[84].mxu0 %vm330_vm3, %v3837_v3 }
0x245d   :  { %7770 = vmatprep.mubr.msk.bf16.mxu0 %vm8507_vm1, %v8505_v40 }
0x245e   :  { %7765 = vmatmul.mubr.msk.bf16.vlgmr.msra.gmra.mrb[100].mxu1 %vm330_vm3, %v3887_v49 }
0x245f   :  { %7776 = vmatprep.mubr.msk.bf16.mxu1 %vm8507_vm1, %v8505_v40 }
0x2527   :  { %v9331_v0 = vpop.f32.mrb[80].mxu0 }
0x2528   :  { %v7748_v20 = vpop.f32.mrb[81].mxu0 }
0x2529   :  { %v3787_v63 = vpop.f32.mrb[82].mxu0  ;;  %v9333_v46 = vpop.f32.mrb[96].mxu1 }
0x252a   :  { %v7749_v35 = vpop.f32.mrb[83].mxu0  ;;  %v7754_v57 = vpop.f32.mrb[97].mxu1 }
0x252b   :  { %v3833_v53 = vpop.f32.mrb[98].mxu1 }
0x252c   :  { %v7755_v62 = vpop.f32.mrb[99].mxu1 }
0x252f   :  { %v3880_v51 = vpop.f32.mrb[84].mxu0 }
0x2530   :  { %v3936_v60 = vmul.f32 0.25, %v3880_v51  ;;  %v7760_v54 = vpop.f32.mrb[85].mxu0 }
0x2531   :  { %v3883_v58 = vpop.f32.mrb[86].mxu0  ;;  %v3930_v48 = vpop.f32.mrb[100].mxu1 }
0x2532   :  { %v3938_v25 = vadd.f32 %v9299_v24, %v3936_v60  ;;  %v3937_v26 = vmul.f32 0.25, %v3930_v48  ;;  %v7761_v27 = vpop.f32.mrb[87].mxu0  ;;  %v7766_v28 = vpop.f32.mrb[101].mxu1 }
0x2533   :  { %v3933_v29 = vpop.f32.mrb[102].mxu1 }
0x2534   :  { %v3939_v56 = vadd.f32 %v9299_v24, %v3937_v26  ;;  %v7767_v30 = vpop.f32.mrb[103].mxu1  ;;  %v3940_v2 = vsel %vm442_vm4, %v3938_v25, -inf }
0x2535   :  { %3941 = vmax.xlane.f32.xlu0 %v3940_v2 }
0x2536   :  { %v3943_v31 = vsel %vm442_vm4, %v3939_v56, -inf }
0x2537   :  { %3944 = vmax.xlane.f32.xlu1 %v3943_v31 }
0x2548   :  { %4014 = vrot.lane.b32.xlu1 %v9277_v38, %s8511_s28 }
0x254c   :  { %4064 = vrot.lane.b32.xlu1 %v9262_v21, %s8512_s29 }
0x2550   :  { %4114 = vrot.lane.b32.xlu1 %v9264_v22, %s8512_s29 }
0x2554   :  { %4112 = vrot.lane.b32.xlu1 %v9264_v22, %s8513_s30 }
0x25c2   :  { %v3942_v32 = vpop.xlane.xlu0 %3941 }
0x25c3   :  { %v3946_v33 = vsub.f32 %v3938_v25, %v3942_v32 }
0x25c4   :  { %v3945_v36 = vpop.xlane.xlu1 %3944 }
0x25c5   :  { %v3948_v39 = vmul.f32 1.442695, %v3946_v33  ;;  %v3947_v50 = vsub.f32 %v3939_v56, %v3945_v36 }
0x25c7   :  { %8406 = vpow2.f32 %v3948_v39  ;;  %v3950_v1 = vmul.f32 1.442695, %v3947_v50 }
0x25c8   :  { %v4015_v4 = vpop.permute.xlu1 %4014 }
0x25c9   :  { %8408 = vpow2.f32 %v3950_v1  ;;  %v4020_v5 = vsel %vm472_vm2, %v4015_v4, 0 }
0x25ca   :  { %7775 = vmatpush3.bf16.msra.mxu1 %v4020_v5 }
0x25cb   :  { %7786 = vmatprep.subr.bf16.mxu1 %v8505_v40 }
0x25cc   :  { %v4065_v16 = vpop.permute.xlu1 %4064 }
0x25cd   :  { %v4070_v11 = vsel %vm330_vm3, %v4065_v16, 0 }
0x25d0   :  { %v4115_v47 = vpop.permute.xlu1 %4114 }
0x25d1   :  { %v8407_v6 = vpop.eup %8406  ;;  %v4120_v3 = vsel %vm330_vm3, %v4115_v47, 0 }
0x25d2   :  { %v3952_v7 = vsel %vm442_vm4, %v8407_v6, 0.0 }
0x25d3   :  { %v8409_v8 = vpop.eup %8408  ;;  %3953 = vadd.xlane.f32.xlu0 %v3952_v7 }
0x25d4   :  { %v3955_v52 = vsel %vm442_vm4, %v8409_v8, 0.0  ;;  %v4113_v20 = vpop.permute.xlu1 %4112 }
0x25d7   :  { %3956 = vadd.xlane.f32.xlu0 %v3955_v52 }
0x25ed   :  { %3965 = vrot.lane.b32.xlu0 %v9274_v37, %s8511_s28 }
0x25f1   :  { %4062 = vrot.lane.b32.xlu0 %v9262_v21, %s8513_s30 }
0x2660   :  { %v3954_v9 = vpop.xlane.xlu0 %3953 }
0x2661   :  { %8410 = vrcp.f32 %v3954_v9 }
0x2664   :  { %v3957_v10 = vpop.xlane.xlu0 %3956 }
0x2665   :  { %8412 = vrcp.f32 %v3957_v10 }
0x2668   :  { %v3966_v12 = vpop.permute.xlu0 %3965 }
0x2669   :  { %v3971_v13 = vsel %vm472_vm2, %v3966_v12, 0 }
0x266a   :  { %7769 = vmatpush3.bf16.msra.mxu0 %v3971_v13 }
0x266b   :  { %v8411_v14 = vpop.eup %8410  ;;  %7780 = vmatprep.subr.bf16.mxu0 %v8505_v40 }
0x266c   :  { %v3960_v17 = vmul.f32 %v8411_v14, %v8407_v6  ;;  %v4063_v49 = vpop.permute.xlu0 %4062 }
0x266e   :  { %v3962_v18 = vpack.c.bf16 %v3960_v17, %v3960_v17 }
0x266f   :  { %v8413_v19 = vpop.eup %8412 }
0x2670   :  { %v3961_v59 = vmul.f32 %v8413_v19, %v8409_v8  ;;  %7771 = vmatmul.mubr.msk.bf16.vlgmr.msra.gmra.mrb[88].mxu0 %vm442_vm4, %v3962_v18 }
0x2671   :  { %7782 = vmatprep.mubr.msk.bf16.mxu0 %vm8507_vm1, %v8505_v40 }
0x2672   :  { %v3963_v44 = vpack.c.bf16 %v3961_v59, %v3961_v59 }
0x2673   :  { %7781 = vmatpush3.bf16.xpose.msra.mxu0 %v4070_v11 }
0x2674   :  { %7777 = vmatmul.mubr.msk.bf16.vlgmr.msra.gmra.mrb[104].mxu1 %vm442_vm4, %v3963_v44  ;;  %7792 = vmatprep.subr.bf16.mxu0 %v8505_v40 }
0x2675   :  { %7787 = vmatpush3.bf16.xpose.msra.mxu1 %v4120_v3  ;;  %7788 = vmatprep.mubr.msk.bf16.mxu1 %vm8507_vm1, %v8505_v40 }
0x2676   :  { %7798 = vmatprep.subr.bf16.mxu1 %v8505_v40 }
0x267a   :  { %7783 = vmatmul.mubr.msk.bf16.vlgmr.msra.gmra.mrb[92].mxu0 %vm330_vm3, %v4063_v49 }
0x267b   :  { %7794 = vmatprep.mubr.msk.bf16.mxu0 %vm8507_vm1, %v8505_v40 }
0x267c   :  { %7789 = vmatmul.mubr.msk.bf16.vlgmr.msra.gmra.mrb[108].mxu1 %vm330_vm3, %v4113_v20 }
0x267d   :  { %7800 = vmatprep.mubr.msk.bf16.mxu1 %vm8507_vm1, %v8505_v40 }
0x2743   :  { %v9373_v63 = vpop.f32.mrb[88].mxu0 }
0x2744   :  { %v7772_v35 = vpop.f32.mrb[89].mxu0 }
0x2745   :  { %v4010_v57 = vpop.f32.mrb[90].mxu0 }
0x2746   :  { %v7773_v53 = vpop.f32.mrb[91].mxu0 }
0x2747   :  { %v9375_v62 = vpop.f32.mrb[104].mxu1 }
0x2748   :  { %v8064_v51 = vpack.i.bf16 %v9375_v62, %v9373_v63  ;;  %v7778_v60 = vpop.f32.mrb[105].mxu1 }
0x2749   :  { %v4059_v54 = vpop.f32.mrb[106].mxu1 }
0x274a   :  { %v7779_v58 = vpop.f32.mrb[107].mxu1 }
0x274d   :  { %v4106_v48 = vpop.f32.mrb[92].mxu0 }
0x274e   :  { %v4162_v25 = vmul.f32 0.25, %v4106_v48  ;;  %v7784_v26 = vpop.f32.mrb[93].mxu0 }
0x274f   :  { %v4109_v27 = vpop.f32.mrb[94].mxu0  ;;  %v4156_v28 = vpop.f32.mrb[108].mxu1 }
0x2750   :  { %v4164_v29 = vadd.f32 %v9299_v24, %v4162_v25  ;;  %v4163_v56 = vmul.f32 0.25, %v4156_v28  ;;  %v7785_v30 = vpop.f32.mrb[95].mxu0  ;;  %v7790_v2 = vpop.f32.mrb[109].mxu1 }
0x2751   :  { %v4159_v31 = vpop.f32.mrb[110].mxu1 }
0x2752   :  { %v4165_v32 = vadd.f32 %v9299_v24, %v4163_v56  ;;  %v7791_v33 = vpop.f32.mrb[111].mxu1  ;;  %v4166_v36 = vsel %vm442_vm4, %v4164_v29, -inf }
0x2753   :  { %4167 = vmax.xlane.f32.xlu0 %v4166_v36 }
0x2754   :  { %v4169_v39 = vsel %vm442_vm4, %v4165_v32, -inf }
0x2755   :  { %4170 = vmax.xlane.f32.xlu1 %v4169_v39 }
0x2766   :  { %4238 = vrot.lane.b32.xlu1 %v9277_v38, %s8513_s30 }
0x276a   :  { %4288 = vrot.lane.b32.xlu1 %v9262_v21, %s8514_s1 }
0x276e   :  { %4338 = vrot.lane.b32.xlu1 %v9264_v22, %s8514_s1 }
0x2772   :  { %4336 = vrot.lane.b32.xlu1 %v9264_v22, %s8515_s2 }
0x27e0   :  { %v4168_v50 = vpop.xlane.xlu0 %4167 }
0x27e1   :  { %v4172_v1 = vsub.f32 %v4164_v29, %v4168_v50 }
0x27e2   :  { %v4171_v4 = vpop.xlane.xlu1 %4170 }
0x27e3   :  { %v4174_v5 = vmul.f32 1.442695, %v4172_v1  ;;  %v4173_v6 = vsub.f32 %v4165_v32, %v4171_v4 }
0x27e5   :  { %8414 = vpow2.f32 %v4174_v5  ;;  %v4176_v7 = vmul.f32 1.442695, %v4173_v6 }
0x27e6   :  { %v4239_v8 = vpop.permute.xlu1 %4238 }
0x27e7   :  { %8416 = vpow2.f32 %v4176_v7  ;;  %v4244_v52 = vsel %vm472_vm2, %v4239_v8, 0 }
0x27e8   :  { %7799 = vmatpush3.bf16.msra.mxu1 %v4244_v52 }
0x27e9   :  { %7810 = vmatprep.subr.bf16.mxu1 %v8505_v40 }
0x27ea   :  { %v4289_v19 = vpop.permute.xlu1 %4288 }
0x27ee   :  { %v4339_v3 = vpop.permute.xlu1 %4338 }
0x27ef   :  { %v8415_v9 = vpop.eup %8414  ;;  %v4344_v20 = vsel %vm330_vm3, %v4339_v3, 0  ;;  %v8207_v3 = vld [vmem:[%s9443_s23 + $0x8] sm:$0xff]  }
0x27f0   :  { %v4178_v10 = vsel %vm442_vm4, %v8415_v9, 0.0 }
0x27f1   :  { %v8417_v12 = vpop.eup %8416  ;;  %4179 = vadd.xlane.f32.xlu0 %v4178_v10 }
0x27f2   :  { %v4181_v22 = vsel %vm442_vm4, %v8417_v12, 0.0  ;;  %v4337_v57 = vpop.permute.xlu1 %4336 }
0x27f5   :  { %4182 = vadd.xlane.f32.xlu0 %v4181_v22 }
0x280b   :  { %4190 = vrot.lane.b32.xlu0 %v9274_v37, %s8513_s30 }
0x280f   :  { %4286 = vrot.lane.b32.xlu0 %v9262_v21, %s8515_s2  ;;  %v4294_v21 = vsel %vm330_vm3, %v4289_v19, 0 }
0x287e   :  { %v4180_v13 = vpop.xlane.xlu0 %4179 }
0x287f   :  { %8418 = vrcp.f32 %v4180_v13 }
0x2882   :  { %v4183_v14 = vpop.xlane.xlu0 %4182 }
0x2883   :  { %8420 = vrcp.f32 %v4183_v14 }
0x2886   :  { %v4191_v16 = vpop.permute.xlu0 %4190 }
0x2887   :  { %v4196_v17 = vsel %vm472_vm2, %v4191_v16, 0 }
0x2888   :  { %7793 = vmatpush3.bf16.msra.mxu0 %v4196_v17 }
0x2889   :  { %v8419_v18 = vpop.eup %8418  ;;  %7804 = vmatprep.subr.bf16.mxu0 %v8505_v40 }
0x288a   :  { %v4186_v59 = vmul.f32 %v8419_v18, %v8415_v9  ;;  %v4287_v35 = vpop.permute.xlu0 %4286 }
0x288c   :  { %v4188_v47 = vpack.c.bf16 %v4186_v59, %v4186_v59 }
0x288d   :  { %v8421_v11 = vpop.eup %8420 }
0x288e   :  { %v4187_v44 = vmul.f32 %v8421_v11, %v8417_v12  ;;  %7795 = vmatmul.mubr.msk.bf16.vlgmr.msra.gmra.mrb[96].mxu0 %vm442_vm4, %v4188_v47 }
0x288f   :  { %7806 = vmatprep.mubr.msk.bf16.mxu0 %vm8507_vm1, %v8505_v40 }
0x2890   :  { %v4189_v49 = vpack.c.bf16 %v4187_v44, %v4187_v44  ;;  %v8206_v44 = vld [vmem:[%s9443_s23] sm:$0xff]  }
0x2891   :  { %7805 = vmatpush3.bf16.xpose.msra.mxu0 %v4294_v21  ;;  %v8208_v21 = vld [vmem:[%s9443_s23 + $0x10] sm:$0xff]  }
0x2892   :  { %7801 = vmatmul.mubr.msk.bf16.vlgmr.msra.gmra.mrb[112].mxu1 %vm442_vm4, %v4189_v49  ;;  %7816 = vmatprep.subr.bf16.mxu0 %v8505_v40  ;;  %v8209_v49 = vld [vmem:[%s9443_s23 + $0x18] sm:$0xff]  }
0x2893   :  { %7811 = vmatpush3.bf16.xpose.msra.mxu1 %v4344_v20  ;;  %7812 = vmatprep.mubr.msk.bf16.mxu1 %vm8507_vm1, %v8505_v40 }
0x2894   :  { %7822 = vmatprep.subr.bf16.mxu1 %v8505_v40 }
0x2898   :  { %7807 = vmatmul.mubr.msk.bf16.vlgmr.msra.gmra.mrb[100].mxu0 %vm330_vm3, %v4287_v35 }
0x2899   :  { %7818 = vmatprep.mubr.msk.bf16.mxu0 %vm8507_vm1, %v8505_v40 }
0x289a   :  { %7813 = vmatmul.mubr.msk.bf16.vlgmr.msra.gmra.mrb[116].mxu1 %vm330_vm3, %v4337_v57 }
0x289b   :  { %7824 = vmatprep.mubr.msk.bf16.mxu1 %vm8507_vm1, %v8505_v40 }
0x2961   :  { %v4232_v53 = vpop.f32.mrb[96].mxu0 }
0x2962   :  { %v7796_v60 = vpop.f32.mrb[97].mxu0 }
0x2963   :  { %v4235_v54 = vpop.f32.mrb[98].mxu0 }
0x2964   :  { %v7797_v58 = vpop.f32.mrb[99].mxu0 }
0x2965   :  { %v4280_v48 = vpop.f32.mrb[112].mxu1 }
0x2966   :  { %v8069_v25 = vpack.i.bf16 %v4280_v48, %v4232_v53  ;;  %v7802_v26 = vpop.f32.mrb[113].mxu1 }
0x2967   :  { %v4283_v27 = vpop.f32.mrb[114].mxu1 }
0x2968   :  { %v7803_v28 = vpop.f32.mrb[115].mxu1 }
0x296b   :  { %v4330_v29 = vpop.f32.mrb[100].mxu0 }
0x296c   :  { %v4386_v56 = vmul.f32 0.25, %v4330_v29  ;;  %v7808_v30 = vpop.f32.mrb[101].mxu0 }
0x296d   :  { %v4333_v2 = vpop.f32.mrb[102].mxu0  ;;  %v4380_v31 = vpop.f32.mrb[116].mxu1 }
0x296e   :  { %v4388_v32 = vadd.f32 %v9299_v24, %v4386_v56  ;;  %v4387_v33 = vmul.f32 0.25, %v4380_v31  ;;  %v7809_v36 = vpop.f32.mrb[103].mxu0  ;;  %v7814_v39 = vpop.f32.mrb[117].mxu1 }
0x296f   :  { %v4383_v50 = vpop.f32.mrb[118].mxu1 }
0x2970   :  { %v4389_v1 = vadd.f32 %v9299_v24, %v4387_v33  ;;  %v7815_v4 = vpop.f32.mrb[119].mxu1  ;;  %v4390_v5 = vsel %vm442_vm4, %v4388_v32, -inf }
0x2971   :  { %4391 = vmax.xlane.f32.xlu0 %v4390_v5 }
0x2972   :  { %v4393_v6 = vsel %vm442_vm4, %v4389_v1, -inf }
0x2973   :  { %4394 = vmax.xlane.f32.xlu1 %v4393_v6 }
0x2984   :  { %4462 = vrot.lane.b32.xlu1 %v9277_v38, %s8515_s2 }
0x2988   :  { %8065 = vrot.lane.b32.xlu1 %v8064_v51, %s8514_s1 }
0x298c   :  { %8070 = vrot.lane.b32.xlu1 %v8069_v25, %s8512_s29 }
0x29fe   :  { %v4392_v7 = vpop.xlane.xlu0 %4391 }
0x29ff   :  { %v4396_v8 = vsub.f32 %v4388_v32, %v4392_v7 }
0x2a00   :  { %v4395_v24 = vpop.xlane.xlu1 %4394 }
0x2a01   :  { %v4398_v52 = vmul.f32 1.442695, %v4396_v8  ;;  %v4397_v9 = vsub.f32 %v4389_v1, %v4395_v24 }
0x2a03   :  { %8422 = vpow2.f32 %v4398_v52  ;;  %v4400_v10 = vmul.f32 1.442695, %v4397_v9 }
0x2a04   :  { %v4463_v12 = vpop.permute.xlu1 %4462 }
0x2a05   :  { %8424 = vpow2.f32 %v4400_v10  ;;  %v4468_v22 = vsel %vm472_vm2, %v4463_v12, 0 }
0x2a06   :  { %7823 = vmatpush3.bf16.msra.mxu1 %v4468_v22 }
0x2a08   :  { %v8066_v26 = vpop.permute.xlu1 %8065 }
0x2a09   :  { %v8068_v28 = vunpack.i.h.bf16 %v8066_v26  ;;  %v8067_v29 = vunpack.i.l.bf16 %v8066_v26 }
0x2a0b   :  { %v4535_v31 = vsel %vm330_vm3, %v9333_v46, %v8068_v28  ;;  %v4534_v32 = vsel %vm330_vm3, %v9331_v0, %v8067_v29  ;;  %v7083_v0 = vld [vmem:[%s9465_s21] ss:$0 sm:$0xff] }
0x2a0c   :  { %v8071_v27 = vpop.permute.xlu1 %8070 }
0x2a0d   :  { %v8423_v38 = vpop.eup %8422  ;;  %v8073_v56 = vunpack.i.h.bf16 %v8071_v27  ;;  %v8072_v30 = vunpack.i.l.bf16 %v8071_v27  ;;  %v7090_v27 = vld [vmem:[%s9503_s9] ss:$0 sm:$0xff] }
0x2a0e   :  { %v4402_v13 = vsel %vm442_vm4, %v8423_v38, 0.0 }
0x2a0f   :  { %v8425_v14 = vpop.eup %8424  ;;  %4403 = vadd.xlane.f32.xlu0 %v4402_v13  ;;  %v4537_v39 = vsel %vm1262_vm5, %v4535_v31, %v8073_v56  ;;  %v4536_v50 = vsel %vm1262_vm5, %v4534_v32, %v8072_v30  ;;  %v8223_v31 = vld [vmem:[%s9512_s10] sm:$0xff]   ;;  %v8224_v32 = vld [vmem:[%s9512_s10 + $0x48] sm:$0xff]  }
0x2a10   :  { %v4405_v63 = vsel %vm442_vm4, %v8425_v14, 0.0 }
0x2a13   :  { %4406 = vadd.xlane.f32.xlu0 %v4405_v63 }
0x2a29   :  { %4414 = vrot.lane.b32.xlu0 %v9274_v37, %s8515_s2 }
0x2a9c   :  { %v4404_v62 = vpop.xlane.xlu0 %4403 }
0x2a9d   :  { %8426 = vrcp.f32 %v4404_v62 }
0x2aa0   :  { %v4407_v51 = vpop.xlane.xlu0 %4406 }
0x2aa1   :  { %8428 = vrcp.f32 %v4407_v51 }
0x2aa4   :  { %v4415_v16 = vpop.permute.xlu0 %4414 }
0x2aa5   :  { %v4420_v17 = vsel %vm472_vm2, %v4415_v16, 0 }
0x2aa6   :  { %7817 = vmatpush3.bf16.msra.mxu0 %v4420_v17 }
0x2aa7   :  { %v8427_v18 = vpop.eup %8426  ;;  %7828 = vmatprep.subr.bf16.mxu0 %v8505_v40 }
0x2aa8   :  { %v4410_v19 = vmul.f32 %v8427_v18, %v8423_v38  ;;  %v8212_v18 = vld [vmem:[%s9485_s12 + $0x4] ss:$8 sps:$4 sm:$0xff]  }
0x2aa9   :  { %4725 = vmatprep.subr.bf16.mxu1 %v8212_v18 }
0x2aaa   :  { %v4412_v59 = vpack.c.bf16 %v4410_v19, %v4410_v19  ;;  %v8210_v19 = vld [vmem:[%s9485_s12] ss:$8 sps:$4 sm:$0xff]  }
0x2aab   :  { %v8429_v47 = vpop.eup %8428 }
0x2aac   :  { %v4411_v11 = vmul.f32 %v8429_v47, %v8425_v14  ;;  %7819 = vmatmul.mubr.msk.bf16.vlgmr.msra.gmra.mrb[104].mxu0 %vm442_vm4, %v4412_v59  ;;  %v8215_v59 = vld [vmem:[%s9485_s12 + $0x14] ss:$8 sps:$4 sm:$0xff]   ;;  %v8213_v47 = vld [vmem:[%s9485_s12 + $0x10] ss:$8 sps:$4 sm:$0xff]  }
0x2aad   :  { %7836 = vmatprep.mubr.msk.bf16.mxu0 %vm8507_vm1, %v8505_v40  ;;  %7829 = vmatpush3.bf16.msra.mxu0 %v8206_v44  ;;  %v8219_v44 = vld [vmem:[%s9485_s12 + $0x30] ss:$8 sps:$4 sm:$0xff]  }
0x2aae   :  { %v4413_v37 = vpack.c.bf16 %v4411_v11, %v4411_v11  ;;  %7830 = vmatprep.subr.bf16.mxu0 %v8505_v40  ;;  %v8218_v11 = vld [vmem:[%s9485_s12 + $0x24] ss:$8 sps:$4 sm:$0xff]  }
0x2ab0   :  { %7825 = vmatmul.mubr.msk.bf16.vlgmr.msra.gmra.mrb[120].mxu1 %vm442_vm4, %v4413_v37  ;;  %v8216_v37 = vld [vmem:[%s9485_s12 + $0x20] ss:$8 sps:$4 sm:$0xff]  }
0x2ab1   :  { %4757 = vmatprep.mubr.bf16.mxu1 %v8502_v15  ;;  %7831 = vmatpush3.bf16.msra.mxu0 %v8207_v3  ;;  %v8221_v3 = vld [vmem:[%s9485_s12 + $0x34] ss:$8 sps:$4 sm:$0xff]  }
0x2ab2   :  { %7832 = vmatprep.subr.bf16.mxu0 %v8505_v40  ;;  %4726 = vmatpush1.bf16.msra.mxu1 %v8210_v19 }
0x2ab3   :  { %4727 = vmatprep.subr.bf16.mxu1 %v8215_v59 }
0x2ab5   :  { %7833 = vmatpush3.bf16.msra.mxu0 %v8208_v21 }
0x2ab6   :  { %7834 = vmatprep.subr.bf16.mxu0 %v8505_v40  ;;  %4728 = vmatpush1.bf16.msra.mxu1 %v8213_v47 }
0x2ab7   :  { %4729 = vmatprep.subr.bf16.mxu1 %v8218_v11 }
0x2ab9   :  { %7835 = vmatpush3.bf16.msra.mxu0 %v8209_v49 }
0x2aba   :  { %4730 = vmatpush1.bf16.msra.mxu1 %v8216_v37 }
0x2abb   :  { %4731 = vmatprep.subr.bf16.mxu1 %v8221_v3 }
0x2abe   :  { %4732 = vmatpush1.bf16.msra.mxu1 %v8219_v44 }
0x2b7f   :  { %v4456_v20 = vpop.f32.mrb[104].mxu0 }
0x2b80   :  { %v7820_v35 = vpop.f32.mrb[105].mxu0 }
0x2b81   :  { %v4459_v57 = vpop.f32.mrb[106].mxu0 }
0x2b82   :  { %v7821_v53 = vpop.f32.mrb[107].mxu0 }
0x2b83   :  { %v4504_v60 = vpop.f32.mrb[120].mxu1 }
0x2b84   :  { %v8074_v54 = vpack.i.bf16 %v4504_v60, %v4456_v20  ;;  %v7826_v58 = vpop.f32.mrb[121].mxu1 }
0x2b85   :  { %v4507_v48 = vpop.f32.mrb[122].mxu1  ;;  %v7089_v58 = vld [vmem:[%s9498_s13] ss:$0 sm:$0xff] }
0x2b86   :  { %v7827_v25 = vpop.f32.mrb[123].mxu1  ;;  %8075 = vrot.lane.b32.xlu0 %v8074_v54, %s8510_s27 }
0x2bf8   :  { %v8076_v2 = vpop.permute.xlu0 %8075 }
0x2bf9   :  { %v8078_v33 = vunpack.i.h.bf16 %v8076_v2  ;;  %v8077_v36 = vunpack.i.l.bf16 %v8076_v2  ;;  %v8222_v2 = vld [vmem:[%s9512_s10 + $0x40] sm:$0xff]  }
0x2bfa   :  { %7417 = vmatprep.subr.bf16.mxu0 %v8222_v2 }
0x2bfb   :  { %v4539_v1 = vsel %vm1265_vm6, %v4537_v39, %v8078_v33  ;;  %v4538_v4 = vsel %vm1265_vm6, %v4536_v50, %v8077_v36  ;;  %v8225_v33 = vld [vmem:[%s9512_s10 + $0x8] sm:$0xff]   ;;  %v8226_v36 = vld [vmem:[%s9512_s10 + $0x50] sm:$0xff]   ;;  %v8228_v50 = vld [vmem:[%s9512_s10 + $0x58] sm:$0xff]  }
0x2bfc   :  { %v4540_v5 = vpack.c.bf16 %v4539_v1, %v4538_v4  ;;  %v8227_v39 = vld [vmem:[%s9512_s10 + $0x10] sm:$0xff]   ;;  %v8229_v1 = vld [vmem:[%s9512_s10 + $0x18] sm:$0xff]   ;;  %v8230_v4 = vld [vmem:[%s9512_s10 + $0x60] sm:$0xff]  }
0x2bfe   :  { %7837 = vmatmul.mubr.msk.bf16.vlgmr.msra.gmra.mrb[108].mxu0 %vm163_vm0, %v4540_v5  ;;  %v8231_v5 = vld [vmem:[%s9512_s10 + $0x20] sm:$0xff]  }
0x2bff   :  { %7418 = vmatpush3.bf16.msra.mxu0 %v8223_v31 }
0x2c00   :  { %7419 = vmatprep.subr.bf16.mxu0 %v8224_v32 }
0x2c03   :  { %7420 = vmatpush3.bf16.msra.mxu0 %v8225_v33 }
0x2c04   :  { %7421 = vmatprep.subr.bf16.mxu0 %v8226_v36 }
0x2c07   :  { %7422 = vmatpush3.bf16.msra.mxu0 %v8227_v39 }
0x2c08   :  { %7423 = vmatprep.subr.bf16.mxu0 %v8228_v50 }
0x2c0b   :  { %7424 = vmatpush3.bf16.msra.mxu0 %v8229_v1 }
0x2c0c   :  { %7425 = vmatprep.subr.bf16.mxu0 %v8230_v4 }
0x2c0f   :  { %7426 = vmatpush3.bf16.msra.mxu0 %v8231_v5 }
0x2cd1   :  { %v4608_v46 = vpop.f32.mrb[108].mxu0 }
0x2cd2   :  { %v4609_v6 = vadd.f32 %v7083_v0, %v4608_v46  ;;  %v7838_v7 = vpop.f32.mrb[109].mxu0  ;;  %v8233_v46 = vld [vmem:[%s9512_s10 + $0x28] sm:$0xff]  }
0x2cd3   :  { %v4611_v8 = vpop.f32.mrb[110].mxu0  ;;  %v8235_v7 = vld [vmem:[%s9512_s10 + $0x30] sm:$0xff]  }
0x2cd4   :  { %v9469_v24 = vadd.f32 %v4609_v6, %v9210_v23  ;;  %v4612_v52 = vadd.f32 %v7083_v0, %v4611_v8  ;;  %v7839_v9 = vpop.f32.mrb[111].mxu0  ;;  %v8232_v0 = vld [vmem:[%s9512_s10 + $0x68] sm:$0xff]   ;;  %v8234_v6 = vld [vmem:[%s9512_s10 + $0x70] sm:$0xff]   ;;  %v8236_v8 = vld [vmem:[%s9512_s10 + $0x78] sm:$0xff]  }
0x2cd5   :  { %7427 = vmatprep.subr.bf16.mxu0 %v8232_v0  ;;  %v4670_v9 = vld [vmem:[%s9534_s16] sm:$0x3] }
0x2cd6   :  { %v9472_v10 = vadd.f32 %v4612_v52, %v9212_v41  ;;  %v4619_v12 = vsel %vm163_vm0, %v9469_v24, 0.0  ;;  %7428 = vmatpush3.bf16.msra.mxu0 %v8233_v46  ;;  %v8237_v52 = vld [vmem:[%s9512_s10 + $0x38] sm:$0xff]  }
0x2cd7   :  { %4620 = vadd.xlane.f32.xlu1 %v4619_v12  ;;  %7429 = vmatprep.subr.bf16.mxu0 %v8234_v6  ;;  %v4675_v12 = vrot.slane %v4670_v9, %v8593_v43  ;;  %v7100_v6 = vld [vmem:[%s9544_s26] ss:$0 sm:$0xff] }
0x2cd8   :  { %v4622_v22 = vsel %vm163_vm0, %v9472_v10, 0.0 }
0x2cd9   :  { %4623 = vadd.xlane.f32.xlu0 %v4622_v22  ;;  %v4679_v22 = vrot.slane %v4670_v9, %v8596_v45 }
0x2cda   :  { %7430 = vmatpush3.bf16.msra.mxu0 %v8235_v7 }
0x2cdb   :  { %7431 = vmatprep.subr.bf16.mxu0 %v8236_v8 }
0x2cde   :  { %7432 = vmatpush3.bf16.msra.mxu0 %v8237_v52 }
0x2cdf   :  { %7852 = vmatprep.subr.bf16.mxu0 %v8505_v40 }
0x2d64   :  { %v4621_v38 = vpop.xlane.xlu1 %4620 }
0x2d65   :  { %v4625_v13 = vmul.f32 0.015625, %v4621_v38 }
0x2d66   :  { %v4624_v14 = vpop.xlane.xlu0 %4623 }
0x2d67   :  { %v4627_v63 = vsub.f32 %v9469_v24, %v4625_v13  ;;  %v4626_v23 = vmul.f32 0.015625, %v4624_v14 }
0x2d69   :  { %v4628_v62 = vsub.f32 %v9472_v10, %v4626_v23  ;;  %v4629_v51 = vmul.f32 %v4627_v63, %v4627_v63 }
0x2d6b   :  { %v4631_v41 = vsel %vm163_vm0, %v4629_v51, 0.0  ;;  %v4630_v16 = vmul.f32 %v4628_v62, %v4628_v62 }
0x2d6c   :  { %4632 = vadd.xlane.f32.xlu0 %v4631_v41 }
0x2d6d   :  { %v4634_v17 = vsel %vm163_vm0, %v4630_v16, 0.0 }
0x2d70   :  { %4635 = vadd.xlane.f32.xlu0 %v4634_v17 }
0x2df9   :  { %v4633_v21 = vpop.xlane.xlu0 %4632 }
0x2dfa   :  { %v4637_v49 = vmul.f32 0.015625, %v4633_v21 }
0x2dfc   :  { %v4639_v20 = vadd.f32 1e-12, %v4637_v49 }
0x2dfd   :  { %v4636_v35 = vpop.xlane.xlu0 %4635 }
0x2dfe   :  { %8430 = vrsqrt.f32 %v4639_v20  ;;  %v4638_v57 = vmul.f32 0.015625, %v4636_v35 }
0x2e00   :  { %v4640_v53 = vadd.f32 1e-12, %v4638_v57 }
0x2e02   :  { %8432 = vrsqrt.f32 %v4640_v53 }
0x2e08   :  { %v8431_v60 = vpop.eup %8430 }
0x2e09   :  { %v4643_v54 = vmul.f32 %v8431_v60, %v4627_v63 }
0x2e0b   :  { %v4651_v25 = vmul.f32 %v7089_v58, %v4643_v54 }
0x2e0c   :  { %v8433_v48 = vpop.eup %8432 }
0x2e0d   :  { %v4644_v26 = vmul.f32 %v8433_v48, %v4628_v62  ;;  %v4659_v29 = vadd.f32 %v7090_v27, %v4651_v25 }
0x2e0f   :  { %v4652_v28 = vmul.f32 %v7089_v58, %v4644_v26 }
0x2e11   :  { %v4660_v56 = vadd.f32 %v7090_v27, %v4652_v28 }
0x2e13   :  { %v4669_v30 = vpack.c.bf16 %v4660_v56, %v4659_v29 }
0x2e15   :  { %7099 = vmatmul.mubr.msk.bf16.vlgmr.msra.gmra.mrb[124].mxu1 %vm163_vm0, %v4669_v30 }
0x2e16   :  { %5139 = vmatprep.mubr.bf16.mxu1 %v8502_v15 }
0x2ee8   :  { %v4759_v38 = vpop.f32.mrb[124].mxu1 }
0x2ee9   :  { %v4760_v13 = vadd.f32 %v4759_v38, %v4675_v12  ;;  %v4761_v14 = vpop.f32.mrb[125].mxu1 }
0x2eea   :  { %v4762_v63 = vadd.f32 %v4761_v14, %v4679_v22  ;;  %v4763_v23 = vpop.f32.mrb[126].mxu1 }
0x2eeb   :  { %v4768_v62 = vmul.f32 %v4760_v13, %v4760_v13  ;;  %v4764_v51 = vadd.f32 %v4763_v23, %v4675_v12  ;;  %v4765_v41 = vpop.f32.mrb[127].mxu1 }
0x2eec   :  { %v4769_v16 = vmul.f32 %v4762_v63, %v4762_v63  ;;  %v4766_v17 = vadd.f32 %v4765_v41, %v4679_v22 }
0x2eed   :  { %v4772_v18 = vmul.f32 %v4768_v62, %v4760_v13  ;;  %v4770_v19 = vmul.f32 %v4764_v51, %v4764_v51 }
0x2eee   :  { %v4773_v59 = vmul.f32 %v4769_v16, %v4762_v63  ;;  %v4771_v47 = vmul.f32 %v4766_v17, %v4766_v17 }
0x2eef   :  { %v4776_v11 = vmul.f32 0.044715, %v4772_v18  ;;  %v4774_v37 = vmul.f32 %v4770_v19, %v4764_v51 }
0x2ef0   :  { %v4777_v44 = vmul.f32 0.044715, %v4773_v59  ;;  %v4775_v3 = vmul.f32 %v4771_v47, %v4766_v17  ;;  %v8240_v47 = vld [vmem:[%s9225_s20 + $0x44] ss:$8 sps:$4 sm:$0xff]  }
0x2ef1   :  { %v4780_v21 = vadd.f32 %v4776_v11, %v4760_v13  ;;  %v4778_v49 = vmul.f32 0.044715, %v4774_v37  ;;  %v8238_v11 = vld [vmem:[%s9225_s20 + $0x40] ss:$8 sps:$4 sm:$0xff]   ;;  %5107 = vmatprep.subr.bf16.mxu1 %v8240_v47  ;;  %v8243_v37 = vld [vmem:[%s9225_s20 + $0x54] ss:$8 sps:$4 sm:$0xff]  }
0x2ef2   :  { %v4781_v20 = vadd.f32 %v4777_v44, %v4762_v63  ;;  %v4779_v35 = vmul.f32 0.044715, %v4775_v3  ;;  %5108 = vmatpush1.bf16.msra.mxu1 %v8238_v11  ;;  %v8241_v44 = vld [vmem:[%s9225_s20 + $0x50] ss:$8 sps:$4 sm:$0xff]   ;;  %v8246_v3 = vld [vmem:[%s9225_s20 + $0x64] ss:$8 sps:$4 sm:$0xff]  }
0x2ef3   :  { %v4784_v57 = vmul.f32 0.7978846, %v4780_v21  ;;  %v4782_v53 = vadd.f32 %v4778_v49, %v4764_v51  ;;  %5109 = vmatprep.subr.bf16.mxu1 %v8243_v37  ;;  %v8244_v21 = vld [vmem:[%s9225_s20 + $0x60] ss:$8 sps:$4 sm:$0xff]   ;;  %v8247_v49 = vld [vmem:[%s9225_s20 + $0x70] ss:$8 sps:$4 sm:$0xff]  }
0x2ef4   :  { %v4785_v60 = vmul.f32 0.7978846, %v4781_v20  ;;  %v4783_v54 = vadd.f32 %v4779_v35, %v4766_v17  ;;  %v8249_v20 = vld [vmem:[%s9225_s20 + $0x74] ss:$8 sps:$4 sm:$0xff]   ;;  %s6845_s20 = sld [smem:[%s9906_s0 + %s8512_s29]]  }
0x2ef5   :  { %8434 = vtanh.f32 %v4784_v57  ;;  %v4786_v58 = vmul.f32 0.7978846, %v4782_v53 }
0x2ef6   :  { %8436 = vtanh.f32 %v4785_v60  ;;  %v4787_v48 = vmul.f32 0.7978846, %v4783_v54  ;;  %5110 = vmatpush1.bf16.msra.mxu1 %v8241_v44 }
0x2ef7   :  { %8438 = vtanh.f32 %v4786_v58  ;;  %5111 = vmatprep.subr.bf16.mxu1 %v8246_v3 }
0x2ef8   :  { %8440 = vtanh.f32 %v4787_v48 }
0x2efa   :  { %5112 = vmatpush1.bf16.msra.mxu1 %v8244_v21 }
0x2efb   :  { %5113 = vmatprep.subr.bf16.mxu1 %v8249_v20 }
0x2efe   :  { %5114 = vmatpush1.bf16.msra.mxu1 %v8247_v49 }
0x2eff   :  { %v8435_v25 = vpop.eup %8434  ;;  %7840 = vmatprep.subr.bf16.mxu1 %v8505_v40 }
0x2f00   :  { %v8437_v26 = vpop.eup %8436  ;;  %v4792_v27 = vadd.f32 1.0, %v8435_v25  ;;  %v7119_v25 = vld [vmem:[%s9243_s4 + $0x1] ss:$0 sm:$0xff]  ;;  %s8542_s4 = smov 33  }
0x2f01   :  { %v8439_v28 = vpop.eup %8438  ;;  %v4793_v29 = vadd.f32 1.0, %v8437_v26 }
0x2f02   :  { %v8441_v56 = vpop.eup %8440  ;;  %v4796_v30 = vmul.f32 0.5, %v4792_v27  ;;  %v4794_v2 = vadd.f32 1.0, %v8439_v28 }
0x2f03   :  { %v4795_v31 = vadd.f32 1.0, %v8441_v56  ;;  %v4797_v32 = vmul.f32 0.5, %v4793_v29  ;;  %v7120_v56 = vld [vmem:[%s9248_s6 + $0x1] ss:$0 sm:$0xff] }
0x2f04   :  { %v4798_v33 = vmul.f32 0.5, %v4794_v2  ;;  %v4800_v39 = vmul.f32 %v4796_v30, %v4760_v13 }
0x2f05   :  { %v4799_v36 = vmul.f32 0.5, %v4795_v31  ;;  %v4801_v1 = vmul.f32 %v4797_v32, %v4762_v63 }
0x2f06   :  { %v4802_v50 = vmul.f32 %v4798_v33, %v4764_v51  ;;  %v7129_v33 = vld [vmem:[%s9258_s14 + $0x2] sm:$0x3] }
0x2f07   :  { %v4803_v4 = vmul.f32 %v4799_v36, %v4766_v17  ;;  %v5057_v36 = vrot.slane %v7129_v33, %v8593_v43 }
0x2f08   :  { %v4836_v5 = vpack.c.bf16 %v4802_v50, %v4800_v39  ;;  %v5061_v39 = vrot.slane %v7129_v33, %v8596_v45 }
0x2f09   :  { %v4837_v0 = vpack.c.bf16 %v4803_v4, %v4801_v1 }
0x2f0b   :  { %4973 = vmatprep.mubr.bf16.mxu0 %v4837_v0 }
0x2f0c   :  { %4974 = vmatmul.mubr.bf16.vlgmr.msra.gmra.mrb[112].mxu0 %v4836_v5 }
0x2f0d   :  { %7854 = vmatprep.mubr.msk.bf16.mxu0 %vm8507_vm1, %v8505_v40 }
0x2fdf   :  { %v7433_v46 = vpop.f32.mrb[112].mxu0 }
0x2fe0   :  { %v7434_v7 = vpop.f32.mrb[113].mxu0 }
0x2fe1   :  { %v7435_v8 = vadd.f32 %v7434_v7, %v7433_v46  ;;  %v7436_v52 = vpop.f32.mrb[114].mxu0 }
0x2fe2   :  { %v7437_v9 = vpop.f32.mrb[115].mxu0 }
0x2fe3   :  { %v4976_v12 = vadd.f32 %v7435_v8, %v7100_v6  ;;  %v7438_v22 = vadd.f32 %v7437_v9, %v7436_v52 }
0x2fe5   :  { %v9548_v38 = vadd.f32 %v4976_v12, %v9469_v24  ;;  %v4979_v13 = vadd.f32 %v7438_v22, %v7100_v6 }
0x2fe7   :  { %v9551_v14 = vadd.f32 %v4979_v13, %v9472_v10  ;;  %v4988_v63 = vsel %vm163_vm0, %v9548_v38, 0.0 }
0x2fe8   :  { %4989 = vadd.xlane.f32.xlu1 %v4988_v63 }
0x2fe9   :  { %v4991_v23 = vsel %vm163_vm0, %v9551_v14, 0.0 }
0x2fea   :  { %4992 = vadd.xlane.f32.xlu0 %v4991_v23 }
0x3075   :  { %v4990_v62 = vpop.xlane.xlu1 %4989 }
0x3076   :  { %v4994_v51 = vmul.f32 0.015625, %v4990_v62 }
0x3077   :  { %v4993_v24 = vpop.xlane.xlu0 %4992 }
0x3078   :  { %v4996_v41 = vsub.f32 %v9548_v38, %v4994_v51  ;;  %v4995_v16 = vmul.f32 0.015625, %v4993_v24 }
0x307a   :  { %v4997_v10 = vsub.f32 %v9551_v14, %v4995_v16  ;;  %v4998_v17 = vmul.f32 %v4996_v41, %v4996_v41 }
0x307c   :  { %v5000_v18 = vsel %vm163_vm0, %v4998_v17, 0.0  ;;  %v4999_v19 = vmul.f32 %v4997_v10, %v4997_v10  ;;  %v9609_v17 = vld [vmem:[%s9296_s7] ss:$0 sm:$0xff]  ;;  %s6846_s7 = sld [smem:[%s9906_s0 + %s8542_s4]]  }
0x307d   :  { %5001 = vadd.xlane.f32.xlu1 %v5000_v18 }
0x307e   :  { %v5003_v59 = vsel %vm163_vm0, %v4999_v19, 0.0 }
0x307f   :  { %5004 = vadd.xlane.f32.xlu0 %v5003_v59 }
0x310a   :  { %v5002_v35 = vpop.xlane.xlu1 %5001 }
0x310b   :  { %v5006_v57 = vmul.f32 0.015625, %v5002_v35 }
0x310c   :  { %v5005_v53 = vpop.xlane.xlu0 %5004 }
0x310d   :  { %v5008_v60 = vadd.f32 1e-12, %v5006_v57  ;;  %v5007_v54 = vmul.f32 0.015625, %v5005_v53 }
0x310f   :  { %8442 = vrsqrt.f32 %v5008_v60  ;;  %v5009_v58 = vadd.f32 1e-12, %v5007_v54 }
0x3111   :  { %8444 = vrsqrt.f32 %v5009_v58 }
0x3119   :  { %v8443_v48 = vpop.eup %8442 }
0x311a   :  { %v5012_v26 = vmul.f32 %v8443_v48, %v4996_v41 }
0x311b   :  { %v8445_v27 = vpop.eup %8444 }
0x311c   :  { %v5020_v28 = vmul.f32 %v7119_v25, %v5012_v26  ;;  %v5013_v29 = vmul.f32 %v8445_v27, %v4997_v10 }
0x311e   :  { %v5021_v30 = vmul.f32 %v7119_v25, %v5013_v29  ;;  %v5028_v2 = vadd.f32 %v7120_v56, %v5020_v28 }
0x3120   :  { %v5029_v31 = vadd.f32 %v7120_v56, %v5021_v30 }
0x3122   :  { %v5052_v32 = vpack.c.bf16 %v5029_v31, %v5028_v2 }
0x3124   :  { %7147 = vmatmul.mubr.msk.bf16.vlgmr.msra.gmra.mrb[128].mxu1 %vm163_vm0, %v5052_v32 }
0x3125   :  { %7842 = vmatprep.mubr.msk.bf16.mxu1 %vm8507_vm1, %v8505_v40 }
0x31f7   :  { %v5141_v50 = vpop.f32.mrb[128].mxu1 }
0x31f8   :  { %v5142_v1 = vadd.f32 %v5141_v50, %v5057_v36  ;;  %v5143_v4 = vpop.f32.mrb[129].mxu1 }
0x31f9   :  { %v5144_v5 = vadd.f32 %v5143_v4, %v5061_v39  ;;  %v5145_v0 = vpop.f32.mrb[130].mxu1 }
0x31fa   :  { %v9578_v46 = vpack.c.bf16 %v5142_v1, %v5142_v1  ;;  %v5146_v6 = vadd.f32 %v5145_v0, %v5057_v36  ;;  %v5147_v7 = vpop.f32.mrb[131].mxu1 }
0x31fb   :  { %v9580_v8 = vpack.c.bf16 %v5144_v5, %v5144_v5  ;;  %v5148_v52 = vadd.f32 %v5147_v7, %v5061_v39 }
0x31fc   :  { %v9582_v9 = vpack.c.bf16 %v5146_v6, %v5146_v6  ;;  %5153 = vrot.lane.b32.xlu1 %v9578_v46, %s8508_s22 }
0x31fd   :  { %v5284_v12 = vsel %vm472_vm2, %v9580_v8, 0  ;;  %v9599_v62 = vpack.c.bf16 %v5148_v52, %v5148_v52 }
0x31fe   :  { %5202 = vrot.lane.b32.xlu0 %v9582_v9, %s8508_s22  ;;  %7853 = vmatpush3.bf16.msra.mxu0 %v5284_v12 }
0x31ff   :  { %7864 = vmatprep.subr.bf16.mxu0 %v8505_v40  ;;  %v5330_v51 = vsel %vm472_vm2, %v9599_v62, 0 }
0x326e   :  { %v5154_v22 = vpop.permute.xlu1 %5153 }
0x326f   :  { %v5159_v13 = vsel %vm330_vm3, %v5154_v22, 0 }
0x3270   :  { %7841 = vmatpush3.bf16.xpose.msra.mxu1 %v5159_v13  ;;  %v5203_v63 = vpop.permute.xlu0 %5202 }
0x3271   :  { %7846 = vmatprep.subr.bf16.mxu1 %v8505_v40  ;;  %v5208_v23 = vsel %vm330_vm3, %v5203_v63, 0 }
0x3277   :  { %7843 = vmatmul.mubr.msk.bf16.vlgmr.msra.gmra.mrb[132].mxu1 %vm330_vm3, %v9578_v46 }
0x3278   :  { %7847 = vmatpush3.bf16.xpose.msra.mxu1 %v5208_v23  ;;  %7848 = vmatprep.mubr.msk.bf16.mxu1 %vm8507_vm1, %v8505_v40 }
0x3279   :  { %7858 = vmatprep.subr.bf16.mxu1 %v8505_v40 }
0x327f   :  { %7849 = vmatmul.mubr.msk.bf16.vlgmr.msra.gmra.mrb[136].mxu1 %vm330_vm3, %v9582_v9 }
0x3280   :  { %7859 = vmatpush3.bf16.msra.mxu1 %v5330_v51  ;;  %7860 = vmatprep.mubr.msk.bf16.mxu1 %vm8507_vm1, %v8505_v40 }
0x3281   :  { %7870 = vmatprep.subr.bf16.mxu1 %v8505_v40 }
0x334a   :  { %v5195_v24 = vpop.f32.mrb[132].mxu1 }
0x334b   :  { %v5250_v41 = vmul.f32 0.25, %v5195_v24  ;;  %v7844_v16 = vpop.f32.mrb[133].mxu1 }
0x334c   :  { %v5198_v10 = vpop.f32.mrb[134].mxu1 }
0x334d   :  { %v5252_v18 = vadd.f32 %v9609_v17, %v5250_v41  ;;  %v7845_v19 = vpop.f32.mrb[135].mxu1 }
0x334f   :  { %v5254_v59 = vsel %vm442_vm4, %v5252_v18, -inf }
0x3350   :  { %5255 = vmax.xlane.f32.xlu1 %v5254_v59 }
0x3352   :  { %v5244_v47 = vpop.f32.mrb[136].mxu1 }
0x3353   :  { %v5251_v11 = vmul.f32 0.25, %v5244_v47  ;;  %v7850_v37 = vpop.f32.mrb[137].mxu1 }
0x3354   :  { %v5247_v44 = vpop.f32.mrb[138].mxu1 }
0x3355   :  { %v5253_v3 = vadd.f32 %v9609_v17, %v5251_v11  ;;  %v7851_v21 = vpop.f32.mrb[139].mxu1 }
0x3357   :  { %v5257_v49 = vsel %vm442_vm4, %v5253_v3, -inf }
0x3358   :  { %5258 = vmax.xlane.f32.xlu0 %v5257_v49 }
0x3361   :  { %5374 = vrot.lane.b32.xlu1 %v9578_v46, %s8510_s27 }
0x33dd   :  { %v5256_v20 = vpop.xlane.xlu1 %5255 }
0x33de   :  { %v5260_v35 = vsub.f32 %v5252_v18, %v5256_v20 }
0x33e0   :  { %v5262_v57 = vmul.f32 1.442695, %v5260_v35 }
0x33e1   :  { %v5375_v27 = vpop.permute.xlu1 %5374 }
0x33e2   :  { %8446 = vpow2.f32 %v5262_v57  ;;  %v5380_v31 = vsel %vm330_vm3, %v5375_v27, 0 }
0x33e5   :  { %v5259_v53 = vpop.xlane.xlu0 %5258 }
0x33e6   :  { %v5261_v60 = vsub.f32 %v5253_v3, %v5259_v53 }
0x33e8   :  { %v5264_v54 = vmul.f32 1.442695, %v5261_v60 }
0x33ea   :  { %8448 = vpow2.f32 %v5264_v54 }
0x33ec   :  { %v8447_v58 = vpop.eup %8446 }
0x33ed   :  { %v5266_v48 = vsel %vm442_vm4, %v8447_v58, 0.0 }
0x33ee   :  { %5267 = vadd.xlane.f32.xlu1 %v5266_v48 }
0x33f4   :  { %v8449_v25 = vpop.eup %8448 }
0x33f5   :  { %v5269_v26 = vsel %vm442_vm4, %v8449_v25, 0.0 }
0x33f6   :  { %5270 = vadd.xlane.f32.xlu0 %v5269_v26 }
0x33ff   :  { %5372 = vrot.lane.b32.xlu1 %v9578_v46, %s8511_s28 }
0x3403   :  { %5422 = vrot.lane.b32.xlu1 %v9582_v9, %s8511_s28 }
0x340c   :  { %5424 = vrot.lane.b32.xlu0 %v9582_v9, %s8510_s27 }
0x347b   :  { %v5268_v28 = vpop.xlane.xlu1 %5267 }
0x347c   :  { %8450 = vrcp.f32 %v5268_v28 }
0x347f   :  { %v5373_v50 = vpop.permute.xlu1 %5372 }
0x3483   :  { %v5271_v29 = vpop.xlane.xlu0 %5270  ;;  %v5423_v4 = vpop.permute.xlu1 %5422 }
0x3484   :  { %8452 = vrcp.f32 %v5271_v29 }
0x3486   :  { %v8451_v56 = vpop.eup %8450 }
0x3487   :  { %v5274_v30 = vmul.f32 %v8451_v56, %v8447_v58  ;;  %v5425_v36 = vpop.permute.xlu0 %5424 }
0x3488   :  { %v5430_v1 = vsel %vm330_vm3, %v5425_v36, 0 }
0x3489   :  { %v5276_v2 = vpack.c.bf16 %v5274_v30, %v5274_v30 }
0x348b   :  { %7855 = vmatmul.mubr.msk.bf16.vlgmr.msra.gmra.mrb[116].mxu0 %vm442_vm4, %v5276_v2 }
0x348c   :  { %7865 = vmatpush3.bf16.xpose.msra.mxu0 %v5380_v31  ;;  %7866 = vmatprep.mubr.msk.bf16.mxu0 %vm8507_vm1, %v8505_v40 }
0x348d   :  { %7876 = vmatprep.subr.bf16.mxu0 %v8505_v40 }
0x348e   :  { %v8453_v32 = vpop.eup %8452 }
0x348f   :  { %v5275_v33 = vmul.f32 %v8453_v32, %v8449_v25 }
0x3491   :  { %v5277_v39 = vpack.c.bf16 %v5275_v33, %v5275_v33 }
0x3493   :  { %7861 = vmatmul.mubr.msk.bf16.vlgmr.msra.gmra.mrb[140].mxu1 %vm442_vm4, %v5277_v39  ;;  %7867 = vmatmul.mubr.msk.bf16.vlgmr.msra.gmra.mrb[120].mxu0 %vm330_vm3, %v5373_v50 }
0x3494   :  { %7871 = vmatpush3.bf16.xpose.msra.mxu1 %v5430_v1  ;;  %7872 = vmatprep.mubr.msk.bf16.mxu1 %vm8507_vm1, %v8505_v40 }
0x3495   :  { %7882 = vmatprep.subr.bf16.mxu1 %v8505_v40  ;;  %7878 = vmatprep.mubr.msk.bf16.mxu0 %vm8507_vm1, %v8505_v40 }
0x349b   :  { %7873 = vmatmul.mubr.msk.bf16.vlgmr.msra.gmra.mrb[144].mxu1 %vm330_vm3, %v5423_v4 }
0x349c   :  { %7884 = vmatprep.mubr.msk.bf16.mxu1 %vm8507_vm1, %v8505_v40 }
0x355e   :  { %v9641_v5 = vpop.f32.mrb[116].mxu0 }
0x355f   :  { %v7856_v0 = vpop.f32.mrb[117].mxu0 }
0x3560   :  { %v5323_v6 = vpop.f32.mrb[118].mxu0 }
0x3561   :  { %v7857_v7 = vpop.f32.mrb[119].mxu0 }
0x3566   :  { %v9643_v52 = vpop.f32.mrb[140].mxu1  ;;  %v5416_v12 = vpop.f32.mrb[120].mxu0 }
0x3567   :  { %v5472_v22 = vmul.f32 0.25, %v5416_v12  ;;  %v7862_v13 = vpop.f32.mrb[141].mxu1  ;;  %v7868_v63 = vpop.f32.mrb[121].mxu0 }
0x3568   :  { %v5369_v23 = vpop.f32.mrb[142].mxu1  ;;  %v5419_v51 = vpop.f32.mrb[122].mxu0 }
0x3569   :  { %v5474_v24 = vadd.f32 %v9609_v17, %v5472_v22  ;;  %v7863_v41 = vpop.f32.mrb[143].mxu1  ;;  %v7869_v16 = vpop.f32.mrb[123].mxu0 }
0x356b   :  { %v5476_v10 = vsel %vm442_vm4, %v5474_v24, -inf }
0x356c   :  { %5477 = vmax.xlane.f32.xlu1 %v5476_v10 }
0x356e   :  { %v5466_v18 = vpop.f32.mrb[144].mxu1 }
0x356f   :  { %v5473_v19 = vmul.f32 0.25, %v5466_v18  ;;  %v7874_v59 = vpop.f32.mrb[145].mxu1 }
0x3570   :  { %v5469_v47 = vpop.f32.mrb[146].mxu1 }
0x3571   :  { %v5475_v11 = vadd.f32 %v9609_v17, %v5473_v19  ;;  %v7875_v37 = vpop.f32.mrb[147].mxu1 }
0x3573   :  { %v5479_v44 = vsel %vm442_vm4, %v5475_v11, -inf }
0x3574   :  { %5480 = vmax.xlane.f32.xlu0 %v5479_v44 }
0x357d   :  { %5501 = vrot.lane.b32.xlu1 %v9580_v8, %s8511_s28 }
0x3581   :  { %5600 = vrot.lane.b32.xlu1 %v9578_v46, %s8512_s29 }
0x3585   :  { %5650 = vrot.lane.b32.xlu1 %v9582_v9, %s8512_s29 }
0x3589   :  { %5598 = vrot.lane.b32.xlu1 %v9578_v46, %s8513_s30 }
0x35f9   :  { %v5478_v3 = vpop.xlane.xlu1 %5477 }
0x35fa   :  { %v5482_v21 = vsub.f32 %v5474_v24, %v5478_v3 }
0x35fc   :  { %v5484_v49 = vmul.f32 1.442695, %v5482_v21 }
0x35fd   :  { %v5502_v20 = vpop.permute.xlu1 %5501 }
0x35fe   :  { %8454 = vpow2.f32 %v5484_v49  ;;  %v5507_v35 = vsel %vm472_vm2, %v5502_v20, 0 }
0x35ff   :  { %7877 = vmatpush3.bf16.msra.mxu0 %v5507_v35 }
0x3600   :  { %7888 = vmatprep.subr.bf16.mxu0 %v8505_v40 }
0x3601   :  { %v5481_v57 = vpop.xlane.xlu0 %5480  ;;  %v5601_v29 = vpop.permute.xlu1 %5600 }
0x3602   :  { %v5483_v53 = vsub.f32 %v5475_v11, %v5481_v57  ;;  %v5606_v32 = vsel %vm330_vm3, %v5601_v29, 0 }
0x3604   :  { %v5486_v60 = vmul.f32 1.442695, %v5483_v53 }
0x3605   :  { %v5651_v33 = vpop.permute.xlu1 %5650 }
0x3606   :  { %8456 = vpow2.f32 %v5486_v60  ;;  %v5656_v4 = vsel %vm330_vm3, %v5651_v33, 0 }
0x3608   :  { %v8455_v54 = vpop.eup %8454 }
0x3609   :  { %v5488_v58 = vsel %vm442_vm4, %v8455_v54, 0.0  ;;  %v5599_v1 = vpop.permute.xlu1 %5598 }
0x360a   :  { %5489 = vadd.xlane.f32.xlu0 %v5488_v58 }
0x3610   :  { %v8457_v48 = vpop.eup %8456 }
0x3611   :  { %v5491_v25 = vsel %vm442_vm4, %v8457_v48, 0.0 }
0x3612   :  { %5492 = vadd.xlane.f32.xlu0 %v5491_v25 }
0x3628   :  { %5550 = vrot.lane.b32.xlu0 %v9599_v62, %s8511_s28 }
0x362c   :  { %5648 = vrot.lane.b32.xlu0 %v9582_v9, %s8513_s30 }
0x3697   :  { %v5490_v26 = vpop.xlane.xlu0 %5489 }
0x3698   :  { %8458 = vrcp.f32 %v5490_v26 }
0x369f   :  { %v5493_v27 = vpop.xlane.xlu0 %5492 }
0x36a0   :  { %8460 = vrcp.f32 %v5493_v27 }
0x36a2   :  { %v8459_v28 = vpop.eup %8458 }
0x36a3   :  { %v5496_v56 = vmul.f32 %v8459_v28, %v8455_v54  ;;  %v5551_v30 = vpop.permute.xlu0 %5550 }
0x36a4   :  { %v5556_v2 = vsel %vm472_vm2, %v5551_v30, 0 }
0x36a5   :  { %7883 = vmatpush3.bf16.msra.mxu1 %v5556_v2  ;;  %v5498_v31 = vpack.c.bf16 %v5496_v56, %v5496_v56 }
0x36a6   :  { %7894 = vmatprep.subr.bf16.mxu1 %v8505_v40 }
0x36a7   :  { %7879 = vmatmul.mubr.msk.bf16.vlgmr.msra.gmra.mrb[124].mxu0 %vm442_vm4, %v5498_v31  ;;  %v5649_v0 = vpop.permute.xlu0 %5648 }
0x36a8   :  { %7889 = vmatpush3.bf16.xpose.msra.mxu0 %v5606_v32  ;;  %7890 = vmatprep.mubr.msk.bf16.mxu0 %vm8507_vm1, %v8505_v40 }
0x36a9   :  { %7900 = vmatprep.subr.bf16.mxu0 %v8505_v40 }
0x36aa   :  { %v8461_v36 = vpop.eup %8460 }
0x36ab   :  { %v5497_v39 = vmul.f32 %v8461_v36, %v8457_v48 }
0x36ad   :  { %v5499_v50 = vpack.c.bf16 %v5497_v39, %v5497_v39 }
0x36af   :  { %7885 = vmatmul.mubr.msk.bf16.vlgmr.msra.gmra.mrb[148].mxu1 %vm442_vm4, %v5499_v50  ;;  %7891 = vmatmul.mubr.msk.bf16.vlgmr.msra.gmra.mrb[128].mxu0 %vm330_vm3, %v5599_v1 }
0x36b0   :  { %7895 = vmatpush3.bf16.xpose.msra.mxu1 %v5656_v4  ;;  %7896 = vmatprep.mubr.msk.bf16.mxu1 %vm8507_vm1, %v8505_v40 }
0x36b1   :  { %7906 = vmatprep.subr.bf16.mxu1 %v8505_v40  ;;  %7902 = vmatprep.mubr.msk.bf16.mxu0 %vm8507_vm1, %v8505_v40 }
0x36b7   :  { %7897 = vmatmul.mubr.msk.bf16.vlgmr.msra.gmra.mrb[152].mxu1 %vm330_vm3, %v5649_v0 }
0x36b8   :  { %7908 = vmatprep.mubr.msk.bf16.mxu1 %vm8507_vm1, %v8505_v40 }
0x377a   :  { %v9683_v6 = vpop.f32.mrb[124].mxu0 }
0x377b   :  { %v7880_v7 = vpop.f32.mrb[125].mxu0 }
0x377c   :  { %v5546_v12 = vpop.f32.mrb[126].mxu0 }
0x377d   :  { %v7881_v22 = vpop.f32.mrb[127].mxu0 }
0x3782   :  { %v9685_v13 = vpop.f32.mrb[148].mxu1  ;;  %v5642_v63 = vpop.f32.mrb[128].mxu0 }
0x3783   :  { %v8079_v23 = vpack.i.bf16 %v9685_v13, %v9683_v6  ;;  %v5698_v51 = vmul.f32 0.25, %v5642_v63  ;;  %v7886_v24 = vpop.f32.mrb[149].mxu1  ;;  %v7892_v41 = vpop.f32.mrb[129].mxu0 }
0x3784   :  { %v5595_v16 = vpop.f32.mrb[150].mxu1  ;;  %v5645_v10 = vpop.f32.mrb[130].mxu0 }
0x3785   :  { %v5700_v18 = vadd.f32 %v9609_v17, %v5698_v51  ;;  %v7887_v19 = vpop.f32.mrb[151].mxu1  ;;  %v7893_v59 = vpop.f32.mrb[131].mxu0 }
0x3787   :  { %v5702_v47 = vsel %vm442_vm4, %v5700_v18, -inf }
0x3788   :  { %5703 = vmax.xlane.f32.xlu1 %v5702_v47 }
0x378a   :  { %v5692_v11 = vpop.f32.mrb[152].mxu1 }
0x378b   :  { %v5699_v37 = vmul.f32 0.25, %v5692_v11  ;;  %v7898_v44 = vpop.f32.mrb[153].mxu1 }
0x378c   :  { %v5695_v3 = vpop.f32.mrb[154].mxu1 }
0x378d   :  { %v5701_v21 = vadd.f32 %v9609_v17, %v5699_v37  ;;  %v7899_v49 = vpop.f32.mrb[155].mxu1 }
0x378f   :  { %v5705_v20 = vsel %vm442_vm4, %v5701_v21, -inf }
0x3790   :  { %5706 = vmax.xlane.f32.xlu0 %v5705_v20 }
0x3799   :  { %5726 = vrot.lane.b32.xlu1 %v9580_v8, %s8513_s30 }
0x379d   :  { %5824 = vrot.lane.b32.xlu1 %v9578_v46, %s8514_s1 }
0x37a1   :  { %5874 = vrot.lane.b32.xlu1 %v9582_v9, %s8514_s1 }
0x37a5   :  { %5822 = vrot.lane.b32.xlu1 %v9578_v46, %s8515_s2 }
0x3815   :  { %v5704_v35 = vpop.xlane.xlu1 %5703 }
0x3816   :  { %v5708_v57 = vsub.f32 %v5700_v18, %v5704_v35 }
0x3818   :  { %v5710_v53 = vmul.f32 1.442695, %v5708_v57 }
0x3819   :  { %v5727_v60 = vpop.permute.xlu1 %5726 }
0x381a   :  { %8462 = vpow2.f32 %v5710_v53  ;;  %v5732_v54 = vsel %vm472_vm2, %v5727_v60, 0 }
0x381b   :  { %7901 = vmatpush3.bf16.msra.mxu0 %v5732_v54 }
0x381c   :  { %7912 = vmatprep.subr.bf16.mxu0 %v8505_v40 }
0x381d   :  { %v5707_v58 = vpop.xlane.xlu0 %5706  ;;  %v5825_v2 = vpop.permute.xlu1 %5824 }
0x381e   :  { %v5709_v48 = vsub.f32 %v5701_v21, %v5707_v58  ;;  %v5830_v39 = vsel %vm330_vm3, %v5825_v2, 0 }
0x3820   :  { %v5712_v25 = vmul.f32 1.442695, %v5709_v48 }
0x3821   :  { %v5875_v50 = vpop.permute.xlu1 %5874 }
0x3822   :  { %8464 = vpow2.f32 %v5712_v25  ;;  %v5880_v7 = vsel %vm330_vm3, %v5875_v50, 0  ;;  %v8250_v50 = vld [vmem:[%s9443_s23 + $0x20] sm:$0xff]  }
0x3824   :  { %v8463_v26 = vpop.eup %8462 }
0x3825   :  { %v5714_v27 = vsel %vm442_vm4, %v8463_v26, 0.0  ;;  %v5823_v0 = vpop.permute.xlu1 %5822 }
0x3826   :  { %5715 = vadd.xlane.f32.xlu0 %v5714_v27 }
0x382c   :  { %v8465_v28 = vpop.eup %8464 }
0x382d   :  { %v5717_v46 = vsel %vm442_vm4, %v8465_v28, 0.0 }
0x382e   :  { %5718 = vadd.xlane.f32.xlu0 %v5717_v46 }
0x3844   :  { %5774 = vrot.lane.b32.xlu0 %v9599_v62, %s8513_s30 }
0x3848   :  { %5872 = vrot.lane.b32.xlu0 %v9582_v9, %s8515_s2 }
0x38b3   :  { %v5716_v29 = vpop.xlane.xlu0 %5715 }
0x38b4   :  { %8466 = vrcp.f32 %v5716_v29 }
0x38bb   :  { %v5719_v56 = vpop.xlane.xlu0 %5718 }
0x38bc   :  { %8468 = vrcp.f32 %v5719_v56 }
0x38be   :  { %v8467_v30 = vpop.eup %8466 }
0x38bf   :  { %v5722_v31 = vmul.f32 %v8467_v30, %v8463_v26  ;;  %v5775_v32 = vpop.permute.xlu0 %5774 }
0x38c0   :  { %v5780_v33 = vsel %vm472_vm2, %v5775_v32, 0 }
0x38c1   :  { %7907 = vmatpush3.bf16.msra.mxu1 %v5780_v33  ;;  %v5724_v36 = vpack.c.bf16 %v5722_v31, %v5722_v31 }
0x38c2   :  { %7918 = vmatprep.subr.bf16.mxu1 %v8505_v40 }
0x38c3   :  { %7903 = vmatmul.mubr.msk.bf16.vlgmr.msra.gmra.mrb[132].mxu0 %vm442_vm4, %v5724_v36  ;;  %v5873_v12 = vpop.permute.xlu0 %5872 }
0x38c4   :  { %7913 = vmatpush3.bf16.xpose.msra.mxu0 %v5830_v39  ;;  %7914 = vmatprep.mubr.msk.bf16.mxu0 %vm8507_vm1, %v8505_v40 }
0x38c5   :  { %7924 = vmatprep.subr.bf16.mxu0 %v8505_v40 }
0x38c6   :  { %v8469_v9 = vpop.eup %8468 }
0x38c7   :  { %v5723_v1 = vmul.f32 %v8469_v9, %v8465_v28  ;;  %v8251_v9 = vld [vmem:[%s9443_s23 + $0x28] sm:$0xff]  }
0x38c9   :  { %v5725_v4 = vpack.c.bf16 %v5723_v1, %v5723_v1  ;;  %v8252_v1 = vld [vmem:[%s9443_s23 + $0x30] sm:$0xff]  }
0x38cb   :  { %7909 = vmatmul.mubr.msk.bf16.vlgmr.msra.gmra.mrb[156].mxu1 %vm442_vm4, %v5725_v4  ;;  %7915 = vmatmul.mubr.msk.bf16.vlgmr.msra.gmra.mrb[136].mxu0 %vm330_vm3, %v5823_v0  ;;  %v8253_v4 = vld [vmem:[%s9443_s23 + $0x38] sm:$0xff]   ;;  %s8543_s23 = smov 36  }
0x38cc   :  { %7919 = vmatpush3.bf16.xpose.msra.mxu1 %v5880_v7  ;;  %7920 = vmatprep.mubr.msk.bf16.mxu1 %vm8507_vm1, %v8505_v40 }
0x38cd   :  { %7930 = vmatprep.subr.bf16.mxu1 %v8505_v40  ;;  %7926 = vmatprep.mubr.msk.bf16.mxu0 %vm8507_vm1, %v8505_v40 }
0x38d3   :  { %7921 = vmatmul.mubr.msk.bf16.vlgmr.msra.gmra.mrb[160].mxu1 %vm330_vm3, %v5873_v12 }
0x38d4   :  { %7932 = vmatprep.mubr.msk.bf16.mxu1 %vm8507_vm1, %v8505_v40 }
0x3996   :  { %v5768_v22 = vpop.f32.mrb[132].mxu0 }
0x3997   :  { %v7904_v63 = vpop.f32.mrb[133].mxu0 }
0x3998   :  { %v5771_v51 = vpop.f32.mrb[134].mxu0 }
0x3999   :  { %v7905_v24 = vpop.f32.mrb[135].mxu0 }
0x399e   :  { %v5816_v41 = vpop.f32.mrb[156].mxu1  ;;  %v5866_v16 = vpop.f32.mrb[136].mxu0 }
0x399f   :  { %v8084_v10 = vpack.i.bf16 %v5816_v41, %v5768_v22  ;;  %v5922_v18 = vmul.f32 0.25, %v5866_v16  ;;  %v7910_v19 = vpop.f32.mrb[157].mxu1  ;;  %v7916_v59 = vpop.f32.mrb[137].mxu0 }
0x39a0   :  { %v5819_v47 = vpop.f32.mrb[158].mxu1  ;;  %v5869_v11 = vpop.f32.mrb[138].mxu0 }
0x39a1   :  { %v5924_v37 = vadd.f32 %v9609_v17, %v5922_v18  ;;  %v7911_v44 = vpop.f32.mrb[159].mxu1  ;;  %v7917_v3 = vpop.f32.mrb[139].mxu0 }
0x39a3   :  { %v5926_v21 = vsel %vm442_vm4, %v5924_v37, -inf }
0x39a4   :  { %5927 = vmax.xlane.f32.xlu1 %v5926_v21 }
0x39a6   :  { %v5916_v49 = vpop.f32.mrb[160].mxu1 }
0x39a7   :  { %v5923_v20 = vmul.f32 0.25, %v5916_v49  ;;  %v7922_v35 = vpop.f32.mrb[161].mxu1 }
0x39a8   :  { %v5919_v57 = vpop.f32.mrb[162].mxu1 }
0x39a9   :  { %v5925_v53 = vadd.f32 %v9609_v17, %v5923_v20  ;;  %v7923_v60 = vpop.f32.mrb[163].mxu1 }
0x39aa   :  { %v7164_v60 = vld [vmem:[%s9465_s21 + $0x1] ss:$0 sm:$0xff] }
0x39ab   :  { %v5929_v54 = vsel %vm442_vm4, %v5925_v53, -inf }
0x39ac   :  { %5930 = vmax.xlane.f32.xlu0 %v5929_v54 }
0x39b5   :  { %5950 = vrot.lane.b32.xlu1 %v9580_v8, %s8515_s2 }
0x39b9   :  { %8080 = vrot.lane.b32.xlu1 %v8079_v23, %s8514_s1 }
0x39bd   :  { %8085 = vrot.lane.b32.xlu1 %v8084_v10, %s8512_s29 }
0x3a31   :  { %v5928_v58 = vpop.xlane.xlu1 %5927 }
0x3a32   :  { %v5932_v48 = vsub.f32 %v5924_v37, %v5928_v58 }
0x3a34   :  { %v5934_v25 = vmul.f32 1.442695, %v5932_v48 }
0x3a35   :  { %v5951_v26 = vpop.permute.xlu1 %5950 }
0x3a36   :  { %8470 = vpow2.f32 %v5934_v25  ;;  %v5956_v17 = vsel %vm472_vm2, %v5951_v26, 0 }
0x3a37   :  { %7925 = vmatpush3.bf16.msra.mxu0 %v5956_v17 }
0x3a38   :  { %7936 = vmatprep.subr.bf16.mxu0 %v8505_v40 }
0x3a39   :  { %v5931_v27 = vpop.xlane.xlu0 %5930  ;;  %v8081_v16 = vpop.permute.xlu1 %8080 }
0x3a3a   :  { %v5933_v28 = vsub.f32 %v5925_v53, %v5931_v27  ;;  %v8083_v18 = vunpack.i.h.bf16 %v8081_v16  ;;  %v8082_v19 = vunpack.i.l.bf16 %v8081_v16  ;;  %v7173_v16 = vld [vmem:[%s9503_s9 + $0x1] ss:$0 sm:$0xff]  ;;  %s8545_s9 = smov 37  }
0x3a3b   :  { %s6850_s15 = sld [smem:[%s9906_s0 + %s8545_s9]]  }
0x3a3c   :  { %v5936_v8 = vmul.f32 1.442695, %v5933_v28  ;;  %v6071_v37 = vsel %vm330_vm3, %v9643_v52, %v8083_v18  ;;  %v6070_v44 = vsel %vm330_vm3, %v9641_v5, %v8082_v19 }
0x3a3d   :  { %v8086_v10 = vpop.permute.xlu1 %8085 }
0x3a3e   :  { %8472 = vpow2.f32 %v5936_v8  ;;  %v8088_v59 = vunpack.i.h.bf16 %v8086_v10  ;;  %v8087_v47 = vunpack.i.l.bf16 %v8086_v10 }
0x3a40   :  { %v8471_v46 = vpop.eup %8470  ;;  %v6073_v49 = vsel %vm1262_vm5, %v6071_v37, %v8088_v59  ;;  %v6072_v20 = vsel %vm1262_vm5, %v6070_v44, %v8087_v47  ;;  %v8266_v47 = vld [vmem:[%s9512_s10 + $0xc0] sm:$0xff]   ;;  %v8268_v37 = vld [vmem:[%s9512_s10 + $0xc8] sm:$0xff]  }
0x3a41   :  { %v5938_v6 = vsel %vm442_vm4, %v8471_v46, 0.0  ;;  %v8269_v44 = vld [vmem:[%s9512_s10 + $0x88] sm:$0xff]  }
0x3a42   :  { %5939 = vadd.xlane.f32.xlu0 %v5938_v6 }
0x3a48   :  { %v8473_v13 = vpop.eup %8472 }
0x3a49   :  { %v5941_v23 = vsel %vm442_vm4, %v8473_v13, 0.0 }
0x3a4a   :  { %5942 = vadd.xlane.f32.xlu0 %v5941_v23 }
0x3a60   :  { %5998 = vrot.lane.b32.xlu0 %v9599_v62, %s8515_s2 }
0x3acf   :  { %v5940_v29 = vpop.xlane.xlu0 %5939 }
0x3ad0   :  { %8474 = vrcp.f32 %v5940_v29 }
0x3ad7   :  { %v5943_v56 = vpop.xlane.xlu0 %5942 }
0x3ad8   :  { %8476 = vrcp.f32 %v5943_v56 }
0x3ada   :  { %v8475_v30 = vpop.eup %8474 }
0x3adb   :  { %v5946_v2 = vmul.f32 %v8475_v30, %v8471_v46  ;;  %v5999_v31 = vpop.permute.xlu0 %5998 }
0x3adc   :  { %v6004_v32 = vsel %vm472_vm2, %v5999_v31, 0  ;;  %v8254_v31 = vld [vmem:[%s9485_s12 + $0x40] ss:$8 sps:$4 sm:$0xff]  }
0x3add   :  { %7931 = vmatpush3.bf16.msra.mxu1 %v6004_v32  ;;  %v5948_v33 = vpack.c.bf16 %v5946_v2, %v5946_v2  ;;  %v8256_v2 = vld [vmem:[%s9485_s12 + $0x44] ss:$8 sps:$4 sm:$0xff]   ;;  %v8259_v32 = vld [vmem:[%s9485_s12 + $0x54] ss:$8 sps:$4 sm:$0xff]  }
0x3ade   :  { %6265 = vmatprep.subr.bf16.mxu1 %v8256_v2 }
0x3adf   :  { %7927 = vmatmul.mubr.msk.bf16.vlgmr.msra.gmra.mrb[140].mxu0 %vm442_vm4, %v5948_v33  ;;  %v8257_v33 = vld [vmem:[%s9485_s12 + $0x50] ss:$8 sps:$4 sm:$0xff]  }
0x3ae0   :  { %7944 = vmatprep.mubr.msk.bf16.mxu0 %vm8507_vm1, %v8505_v40  ;;  %7937 = vmatpush3.bf16.msra.mxu0 %v8250_v50  ;;  %v8265_v50 = vld [vmem:[%s9485_s12 + $0x74] ss:$8 sps:$4 sm:$0xff]  }
0x3ae1   :  { %7938 = vmatprep.subr.bf16.mxu0 %v8505_v40 }
0x3ae2   :  { %v8477_v62 = vpop.eup %8476 }
0x3ae3   :  { %v5947_v36 = vmul.f32 %v8477_v62, %v8473_v13  ;;  %v8262_v62 = vld [vmem:[%s9485_s12 + $0x64] ss:$8 sps:$4 sm:$0xff]  }
0x3ae4   :  { %7939 = vmatpush3.bf16.msra.mxu0 %v8251_v9 }
0x3ae5   :  { %v5949_v39 = vpack.c.bf16 %v5947_v36, %v5947_v36  ;;  %7940 = vmatprep.subr.bf16.mxu0 %v8505_v40  ;;  %v8260_v36 = vld [vmem:[%s9485_s12 + $0x60] ss:$8 sps:$4 sm:$0xff]  }
0x3ae7   :  { %7933 = vmatmul.mubr.msk.bf16.vlgmr.msra.gmra.mrb[164].mxu1 %vm442_vm4, %v5949_v39  ;;  %v8263_v39 = vld [vmem:[%s9485_s12 + $0x70] ss:$8 sps:$4 sm:$0xff]  }
0x3ae8   :  { %6297 = vmatprep.mubr.bf16.mxu1 %v8502_v15  ;;  %7941 = vmatpush3.bf16.msra.mxu0 %v8252_v1 }
0x3ae9   :  { %7942 = vmatprep.subr.bf16.mxu0 %v8505_v40  ;;  %6266 = vmatpush1.bf16.msra.mxu1 %v8254_v31 }
0x3aea   :  { %6267 = vmatprep.subr.bf16.mxu1 %v8259_v32 }
0x3aec   :  { %7943 = vmatpush3.bf16.msra.mxu0 %v8253_v4 }
0x3aed   :  { %6268 = vmatpush1.bf16.msra.mxu1 %v8257_v33  ;;  %7476 = vmatprep.subr.bf16.mxu0 %v8266_v47 }
0x3aee   :  { %6269 = vmatprep.subr.bf16.mxu1 %v8262_v62 }
0x3af1   :  { %6270 = vmatpush1.bf16.msra.mxu1 %v8260_v36 }
0x3af2   :  { %6271 = vmatprep.subr.bf16.mxu1 %v8265_v50 }
0x3af5   :  { %6272 = vmatpush1.bf16.msra.mxu1 %v8263_v39 }
0x3af6   :  { %7948 = vmatprep.subr.bf16.mxu1 %v8505_v40 }
0x3bb2   :  { %v5992_v0 = vpop.f32.mrb[140].mxu0 }
0x3bb3   :  { %v7928_v7 = vpop.f32.mrb[141].mxu0 }
0x3bb4   :  { %v5995_v12 = vpop.f32.mrb[142].mxu0 }
0x3bb5   :  { %v7929_v22 = vpop.f32.mrb[143].mxu0 }
0x3bba   :  { %v6040_v63 = vpop.f32.mrb[164].mxu1 }
0x3bbb   :  { %v8089_v15 = vpack.i.bf16 %v6040_v63, %v5992_v0  ;;  %v7934_v51 = vpop.f32.mrb[165].mxu1 }
0x3bbc   :  { %v6043_v24 = vpop.f32.mrb[166].mxu1 }
0x3bbd   :  { %8090 = vrot.lane.b32.xlu1 %v8089_v15, %s8510_s27  ;;  %v7935_v41 = vpop.f32.mrb[167].mxu1  ;;  %v7172_v15 = vld [vmem:[%s9498_s13 + $0x1] ss:$0 sm:$0xff]  ;;  %s8541_s27 = smov 34   ;;  %s9872_s13 = sld [smem:[%s9906_s0 + %s8543_s23]]  }
0x3bbe   :  { %s9845_s1 = sld [smem:[%s9906_s0 + %s8541_s27]]  }
0x3c2f   :  { %v8091_v11 = vpop.permute.xlu1 %8090 }
0x3c30   :  { %v8093_v3 = vunpack.i.h.bf16 %v8091_v11  ;;  %v8092_v21 = vunpack.i.l.bf16 %v8091_v11  ;;  %v8267_v11 = vld [vmem:[%s9512_s10 + $0x80] sm:$0xff]  }
0x3c32   :  { %v6075_v35 = vsel %vm1265_vm6, %v6073_v49, %v8093_v3  ;;  %v6074_v57 = vsel %vm1265_vm6, %v6072_v20, %v8092_v21  ;;  %v8270_v3 = vld [vmem:[%s9512_s10 + $0xd0] sm:$0xff]   ;;  %v8272_v49 = vld [vmem:[%s9512_s10 + $0xd8] sm:$0xff]  }
0x3c33   :  { %v6076_v53 = vpack.c.bf16 %v6075_v35, %v6074_v57  ;;  %v8271_v21 = vld [vmem:[%s9512_s10 + $0x90] sm:$0xff]   ;;  %v8273_v20 = vld [vmem:[%s9512_s10 + $0x98] sm:$0xff]   ;;  %v8274_v35 = vld [vmem:[%s9512_s10 + $0xe0] sm:$0xff]  }
0x3c34   :  { %v8275_v57 = vld [vmem:[%s9512_s10 + $0xa0] sm:$0xff]  }
0x3c35   :  { %7945 = vmatmul.mubr.msk.bf16.vlgmr.msra.gmra.mrb[144].mxu0 %vm163_vm0, %v6076_v53  ;;  %v8276_v53 = vld [vmem:[%s9512_s10 + $0xe8] sm:$0xff]  }
0x3c36   :  { %7477 = vmatpush3.bf16.msra.mxu0 %v8267_v11 }
0x3c37   :  { %7478 = vmatprep.subr.bf16.mxu0 %v8268_v37 }
0x3c3a   :  { %7479 = vmatpush3.bf16.msra.mxu0 %v8269_v44 }
0x3c3b   :  { %7480 = vmatprep.subr.bf16.mxu0 %v8270_v3 }
0x3c3e   :  { %7481 = vmatpush3.bf16.msra.mxu0 %v8271_v21 }
0x3c3f   :  { %7482 = vmatprep.subr.bf16.mxu0 %v8272_v49 }
0x3c42   :  { %7483 = vmatpush3.bf16.msra.mxu0 %v8273_v20 }
0x3c43   :  { %7484 = vmatprep.subr.bf16.mxu0 %v8274_v35 }
0x3c46   :  { %7485 = vmatpush3.bf16.msra.mxu0 %v8275_v57  ;;  %v7021_v57 = vld [vmem:[%s8886_s18 + $0x1] ss:$0 sm:$0xff] }
0x3c47   :  { %7486 = vmatprep.subr.bf16.mxu0 %v8276_v53  ;;  %v7225_v53 = vld [vmem:[%s9544_s26 + $0x1] ss:$0 sm:$0xff] }
0x3d08   :  { %v6144_v54 = vpop.f32.mrb[144].mxu0 }
0x3d09   :  { %v6145_v58 = vadd.f32 %v7164_v60, %v6144_v54  ;;  %v7946_v52 = vpop.f32.mrb[145].mxu0  ;;  %v8278_v54 = vld [vmem:[%s9512_s10 + $0xf0] sm:$0xff]  }
0x3d0a   :  { %v6147_v48 = vpop.f32.mrb[146].mxu0  ;;  %v8280_v52 = vld [vmem:[%s9512_s10 + $0xf8] sm:$0xff]  }
0x3d0b   :  { %v9769_v5 = vadd.f32 %v6145_v58, %v9548_v38  ;;  %v6148_v25 = vadd.f32 %v7164_v60, %v6147_v48  ;;  %v7947_v26 = vpop.f32.mrb[147].mxu0  ;;  %v8277_v60 = vld [vmem:[%s9512_s10 + $0xa8] sm:$0xff]   ;;  %v8279_v58 = vld [vmem:[%s9512_s10 + $0xb0] sm:$0xff]   ;;  %v8281_v48 = vld [vmem:[%s9512_s10 + $0xb8] sm:$0xff]  }
0x3d0c   :  { %7487 = vmatpush3.bf16.msra.mxu0 %v8277_v60 }
0x3d0d   :  { %v9772_v17 = vadd.f32 %v6148_v25, %v9551_v14  ;;  %v6157_v27 = vsel %vm163_vm0, %v9769_v5, 0.0  ;;  %7488 = vmatprep.subr.bf16.mxu0 %v8278_v54  ;;  %v7182_v25 = vld [vmem:[%s9534_s16 + $0x2] sm:$0x3] }
0x3d0e   :  { %6158 = vadd.xlane.f32.xlu0 %v6157_v27  ;;  %v6215_v26 = vrot.slane %v7182_v25, %v8593_v43  ;;  %v6219_v27 = vrot.slane %v7182_v25, %v8596_v45 }
0x3d0f   :  { %v6160_v28 = vsel %vm163_vm0, %v9772_v17, 0.0 }
0x3d10   :  { %6161 = vadd.xlane.f32.xlu1 %v6160_v28  ;;  %7489 = vmatpush3.bf16.msra.mxu0 %v8279_v58 }
0x3d11   :  { %7490 = vmatprep.subr.bf16.mxu0 %v8280_v52 }
0x3d14   :  { %7491 = vmatpush3.bf16.msra.mxu0 %v8281_v48  ;;  %v3244_v48 = vadd.f32 %v9236_v34, %v7021_v57 }
0x3d15   :  { %7968 = vmatprep.subr.bf16.mxu0 %v8505_v40 }
0x3d9b   :  { %v6159_v8 = vpop.xlane.xlu0 %6158 }
0x3d9c   :  { %v6163_v46 = vmul.f32 0.015625, %v6159_v8 }
0x3d9d   :  { %v6162_v38 = vpop.xlane.xlu1 %6161 }
0x3d9e   :  { %v6165_v6 = vsub.f32 %v9769_v5, %v6163_v46  ;;  %v6164_v13 = vmul.f32 0.015625, %v6162_v38 }
0x3da0   :  { %v6166_v14 = vsub.f32 %v9772_v17, %v6164_v13  ;;  %v6167_v23 = vmul.f32 %v6165_v6, %v6165_v6 }
0x3da2   :  { %v6169_v29 = vsel %vm163_vm0, %v6167_v23, 0.0  ;;  %v6168_v56 = vmul.f32 %v6166_v14, %v6166_v14 }
0x3da3   :  { %6170 = vadd.xlane.f32.xlu0 %v6169_v29 }
0x3da4   :  { %v6172_v30 = vsel %vm163_vm0, %v6168_v56, 0.0 }
0x3da7   :  { %6173 = vadd.xlane.f32.xlu0 %v6172_v30 }
0x3e30   :  { %v6171_v9 = vpop.xlane.xlu0 %6170 }
0x3e31   :  { %v6175_v1 = vmul.f32 0.015625, %v6171_v9 }
0x3e33   :  { %v6177_v4 = vadd.f32 1e-12, %v6175_v1 }
0x3e34   :  { %v6174_v0 = vpop.xlane.xlu0 %6173 }
0x3e35   :  { %8478 = vrsqrt.f32 %v6177_v4  ;;  %v6176_v7 = vmul.f32 0.015625, %v6174_v0 }
0x3e37   :  { %v6178_v12 = vadd.f32 1e-12, %v6176_v7 }
0x3e39   :  { %8480 = vrsqrt.f32 %v6178_v12 }
0x3e3f   :  { %v8479_v22 = vpop.eup %8478 }
0x3e40   :  { %v6181_v63 = vmul.f32 %v8479_v22, %v6165_v6 }
0x3e42   :  { %v6189_v24 = vmul.f32 %v7172_v15, %v6181_v63 }
0x3e43   :  { %v8481_v51 = vpop.eup %8480 }
0x3e44   :  { %v6182_v41 = vmul.f32 %v8481_v51, %v6166_v14  ;;  %v6197_v18 = vadd.f32 %v7173_v16, %v6189_v24 }
0x3e46   :  { %v6190_v10 = vmul.f32 %v7172_v15, %v6182_v41 }
0x3e48   :  { %v6198_v19 = vadd.f32 %v7173_v16, %v6190_v10 }
0x3e4a   :  { %v6208_v59 = vpack.c.bf16 %v6198_v19, %v6197_v18 }
0x3e4c   :  { %7191 = vmatmul.mubr.msk.bf16.vlgmr.msra.gmra.mrb[168].mxu1 %vm163_vm0, %v6208_v59 }
0x3e4d   :  { %7964 = vmatprep.mubr.msk.bf16.mxu1 %vm8507_vm1, %v8505_v40 }
0x3f1f   :  { %v6299_v28 = vpop.f32.mrb[168].mxu1 }
0x3f20   :  { %v6300_v8 = vadd.f32 %v6299_v28, %v6215_v26  ;;  %v6301_v46 = vpop.f32.mrb[169].mxu1 }
0x3f21   :  { %v6302_v38 = vadd.f32 %v6301_v46, %v6219_v27  ;;  %v6303_v6 = vpop.f32.mrb[170].mxu1 }
0x3f22   :  { %v6308_v13 = vmul.f32 %v6300_v8, %v6300_v8  ;;  %v6304_v14 = vadd.f32 %v6303_v6, %v6215_v26  ;;  %v6305_v23 = vpop.f32.mrb[171].mxu1  ;;  %v3250_v6 = vadd.f32 %v3244_v48, %v9151_v55  ;;  %v8294_v48 = vld [vmem:[%s9872_s13 + $0x20] sm:$0xff]  }
0x3f23   :  { %v6309_v29 = vmul.f32 %v6302_v38, %v6302_v38  ;;  %v6306_v56 = vadd.f32 %v6305_v23, %v6219_v27  ;;  %v3247_v27 = vadd.f32 %v9238_v42, %v7021_v57 }
0x3f24   :  { %v6312_v30 = vmul.f32 %v6308_v13, %v6300_v8  ;;  %v6310_v2 = vmul.f32 %v6304_v14, %v6304_v14  ;;  %v3256_v34 = vsel %vm163_vm0, %v3250_v6, 0.0 }
0x3f25   :  { %v6313_v31 = vmul.f32 %v6309_v29, %v6302_v38  ;;  %v6311_v32 = vmul.f32 %v6306_v56, %v6306_v56 }
0x3f26   :  { %v6316_v33 = vmul.f32 0.044715, %v6312_v30  ;;  %v6314_v62 = vmul.f32 %v6310_v2, %v6304_v14 }
0x3f27   :  { %v6317_v36 = vmul.f32 0.044715, %v6313_v31  ;;  %v6315_v43 = vmul.f32 %v6311_v32, %v6306_v56 }
0x3f28   :  { %v6320_v39 = vadd.f32 %v6316_v33, %v6300_v8  ;;  %v6318_v45 = vmul.f32 0.044715, %v6314_v62 }
0x3f29   :  { %v6321_v50 = vadd.f32 %v6317_v36, %v6302_v38  ;;  %v6319_v9 = vmul.f32 0.044715, %v6315_v43 }
0x3f2a   :  { %v6324_v1 = vmul.f32 0.7978846, %v6320_v39  ;;  %v6322_v4 = vadd.f32 %v6318_v45, %v6304_v14 }
0x3f2b   :  { %v6325_v0 = vmul.f32 0.7978846, %v6321_v50  ;;  %v6323_v7 = vadd.f32 %v6319_v9, %v6306_v56 }
0x3f2c   :  { %8482 = vtanh.f32 %v6324_v1  ;;  %v6326_v12 = vmul.f32 0.7978846, %v6322_v4  ;;  %v8282_v4 = vld [vmem:[%s9845_s1] sm:$0xff]  }
0x3f2d   :  { %8484 = vtanh.f32 %v6325_v0  ;;  %v6327_v22 = vmul.f32 0.7978846, %v6323_v7  ;;  %7949 = vmatpush3.bf16.msra.mxu1 %v8282_v4  ;;  %v8283_v0 = vld [vmem:[%s9845_s1 + $0x8] sm:$0xff]   ;;  %v8284_v7 = vld [vmem:[%s9845_s1 + $0x10] sm:$0xff]  }
0x3f2e   :  { %8486 = vtanh.f32 %v6326_v12  ;;  %7950 = vmatprep.subr.bf16.mxu1 %v8505_v40  ;;  %v8285_v12 = vld [vmem:[%s9845_s1 + $0x18] sm:$0xff]  }
0x3f2f   :  { %8488 = vtanh.f32 %v6327_v22  ;;  %v8286_v22 = vld [vmem:[%s9845_s1 + $0x20] sm:$0xff]  }
0x3f31   :  { %7951 = vmatpush3.bf16.msra.mxu1 %v8283_v0 }
0x3f32   :  { %7952 = vmatprep.subr.bf16.mxu1 %v8505_v40 }
0x3f35   :  { %7953 = vmatpush3.bf16.msra.mxu1 %v8284_v7 }
0x3f36   :  { %v8483_v63 = vpop.eup %8482  ;;  %7954 = vmatprep.subr.bf16.mxu1 %v8505_v40 }
0x3f37   :  { %v8485_v15 = vpop.eup %8484  ;;  %v6332_v51 = vadd.f32 1.0, %v8483_v63  ;;  %v8287_v63 = vld [vmem:[%s9845_s1 + $0x28] sm:$0xff]  }
0x3f38   :  { %v8487_v24 = vpop.eup %8486  ;;  %v6333_v41 = vadd.f32 1.0, %v8485_v15  ;;  %v8288_v15 = vld [vmem:[%s9845_s1 + $0x30] sm:$0xff]  }
0x3f39   :  { %v8489_v16 = vpop.eup %8488  ;;  %v6336_v10 = vmul.f32 0.5, %v6332_v51  ;;  %v6334_v18 = vadd.f32 1.0, %v8487_v24  ;;  %7955 = vmatpush3.bf16.msra.mxu1 %v8285_v12 }
0x3f3a   :  { %v6335_v19 = vadd.f32 1.0, %v8489_v16  ;;  %v6337_v59 = vmul.f32 0.5, %v6333_v41  ;;  %7956 = vmatprep.subr.bf16.mxu1 %v8505_v40 }
0x3f3b   :  { %v6338_v47 = vmul.f32 0.5, %v6334_v18  ;;  %v6340_v37 = vmul.f32 %v6336_v10, %v6300_v8 }
0x3f3c   :  { %v6339_v11 = vmul.f32 0.5, %v6335_v19  ;;  %v6341_v3 = vmul.f32 %v6337_v59, %v6302_v38  ;;  %v8289_v19 = vld [vmem:[%s9845_s1 + $0x38] sm:$0xff]  }
0x3f3d   :  { %v6342_v44 = vmul.f32 %v6338_v47, %v6304_v14  ;;  %v3251_v14 = vadd.f32 %v3247_v27, %v9153_v61  ;;  %7957 = vmatpush3.bf16.msra.mxu1 %v8286_v22 }
0x3f3e   :  { %v6343_v21 = vmul.f32 %v6339_v11, %v6306_v56  ;;  %7958 = vmatprep.subr.bf16.mxu1 %v8505_v40 }
0x3f3f   :  { %v6377_v49 = vpack.c.bf16 %v6342_v44, %v6340_v37  ;;  %v3259_v42 = vsel %vm163_vm0, %v3251_v14, 0.0  ;;  %v7242_v37 = vld [vmem:[%s6845_s20] ss:$0 sm:$0xff] }
0x3f40   :  { %v6378_v20 = vpack.c.bf16 %v6343_v21, %v6341_v3 }
0x3f41   :  { %7959 = vmatpush3.bf16.msra.mxu1 %v8287_v63 }
0x3f42   :  { %6515 = vmatprep.mubr.bf16.mxu0 %v6378_v20  ;;  %7960 = vmatprep.subr.bf16.mxu1 %v8505_v40 }
0x3f43   :  { %6516 = vmatmul.mubr.bf16.vlgmr.msra.gmra.mrb[148].mxu0 %v6377_v49  ;;  %v7243_v49 = vld [vmem:[%s6846_s7] ss:$0 sm:$0xff] }
0x3f44   :  { %7984 = vmatprep.mubr.msk.bf16.mxu0 %vm8507_vm1, %v8505_v40 }
0x3f45   :  { %7961 = vmatpush3.bf16.msra.mxu1 %v8288_v15 }
0x3f46   :  { %7962 = vmatprep.subr.bf16.mxu1 %v8505_v40 }
0x3f49   :  { %7963 = vmatpush3.bf16.msra.mxu1 %v8289_v19 }
0x4016   :  { %v7492_v35 = vpop.f32.mrb[148].mxu0 }
0x4017   :  { %v7493_v60 = vpop.f32.mrb[149].mxu0 }
0x4018   :  { %v7494_v54 = vadd.f32 %v7493_v60, %v7492_v35  ;;  %v7495_v58 = vpop.f32.mrb[150].mxu0 }
0x4019   :  { %v7496_v52 = vpop.f32.mrb[151].mxu0 }
0x401a   :  { %v6518_v25 = vadd.f32 %v7494_v54, %v7225_v53  ;;  %v7497_v26 = vadd.f32 %v7496_v52, %v7495_v58  ;;  %v8291_v54 = vld [vmem:[%s9872_s13 + $0x8] sm:$0xff]   ;;  %v8292_v58 = vld [vmem:[%s9872_s13 + $0x10] sm:$0xff]   ;;  %v8293_v52 = vld [vmem:[%s9872_s13 + $0x18] sm:$0xff]  }
0x401c   :  { %v6521_v28 = vadd.f32 %v7497_v26, %v7225_v53  ;;  %v6524_v8 = vadd.f32 %v6518_v25, %v9769_v5  ;;  %v8290_v53 = vld [vmem:[%s9872_s13] sm:$0xff]   ;;  %v8295_v25 = vld [vmem:[%s9872_s13 + $0x28] sm:$0xff]  }
0x401d   :  { %7969 = vmatpush3.bf16.msra.mxu0 %v8290_v53 }
0x401e   :  { %v6528_v46 = vsel %vm163_vm0, %v6524_v8, 0.0  ;;  %v6525_v38 = vadd.f32 %v6521_v28, %v9772_v17  ;;  %7970 = vmatprep.subr.bf16.mxu0 %v8505_v40 }
0x401f   :  { %6529 = vadd.xlane.f32.xlu1 %v6528_v46 }
0x4020   :  { %v6531_v13 = vsel %vm163_vm0, %v6525_v38, 0.0 }
0x4021   :  { %6532 = vadd.xlane.f32.xlu0 %v6531_v13  ;;  %7971 = vmatpush3.bf16.msra.mxu0 %v8291_v54 }
0x4022   :  { %7972 = vmatprep.subr.bf16.mxu0 %v8505_v40 }
0x4023   :  { %3257 = vadd.xlane.f32.xlu1 %v3256_v34  ;;  %v7040_v34 = vld [vmem:[%s8907_s3 + $0x1] ss:$0 sm:$0xff] }
0x4025   :  { %3260 = vadd.xlane.f32.xlu0 %v3259_v42  ;;  %7973 = vmatpush3.bf16.msra.mxu0 %v8292_v58 }
0x4026   :  { %7974 = vmatprep.subr.bf16.mxu0 %v8505_v40 }
0x4029   :  { %7975 = vmatpush3.bf16.msra.mxu0 %v8293_v52 }
0x402a   :  { %7976 = vmatprep.subr.bf16.mxu0 %v8505_v40 }
0x402d   :  { %7977 = vmatpush3.bf16.msra.mxu0 %v8294_v48 }
0x402e   :  { %7978 = vmatprep.subr.bf16.mxu0 %v8505_v40 }
0x4031   :  { %7979 = vmatpush3.bf16.msra.mxu0 %v8295_v25 }
0x4032   :  { %7980 = vmatprep.subr.bf16.mxu0 %v8505_v40 }
0x40ac   :  { %v6530_v23 = vpop.xlane.xlu1 %6529 }
0x40ad   :  { %v6534_v5 = vmul.f32 0.015625, %v6530_v23 }
0x40ae   :  { %v6533_v29 = vpop.xlane.xlu0 %6532 }
0x40af   :  { %v6536_v56 = vsub.f32 %v6524_v8, %v6534_v5  ;;  %v6535_v30 = vmul.f32 0.015625, %v6533_v29  ;;  %v7041_v5 = vld [vmem:[%s8912_s8 + $0x1] ss:$0 sm:$0xff] }
0x40b0   :  { %v3258_v17 = vpop.xlane.xlu1 %3257 }
0x40b1   :  { %v6537_v2 = vsub.f32 %v6525_v38, %v6535_v30  ;;  %v3262_v55 = vmul.f32 0.015625, %v3258_v17  ;;  %v6538_v31 = vmul.f32 %v6536_v56, %v6536_v56 }
0x40b2   :  { %v3261_v32 = vpop.xlane.xlu0 %3260 }
0x40b3   :  { %v9830_v33 = vsub.f32 %v3250_v6, %v3262_v55  ;;  %v3263_v61 = vmul.f32 0.015625, %v3261_v32  ;;  %v6540_v62 = vsel %vm163_vm0, %v6538_v31, 0.0  ;;  %v6539_v36 = vmul.f32 %v6537_v2, %v6537_v2 }
0x40b4   :  { %6541 = vadd.xlane.f32.xlu1 %v6540_v62  ;;  %v8297_v62 = vld [vmem:[%s9872_s13 + $0x38] sm:$0xff]  }
0x40b5   :  { %v9833_v43 = vsub.f32 %v3251_v14, %v3263_v61  ;;  %v6543_v39 = vsel %vm163_vm0, %v6539_v36, 0.0  ;;  %v3266_v45 = vmul.f32 %v9830_v33, %v9830_v33  ;;  %v8296_v61 = vld [vmem:[%s9872_s13 + $0x30] sm:$0xff]  }
0x40b6   :  { %6544 = vadd.xlane.f32.xlu0 %v6543_v39  ;;  %7981 = vmatpush3.bf16.msra.mxu0 %v8296_v61 }
0x40b7   :  { %v3268_v50 = vsel %vm163_vm0, %v3266_v45, 0.0  ;;  %v3267_v9 = vmul.f32 %v9833_v43, %v9833_v43  ;;  %7982 = vmatprep.subr.bf16.mxu0 %v8505_v40  ;;  %v7253_v40 = vld [vmem:[%s6850_s15] ss:$0 sm:$0xff] }
0x40b8   :  { %3269 = vadd.xlane.f32.xlu1 %v3268_v50 }
0x40b9   :  { %v3271_v1 = vsel %vm163_vm0, %v3267_v9, 0.0 }
0x40ba   :  { %3272 = vadd.xlane.f32.xlu0 %v3271_v1  ;;  %7983 = vmatpush3.bf16.msra.mxu0 %v8297_v62 }
0x4141   :  { %v6542_v51 = vpop.xlane.xlu1 %6541 }
0x4142   :  { %v6546_v24 = vmul.f32 0.015625, %v6542_v51 }
0x4143   :  { %v6545_v41 = vpop.xlane.xlu0 %6544 }
0x4144   :  { %v6548_v16 = vadd.f32 1e-12, %v6546_v24  ;;  %v6547_v10 = vmul.f32 0.015625, %v6545_v41 }
0x4145   :  { %v3270_v28 = vpop.xlane.xlu1 %3269 }
0x4146   :  { %8490 = vrsqrt.f32 %v6548_v16  ;;  %v6549_v18 = vadd.f32 1e-12, %v6547_v10  ;;  %v3274_v46 = vmul.f32 0.015625, %v3270_v28 }
0x4147   :  { %v3273_v26 = vpop.xlane.xlu0 %3272 }
0x4148   :  { %8492 = vrsqrt.f32 %v6549_v18  ;;  %v3275_v27 = vmul.f32 0.015625, %v3273_v26  ;;  %v3276_v38 = vadd.f32 1e-12, %v3274_v46 }
0x414a   :  { %v3277_v8 = vadd.f32 1e-12, %v3275_v27 }
0x414c   :  { %8494 = vrsqrt.f32 %v3277_v8 }
0x414d   :  { %8496 = vrsqrt.f32 %v3276_v38 }
0x4150   :  { %v8491_v59 = vpop.eup %8490 }
0x4151   :  { %v6552_v47 = vmul.f32 %v8491_v59, %v6536_v56 }
0x4152   :  { %v8493_v11 = vpop.eup %8492 }
0x4153   :  { %v6553_v44 = vmul.f32 %v8493_v11, %v6537_v2  ;;  %v6560_v3 = vmul.f32 %v7242_v37, %v6552_v47 }
0x4155   :  { %v6561_v21 = vmul.f32 %v7242_v37, %v6553_v44  ;;  %v6568_v35 = vadd.f32 %v7243_v49, %v6560_v3 }
0x4156   :  { %v8495_v6 = vpop.eup %8494 }
0x4157   :  { %v6569_v20 = vadd.f32 %v7243_v49, %v6561_v21  ;;  %v3281_v13 = vmul.f32 %v8495_v6, %v9833_v43  ;;  %v8497_v14 = vpop.eup %8496 }
0x4158   :  { %v3280_v23 = vmul.f32 %v8497_v14, %v9830_v33 }
0x4159   :  { %v6578_v57 = vrot.slane %v6569_v20, 7  ;;  %v3289_v42 = vmul.f32 %v7040_v34, %v3281_v13 }
0x415a   :  { %v3288_v56 = vmul.f32 %v7040_v34, %v3280_v23 }
0x415b   :  { %v6579_v60 = vsel %vm6573_vm7, %v6578_v57, %v6568_v35  ;;  %v3297_v29 = vadd.f32 %v7041_v5, %v3289_v42 }
0x415c   :  { %6580 = vrot.lane.b32.xlu0 %v6579_v60, %s8508_s22  ;;  %v3296_v17 = vadd.f32 %v7041_v5, %v3288_v56  ;;  %s8544_s22 = smov 35  }
0x415d   :  { %v6572_v30 = vrot.slane %v3297_v29, 7  ;;  %s6848_s8 = sld [smem:[%s9906_s0 + %s8544_s22]]  }
0x415f   :  { %v6574_v55 = vsel %vm6573_vm7, %v6572_v30, %v3296_v17 }
0x4163   :  { %v7244_v33 = vld [vmem:[%s6848_s8] ss:$0 sm:$0xff] }
0x41ce   :  { %v6581_v2 = vpop.permute.xlu0 %6580 }
0x41cf   :  { %v6583_v31 = vsel %vm163_vm0, %v6574_v55, %v6581_v2 }
0x41d0   :  { %v6600_v32 = vpack.c.bf16 %v6583_v31, %v6583_v31 }
0x41d2   :  { %7965 = vmatmul.mubr.bf16.vlgmr.msra.gmra.mrb[172].mxu1 %v6600_v32 }
0x42a5   :  { %v6690_v36 = vpop.f32.mrb[172].mxu1 }
0x42a6   :  { %v6691_v43 = vadd.f32 %v7244_v33, %v6690_v36  ;;  %v7966_v39 = vpop.f32.mrb[173].mxu1 }
0x42a7   :  { %v6693_v45 = vpop.f32.mrb[174].mxu1 }
0x42a8   :  { %v6696_v50 = vmax.f32 %v6691_v43, 0.0  ;;  %v7967_v9 = vpop.f32.mrb[175].mxu1 }
0x42aa   :  { %v6713_v1 = vpack.c.bf16 %v6696_v50, %v6696_v50 }
0x42ac   :  { %7985 = vmatmul.mubr.bf16.vlgmr.msra.gmra.mrb[152].mxu0 %v6713_v1 }
0x437f   :  { %v6803_v4 = vpop.f32.mrb[152].mxu0 }
0x4380   :  { %v6804_v0 = vadd.f32 %v7253_v40, %v6803_v4  ;;  %v7986_v7 = vpop.f32.mrb[153].mxu0 }
0x4381   :  { %v6806_v12 = vpop.f32.mrb[154].mxu0 }
0x4382   :  { %6809 = vst [vmem:[%s6851_s17] sm:$0x3] %v6804_v0  ;;  %v7987_v22 = vpop.f32.mrb[155].mxu0 }

</bundles_post_ra>
